<compile_context>
chip_gen: v6e
topology: v6e:2x2x1
jax: 0.10.0
libtpu: 0.0.40
codegen_flags: <defaults>
</compile_context>

<pallas_src>
import functools

import jax
import jax.numpy as jnp
from jax.experimental import pallas as pl
from jax.experimental.pallas import tpu as pltpu

IN_FEATURES = 64 * 64 * 3          # 12288
H1, H2, H3, OUT = 1024, 512, 256, 1


def _leaky_relu(x, slope=0.2):
    return jnp.where(x > 0, x, slope * x)


def _tpu_config():
    """Per-generation tiling: (NH halves of H1, K-tile, vmem limit, dim semantics)."""
    kind = ""
    try:
        kind = jax.devices()[0].device_kind.lower()
    except Exception:  # pragma: no cover - device query should not fail on TPU
        pass
    if "v7" in kind:
        # 2 TensorCores: shard the H1 halves across cores (guaranteed via CORE_PARALLEL).
        # Per-core VMEM: 2 x (6144x512 bf16 w1 tile) = 12 MiB + resident x + acc  (< 28 MiB).
        return dict(nh=2, tk=6144, vmem=28 << 20,
                    sem=(pltpu.CORE_PARALLEL, pltpu.ARBITRARY))
    if "v6" in kind:
        # Single TC, 128 MiB VMEM: fat (6144, 1024) tiles, 2 reduction steps, no H1 split.
        return dict(nh=1, tk=6144, vmem=40 << 20, sem=("arbitrary", "arbitrary"))
    # v5e / unknown: (4096, 1024) tiles, 3 reduction steps, no H1 split.
    return dict(nh=1, tk=4096, vmem=32 << 20, sem=("arbitrary", "arbitrary"))


# ------------------------------ kernel 1: layer 1 -------------------------------
def _layer1_kernel(x_ref, w1_ref, b1_ref, h1_ref, acc_ref, *, tk):
    """h1[:, half] = leaky_relu(x @ w1[:, half] + b1[:, half]) stored as bf16.

    grid = (NH, NK): axis 0 picks an H1 half (CORE_PARALLEL on v7x, trivial size-1 elsewhere),
    axis 1 ("arbitrary") streams w1 K-tiles and accumulates in an f32 VMEM scratch.  x is
    resident for the whole grid; the matching K-tile is sliced in-kernel.
    """
    k = pl.program_id(1)

    @pl.when(k == 0)
    def _():
        acc_ref[...] = jnp.zeros_like(acc_ref)

    start = pl.multiple_of(k * tk, tk)
    # bf16 x bf16 -> f32 accumulate on the MXU.
    acc_ref[...] += jnp.dot(x_ref[:, pl.ds(start, tk)], w1_ref[...],
                            preferred_element_type=jnp.float32)

    @pl.when(k == pl.num_programs(1) - 1)
    def _():
        h1_ref[...] = _leaky_relu(acc_ref[...] + b1_ref[...]).astype(h1_ref.dtype)


# ---------------------------- kernel 2: layers 2..4 -----------------------------
def _head_kernel(h1_ref, w2_ref, b2_ref, w3_ref, b3_ref, w4t_ref, b4_ref, out_ref):
    """out = sigmoid(LReLU(LReLU(h1 @ w2 + b2) @ w3 + b3) . w4 + b4).

    h1 arrives bf16; activations / bias / sigmoid stay f32.  The final N=1 projection is a
    VPU multiply + XLU row-reduce instead of an MXU matmul with one live column.
    """
    h2 = _leaky_relu(
        jnp.dot(h1_ref[...], w2_ref[...],
                preferred_element_type=jnp.float32) + b2_ref[...])
    h3 = _leaky_relu(
        jnp.dot(h2.astype(jnp.bfloat16), w3_ref[...],
                preferred_element_type=jnp.float32) + b3_ref[...])
    w4_row = w4t_ref[...].astype(jnp.float32)                    # (1, H3)
    logits = jnp.sum(h3 * w4_row, axis=-1, keepdims=True) + b4_ref[...]
    out_ref[...] = jax.nn.sigmoid(logits).astype(out_ref.dtype)


def discriminator_forward(img, params):
    """img: (B, 3, 64, 64) float32 (NCHW).  Returns (B, 1) f32 validity scores."""
    B = img.shape[0]
    x = img.reshape(B, -1).astype(jnp.bfloat16)  # same flattening order as torch .view on NCHW
    assert x.shape[1] == IN_FEATURES

    cfg = _tpu_config()
    NH, TK, VMEM_LIMIT = cfg["nh"], cfg["tk"], cfg["vmem"]
    H1_HALF = H1 // NH
    n_k = IN_FEATURES // TK

    w1, b1, w2, b2, w3, b3, w4, b4 = params
    w4_t = w4.reshape(OUT, H3)                   # (1, 256) row for the VPU reduce

    # ---- layer 1: (B, 12288) @ (12288, 1024), K-tiled, x resident, optional H1 split ------
    # NOTE: do NOT add a batch grid axis here even for large B -- that would re-stream the
    # ~24 MiB bf16 w1 once per batch tile; keep the whole batch resident (x is ~3 MiB at
    # B=128) and only batch-tile the head if B ever gets huge.
    h1 = pl.pallas_call(
        functools.partial(_layer1_kernel, tk=TK),
        out_shape=jax.ShapeDtypeStruct((B, H1), jnp.bfloat16),
        grid_spec=pltpu.PrefetchScalarGridSpec(
            num_scalar_prefetch=0,
            grid=(NH, n_k),
            in_specs=[
                pl.BlockSpec((B, IN_FEATURES), lambda h, k: (0, 0)),   # x resident (bf16)
                pl.BlockSpec((TK, H1_HALF), lambda h, k: (k, h)),      # w1 tile (bf16)
                pl.BlockSpec((1, H1_HALF), lambda h, k: (0, h)),       # b1 half (f32)
            ],
            out_specs=pl.BlockSpec((B, H1_HALF), lambda h, k: (0, h)),
            scratch_shapes=[pltpu.VMEM((B, H1_HALF), jnp.float32)],
        ),
        compiler_params=pltpu.CompilerParams(
            dimension_semantics=cfg["sem"],
            vmem_limit_bytes=VMEM_LIMIT,
        ),
        cost_estimate=pl.CostEstimate(
            flops=2 * B * IN_FEATURES * H1,
            transcendentals=0,
            bytes_accessed=(B * IN_FEATURES * 2          # x once (resident)
                            + IN_FEATURES * H1 * 2       # w1 stream (bf16)
                            + H1 * 4                     # b1
                            + B * H1 * 2),               # h1 out (bf16)
        ),
    )(x, w1, b1)

    # ---- layers 2..4 + sigmoid: tiny, single invocation ----------------------------------
    # (Head fusion into the layer-1 epilogue is a ~5-10% win on single-TC parts but breaks
    #  when the H1 axis is core-sharded on v7x; kept as a separate kernel for one code path.)
    validity = pl.pallas_call(
        _head_kernel,
        out_shape=jax.ShapeDtypeStruct((B, OUT), jnp.float32),
        grid_spec=pltpu.PrefetchScalarGridSpec(
            num_scalar_prefetch=0,
            grid=(1,),
            in_specs=[
                pl.BlockSpec((B, H1), lambda i: (0, 0)),     # h1 (bf16)
                pl.BlockSpec((H1, H2), lambda i: (0, 0)),    # w2 (bf16)
                pl.BlockSpec((1, H2), lambda i: (0, 0)),     # b2
                pl.BlockSpec((H2, H3), lambda i: (0, 0)),    # w3 (bf16)
                pl.BlockSpec((1, H3), lambda i: (0, 0)),     # b3
                pl.BlockSpec((OUT, H3), lambda i: (0, 0)),   # w4 row (bf16)
                pl.BlockSpec((1, OUT), lambda i: (0, 0)),    # b4
            ],
            out_specs=pl.BlockSpec((B, OUT), lambda i: (0, 0)),
        ),
        compiler_params=pltpu.CompilerParams(
            dimension_semantics=("arbitrary",),
            vmem_limit_bytes=VMEM_LIMIT,
        ),
        cost_estimate=pl.CostEstimate(
            flops=2 * B * (H1 * H2 + H2 * H3 + H3 * OUT),
            transcendentals=B,
            bytes_accessed=(B * H1 * 2
                            + (H1 * H2 + H2 * H3 + H3 * OUT) * 2
                            + (H2 + H3 + OUT) * 4
                            + B * OUT * 4),
        ),
    )(h1, w2, b2, w3, b3, w4_t, b4)

    return validity


def init_params(key):
    """Deterministic init matching the nn.Linear shapes; weights stored bf16, biases f32."""
    ks = jax.random.split(key, 8)

    def lin(kw, kb, fan_in, fan_out):
        scale = 1.0 / jnp.sqrt(jnp.float32(fan_in))
        w = jax.random.uniform(kw, (fan_in, fan_out), jnp.float32, -scale, scale)
        b = jax.random.uniform(kb, (1, fan_out), jnp.float32, -scale, scale)
        return w.astype(jnp.bfloat16), b

    w1, b1 = lin(ks[0], ks[1], IN_FEATURES, H1)
    w2, b2 = lin(ks[2], ks[3], H1, H2)
    w3, b3 = lin(ks[4], ks[5], H2, H3)
    w4, b4 = lin(ks[6], ks[7], H3, OUT)
    return (w1, b1, w2, b2, w3, b3, w4, b4)


def reference_forward(img, params):
    """Pure-JAX reference mirroring the kernel's precision choices (bf16 inputs, f32 acc)."""
    w1, b1, w2, b2, w3, b3, w4, b4 = params
    B = img.shape[0]

    def f32(a):
        return a.astype(jnp.float32)

    def lrelu(v):
        return jnp.where(v > 0, v, 0.2 * v)

    x = f32(img.reshape(B, -1).astype(jnp.bfloat16))
    h1 = lrelu(x @ f32(w1) + b1)
    h1 = f32(h1.astype(jnp.bfloat16))            # h1 is stored bf16 between the two kernels
    h2 = lrelu(h1 @ f32(w2) + b2)
    h3 = lrelu(f32(h2.astype(jnp.bfloat16)) @ f32(w3) + b3)
    logits = h3 @ f32(w4) + b4                   # final layer keeps h3 in f32 (VPU reduce)
    return jax.nn.sigmoid(logits)


if __name__ == "__main__":
    key = jax.random.PRNGKey(0)
    k_img, k_par = jax.random.split(key)

    B = 2
    img = jax.random.normal(k_img, (B, 3, 64, 64), jnp.float32)  # NCHW
    params = init_params(k_par)

    validity = jax.block_until_ready(discriminator_forward(img, params))
    ref = jax.block_until_ready(reference_forward(img, params))

    assert validity.shape == (B, OUT)
    assert bool(jnp.all(jnp.isfinite(validity)))
    assert bool(jnp.all((validity >= 0.0) & (validity <= 1.0)))
    assert bool(jnp.allclose(validity, ref, atol=2e-3, rtol=2e-3))
    print("KERNEL_OK")
</pallas_src>

<mosaic_0001>
module attributes {stable_mosaic.version = 11 : i64} {
  func.func @_layer1_kernel(%arg0: i32, %arg1: i32, %arg2: memref<2x12288xbf16, #tpu.memory_space<vmem>>, %arg3: memref<4096x1024xbf16, #tpu.memory_space<vmem>>, %arg4: memref<1x1024xf32, #tpu.memory_space<vmem>>, %arg5: memref<2x1024xbf16, #tpu.memory_space<vmem>>, %arg6: memref<2x1024xf32, #tpu.memory_space<vmem>>) attributes {dimension_semantics = [#tpu.dimension_semantics<arbitrary>, #tpu.dimension_semantics<arbitrary>], iteration_bounds = array<i64: 1, 3>, scalar_prefetch = 0 : i64, scratch_operands = 1 : i64, tpu.core_type = #tpu.core_type<tc>, window_params = [{pipeline_mode = #tpu.pipeline_mode<synchronous>, transform_indices = @transform_0, window_bounds = array<i64: 2, 12288>}, {transform_indices = @transform_1, window_bounds = array<i64: 4096, 1024>}, {transform_indices = @transform_2, window_bounds = array<i64: 1, 1024>}, {transform_indices = @transform_3, window_bounds = array<i64: 2, 1024>}]} {
    %c0_i32 = arith.constant 0 : i32
    %0 = arith.cmpi eq, %arg1, %c0_i32 : i32
    %1 = arith.extui %0 : i1 to i32
    %c0_i32_0 = arith.constant 0 : i32
    %2 = arith.cmpi ne, %1, %c0_i32_0 : i32
    scf.if %2 {
      %cst_8 = arith.constant 0.000000e+00 : f32
      %15 = vector.broadcast %cst_8 : f32 to vector<2x1024xf32>
      %c0_9 = arith.constant 0 : index
      %c0_10 = arith.constant 0 : index
      %16 = vector.load %arg6[%c0_9, %c0_10] : memref<2x1024xf32, #tpu.memory_space<vmem>>, vector<2x1024xf32>
      tpu.vector_store %arg6[%c0_9, %c0_10], %15 {strides = array<i32>} : memref<2x1024xf32, #tpu.memory_space<vmem>>, vector<2x1024xf32>,
    } else {
    }
    %c4096_i32 = arith.constant 4096 : i32
    %3 = arith.muli %arg1, %c4096_i32 : i32
    %4 = tpu.assume_multiple %3, 4096 : i32
    %c0 = arith.constant 0 : index
    %c0_1 = arith.constant 0 : index
    %5 = vector.load %arg6[%c0, %c0_1] : memref<2x1024xf32, #tpu.memory_space<vmem>>, vector<2x1024xf32>
    %c0_2 = arith.constant 0 : index
    %6 = arith.index_cast %4 : i32 to index
    %7 = vector.load %arg2[%c0_2, %6] : memref<2x12288xbf16, #tpu.memory_space<vmem>>, vector<2x4096xbf16>
    %c0_3 = arith.constant 0 : index
    %c0_4 = arith.constant 0 : index
    %8 = vector.load %arg3[%c0_3, %c0_4] : memref<4096x1024xbf16, #tpu.memory_space<vmem>>, vector<4096x1024xbf16>
    %cst = arith.constant dense<0.000000e+00> : vector<2x1024xf32>
    %9 = tpu.matmul %7, %8, %cst {dimension_numbers = #tpu.dot_dimension_numbers<[1], [0], [0], [1], [0, 0, 1, 1], [], []>} : vector<2x4096xbf16>, vector<4096x1024xbf16>, vector<2x1024xf32> -> vector<2x1024xf32>
    %10 = arith.addf %5, %9 : vector<2x1024xf32>
    %c0_5 = arith.constant 0 : index
    %c0_6 = arith.constant 0 : index
    %11 = vector.load %arg6[%c0_5, %c0_6] : memref<2x1024xf32, #tpu.memory_space<vmem>>, vector<2x1024xf32>
    tpu.vector_store %arg6[%c0_5, %c0_6], %10 {strides = array<i32>} : memref<2x1024xf32, #tpu.memory_space<vmem>>, vector<2x1024xf32>,
    %c2_i32 = arith.constant 2 : i32
    %12 = arith.cmpi eq, %arg1, %c2_i32 : i32
    %13 = arith.extui %12 : i1 to i32
    %c0_i32_7 = arith.constant 0 : i32
    %14 = arith.cmpi ne, %13, %c0_i32_7 : i32
    scf.if %14 {
      %c0_8 = arith.constant 0 : index
      %c0_9 = arith.constant 0 : index
      %15 = vector.load %arg6[%c0_8, %c0_9] : memref<2x1024xf32, #tpu.memory_space<vmem>>, vector<2x1024xf32>
      %c0_10 = arith.constant 0 : index
      %c0_11 = arith.constant 0 : index
      %16 = vector.load %arg4[%c0_10, %c0_11] : memref<1x1024xf32, #tpu.memory_space<vmem>>, vector<1x1024xf32>
      %17 = vector.broadcast %16 : vector<1x1024xf32> to vector<2x1024xf32>
      %18 = arith.addf %15, %17 : vector<2x1024xf32>
      %cst_12 = arith.constant 0.000000e+00 : f32
      %19 = vector.broadcast %cst_12 : f32 to vector<2x1024xf32>
      %20 = arith.cmpf ogt, %18, %19 : vector<2x1024xf32>
      %cst_13 = arith.constant 2.000000e-01 : f32
      %21 = vector.broadcast %cst_13 : f32 to vector<2x1024xf32>
      %22 = arith.mulf %21, %18 : vector<2x1024xf32>
      %23 = arith.select %20, %18, %22 : vector<2x1024xi1>, vector<2x1024xf32>
      %24 = arith.truncf %23 : vector<2x1024xf32> to vector<2x1024xbf16>
      %c0_14 = arith.constant 0 : index
      %c0_15 = arith.constant 0 : index
      %25 = vector.load %arg5[%c0_14, %c0_15] : memref<2x1024xbf16, #tpu.memory_space<vmem>>, vector<2x1024xbf16>
      tpu.vector_store %arg5[%c0_14, %c0_15], %24 {strides = array<i32>} : memref<2x1024xbf16, #tpu.memory_space<vmem>>, vector<2x1024xbf16>,
    } else {
    }
    return
  }
  func.func @transform_0(%arg0: i32, %arg1: i32) -> (i32, i32) {
    %c0_i32 = arith.constant 0 : i32
    %c0_i32_0 = arith.constant 0 : i32
    %c0_i32_1 = arith.constant 0 : i32
    return %c0_i32, %c0_i32_0 : i32, i32
  }
  func.func @transform_1(%arg0: i32, %arg1: i32) -> (i32, i32) {
    %c0_i32 = arith.constant 0 : i32
    return %arg1, %arg0 : i32, i32
  }
  func.func @transform_2(%arg0: i32, %arg1: i32) -> (i32, i32) {
    %c0_i32 = arith.constant 0 : i32
    %c0_i32_0 = arith.constant 0 : i32
    return %c0_i32, %arg0 : i32, i32
  }
  func.func @transform_3(%arg0: i32, %arg1: i32) -> (i32, i32) {
    %c0_i32 = arith.constant 0 : i32
    %c0_i32_0 = arith.constant 0 : i32
    return %c0_i32, %arg0 : i32, i32
  }
}

</mosaic_0001>

<bundles_post_ra>
// kernel: tpu_custom_call.1
= control target key start
LH: loop header
LB: loop body
LE: loop exit
PB: predicated region body
PF: predicated region fallthrough
CT: control target
= control target key end

     0   :  { %8 = vsyncpa [#allocation4], 0  ;;  %s20821_s0 = inlined_call_operand.hbm [shape: bf16[2,12288], index: 0, kind: input, shape index: {}]   ;;  %s20822_s1 = inlined_call_operand.hbm [shape: bf16[12288,1024], index: 1, kind: input, shape index: {}]   ;;  %s20823_s2 = inlined_call_operand.hbm [shape: f32[1,1024], index: 2, kind: input, shape index: {}]   ;;  %s20824_s3 = inlined_call_operand.hbm [shape: bf16[2,1024], index: 3, kind: output, shape index: {}]  }
   0x1   :  { %9 = vsyncpa [#allocation7], 0 }
   0x2   :  { %11 = vsyncpa [#allocation7 + $0x1], 0 }
   0x3   :  { %12 = vsyncpa [#allocation5], 0  ;;  %s18100_s12 = smov 0   ;;  %s18102_s13 = smov 0  }
   0x4   :  { %s18104_s14 = smov 0   ;;  %s18106_s15 = smov 0  }
   0x5   :  { %s18108_s16 = smov 0   ;;  %s18110_s17 = smov 0  }
   0x6 LB: > { %s18129_s18 = sadd.s32 4294967295, %s18069_s17   ;;  %s60_s19 = sadd.s32 1, %s18057_s14  ;;  %s18069_s17 = sphi %s18110_s17, %s18_s17   ;;  %s18065_s16 = sphi %s18108_s16, %s20850_s16   ;;  %s18061_s15 = sphi %s18106_s15, %s20849_s15   ;;  %s18057_s14 = sphi %s18104_s14, %s20848_s14   ;;  %s18053_s13 = sphi %s18102_s13, %s20847_s13   ;;  %s18049_s12 = sphi %s18100_s12, %s20846_s12  }
   0x7   : > { %p67_p0 = scmp.ne.s32.totalorder %s18057_s14, %s18053_s13  ;;  %p68_p1 = scmp.eq.s32.totalorder %s18069_s17, 0 }
   0x8   : > { %p73_p2 = scmp.ne.s32.totalorder %s18053_s13, %s18049_s12  ;;  %p20825_p3 = scmp.eq.s32.totalorder %s18129_s18, 0 }
   0x9   : > { %p69_p4 = por %p68_p1, %p67_p0  ;;  %p15738_p5 = scmp.ge.s32.totalorder %s18069_s17, 1 }
   0xa   : > { %p18140_p6 = por %p20825_p3, %p73_p2  ;;  %p136_p7 = scmp.lt.s32.totalorder %s18069_s17, 4 }
   0xb   : > { %s18071_s22 = smov [#allocation8]   ;;  %p17838_p10 = scmp.lt.s32.totalorder %s18069_s17, 3 }
   0xc   : > { %s20831_s20 = scalar_select %p18140_p6, 1, 0 }
   0xd   : > { %p18145_p8 = pnand %p15738_p5, %p136_p7  ;;  %s163_s23 = sshll.u32 %s18071_s22, 4  ;;  %s164_s23 = int_to_ptr.vmem [resolvable:$true] %s163_s23 }
   0xe   : > { %p18158_p12 = pnand %p17838_p10, %p69_p4  ;;  %s18072_s26 = smov [#allocation3]  }
   0xf   : > { %s20832_s21 = scalar_select %p18145_p8, 1, 0 }
  0x10   : > { %p17825_p9 = pneg %p18145_p8  ;;  %s149_s27 = sshll.u32 %s18072_s26, 4  ;;  %s150_s27 = int_to_ptr.vmem [resolvable:$true] %s149_s27 }
  0x11   : > { %s17914_s28 = scalar_lea.vmem %s164_s23, 128  ;;  %p17922_p5 = scmp.lt.s32.totalorder %s164_s23, %s164_s23 }
  0x12   : > { %p18154_p11 = pnand %p17825_p9, %p20825_p3  ;;  %p17915_p0 = scmp.ne.s32.totalorder %s164_s23, %s17914_s28 }
  0x13   : > { %p17923_p7 = scmp.lt.s32.totalorder %s17914_s28, %s17914_s28 }
  0x14   : > { %p17905_p13 = pneg %p18154_p11 }
  0x15   : > { %p17924_p9 = por %p17923_p7, %p17922_p5 }
  0x16   : > { %p17917_p1 = pnand %p17915_p0, %p17905_p13 }
  0x18   : > { %p17918_p2 = pneg %p17917_p1 }
  0x1a   : > { %p17925_p3 = pnand %p17924_p9, %p17918_p2 }
  0x1c   : > { %17928 = shalt.err (!%p17925_p3)
}
  0x1d   : > { %17831 = dma.hbm_to_vmem [thread:$0]  (!%p18154_p11), %s20823_s2, 128, %s164_s23, [#allocation7]  }
  0x1e   : > { %s17940_s4 = scalar_lea.vmem %s150_s27, 1536  ;;  %p17948_p1 = scmp.lt.s32.totalorder %s150_s27, %s150_s27 }
  0x1f   : > { %p17941_p4 = scmp.ne.s32.totalorder %s150_s27, %s17940_s4  ;;  %p17949_p6 = scmp.lt.s32.totalorder %s17940_s4, %s17940_s4 }
  0x21   : > { %p17943_p10 = pnand %p17941_p4, %p17905_p13  ;;  %p17950_p8 = por %p17949_p6, %p17948_p1 }
  0x23   : > { %p17944_p0 = pneg %p17943_p10 }
  0x25   : > { %p17951_p5 = pnand %p17950_p8, %p17944_p0 }
  0x27   : > { %17954 = shalt.err (!%p17951_p5)
}
  0x28   : > { %17828 = dma.hbm_to_vmem [thread:$0]  (!%p18154_p11), %s20821_s0, 1536, %s150_s27, [#allocation4]  }
  0x29   : > { %s174_s7 = sand.u32 1, %s18069_s17   ;;  %s27_s8 = sadd.s32 1, %s18065_s16 }
  0x2a   : > { %p28_p3 = scmp.ge.s32.totalorder %s27_s8, 3  ;;  %s176_s9 = sand.u32 1, %s18057_s14  }
  0x2b   : > { %s15742_s10 = sshll.u32 %s176_s9, 14  ;;  %s17810_s11 = sshll.u32 %s18065_s16, 18 }
  0x2c   : > { %s20852_s8 = smov (%p28_p3, %s27_s8), 0  ;;  %s187_s23 = scalar_lea.hbm %s20822_s1, %s17810_s11 }
  0x2d   : > { %s55_s24 = ssub.s32 %s18065_s16, %s20852_s8  ;;  %s178_s26 = scalar_lea.vmem [#allocation6], %s15742_s10 }
  0x2e   : > { %s188_s28 = sshll.u32 %s178_s26, 4  ;;  %p58_p6 = scmp.eq.s32.totalorder %s55_s24, 0  ;;  %s189_s28 = int_to_ptr.vmem [resolvable:$true] %s188_s28 }
  0x2f   : > { %s175_s29 = scalar_lea.sflag [#allocation7], %s174_s7  ;;  %p17957_p8 = pneg %p18158_p12 }
  0x30   : > { %s18194_s27 = scalar_select %p58_p6, %s18057_s14, %s60_s19  }
  0x31   : > { %s17968_s30 = scalar_lea.vmem %s189_s28, 262144  ;;  %s18073_s4 = smov [#allocation6]  }
  0x32   : > { %p17969_p11 = scmp.ne.s32.totalorder %s189_s28, %s17968_s30  ;;  %s17973_s5 = sshll.u32 %s18073_s4, 4  ;;  %s17974_s5 = int_to_ptr.vmem [resolvable:$false] %s17973_s5 }
  0x33   : > { %s17975_s6 = scalar_lea.vmem %s17974_s5, 524288  ;;  %p17976_p7 = scmp.lt.s32.totalorder %s189_s28, %s17974_s5 }
  0x34   : > { %p17971_p13 = pnand %p17969_p11, %p17957_p8  ;;  %p17977_p9 = scmp.lt.s32.totalorder %s17975_s6, %s17968_s30 }
  0x36   : > { %p17972_p2 = pneg %p17971_p13  ;;  %p17978_p4 = por %p17977_p9, %p17976_p7 }
  0x38   : > { %p17979_p10 = pnand %p17978_p4, %p17972_p2 }
  0x3a   : > { %17982 = shalt.err (!%p17979_p10)
}
  0x3b   : > { %s18074_s9 = smov 512   ;;  %s18075_s19 = smov 32  }
  0x3c   : > { %17835 = dma.hbm_to_vmem [thread:$0]  (!%p18158_p12), %s187_s23, 262144, %s189_s28, %s175_s29, %s18074_s9, %s18074_s9, %s18075_s19  }
  0x3d   : > { %p20835_p0 = scmp.ne.s32.totalorder %s20832_s21, 0 }
  0x3f   : > { %200 = sbr.rel (%p20835_p0) target bundleno = 2397 (0x95d), region = 32 }
  0x44   : > { %p20836_p1 = scmp.eq.s32.totalorder %s18129_s18, 0 }
  0x46   : > { %18032 = dma.done.wait (%p20836_p1), [#allocation4], 1536   ;;  %p20837_p5 = pmov %p20836_p1 }
  0x47   : > { %s206_s7 = sand.u32 1, %s18129_s18   ;;  %s208_s10 = sand.u32 1, %s18053_s13  }
  0x48   : > { %18034 = vsyncadd (%p20837_p5), [#allocation4], 4294965760  ;;  %s15748_s11 = sshll.u32 %s208_s10, 14  ;;  %s207_s12 = scalar_lea.sflag [#allocation7], %s206_s7 }
  0x49   : > { %s18208_s22 = scalar_lea.vmem [#allocation6], %s15748_s11  ;;  %p20838_p3 = scmp.ne.s32.totalorder %s20831_s20, 0 }
  0x4b   : > { %18036 = dma.done.wait (%p20838_p3), %s207_s12, 262144  }
  0x4c   : > { %18038 = vsyncadd (%p20838_p3), %s207_s12, 4294705152  ;;  %p20839_p12 = pmov %p20836_p1 }
  0x4d   : > { %p20840_p6 = pmov %p20836_p1 }
  0x4e   : > { %18040 = dma.done.wait (%p20839_p12), [#allocation7], 128  }
  0x4f   : > { %18042 = vsyncadd (%p20840_p6), [#allocation7], 4294967168  ;;  %p15750_p8 = scmp.ne.s32.totalorder %s18061_s15, 0 }
  0x51   : > { %239 = sbr.rel (%p15750_p8) target bundleno = 88 (0x58), region = 48 }
  0x56   : > { %v18076_v0 = vmov 0.0  }
  0x57   : > { %240 = vst [vmem:[#allocation2] sm:$0xff] %v18076_v0  ;;  %241 = vst [vmem:[#allocation2 + $0x8] sm:$0xff] %v18076_v0 }
  0x58 PF: > { %v308_v1 = vld [vmem:[%s18208_s22 + $0x1c0] sm:$0xff]  ;;  %v18077_v33 = vmov 1966171168   ;;  %v2308_v35 = vlaneseq  ;;  %s15751_s20 = sshll.u32 %s18061_s15, 12  ;;  %p17800_p11 = scmp.ne.s32.totalorder %s18061_s15, 2 }
  0x59   : > { %v312_v2 = vld [vmem:[%s18208_s22 + $0x1e0] sm:$0xff]  ;;  %v2306_v34 = vunpack.c.l.s4 %v18077_v33  ;;  %s245_s21 = sshra.s32 %s15751_s20, 7 }
  0x5a   : > { %v436_v3 = vld [vmem:[%s18208_s22 + $0x5c0] sm:$0xff]  ;;  %v15809_v4 = vcombine.high %v308_v1, %v312_v2  ;;  %v15808_v6 = vcombine.low %v308_v1, %v312_v2  ;;  %v18242_v45 = vshrl.u32 %v2308_v35, 7  ;;  %s18253_s25 = scalar_lea.vmem [#allocation3], %s245_s21 }
  0x5b   : > { %v440_v5 = vld [vmem:[%s18208_s22 + $0x5e0] sm:$0xff]  ;;  %v2307_v44 = vunpack.c.0.s8 %v2306_v34  ;;  %v18256_v60 = vld [vmem:[%s18253_s25] sm:$0xff] }
  0x5c   : > { %v300_v7 = vld [vmem:[%s18208_s22 + $0x180] sm:$0xff]  ;;  %v15937_v9 = vcombine.high %v436_v3, %v440_v5  ;;  %v15936_v10 = vcombine.low %v436_v3, %v440_v5  ;;  %12772 = vmatprep.subr.bf16.mxu0 %v15809_v4 }
  0x5d   : > { %v304_v8 = vld [vmem:[%s18208_s22 + $0x1a0] sm:$0xff]  ;;  %12773 = vmatpush1.bf16.msra.mxu0 %v15808_v6  ;;  %v18249_v54 = vsub.s32 %v2307_v44, %v18242_v45 }
  0x5e   : > { %v15801_v11 = vcombine.high %v300_v7, %v304_v8  ;;  %v428_v12 = vld [vmem:[%s18208_s22 + $0x580] sm:$0xff]  ;;  %12813 = vmatprep.subr.bf16.mxu1 %v15937_v9  ;;  %v15800_v19 = vcombine.low %v300_v7, %v304_v8 }
  0x5f   : > { %v432_v13 = vld [vmem:[%s18208_s22 + $0x5a0] sm:$0xff]  ;;  %12814 = vmatpush1.bf16.msra.mxu1 %v15936_v10  ;;  %20841 = vst [vmem:[#allocation14_spill] sm:$0xff] %v18249_v54  ;;  %v18262_v0 = vrot.slane %v18256_v60, %v18249_v54 }
  0x60   : > { %v292_v14 = vld [vmem:[%s18208_s22 + $0x140] sm:$0xff]  ;;  %v15929_v15 = vcombine.high %v428_v12, %v432_v13  ;;  %12774 = vmatprep.subr.bf16.mxu0 %v15801_v11  ;;  %v15928_v20 = vcombine.low %v428_v12, %v432_v13 }
  0x61   : > { %v296_v16 = vld [vmem:[%s18208_s22 + $0x160] sm:$0xff]  ;;  %12775 = vmatpush1.bf16.msra.mxu0 %v15800_v19  ;;  %v2319_v4 = vcombine.high %v18262_v0, %v18262_v0 }
  0x62   : > { %v420_v17 = vld [vmem:[%s18208_s22 + $0x540] sm:$0xff]  ;;  %v15793_v21 = vcombine.high %v292_v14, %v296_v16  ;;  %12815 = vmatprep.subr.bf16.mxu1 %v15929_v15  ;;  %v15792_v27 = vcombine.low %v292_v14, %v296_v16 }
  0x63   : > { %v424_v18 = vld [vmem:[%s18208_s22 + $0x560] sm:$0xff]  ;;  %12816 = vmatpush1.bf16.msra.mxu1 %v15928_v20  ;;  %v18271_v10 = vrot.slane %v2319_v4, %v18249_v54 }
  0x64   : > { %v15921_v22 = vcombine.high %v420_v17, %v424_v18  ;;  %v284_v23 = vld [vmem:[%s18208_s22 + $0x100] sm:$0xff]  ;;  %12776 = vmatprep.subr.bf16.mxu0 %v15793_v21  ;;  %v15920_v28 = vcombine.low %v420_v17, %v424_v18 }
  0x65   : > { %v288_v24 = vld [vmem:[%s18208_s22 + $0x120] sm:$0xff]  ;;  %12777 = vmatpush1.bf16.msra.mxu0 %v15792_v27  ;;  %12804 = vmatprep.mubr.bf16.mxu0 %v18271_v10  ;;  %v18278_v14 = vcombine.high %v18271_v10, %v18271_v10 }
  0x66   : > { %v412_v25 = vld [vmem:[%s18208_s22 + $0x500] sm:$0xff]  ;;  %v15785_v29 = vcombine.high %v284_v23, %v288_v24  ;;  %12817 = vmatprep.subr.bf16.mxu1 %v15921_v22  ;;  %v15784_v38 = vcombine.low %v284_v23, %v288_v24 }
  0x67   : > { %v416_v26 = vld [vmem:[%s18208_s22 + $0x520] sm:$0xff]  ;;  %12818 = vmatpush1.bf16.msra.mxu1 %v15920_v28  ;;  %12845 = vmatprep.mubr.bf16.mxu1 %v18278_v14 }
  0x68   : > { %v15913_v30 = vcombine.high %v412_v25, %v416_v26  ;;  %v276_v31 = vld [vmem:[%s18208_s22 + $0xc0] sm:$0xff]  ;;  %12778 = vmatprep.subr.bf16.mxu0 %v15785_v29  ;;  %v15912_v39 = vcombine.low %v412_v25, %v416_v26 }
  0x69   : > { %v280_v32 = vld [vmem:[%s18208_s22 + $0xe0] sm:$0xff]  ;;  %12779 = vmatpush1.bf16.msra.mxu0 %v15784_v38 }
  0x6a   : > { %v404_v36 = vld [vmem:[%s18208_s22 + $0x4c0] sm:$0xff]  ;;  %v15777_v40 = vcombine.high %v276_v31, %v280_v32  ;;  %12819 = vmatprep.subr.bf16.mxu1 %v15913_v30  ;;  %v15776_v48 = vcombine.low %v276_v31, %v280_v32 }
  0x6b   : > { %v408_v37 = vld [vmem:[%s18208_s22 + $0x4e0] sm:$0xff]  ;;  %12820 = vmatpush1.bf16.msra.mxu1 %v15912_v39 }
  0x6c   : > { %v15905_v41 = vcombine.high %v404_v36, %v408_v37  ;;  %v268_v42 = vld [vmem:[%s18208_s22 + $0x80] sm:$0xff]  ;;  %12780 = vmatprep.subr.bf16.mxu0 %v15777_v40  ;;  %v15904_v49 = vcombine.low %v404_v36, %v408_v37 }
  0x6d   : > { %v272_v43 = vld [vmem:[%s18208_s22 + $0xa0] sm:$0xff]  ;;  %12781 = vmatpush1.bf16.msra.mxu0 %v15776_v48 }
  0x6e   : > { %v396_v46 = vld [vmem:[%s18208_s22 + $0x480] sm:$0xff]  ;;  %v15769_v50 = vcombine.high %v268_v42, %v272_v43  ;;  %12821 = vmatprep.subr.bf16.mxu1 %v15905_v41  ;;  %v15768_v57 = vcombine.low %v268_v42, %v272_v43 }
  0x6f   : > { %v400_v47 = vld [vmem:[%s18208_s22 + $0x4a0] sm:$0xff]  ;;  %12822 = vmatpush1.bf16.msra.mxu1 %v15904_v49 }
  0x70   : > { %v15897_v51 = vcombine.high %v396_v46, %v400_v47  ;;  %v260_v52 = vld [vmem:[%s18208_s22 + $0x40] sm:$0xff]  ;;  %12782 = vmatprep.subr.bf16.mxu0 %v15769_v50  ;;  %v15896_v58 = vcombine.low %v396_v46, %v400_v47 }
  0x71   : > { %v264_v53 = vld [vmem:[%s18208_s22 + $0x60] sm:$0xff]  ;;  %12783 = vmatpush1.bf16.msra.mxu0 %v15768_v57 }
  0x72   : > { %v388_v55 = vld [vmem:[%s18208_s22 + $0x440] sm:$0xff]  ;;  %v15761_v59 = vcombine.high %v260_v52, %v264_v53  ;;  %12823 = vmatprep.subr.bf16.mxu1 %v15897_v51  ;;  %v15760_v3 = vcombine.low %v260_v52, %v264_v53 }
  0x73   : > { %v392_v56 = vld [vmem:[%s18208_s22 + $0x460] sm:$0xff]  ;;  %12824 = vmatpush1.bf16.msra.mxu1 %v15896_v58 }
  0x74   : > { %v15889_v61 = vcombine.high %v388_v55, %v392_v56  ;;  %v252_v62 = vld [vmem:[%s18208_s22] sm:$0xff]  ;;  %12784 = vmatprep.subr.bf16.mxu0 %v15761_v59  ;;  %v15888_v5 = vcombine.low %v388_v55, %v392_v56 }
  0x75   : > { %v256_v63 = vld [vmem:[%s18208_s22 + $0x20] sm:$0xff]  ;;  %12785 = vmatpush1.bf16.msra.mxu0 %v15760_v3 }
  0x76   : > { %v380_v1 = vld [vmem:[%s18208_s22 + $0x400] sm:$0xff]  ;;  %v15753_v6 = vcombine.high %v252_v62, %v256_v63  ;;  %12825 = vmatprep.subr.bf16.mxu1 %v15889_v61  ;;  %v15752_v13 = vcombine.low %v252_v62, %v256_v63 }
  0x77   : > { %v384_v2 = vld [vmem:[%s18208_s22 + $0x420] sm:$0xff]  ;;  %12826 = vmatpush1.bf16.msra.mxu1 %v15888_v5 }
  0x78   : > { %v15881_v7 = vcombine.high %v380_v1, %v384_v2  ;;  %v372_v8 = vld [vmem:[%s18208_s22 + $0x3c0] sm:$0xff]  ;;  %12786 = vmatprep.subr.bf16.mxu0 %v15753_v6  ;;  %v15880_v15 = vcombine.low %v380_v1, %v384_v2  ;;  %v2304_v2 = vcombine.high %v18256_v60, %v18256_v60 }
  0x79   : > { %v376_v9 = vld [vmem:[%s18208_s22 + $0x3e0] sm:$0xff]  ;;  %12787 = vmatpush1.bf16.msra.mxu0 %v15752_v13 }
  0x7a   : > { %v500_v11 = vld [vmem:[%s18208_s22 + $0x7c0] sm:$0xff]  ;;  %v15873_v16 = vcombine.high %v372_v8, %v376_v9  ;;  %12827 = vmatprep.subr.bf16.mxu1 %v15881_v7  ;;  %v15872_v22 = vcombine.low %v372_v8, %v376_v9 }
  0x7b   : > { %v504_v12 = vld [vmem:[%s18208_s22 + $0x7e0] sm:$0xff]  ;;  %12828 = vmatpush1.bf16.msra.mxu1 %v15880_v15 }
  0x7c   : > { %v16001_v17 = vcombine.high %v500_v11, %v504_v12  ;;  %v364_v18 = vld [vmem:[%s18208_s22 + $0x380] sm:$0xff]  ;;  %12788 = vmatprep.subr.bf16.mxu0 %v15873_v16  ;;  %v16000_v23 = vcombine.low %v500_v11, %v504_v12  ;;  %v18312_v12 = vrot.slane %v2304_v2, %v18249_v54 }
  0x7d   : > { %v368_v19 = vld [vmem:[%s18208_s22 + $0x3a0] sm:$0xff]  ;;  %12789 = vmatpush2.bf16.msra.mxu0 %v15872_v22 }
  0x7e   : > { %v492_v20 = vld [vmem:[%s18208_s22 + $0x780] sm:$0xff]  ;;  %v15865_v24 = vcombine.high %v364_v18, %v368_v19  ;;  %12829 = vmatprep.subr.bf16.mxu1 %v16001_v17  ;;  %v15864_v30 = vcombine.low %v364_v18, %v368_v19 }
  0x7f   : > { %v496_v21 = vld [vmem:[%s18208_s22 + $0x7a0] sm:$0xff]  ;;  %12830 = vmatpush2.bf16.msra.mxu1 %v16000_v23  ;;  %v18322_v23 = vrot.slane %v18262_v0, %v18249_v54 }
  0x80   : > { %v15993_v25 = vcombine.high %v492_v20, %v496_v21  ;;  %v356_v26 = vld [vmem:[%s18208_s22 + $0x340] sm:$0xff]  ;;  %12790 = vmatprep.subr.bf16.mxu0 %v15865_v24  ;;  %v15992_v31 = vcombine.low %v492_v20, %v496_v21  ;;  %v2320_v21 = vcombine.high %v18312_v12, %v18312_v12 }
  0x81   : > { %v360_v27 = vld [vmem:[%s18208_s22 + $0x360] sm:$0xff]  ;;  %12791 = vmatpush2.bf16.msra.mxu0 %v15864_v30  ;;  %v18333_v0 = vcombine.high %v18322_v23, %v18322_v23 }
  0x82   : > { %v484_v28 = vld [vmem:[%s18208_s22 + $0x740] sm:$0xff]  ;;  %v15857_v32 = vcombine.high %v356_v26, %v360_v27  ;;  %12831 = vmatprep.subr.bf16.mxu1 %v15993_v25  ;;  %v15856_v38 = vcombine.low %v356_v26, %v360_v27 }
  0x83   : > { %v488_v29 = vld [vmem:[%s18208_s22 + $0x760] sm:$0xff]  ;;  %12832 = vmatpush2.bf16.msra.mxu1 %v15992_v31  ;;  %v18329_v31 = vrot.slane %v2320_v21, %v18249_v54 }
  0x84   : > { %v15985_v33 = vcombine.high %v484_v28, %v488_v29  ;;  %v348_v34 = vld [vmem:[%s18208_s22 + $0x300] sm:$0xff]  ;;  %12792 = vmatprep.subr.bf16.mxu0 %v15857_v32  ;;  %v15984_v39 = vcombine.low %v484_v28, %v488_v29 }
  0x85   : > { %v352_v35 = vld [vmem:[%s18208_s22 + $0x320] sm:$0xff]  ;;  %12793 = vmatpush2.bf16.msra.mxu0 %v15856_v38 }
  0x86   : > { %v476_v36 = vld [vmem:[%s18208_s22 + $0x700] sm:$0xff]  ;;  %v15849_v40 = vcombine.high %v348_v34, %v352_v35  ;;  %12833 = vmatprep.subr.bf16.mxu1 %v15985_v33  ;;  %v15848_v47 = vcombine.low %v348_v34, %v352_v35 }
  0x87   : > { %v480_v37 = vld [vmem:[%s18208_s22 + $0x720] sm:$0xff]  ;;  %12834 = vmatpush2.bf16.msra.mxu1 %v15984_v39 }
  0x88   : > { %v15977_v41 = vcombine.high %v476_v36, %v480_v37  ;;  %v340_v42 = vld [vmem:[%s18208_s22 + $0x2c0] sm:$0xff]  ;;  %12794 = vmatprep.subr.bf16.mxu0 %v15849_v40  ;;  %v15976_v48 = vcombine.low %v476_v36, %v480_v37  ;;  %v18342_v40 = vcombine.high %v18329_v31, %v18329_v31 }
  0x89   : > { %v344_v43 = vld [vmem:[%s18208_s22 + $0x2e0] sm:$0xff]  ;;  %12795 = vmatpush2.bf16.msra.mxu0 %v15848_v47 }
  0x8a   : > { %v468_v44 = vld [vmem:[%s18208_s22 + $0x6c0] sm:$0xff]  ;;  %v15841_v49 = vcombine.high %v340_v42, %v344_v43  ;;  %12835 = vmatprep.subr.bf16.mxu1 %v15977_v41  ;;  %v15840_v56 = vcombine.low %v340_v42, %v344_v43 }
  0x8b   : > { %v472_v46 = vld [vmem:[%s18208_s22 + $0x6e0] sm:$0xff]  ;;  %12836 = vmatpush2.bf16.msra.mxu1 %v15976_v48 }
  0x8c   : > { %v15969_v50 = vcombine.high %v468_v44, %v472_v46  ;;  %v332_v51 = vld [vmem:[%s18208_s22 + $0x280] sm:$0xff]  ;;  %12796 = vmatprep.subr.bf16.mxu0 %v15841_v49  ;;  %v15968_v57 = vcombine.low %v468_v44, %v472_v46 }
  0x8d   : > { %v336_v52 = vld [vmem:[%s18208_s22 + $0x2a0] sm:$0xff]  ;;  %12797 = vmatpush2.bf16.msra.mxu0 %v15840_v56 }
  0x8e   : > { %v460_v53 = vld [vmem:[%s18208_s22 + $0x680] sm:$0xff]  ;;  %v15833_v58 = vcombine.high %v332_v51, %v336_v52  ;;  %12837 = vmatprep.subr.bf16.mxu1 %v15969_v50  ;;  %v15832_v3 = vcombine.low %v332_v51, %v336_v52 }
  0x8f   : > { %v464_v55 = vld [vmem:[%s18208_s22 + $0x6a0] sm:$0xff]  ;;  %12838 = vmatpush2.bf16.msra.mxu1 %v15968_v57 }
  0x90   : > { %v15961_v59 = vcombine.high %v460_v53, %v464_v55  ;;  %v324_v61 = vld [vmem:[%s18208_s22 + $0x240] sm:$0xff]  ;;  %12798 = vmatprep.subr.bf16.mxu0 %v15833_v58  ;;  %v15960_v4 = vcombine.low %v460_v53, %v464_v55 }
  0x91   : > { %v328_v62 = vld [vmem:[%s18208_s22 + $0x260] sm:$0xff]  ;;  %12799 = vmatpush2.bf16.msra.mxu0 %v15832_v3 }
  0x92   : > { %v452_v63 = vld [vmem:[%s18208_s22 + $0x640] sm:$0xff]  ;;  %v15825_v5 = vcombine.high %v324_v61, %v328_v62  ;;  %12839 = vmatprep.subr.bf16.mxu1 %v15961_v59  ;;  %v15824_v60 = vcombine.low %v324_v61, %v328_v62 }
  0x93   : > { %v456_v1 = vld [vmem:[%s18208_s22 + $0x660] sm:$0xff]  ;;  %12840 = vmatpush2.bf16.msra.mxu1 %v15960_v4 }
  0x94   : > { %v15953_v6 = vcombine.high %v452_v63, %v456_v1  ;;  %v316_v7 = vld [vmem:[%s18208_s22 + $0x200] sm:$0xff]  ;;  %12800 = vmatprep.subr.bf16.mxu0 %v15825_v5  ;;  %v15952_v13 = vcombine.low %v452_v63, %v456_v1 }
  0x95   : > { %v320_v8 = vld [vmem:[%s18208_s22 + $0x220] sm:$0xff]  ;;  %12801 = vmatpush2.bf16.msra.mxu0 %v15824_v60 }
  0x96   : > { %v444_v9 = vld [vmem:[%s18208_s22 + $0x600] sm:$0xff]  ;;  %v15817_v15 = vcombine.high %v316_v7, %v320_v8  ;;  %12841 = vmatprep.subr.bf16.mxu1 %v15953_v6  ;;  %v15816_v22 = vcombine.low %v316_v7, %v320_v8 }
  0x97   : > { %v448_v11 = vld [vmem:[%s18208_s22 + $0x620] sm:$0xff]  ;;  %12842 = vmatpush2.bf16.msra.mxu1 %v15952_v13 }
  0x98   : > { %v15945_v16 = vcombine.high %v444_v9, %v448_v11  ;;  %v564_v17 = vld [vmem:[%s18208_s22 + $0x9c0] sm:$0xff]  ;;  %12802 = vmatprep.subr.bf16.mxu0 %v15817_v15  ;;  %v15944_v24 = vcombine.low %v444_v9, %v448_v11 }
  0x99   : > { %v568_v18 = vld [vmem:[%s18208_s22 + $0x9e0] sm:$0xff]  ;;  %12803 = vmatpush2.bf16.msra.mxu0 %v15816_v22 }
  0x9a   : > { %v692_v19 = vld [vmem:[%s18208_s22 + $0xdc0] sm:$0xff]  ;;  %v16065_v25 = vcombine.high %v564_v17, %v568_v18  ;;  %12843 = vmatprep.subr.bf16.mxu1 %v15945_v16  ;;  %v16064_v32 = vcombine.low %v564_v17, %v568_v18 }
  0x9b   : > { %v696_v20 = vld [vmem:[%s18208_s22 + $0xde0] sm:$0xff]  ;;  %12844 = vmatpush2.bf16.msra.mxu1 %v15944_v24 }
  0x9c   : > { %v16193_v26 = vcombine.high %v692_v19, %v696_v20  ;;  %v556_v27 = vld [vmem:[%s18208_s22 + $0x980] sm:$0xff]  ;;  %12854 = vmatprep.subr.bf16.mxu0 %v16065_v25  ;;  %v16192_v33 = vcombine.low %v692_v19, %v696_v20  ;;  %12805 = vmatmul.mubr.bf16.vlgmr.msra.gmra.mxu0 %v18322_v23 }
  0x9d   : > { %v560_v28 = vld [vmem:[%s18208_s22 + $0x9a0] sm:$0xff]  ;;  %12855 = vmatpush1.bf16.msra.mxu0 %v16064_v32  ;;  %12886 = vmatprep.mubr.bf16.mxu0 %v18329_v31 }
  0x9e   : > { %v684_v29 = vld [vmem:[%s18208_s22 + $0xd80] sm:$0xff]  ;;  %v16057_v34 = vcombine.high %v556_v27, %v560_v28  ;;  %12895 = vmatprep.subr.bf16.mxu1 %v16193_v26  ;;  %12846 = vmatmul.mubr.bf16.vlgmr.msra.gmra.mxu1 %v18333_v0  ;;  %v16056_v41 = vcombine.low %v556_v27, %v560_v28 }
  0x9f   : > { %v688_v30 = vld [vmem:[%s18208_s22 + $0xda0] sm:$0xff]  ;;  %12896 = vmatpush1.bf16.msra.mxu1 %v16192_v33  ;;  %12927 = vmatprep.mubr.bf16.mxu1 %v18342_v40 }
  0xa0   : > { %v16185_v35 = vcombine.high %v684_v29, %v688_v30  ;;  %v548_v36 = vld [vmem:[%s18208_s22 + $0x940] sm:$0xff]  ;;  %12856 = vmatprep.subr.bf16.mxu0 %v16057_v34  ;;  %v16184_v42 = vcombine.low %v684_v29, %v688_v30 }
  0xa1   : > { %v552_v37 = vld [vmem:[%s18208_s22 + $0x960] sm:$0xff]  ;;  %12857 = vmatpush1.bf16.msra.mxu0 %v16056_v41 }
  0xa2   : > { %v676_v38 = vld [vmem:[%s18208_s22 + $0xd40] sm:$0xff]  ;;  %v16049_v43 = vcombine.high %v548_v36, %v552_v37  ;;  %12897 = vmatprep.subr.bf16.mxu1 %v16185_v35  ;;  %v16048_v50 = vcombine.low %v548_v36, %v552_v37 }
  0xa3   : > { %v680_v39 = vld [vmem:[%s18208_s22 + $0xd60] sm:$0xff]  ;;  %12898 = vmatpush1.bf16.msra.mxu1 %v16184_v42 }
  0xa4   : > { %v16177_v44 = vcombine.high %v676_v38, %v680_v39  ;;  %v540_v46 = vld [vmem:[%s18208_s22 + $0x900] sm:$0xff]  ;;  %12858 = vmatprep.subr.bf16.mxu0 %v16049_v43  ;;  %v16176_v51 = vcombine.low %v676_v38, %v680_v39 }
  0xa5   : > { %v544_v47 = vld [vmem:[%s18208_s22 + $0x920] sm:$0xff]  ;;  %12859 = vmatpush1.bf16.msra.mxu0 %v16048_v50 }
  0xa6   : > { %v668_v48 = vld [vmem:[%s18208_s22 + $0xd00] sm:$0xff]  ;;  %v16041_v52 = vcombine.high %v540_v46, %v544_v47  ;;  %12899 = vmatprep.subr.bf16.mxu1 %v16177_v44  ;;  %v16040_v59 = vcombine.low %v540_v46, %v544_v47 }
  0xa7   : > { %v672_v49 = vld [vmem:[%s18208_s22 + $0xd20] sm:$0xff]  ;;  %12900 = vmatpush1.bf16.msra.mxu1 %v16176_v51 }
  0xa8   : > { %v16169_v53 = vcombine.high %v668_v48, %v672_v49  ;;  %v532_v55 = vld [vmem:[%s18208_s22 + $0x8c0] sm:$0xff]  ;;  %12860 = vmatprep.subr.bf16.mxu0 %v16041_v52  ;;  %v16168_v61 = vcombine.low %v668_v48, %v672_v49 }
  0xa9   : > { %v536_v56 = vld [vmem:[%s18208_s22 + $0x8e0] sm:$0xff]  ;;  %12861 = vmatpush1.bf16.msra.mxu0 %v16040_v59 }
  0xaa   : > { %v660_v57 = vld [vmem:[%s18208_s22 + $0xcc0] sm:$0xff]  ;;  %v16033_v62 = vcombine.high %v532_v55, %v536_v56  ;;  %12901 = vmatprep.subr.bf16.mxu1 %v16169_v53  ;;  %v16032_v5 = vcombine.low %v532_v55, %v536_v56 }
  0xab   : > { %v664_v58 = vld [vmem:[%s18208_s22 + $0xce0] sm:$0xff]  ;;  %12902 = vmatpush1.bf16.msra.mxu1 %v16168_v61 }
  0xac   : > { %v16161_v63 = vcombine.high %v660_v57, %v664_v58  ;;  %v524_v1 = vld [vmem:[%s18208_s22 + $0x880] sm:$0xff]  ;;  %12862 = vmatprep.subr.bf16.mxu0 %v16033_v62  ;;  %v16160_v6 = vcombine.low %v660_v57, %v664_v58 }
  0xad   : > { %v528_v2 = vld [vmem:[%s18208_s22 + $0x8a0] sm:$0xff]  ;;  %12863 = vmatpush1.bf16.msra.mxu0 %v16032_v5 }
  0xae   : > { %v652_v3 = vld [vmem:[%s18208_s22 + $0xc80] sm:$0xff]  ;;  %v16025_v7 = vcombine.high %v524_v1, %v528_v2  ;;  %12903 = vmatprep.subr.bf16.mxu1 %v16161_v63  ;;  %v16024_v15 = vcombine.low %v524_v1, %v528_v2 }
  0xaf   : > { %v656_v4 = vld [vmem:[%s18208_s22 + $0xca0] sm:$0xff]  ;;  %12904 = vmatpush1.bf16.msra.mxu1 %v16160_v6 }
  0xb0   : > { %v16153_v8 = vcombine.high %v652_v3, %v656_v4  ;;  %v516_v9 = vld [vmem:[%s18208_s22 + $0x840] sm:$0xff]  ;;  %12864 = vmatprep.subr.bf16.mxu0 %v16025_v7  ;;  %v16152_v16 = vcombine.low %v652_v3, %v656_v4 }
  0xb1   : > { %v520_v11 = vld [vmem:[%s18208_s22 + $0x860] sm:$0xff]  ;;  %12865 = vmatpush1.bf16.msra.mxu0 %v16024_v15 }
  0xb2   : > { %v644_v60 = vld [vmem:[%s18208_s22 + $0xc40] sm:$0xff]  ;;  %v16017_v17 = vcombine.high %v516_v9, %v520_v11  ;;  %12905 = vmatprep.subr.bf16.mxu1 %v16153_v8  ;;  %v16016_v24 = vcombine.low %v516_v9, %v520_v11 }
  0xb3   : > { %v648_v13 = vld [vmem:[%s18208_s22 + $0xc60] sm:$0xff]  ;;  %12906 = vmatpush1.bf16.msra.mxu1 %v16152_v16 }
  0xb4   : > { %v16145_v18 = vcombine.high %v644_v60, %v648_v13  ;;  %v508_v19 = vld [vmem:[%s18208_s22 + $0x800] sm:$0xff]  ;;  %12866 = vmatprep.subr.bf16.mxu0 %v16017_v17  ;;  %v16144_v25 = vcombine.low %v644_v60, %v648_v13 }
  0xb5   : > { %v512_v20 = vld [vmem:[%s18208_s22 + $0x820] sm:$0xff]  ;;  %12867 = vmatpush1.bf16.msra.mxu0 %v16016_v24 }
  0xb6   : > { %v636_v21 = vld [vmem:[%s18208_s22 + $0xc00] sm:$0xff]  ;;  %v16009_v26 = vcombine.high %v508_v19, %v512_v20  ;;  %12907 = vmatprep.subr.bf16.mxu1 %v16145_v18  ;;  %v16008_v33 = vcombine.low %v508_v19, %v512_v20 }
  0xb7   : > { %v640_v22 = vld [vmem:[%s18208_s22 + $0xc20] sm:$0xff]  ;;  %12908 = vmatpush1.bf16.msra.mxu1 %v16144_v25 }
  0xb8   : > { %v16137_v27 = vcombine.high %v636_v21, %v640_v22  ;;  %v628_v28 = vld [vmem:[%s18208_s22 + $0xbc0] sm:$0xff]  ;;  %12868 = vmatprep.subr.bf16.mxu0 %v16009_v26  ;;  %v16136_v34 = vcombine.low %v636_v21, %v640_v22  ;;  %v18396_v26 = vld [vmem:[%s18253_s25 + $0x8] sm:$0xff] }
  0xb9   : > { %v632_v29 = vld [vmem:[%s18208_s22 + $0xbe0] sm:$0xff]  ;;  %12869 = vmatpush1.bf16.msra.mxu0 %v16008_v33 }
  0xba   : > { %v756_v30 = vld [vmem:[%s18208_s22 + $0xfc0] sm:$0xff]  ;;  %v16129_v35 = vcombine.high %v628_v28, %v632_v29  ;;  %12909 = vmatprep.subr.bf16.mxu1 %v16137_v27  ;;  %v16128_v42 = vcombine.low %v628_v28, %v632_v29 }
  0xbb   : > { %v760_v32 = vld [vmem:[%s18208_s22 + $0xfe0] sm:$0xff]  ;;  %12910 = vmatpush1.bf16.msra.mxu1 %v16136_v34 }
  0xbc   : > { %v16257_v36 = vcombine.high %v756_v30, %v760_v32  ;;  %v620_v37 = vld [vmem:[%s18208_s22 + $0xb80] sm:$0xff]  ;;  %12870 = vmatprep.subr.bf16.mxu0 %v16129_v35  ;;  %v16256_v43 = vcombine.low %v756_v30, %v760_v32  ;;  %v18404_v35 = vrot.slane %v18396_v26, %v18249_v54 }
  0xbd   : > { %v624_v38 = vld [vmem:[%s18208_s22 + $0xba0] sm:$0xff]  ;;  %12871 = vmatpush2.bf16.msra.mxu0 %v16128_v42 }
  0xbe   : > { %v748_v39 = vld [vmem:[%s18208_s22 + $0xf80] sm:$0xff]  ;;  %v16121_v44 = vcombine.high %v620_v37, %v624_v38  ;;  %12911 = vmatprep.subr.bf16.mxu1 %v16257_v36  ;;  %v16120_v51 = vcombine.low %v620_v37, %v624_v38 }
  0xbf   : > { %v752_v41 = vld [vmem:[%s18208_s22 + $0xfa0] sm:$0xff]  ;;  %12912 = vmatpush2.bf16.msra.mxu1 %v16256_v43 }
  0xc0   : > { %v16249_v46 = vcombine.high %v748_v39, %v752_v41  ;;  %v612_v47 = vld [vmem:[%s18208_s22 + $0xb40] sm:$0xff]  ;;  %12872 = vmatprep.subr.bf16.mxu0 %v16121_v44  ;;  %v16248_v52 = vcombine.low %v748_v39, %v752_v41 }
  0xc1   : > { %v616_v48 = vld [vmem:[%s18208_s22 + $0xb60] sm:$0xff]  ;;  %12873 = vmatpush2.bf16.msra.mxu0 %v16120_v51 }
  0xc2   : > { %v740_v49 = vld [vmem:[%s18208_s22 + $0xf40] sm:$0xff]  ;;  %v16113_v53 = vcombine.high %v612_v47, %v616_v48  ;;  %12913 = vmatprep.subr.bf16.mxu1 %v16249_v46  ;;  %v16112_v61 = vcombine.low %v612_v47, %v616_v48  ;;  %v2368_v46 = vcombine.high %v18404_v35, %v18404_v35  ;;  %v18414_v48 = vrot.slane %v18312_v12, %v18249_v54 }
  0xc3   : > { %v744_v50 = vld [vmem:[%s18208_s22 + $0xf60] sm:$0xff]  ;;  %12914 = vmatpush2.bf16.msra.mxu1 %v16248_v52 }
  0xc4   : > { %v16241_v55 = vcombine.high %v740_v49, %v744_v50  ;;  %v604_v56 = vld [vmem:[%s18208_s22 + $0xb00] sm:$0xff]  ;;  %12874 = vmatprep.subr.bf16.mxu0 %v16113_v53  ;;  %v16240_v62 = vcombine.low %v740_v49, %v744_v50  ;;  %v18425_v12 = vcombine.high %v18414_v48, %v18414_v48 }
  0xc5   : > { %v608_v57 = vld [vmem:[%s18208_s22 + $0xb20] sm:$0xff]  ;;  %12875 = vmatpush2.bf16.msra.mxu0 %v16112_v61 }
  0xc6   : > { %v732_v58 = vld [vmem:[%s18208_s22 + $0xf00] sm:$0xff]  ;;  %v16105_v63 = vcombine.high %v604_v56, %v608_v57  ;;  %12915 = vmatprep.subr.bf16.mxu1 %v16241_v55  ;;  %v16104_v6 = vcombine.low %v604_v56, %v608_v57  ;;  %v18421_v57 = vrot.slane %v2368_v46, %v18249_v54 }
  0xc7   : > { %v736_v59 = vld [vmem:[%s18208_s22 + $0xf20] sm:$0xff]  ;;  %12916 = vmatpush2.bf16.msra.mxu1 %v16240_v62 }
  0xc8   : > { %v16233_v1 = vcombine.high %v732_v58, %v736_v59  ;;  %v596_v2 = vld [vmem:[%s18208_s22 + $0xac0] sm:$0xff]  ;;  %12876 = vmatprep.subr.bf16.mxu0 %v16105_v63  ;;  %v16232_v7 = vcombine.low %v732_v58, %v736_v59 }
  0xc9   : > { %v600_v3 = vld [vmem:[%s18208_s22 + $0xae0] sm:$0xff]  ;;  %12877 = vmatpush2.bf16.msra.mxu0 %v16104_v6 }
  0xca   : > { %v724_v4 = vld [vmem:[%s18208_s22 + $0xec0] sm:$0xff]  ;;  %v16097_v8 = vcombine.high %v596_v2, %v600_v3  ;;  %12917 = vmatprep.subr.bf16.mxu1 %v16233_v1  ;;  %v16096_v16 = vcombine.low %v596_v2, %v600_v3 }
  0xcb   : > { %v728_v5 = vld [vmem:[%s18208_s22 + $0xee0] sm:$0xff]  ;;  %12918 = vmatpush2.bf16.msra.mxu1 %v16232_v7 }
  0xcc   : > { %v16225_v9 = vcombine.high %v724_v4, %v728_v5  ;;  %v588_v11 = vld [vmem:[%s18208_s22 + $0xa80] sm:$0xff]  ;;  %12878 = vmatprep.subr.bf16.mxu0 %v16097_v8  ;;  %v16224_v17 = vcombine.low %v724_v4, %v728_v5  ;;  %v18434_v4 = vcombine.high %v18421_v57, %v18421_v57 }
  0xcd   : > { %v592_v60 = vld [vmem:[%s18208_s22 + $0xaa0] sm:$0xff]  ;;  %12879 = vmatpush2.bf16.msra.mxu0 %v16096_v16 }
  0xce   : > { %v716_v13 = vld [vmem:[%s18208_s22 + $0xe80] sm:$0xff]  ;;  %v16089_v18 = vcombine.high %v588_v11, %v592_v60  ;;  %12919 = vmatprep.subr.bf16.mxu1 %v16225_v9  ;;  %v16088_v25 = vcombine.low %v588_v11, %v592_v60  ;;  %20842 = vst [vmem:[#allocation15_spill] sm:$0xff] %v18434_v4 }
  0xcf   : > { %v720_v15 = vld [vmem:[%s18208_s22 + $0xea0] sm:$0xff]  ;;  %12920 = vmatpush2.bf16.msra.mxu1 %v16224_v17 }
  0xd0   : > { %v16217_v19 = vcombine.high %v716_v13, %v720_v15  ;;  %v580_v20 = vld [vmem:[%s18208_s22 + $0xa40] sm:$0xff]  ;;  %12880 = vmatprep.subr.bf16.mxu0 %v16089_v18  ;;  %v16216_v27 = vcombine.low %v716_v13, %v720_v15 }
  0xd1   : > { %v584_v21 = vld [vmem:[%s18208_s22 + $0xa60] sm:$0xff]  ;;  %12881 = vmatpush2.bf16.msra.mxu0 %v16088_v25 }
  0xd2   : > { %v708_v22 = vld [vmem:[%s18208_s22 + $0xe40] sm:$0xff]  ;;  %v16081_v28 = vcombine.high %v580_v20, %v584_v21  ;;  %12921 = vmatprep.subr.bf16.mxu1 %v16217_v19  ;;  %v16080_v36 = vcombine.low %v580_v20, %v584_v21 }
  0xd3   : > { %v712_v24 = vld [vmem:[%s18208_s22 + $0xe60] sm:$0xff]  ;;  %12922 = vmatpush2.bf16.msra.mxu1 %v16216_v27 }
  0xd4   : > { %v16209_v29 = vcombine.high %v708_v22, %v712_v24  ;;  %v572_v30 = vld [vmem:[%s18208_s22 + $0xa00] sm:$0xff]  ;;  %12882 = vmatprep.subr.bf16.mxu0 %v16081_v28  ;;  %v16208_v37 = vcombine.low %v708_v22, %v712_v24 }
  0xd5   : > { %v576_v32 = vld [vmem:[%s18208_s22 + $0xa20] sm:$0xff]  ;;  %12883 = vmatpush2.bf16.msra.mxu0 %v16080_v36 }
  0xd6   : > { %v700_v33 = vld [vmem:[%s18208_s22 + $0xe00] sm:$0xff]  ;;  %v16073_v38 = vcombine.high %v572_v30, %v576_v32  ;;  %12923 = vmatprep.subr.bf16.mxu1 %v16209_v29  ;;  %v16072_v47 = vcombine.low %v572_v30, %v576_v32 }
  0xd7   : > { %v704_v34 = vld [vmem:[%s18208_s22 + $0xe20] sm:$0xff]  ;;  %12924 = vmatpush2.bf16.msra.mxu1 %v16208_v37 }
  0xd8   : > { %v16201_v39 = vcombine.high %v700_v33, %v704_v34  ;;  %v820_v41 = vld [vmem:[%s18208_s22 + $0x11c0] sm:$0xff]  ;;  %12884 = vmatprep.subr.bf16.mxu0 %v16073_v38  ;;  %v16200_v49 = vcombine.low %v700_v33, %v704_v34 }
  0xd9   : > { %v824_v42 = vld [vmem:[%s18208_s22 + $0x11e0] sm:$0xff]  ;;  %12885 = vmatpush2.bf16.msra.mxu0 %v16072_v47 }
  0xda   : > { %v948_v43 = vld [vmem:[%s18208_s22 + $0x15c0] sm:$0xff]  ;;  %v16321_v50 = vcombine.high %v820_v41, %v824_v42  ;;  %12925 = vmatprep.subr.bf16.mxu1 %v16201_v39  ;;  %v16320_v58 = vcombine.low %v820_v41, %v824_v42 }
  0xdb   : > { %v952_v44 = vld [vmem:[%s18208_s22 + $0x15e0] sm:$0xff]  ;;  %12926 = vmatpush2.bf16.msra.mxu1 %v16200_v49 }
  0xdc   : > { %v16449_v51 = vcombine.high %v948_v43, %v952_v44  ;;  %v812_v52 = vld [vmem:[%s18208_s22 + $0x1180] sm:$0xff]  ;;  %12936 = vmatprep.subr.bf16.mxu0 %v16321_v50  ;;  %v16448_v59 = vcombine.low %v948_v43, %v952_v44  ;;  %12887 = vmatmul.mubr.bf16.vlgmr.msra.gmra.mxu0 %v18414_v48 }
  0xdd   : > { %v816_v53 = vld [vmem:[%s18208_s22 + $0x11a0] sm:$0xff]  ;;  %12937 = vmatpush1.bf16.msra.mxu0 %v16320_v58  ;;  %12968 = vmatprep.mubr.bf16.mxu0 %v18421_v57 }
  0xde   : > { %v940_v55 = vld [vmem:[%s18208_s22 + $0x1580] sm:$0xff]  ;;  %v16313_v61 = vcombine.high %v812_v52, %v816_v53  ;;  %12977 = vmatprep.subr.bf16.mxu1 %v16449_v51  ;;  %12928 = vmatmul.mubr.bf16.vlgmr.msra.gmra.mxu1 %v18425_v12  ;;  %v16312_v5 = vcombine.low %v812_v52, %v816_v53 }
  0xdf   : > { %v944_v56 = vld [vmem:[%s18208_s22 + $0x15a0] sm:$0xff]  ;;  %12978 = vmatpush1.bf16.msra.mxu1 %v16448_v59  ;;  %13009 = vmatprep.mubr.bf16.mxu1 %v18434_v4 }
  0xe0   : > { %v16441_v62 = vcombine.high %v940_v55, %v944_v56  ;;  %v804_v63 = vld [vmem:[%s18208_s22 + $0x1140] sm:$0xff]  ;;  %12938 = vmatprep.subr.bf16.mxu0 %v16313_v61  ;;  %v16440_v6 = vcombine.low %v940_v55, %v944_v56 }
  0xe1   : > { %v808_v1 = vld [vmem:[%s18208_s22 + $0x1160] sm:$0xff]  ;;  %12939 = vmatpush1.bf16.msra.mxu0 %v16312_v5 }
  0xe2   : > { %v932_v2 = vld [vmem:[%s18208_s22 + $0x1540] sm:$0xff]  ;;  %v16305_v7 = vcombine.high %v804_v63, %v808_v1  ;;  %12979 = vmatprep.subr.bf16.mxu1 %v16441_v62  ;;  %v16304_v15 = vcombine.low %v804_v63, %v808_v1 }
  0xe3   : > { %v936_v3 = vld [vmem:[%s18208_s22 + $0x1560] sm:$0xff]  ;;  %12980 = vmatpush1.bf16.msra.mxu1 %v16440_v6 }
  0xe4   : > { %v16433_v8 = vcombine.high %v932_v2, %v936_v3  ;;  %v796_v9 = vld [vmem:[%s18208_s22 + $0x1100] sm:$0xff]  ;;  %12940 = vmatprep.subr.bf16.mxu0 %v16305_v7  ;;  %v16432_v16 = vcombine.low %v932_v2, %v936_v3 }
  0xe5   : > { %v800_v11 = vld [vmem:[%s18208_s22 + $0x1120] sm:$0xff]  ;;  %12941 = vmatpush1.bf16.msra.mxu0 %v16304_v15 }
  0xe6   : > { %v924_v60 = vld [vmem:[%s18208_s22 + $0x1500] sm:$0xff]  ;;  %v16297_v17 = vcombine.high %v796_v9, %v800_v11  ;;  %12981 = vmatprep.subr.bf16.mxu1 %v16433_v8  ;;  %v16296_v24 = vcombine.low %v796_v9, %v800_v11 }
  0xe7   : > { %v928_v13 = vld [vmem:[%s18208_s22 + $0x1520] sm:$0xff]  ;;  %12982 = vmatpush1.bf16.msra.mxu1 %v16432_v16 }
  0xe8   : > { %v16425_v18 = vcombine.high %v924_v60, %v928_v13  ;;  %v788_v19 = vld [vmem:[%s18208_s22 + $0x10c0] sm:$0xff]  ;;  %12942 = vmatprep.subr.bf16.mxu0 %v16297_v17  ;;  %v16424_v25 = vcombine.low %v924_v60, %v928_v13 }
  0xe9   : > { %v792_v20 = vld [vmem:[%s18208_s22 + $0x10e0] sm:$0xff]  ;;  %12943 = vmatpush1.bf16.msra.mxu0 %v16296_v24 }
  0xea   : > { %v916_v21 = vld [vmem:[%s18208_s22 + $0x14c0] sm:$0xff]  ;;  %v16289_v27 = vcombine.high %v788_v19, %v792_v20  ;;  %12983 = vmatprep.subr.bf16.mxu1 %v16425_v18  ;;  %v16288_v34 = vcombine.low %v788_v19, %v792_v20 }
  0xeb   : > { %v920_v22 = vld [vmem:[%s18208_s22 + $0x14e0] sm:$0xff]  ;;  %12984 = vmatpush1.bf16.msra.mxu1 %v16424_v25 }
  0xec   : > { %v16417_v28 = vcombine.high %v916_v21, %v920_v22  ;;  %v780_v29 = vld [vmem:[%s18208_s22 + $0x1080] sm:$0xff]  ;;  %12944 = vmatprep.subr.bf16.mxu0 %v16289_v27  ;;  %v16416_v36 = vcombine.low %v916_v21, %v920_v22 }
  0xed   : > { %v784_v30 = vld [vmem:[%s18208_s22 + $0x10a0] sm:$0xff]  ;;  %12945 = vmatpush1.bf16.msra.mxu0 %v16288_v34 }
  0xee   : > { %v908_v32 = vld [vmem:[%s18208_s22 + $0x1480] sm:$0xff]  ;;  %v16281_v37 = vcombine.high %v780_v29, %v784_v30  ;;  %12985 = vmatprep.subr.bf16.mxu1 %v16417_v28  ;;  %v16280_v44 = vcombine.low %v780_v29, %v784_v30 }
  0xef   : > { %v912_v33 = vld [vmem:[%s18208_s22 + $0x14a0] sm:$0xff]  ;;  %12986 = vmatpush1.bf16.msra.mxu1 %v16416_v36 }
  0xf0   : > { %v16409_v38 = vcombine.high %v908_v32, %v912_v33  ;;  %v772_v39 = vld [vmem:[%s18208_s22 + $0x1040] sm:$0xff]  ;;  %12946 = vmatprep.subr.bf16.mxu0 %v16281_v37  ;;  %v16408_v46 = vcombine.low %v908_v32, %v912_v33 }
  0xf1   : > { %v776_v41 = vld [vmem:[%s18208_s22 + $0x1060] sm:$0xff]  ;;  %12947 = vmatpush1.bf16.msra.mxu0 %v16280_v44 }
  0xf2   : > { %v900_v42 = vld [vmem:[%s18208_s22 + $0x1440] sm:$0xff]  ;;  %v16273_v47 = vcombine.high %v772_v39, %v776_v41  ;;  %12987 = vmatprep.subr.bf16.mxu1 %v16409_v38  ;;  %v16272_v55 = vcombine.low %v772_v39, %v776_v41 }
  0xf3   : > { %v904_v43 = vld [vmem:[%s18208_s22 + $0x1460] sm:$0xff]  ;;  %12988 = vmatpush1.bf16.msra.mxu1 %v16408_v46 }
  0xf4   : > { %v16401_v49 = vcombine.high %v900_v42, %v904_v43  ;;  %v764_v50 = vld [vmem:[%s18208_s22 + $0x1000] sm:$0xff]  ;;  %12948 = vmatprep.subr.bf16.mxu0 %v16273_v47  ;;  %v16400_v56 = vcombine.low %v900_v42, %v904_v43 }
  0xf5   : > { %v768_v51 = vld [vmem:[%s18208_s22 + $0x1020] sm:$0xff]  ;;  %12949 = vmatpush1.bf16.msra.mxu0 %v16272_v55 }
  0xf6   : > { %v892_v52 = vld [vmem:[%s18208_s22 + $0x1400] sm:$0xff]  ;;  %v16265_v58 = vcombine.high %v764_v50, %v768_v51  ;;  %12989 = vmatprep.subr.bf16.mxu1 %v16401_v49  ;;  %v16264_v2 = vcombine.low %v764_v50, %v768_v51 }
  0xf7   : > { %v896_v53 = vld [vmem:[%s18208_s22 + $0x1420] sm:$0xff]  ;;  %12990 = vmatpush1.bf16.msra.mxu1 %v16400_v56 }
  0xf8   : > { %v16393_v59 = vcombine.high %v892_v52, %v896_v53  ;;  %v884_v61 = vld [vmem:[%s18208_s22 + $0x13c0] sm:$0xff]  ;;  %12950 = vmatprep.subr.bf16.mxu0 %v16265_v58  ;;  %v16392_v3 = vcombine.low %v892_v52, %v896_v53 }
  0xf9   : > { %v888_v62 = vld [vmem:[%s18208_s22 + $0x13e0] sm:$0xff]  ;;  %12951 = vmatpush1.bf16.msra.mxu0 %v16264_v2 }
  0xfa   : > { %v1012_v63 = vld [vmem:[%s18208_s22 + $0x17c0] sm:$0xff]  ;;  %v16385_v5 = vcombine.high %v884_v61, %v888_v62  ;;  %12991 = vmatprep.subr.bf16.mxu1 %v16393_v59  ;;  %v16384_v60 = vcombine.low %v884_v61, %v888_v62 }
  0xfb   : > { %v1016_v1 = vld [vmem:[%s18208_s22 + $0x17e0] sm:$0xff]  ;;  %12992 = vmatpush1.bf16.msra.mxu1 %v16392_v3 }
  0xfc   : > { %v16513_v6 = vcombine.high %v1012_v63, %v1016_v1  ;;  %v876_v7 = vld [vmem:[%s18208_s22 + $0x1380] sm:$0xff]  ;;  %12952 = vmatprep.subr.bf16.mxu0 %v16385_v5  ;;  %v16512_v13 = vcombine.low %v1012_v63, %v1016_v1  ;;  %v2353_v63 = vcombine.high %v18396_v26, %v18396_v26 }
  0xfd   : > { %v880_v8 = vld [vmem:[%s18208_s22 + $0x13a0] sm:$0xff]  ;;  %12953 = vmatpush2.bf16.msra.mxu0 %v16384_v60 }
  0xfe   : > { %v1004_v9 = vld [vmem:[%s18208_s22 + $0x1780] sm:$0xff]  ;;  %v16377_v15 = vcombine.high %v876_v7, %v880_v8  ;;  %12993 = vmatprep.subr.bf16.mxu1 %v16513_v6  ;;  %v16376_v21 = vcombine.low %v876_v7, %v880_v8 }
  0xff   : > { %v1008_v11 = vld [vmem:[%s18208_s22 + $0x17a0] sm:$0xff]  ;;  %12994 = vmatpush2.bf16.msra.mxu1 %v16512_v13 }
 0x100   : > { %v16505_v16 = vcombine.high %v1004_v9, %v1008_v11  ;;  %v868_v17 = vld [vmem:[%s18208_s22 + $0x1340] sm:$0xff]  ;;  %12954 = vmatprep.subr.bf16.mxu0 %v16377_v15  ;;  %v16504_v22 = vcombine.low %v1004_v9, %v1008_v11  ;;  %v18494_v11 = vrot.slane %v2353_v63, %v18249_v54 }
 0x101   : > { %v872_v18 = vld [vmem:[%s18208_s22 + $0x1360] sm:$0xff]  ;;  %12955 = vmatpush2.bf16.msra.mxu0 %v16376_v21 }
 0x102   : > { %v996_v19 = vld [vmem:[%s18208_s22 + $0x1740] sm:$0xff]  ;;  %v16369_v24 = vcombine.high %v868_v17, %v872_v18  ;;  %12995 = vmatprep.subr.bf16.mxu1 %v16505_v16  ;;  %v16368_v32 = vcombine.low %v868_v17, %v872_v18 }
 0x103   : > { %v1000_v20 = vld [vmem:[%s18208_s22 + $0x1760] sm:$0xff]  ;;  %12996 = vmatpush2.bf16.msra.mxu1 %v16504_v22  ;;  %v18504_v22 = vrot.slane %v18404_v35, %v18249_v54 }
 0x104   : > { %v16497_v25 = vcombine.high %v996_v19, %v1000_v20  ;;  %v860_v27 = vld [vmem:[%s18208_s22 + $0x1300] sm:$0xff]  ;;  %12956 = vmatprep.subr.bf16.mxu0 %v16369_v24  ;;  %v16496_v33 = vcombine.low %v996_v19, %v1000_v20  ;;  %v2369_v20 = vcombine.high %v18494_v11, %v18494_v11 }
 0x105   : > { %v864_v28 = vld [vmem:[%s18208_s22 + $0x1320] sm:$0xff]  ;;  %12957 = vmatpush2.bf16.msra.mxu0 %v16368_v32  ;;  %v18515_v35 = vcombine.high %v18504_v22, %v18504_v22 }
 0x106   : > { %v988_v29 = vld [vmem:[%s18208_s22 + $0x1700] sm:$0xff]  ;;  %v16361_v34 = vcombine.high %v860_v27, %v864_v28  ;;  %12997 = vmatprep.subr.bf16.mxu1 %v16497_v25  ;;  %v16360_v42 = vcombine.low %v860_v27, %v864_v28 }
 0x107   : > { %v992_v30 = vld [vmem:[%s18208_s22 + $0x1720] sm:$0xff]  ;;  %12998 = vmatpush2.bf16.msra.mxu1 %v16496_v33  ;;  %v18511_v33 = vrot.slane %v2369_v20, %v18249_v54 }
 0x108   : > { %v16489_v36 = vcombine.high %v988_v29, %v992_v30  ;;  %v852_v37 = vld [vmem:[%s18208_s22 + $0x12c0] sm:$0xff]  ;;  %12958 = vmatprep.subr.bf16.mxu0 %v16361_v34  ;;  %v16488_v43 = vcombine.low %v988_v29, %v992_v30 }
 0x109   : > { %v856_v38 = vld [vmem:[%s18208_s22 + $0x12e0] sm:$0xff]  ;;  %12959 = vmatpush2.bf16.msra.mxu0 %v16360_v42 }
 0x10a   : > { %v980_v39 = vld [vmem:[%s18208_s22 + $0x16c0] sm:$0xff]  ;;  %v16353_v44 = vcombine.high %v852_v37, %v856_v38  ;;  %12999 = vmatprep.subr.bf16.mxu1 %v16489_v36  ;;  %v16352_v52 = vcombine.low %v852_v37, %v856_v38 }
 0x10b   : > { %v984_v41 = vld [vmem:[%s18208_s22 + $0x16e0] sm:$0xff]  ;;  %13000 = vmatpush2.bf16.msra.mxu1 %v16488_v43 }
 0x10c   : > { %v16481_v46 = vcombine.high %v980_v39, %v984_v41  ;;  %v844_v47 = vld [vmem:[%s18208_s22 + $0x1280] sm:$0xff]  ;;  %12960 = vmatprep.subr.bf16.mxu0 %v16353_v44  ;;  %v16480_v53 = vcombine.low %v980_v39, %v984_v41  ;;  %v18524_v44 = vcombine.high %v18511_v33, %v18511_v33 }
 0x10d   : > { %v848_v49 = vld [vmem:[%s18208_s22 + $0x12a0] sm:$0xff]  ;;  %12961 = vmatpush2.bf16.msra.mxu0 %v16352_v52 }
 0x10e   : > { %v972_v50 = vld [vmem:[%s18208_s22 + $0x1680] sm:$0xff]  ;;  %v16345_v55 = vcombine.high %v844_v47, %v848_v49  ;;  %13001 = vmatprep.subr.bf16.mxu1 %v16481_v46  ;;  %v16344_v1 = vcombine.low %v844_v47, %v848_v49 }
 0x10f   : > { %v976_v51 = vld [vmem:[%s18208_s22 + $0x16a0] sm:$0xff]  ;;  %13002 = vmatpush2.bf16.msra.mxu1 %v16480_v53 }
 0x110   : > { %v16473_v56 = vcombine.high %v972_v50, %v976_v51  ;;  %v836_v58 = vld [vmem:[%s18208_s22 + $0x1240] sm:$0xff]  ;;  %12962 = vmatprep.subr.bf16.mxu0 %v16345_v55  ;;  %v16472_v2 = vcombine.low %v972_v50, %v976_v51 }
 0x111   : > { %v840_v59 = vld [vmem:[%s18208_s22 + $0x1260] sm:$0xff]  ;;  %12963 = vmatpush2.bf16.msra.mxu0 %v16344_v1 }
 0x112   : > { %v964_v61 = vld [vmem:[%s18208_s22 + $0x1640] sm:$0xff]  ;;  %v16337_v3 = vcombine.high %v836_v58, %v840_v59  ;;  %13003 = vmatprep.subr.bf16.mxu1 %v16473_v56  ;;  %v16336_v26 = vcombine.low %v836_v58, %v840_v59 }
 0x113   : > { %v968_v62 = vld [vmem:[%s18208_s22 + $0x1660] sm:$0xff]  ;;  %13004 = vmatpush2.bf16.msra.mxu1 %v16472_v2 }
 0x114   : > { %v16465_v5 = vcombine.high %v964_v61, %v968_v62  ;;  %v828_v6 = vld [vmem:[%s18208_s22 + $0x1200] sm:$0xff]  ;;  %12964 = vmatprep.subr.bf16.mxu0 %v16337_v3  ;;  %v16464_v60 = vcombine.low %v964_v61, %v968_v62 }
 0x115   : > { %v832_v7 = vld [vmem:[%s18208_s22 + $0x1220] sm:$0xff]  ;;  %12965 = vmatpush2.bf16.msra.mxu0 %v16336_v26 }
 0x116   : > { %v956_v8 = vld [vmem:[%s18208_s22 + $0x1600] sm:$0xff]  ;;  %v16329_v13 = vcombine.high %v828_v6, %v832_v7  ;;  %13005 = vmatprep.subr.bf16.mxu1 %v16465_v5  ;;  %v16328_v21 = vcombine.low %v828_v6, %v832_v7 }
 0x117   : > { %v960_v9 = vld [vmem:[%s18208_s22 + $0x1620] sm:$0xff]  ;;  %13006 = vmatpush2.bf16.msra.mxu1 %v16464_v60 }
 0x118   : > { %v16457_v15 = vcombine.high %v956_v8, %v960_v9  ;;  %v1076_v16 = vld [vmem:[%s18208_s22 + $0x19c0] sm:$0xff]  ;;  %12966 = vmatprep.subr.bf16.mxu0 %v16329_v13  ;;  %v16456_v24 = vcombine.low %v956_v8, %v960_v9 }
 0x119   : > { %v1080_v17 = vld [vmem:[%s18208_s22 + $0x19e0] sm:$0xff]  ;;  %12967 = vmatpush2.bf16.msra.mxu0 %v16328_v21 }
 0x11a   : > { %v1204_v18 = vld [vmem:[%s18208_s22 + $0x1dc0] sm:$0xff]  ;;  %v16577_v25 = vcombine.high %v1076_v16, %v1080_v17  ;;  %13007 = vmatprep.subr.bf16.mxu1 %v16457_v15  ;;  %v16576_v34 = vcombine.low %v1076_v16, %v1080_v17 }
 0x11b   : > { %v1208_v19 = vld [vmem:[%s18208_s22 + $0x1de0] sm:$0xff]  ;;  %13008 = vmatpush2.bf16.msra.mxu1 %v16456_v24 }
 0x11c   : > { %v16705_v27 = vcombine.high %v1204_v18, %v1208_v19  ;;  %v1068_v28 = vld [vmem:[%s18208_s22 + $0x1980] sm:$0xff]  ;;  %13018 = vmatprep.subr.bf16.mxu0 %v16577_v25  ;;  %v16704_v36 = vcombine.low %v1204_v18, %v1208_v19  ;;  %12969 = vmatmul.mubr.bf16.vlgmr.msra.gmra.mxu0 %v18504_v22 }
 0x11d   : > { %v1072_v29 = vld [vmem:[%s18208_s22 + $0x19a0] sm:$0xff]  ;;  %13019 = vmatpush1.bf16.msra.mxu0 %v16576_v34  ;;  %13050 = vmatprep.mubr.bf16.mxu0 %v18511_v33 }
 0x11e   : > { %v1196_v30 = vld [vmem:[%s18208_s22 + $0x1d80] sm:$0xff]  ;;  %v16569_v37 = vcombine.high %v1068_v28, %v1072_v29  ;;  %13059 = vmatprep.subr.bf16.mxu1 %v16705_v27  ;;  %13010 = vmatmul.mubr.bf16.vlgmr.msra.gmra.mxu1 %v18515_v35  ;;  %v16568_v46 = vcombine.low %v1068_v28, %v1072_v29 }
 0x11f   : > { %v1200_v32 = vld [vmem:[%s18208_s22 + $0x1da0] sm:$0xff]  ;;  %13060 = vmatpush1.bf16.msra.mxu1 %v16704_v36  ;;  %13091 = vmatprep.mubr.bf16.mxu1 %v18524_v44 }
 0x120   : > { %v16697_v38 = vcombine.high %v1196_v30, %v1200_v32  ;;  %v1060_v39 = vld [vmem:[%s18208_s22 + $0x1940] sm:$0xff]  ;;  %13020 = vmatprep.subr.bf16.mxu0 %v16569_v37  ;;  %v16696_v47 = vcombine.low %v1196_v30, %v1200_v32 }
 0x121   : > { %v1064_v41 = vld [vmem:[%s18208_s22 + $0x1960] sm:$0xff]  ;;  %13021 = vmatpush1.bf16.msra.mxu0 %v16568_v46 }
 0x122   : > { %v1188_v42 = vld [vmem:[%s18208_s22 + $0x1d40] sm:$0xff]  ;;  %v16561_v49 = vcombine.high %v1060_v39, %v1064_v41  ;;  %13061 = vmatprep.subr.bf16.mxu1 %v16697_v38  ;;  %v16560_v56 = vcombine.low %v1060_v39, %v1064_v41 }
 0x123   : > { %v1192_v43 = vld [vmem:[%s18208_s22 + $0x1d60] sm:$0xff]  ;;  %13062 = vmatpush1.bf16.msra.mxu1 %v16696_v47 }
 0x124   : > { %v16689_v50 = vcombine.high %v1188_v42, %v1192_v43  ;;  %v1052_v51 = vld [vmem:[%s18208_s22 + $0x1900] sm:$0xff]  ;;  %13022 = vmatprep.subr.bf16.mxu0 %v16561_v49  ;;  %v16688_v58 = vcombine.low %v1188_v42, %v1192_v43 }
 0x125   : > { %v1056_v52 = vld [vmem:[%s18208_s22 + $0x1920] sm:$0xff]  ;;  %13023 = vmatpush1.bf16.msra.mxu0 %v16560_v56 }
 0x126   : > { %v1180_v53 = vld [vmem:[%s18208_s22 + $0x1d00] sm:$0xff]  ;;  %v16553_v59 = vcombine.high %v1052_v51, %v1056_v52  ;;  %13063 = vmatprep.subr.bf16.mxu1 %v16689_v50  ;;  %v16552_v3 = vcombine.low %v1052_v51, %v1056_v52 }
 0x127   : > { %v1184_v55 = vld [vmem:[%s18208_s22 + $0x1d20] sm:$0xff]  ;;  %13064 = vmatpush1.bf16.msra.mxu1 %v16688_v58 }
 0x128   : > { %v16681_v61 = vcombine.high %v1180_v53, %v1184_v55  ;;  %v1044_v62 = vld [vmem:[%s18208_s22 + $0x18c0] sm:$0xff]  ;;  %13024 = vmatprep.subr.bf16.mxu0 %v16553_v59  ;;  %v16680_v5 = vcombine.low %v1180_v53, %v1184_v55 }
 0x129   : > { %v1048_v63 = vld [vmem:[%s18208_s22 + $0x18e0] sm:$0xff]  ;;  %13025 = vmatpush1.bf16.msra.mxu0 %v16552_v3 }
 0x12a   : > { %v1172_v1 = vld [vmem:[%s18208_s22 + $0x1cc0] sm:$0xff]  ;;  %v16545_v6 = vcombine.high %v1044_v62, %v1048_v63  ;;  %13065 = vmatprep.subr.bf16.mxu1 %v16681_v61  ;;  %v16544_v13 = vcombine.low %v1044_v62, %v1048_v63 }
 0x12b   : > { %v1176_v2 = vld [vmem:[%s18208_s22 + $0x1ce0] sm:$0xff]  ;;  %13066 = vmatpush1.bf16.msra.mxu1 %v16680_v5 }
 0x12c   : > { %v16673_v7 = vcombine.high %v1172_v1, %v1176_v2  ;;  %v1036_v8 = vld [vmem:[%s18208_s22 + $0x1880] sm:$0xff]  ;;  %13026 = vmatprep.subr.bf16.mxu0 %v16545_v6  ;;  %v16672_v15 = vcombine.low %v1172_v1, %v1176_v2 }
 0x12d   : > { %v1040_v9 = vld [vmem:[%s18208_s22 + $0x18a0] sm:$0xff]  ;;  %13027 = vmatpush1.bf16.msra.mxu0 %v16544_v13 }
 0x12e   : > { %v1164_v26 = vld [vmem:[%s18208_s22 + $0x1c80] sm:$0xff]  ;;  %v16537_v16 = vcombine.high %v1036_v8, %v1040_v9  ;;  %13067 = vmatprep.subr.bf16.mxu1 %v16673_v7  ;;  %v16536_v24 = vcombine.low %v1036_v8, %v1040_v9 }
 0x12f   : > { %v1168_v60 = vld [vmem:[%s18208_s22 + $0x1ca0] sm:$0xff]  ;;  %13068 = vmatpush1.bf16.msra.mxu1 %v16672_v15 }
 0x130   : > { %v16665_v17 = vcombine.high %v1164_v26, %v1168_v60  ;;  %v1028_v18 = vld [vmem:[%s18208_s22 + $0x1840] sm:$0xff]  ;;  %13028 = vmatprep.subr.bf16.mxu0 %v16537_v16  ;;  %v16664_v25 = vcombine.low %v1164_v26, %v1168_v60 }
 0x131   : > { %v1032_v19 = vld [vmem:[%s18208_s22 + $0x1860] sm:$0xff]  ;;  %13029 = vmatpush1.bf16.msra.mxu0 %v16536_v24 }
 0x132   : > { %v1156_v20 = vld [vmem:[%s18208_s22 + $0x1c40] sm:$0xff]  ;;  %v16529_v27 = vcombine.high %v1028_v18, %v1032_v19  ;;  %13069 = vmatprep.subr.bf16.mxu1 %v16665_v17  ;;  %v16528_v36 = vcombine.low %v1028_v18, %v1032_v19 }
 0x133   : > { %v1160_v21 = vld [vmem:[%s18208_s22 + $0x1c60] sm:$0xff]  ;;  %13070 = vmatpush1.bf16.msra.mxu1 %v16664_v25 }
 0x134   : > { %v16657_v28 = vcombine.high %v1156_v20, %v1160_v21  ;;  %v1020_v29 = vld [vmem:[%s18208_s22 + $0x1800] sm:$0xff]  ;;  %13030 = vmatprep.subr.bf16.mxu0 %v16529_v27  ;;  %v16656_v37 = vcombine.low %v1156_v20, %v1160_v21 }
 0x135   : > { %v1024_v30 = vld [vmem:[%s18208_s22 + $0x1820] sm:$0xff]  ;;  %13031 = vmatpush1.bf16.msra.mxu0 %v16528_v36 }
 0x136   : > { %v1148_v32 = vld [vmem:[%s18208_s22 + $0x1c00] sm:$0xff]  ;;  %v16521_v38 = vcombine.high %v1020_v29, %v1024_v30  ;;  %13071 = vmatprep.subr.bf16.mxu1 %v16657_v28  ;;  %v16520_v47 = vcombine.low %v1020_v29, %v1024_v30 }
 0x137   : > { %v1152_v34 = vld [vmem:[%s18208_s22 + $0x1c20] sm:$0xff]  ;;  %13072 = vmatpush1.bf16.msra.mxu1 %v16656_v37 }
 0x138   : > { %v16649_v39 = vcombine.high %v1148_v32, %v1152_v34  ;;  %v1140_v41 = vld [vmem:[%s18208_s22 + $0x1bc0] sm:$0xff]  ;;  %13032 = vmatprep.subr.bf16.mxu0 %v16521_v38  ;;  %v16648_v49 = vcombine.low %v1148_v32, %v1152_v34 }
 0x139   : > { %v1144_v42 = vld [vmem:[%s18208_s22 + $0x1be0] sm:$0xff]  ;;  %13033 = vmatpush1.bf16.msra.mxu0 %v16520_v47 }
 0x13a   : > { %v1268_v43 = vld [vmem:[%s18208_s22 + $0x1fc0] sm:$0xff]  ;;  %v16641_v50 = vcombine.high %v1140_v41, %v1144_v42  ;;  %13073 = vmatprep.subr.bf16.mxu1 %v16649_v39  ;;  %v16640_v58 = vcombine.low %v1140_v41, %v1144_v42 }
 0x13b   : > { %v1272_v46 = vld [vmem:[%s18208_s22 + $0x1fe0] sm:$0xff]  ;;  %13074 = vmatpush1.bf16.msra.mxu1 %v16648_v49 }
 0x13c   : > { %v16769_v51 = vcombine.high %v1268_v43, %v1272_v46  ;;  %v1132_v52 = vld [vmem:[%s18208_s22 + $0x1b80] sm:$0xff]  ;;  %13034 = vmatprep.subr.bf16.mxu0 %v16641_v50  ;;  %v16768_v59 = vcombine.low %v1268_v43, %v1272_v46 }
 0x13d   : > { %v1136_v53 = vld [vmem:[%s18208_s22 + $0x1ba0] sm:$0xff]  ;;  %13035 = vmatpush2.bf16.msra.mxu0 %v16640_v58 }
 0x13e   : > { %v1260_v55 = vld [vmem:[%s18208_s22 + $0x1f80] sm:$0xff]  ;;  %v16633_v61 = vcombine.high %v1132_v52, %v1136_v53  ;;  %13075 = vmatprep.subr.bf16.mxu1 %v16769_v51  ;;  %v16632_v5 = vcombine.low %v1132_v52, %v1136_v53 }
 0x13f   : > { %v1264_v56 = vld [vmem:[%s18208_s22 + $0x1fa0] sm:$0xff]  ;;  %13076 = vmatpush2.bf16.msra.mxu1 %v16768_v59 }
 0x140   : > { %v16761_v62 = vcombine.high %v1260_v55, %v1264_v56  ;;  %v1124_v63 = vld [vmem:[%s18208_s22 + $0x1b40] sm:$0xff]  ;;  %13036 = vmatprep.subr.bf16.mxu0 %v16633_v61  ;;  %v16760_v6 = vcombine.low %v1260_v55, %v1264_v56 }
 0x141   : > { %v1128_v1 = vld [vmem:[%s18208_s22 + $0x1b60] sm:$0xff]  ;;  %13037 = vmatpush2.bf16.msra.mxu0 %v16632_v5 }
 0x142   : > { %v1252_v2 = vld [vmem:[%s18208_s22 + $0x1f40] sm:$0xff]  ;;  %v16625_v7 = vcombine.high %v1124_v63, %v1128_v1  ;;  %13077 = vmatprep.subr.bf16.mxu1 %v16761_v62  ;;  %v16624_v15 = vcombine.low %v1124_v63, %v1128_v1 }
 0x143   : > { %v1256_v3 = vld [vmem:[%s18208_s22 + $0x1f60] sm:$0xff]  ;;  %13078 = vmatpush2.bf16.msra.mxu1 %v16760_v6 }
 0x144   : > { %v16753_v8 = vcombine.high %v1252_v2, %v1256_v3  ;;  %v1116_v9 = vld [vmem:[%s18208_s22 + $0x1b00] sm:$0xff]  ;;  %13038 = vmatprep.subr.bf16.mxu0 %v16625_v7  ;;  %v16752_v16 = vcombine.low %v1252_v2, %v1256_v3 }
 0x145   : > { %v1120_v26 = vld [vmem:[%s18208_s22 + $0x1b20] sm:$0xff]  ;;  %13039 = vmatpush2.bf16.msra.mxu0 %v16624_v15 }
 0x146   : > { %v1244_v60 = vld [vmem:[%s18208_s22 + $0x1f00] sm:$0xff]  ;;  %v16617_v17 = vcombine.high %v1116_v9, %v1120_v26  ;;  %13079 = vmatprep.subr.bf16.mxu1 %v16753_v8  ;;  %v16616_v25 = vcombine.low %v1116_v9, %v1120_v26  ;;  %v18596_v26 = vrot.slane %v18494_v11, %v18249_v54 }
 0x147   : > { %v1248_v13 = vld [vmem:[%s18208_s22 + $0x1f20] sm:$0xff]  ;;  %13080 = vmatpush2.bf16.msra.mxu1 %v16752_v16 }
 0x148   : > { %v16745_v18 = vcombine.high %v1244_v60, %v1248_v13  ;;  %v1108_v19 = vld [vmem:[%s18208_s22 + $0x1ac0] sm:$0xff]  ;;  %13040 = vmatprep.subr.bf16.mxu0 %v16617_v17  ;;  %v16744_v27 = vcombine.low %v1244_v60, %v1248_v13  ;;  %v18607_v11 = vcombine.high %v18596_v26, %v18596_v26 }
 0x149   : > { %v1112_v20 = vld [vmem:[%s18208_s22 + $0x1ae0] sm:$0xff]  ;;  %13041 = vmatpush2.bf16.msra.mxu0 %v16616_v25 }
 0x14a   : > { %v1236_v21 = vld [vmem:[%s18208_s22 + $0x1ec0] sm:$0xff]  ;;  %v16609_v28 = vcombine.high %v1108_v19, %v1112_v20  ;;  %13081 = vmatprep.subr.bf16.mxu1 %v16745_v18  ;;  %v16608_v37 = vcombine.low %v1108_v19, %v1112_v20 }
 0x14b   : > { %v1240_v24 = vld [vmem:[%s18208_s22 + $0x1ee0] sm:$0xff]  ;;  %13082 = vmatpush2.bf16.msra.mxu1 %v16744_v27 }
 0x14c   : > { %v16737_v29 = vcombine.high %v1236_v21, %v1240_v24  ;;  %v1100_v30 = vld [vmem:[%s18208_s22 + $0x1a80] sm:$0xff]  ;;  %13042 = vmatprep.subr.bf16.mxu0 %v16609_v28  ;;  %v16736_v38 = vcombine.low %v1236_v21, %v1240_v24 }
 0x14d   : > { %v1104_v32 = vld [vmem:[%s18208_s22 + $0x1aa0] sm:$0xff]  ;;  %13043 = vmatpush2.bf16.msra.mxu0 %v16608_v37 }
 0x14e   : > { %v1228_v34 = vld [vmem:[%s18208_s22 + $0x1e80] sm:$0xff]  ;;  %v16601_v39 = vcombine.high %v1100_v30, %v1104_v32  ;;  %13083 = vmatprep.subr.bf16.mxu1 %v16737_v29  ;;  %v16600_v49 = vcombine.low %v1100_v30, %v1104_v32 }
 0x14f   : > { %v1232_v36 = vld [vmem:[%s18208_s22 + $0x1ea0] sm:$0xff]  ;;  %13084 = vmatpush2.bf16.msra.mxu1 %v16736_v38 }
 0x150   : > { %v16729_v41 = vcombine.high %v1228_v34, %v1232_v36  ;;  %v1092_v42 = vld [vmem:[%s18208_s22 + $0x1a40] sm:$0xff]  ;;  %13044 = vmatprep.subr.bf16.mxu0 %v16601_v39  ;;  %v16728_v51 = vcombine.low %v1228_v34, %v1232_v36 }
 0x151   : > { %v1096_v43 = vld [vmem:[%s18208_s22 + $0x1a60] sm:$0xff]  ;;  %13045 = vmatpush2.bf16.msra.mxu0 %v16600_v49 }
 0x152   : > { %v1220_v46 = vld [vmem:[%s18208_s22 + $0x1e40] sm:$0xff]  ;;  %v16593_v52 = vcombine.high %v1092_v42, %v1096_v43  ;;  %13085 = vmatprep.subr.bf16.mxu1 %v16729_v41  ;;  %v16592_v62 = vcombine.low %v1092_v42, %v1096_v43 }
 0x153   : > { %v1224_v47 = vld [vmem:[%s18208_s22 + $0x1e60] sm:$0xff]  ;;  %13086 = vmatpush2.bf16.msra.mxu1 %v16728_v51 }
 0x154   : > { %v18578_v50 = vld [vmem:[%s18253_s25 + $0x10] sm:$0xff]  ;;  %v16721_v53 = vcombine.high %v1220_v46, %v1224_v47  ;;  %13046 = vmatprep.subr.bf16.mxu0 %v16593_v52  ;;  %v16720_v63 = vcombine.low %v1220_v46, %v1224_v47 }
 0x155   : > { %v1084_v55 = vld [vmem:[%s18208_s22 + $0x1a00] sm:$0xff]  ;;  %v18586_v61 = vrot.slane %v18578_v50, %v18249_v54  ;;  %13047 = vmatpush2.bf16.msra.mxu0 %v16592_v62 }
 0x156   : > { %v1088_v56 = vld [vmem:[%s18208_s22 + $0x1a20] sm:$0xff]  ;;  %13087 = vmatprep.subr.bf16.mxu1 %v16721_v53 }
 0x157   : > { %v1212_v58 = vld [vmem:[%s18208_s22 + $0x1e00] sm:$0xff]  ;;  %v16585_v1 = vcombine.high %v1084_v55, %v1088_v56  ;;  %v2417_v8 = vcombine.high %v18586_v61, %v18586_v61  ;;  %v16584_v9 = vcombine.low %v1084_v55, %v1088_v56  ;;  %13088 = vmatpush2.bf16.msra.mxu1 %v16720_v63 }
 0x158   : > { %v1216_v59 = vld [vmem:[%s18208_s22 + $0x1e20] sm:$0xff] }
 0x159   : > { %v16713_v2 = vcombine.high %v1212_v58, %v1216_v59  ;;  %v1332_v3 = vld [vmem:[%s18208_s22 + $0x21c0] sm:$0xff]  ;;  %13048 = vmatprep.subr.bf16.mxu0 %v16585_v1  ;;  %v16712_v60 = vcombine.low %v1212_v58, %v1216_v59  ;;  %v18603_v20 = vrot.slane %v2417_v8, %v18249_v54 }
 0x15a   : > { %v1336_v5 = vld [vmem:[%s18208_s22 + $0x21e0] sm:$0xff]  ;;  %13049 = vmatpush2.bf16.msra.mxu0 %v16584_v9 }
 0x15b   : > { %v1460_v6 = vld [vmem:[%s18208_s22 + $0x25c0] sm:$0xff]  ;;  %v16833_v13 = vcombine.high %v1332_v3, %v1336_v5  ;;  %13089 = vmatprep.subr.bf16.mxu1 %v16713_v2  ;;  %v16832_v21 = vcombine.low %v1332_v3, %v1336_v5  ;;  %v18616_v36 = vcombine.high %v18603_v20, %v18603_v20 }
 0x15c   : > { %v1464_v7 = vld [vmem:[%s18208_s22 + $0x25e0] sm:$0xff]  ;;  %13090 = vmatpush2.bf16.msra.mxu1 %v16712_v60  ;;  %v12806_v30 = vpop.f32.mrf.mxu0 }
 0x15d   : > { %v16961_v15 = vcombine.high %v1460_v6, %v1464_v7  ;;  %v1324_v16 = vld [vmem:[%s18208_s22 + $0x2180] sm:$0xff]  ;;  %13100 = vmatprep.subr.bf16.mxu0 %v16833_v13  ;;  %v16960_v24 = vcombine.low %v1460_v6, %v1464_v7  ;;  %13051 = vmatmul.mubr.bf16.vlgmr.msra.gmra.mxu0 %v18596_v26 }
 0x15e   : > { %v1328_v17 = vld [vmem:[%s18208_s22 + $0x21a0] sm:$0xff]  ;;  %v12847_v37 = vpop.f32.mrf.mxu1  ;;  %13101 = vmatpush1.bf16.msra.mxu0 %v16832_v21  ;;  %v12808_v41 = vpop.f32.mrf.mxu0  ;;  %13132 = vmatprep.mubr.bf16.mxu0 %v18603_v20 }
 0x15f   : > { %v1452_v18 = vld [vmem:[%s18208_s22 + $0x2580] sm:$0xff]  ;;  %v16825_v25 = vcombine.high %v1324_v16, %v1328_v17  ;;  %13141 = vmatprep.subr.bf16.mxu1 %v16961_v15  ;;  %13092 = vmatmul.mubr.bf16.vlgmr.msra.gmra.mxu1 %v18607_v11  ;;  %v16824_v38 = vcombine.low %v1324_v16, %v1328_v17  ;;  %v18619_v39 = vadd.f32 %v12847_v37, %v12806_v30 }
 0x160   : > { %v1456_v19 = vld [vmem:[%s18208_s22 + $0x25a0] sm:$0xff]  ;;  %13142 = vmatpush1.bf16.msra.mxu1 %v16960_v24  ;;  %v12849_v46 = vpop.f32.mrf.mxu1  ;;  %v12810_v53 = vpop.f32.mrf.mxu0  ;;  %13173 = vmatprep.mubr.bf16.mxu1 %v18616_v36 }
 0x161   : > { %v16953_v27 = vcombine.high %v1452_v18, %v1456_v19  ;;  %v1316_v28 = vld [vmem:[%s18208_s22 + $0x2140] sm:$0xff]  ;;  %13102 = vmatprep.subr.bf16.mxu0 %v16825_v25  ;;  %v16952_v42 = vcombine.low %v1452_v18, %v1456_v19  ;;  %v18624_v52 = vadd.f32 %v12849_v46, %v12808_v41 }
 0x162   : > { %v1320_v29 = vld [vmem:[%s18208_s22 + $0x2160] sm:$0xff]  ;;  %v12851_v58 = vpop.f32.mrf.mxu1  ;;  %13103 = vmatpush1.bf16.msra.mxu0 %v16824_v38  ;;  %v12811_v62 = vpop.f32.mrf.mxu0 }
 0x163   : > { %v1444_v32 = vld [vmem:[%s18208_s22 + $0x2540] sm:$0xff]  ;;  %v16817_v43 = vcombine.high %v1316_v28, %v1320_v29  ;;  %13143 = vmatprep.subr.bf16.mxu1 %v16953_v27  ;;  %v16816_v59 = vcombine.low %v1316_v28, %v1320_v29 }
 0x164   : > { %v1448_v34 = vld [vmem:[%s18208_s22 + $0x2560] sm:$0xff]  ;;  %13144 = vmatpush1.bf16.msra.mxu1 %v16952_v42  ;;  %v12852_v2 = vpop.f32.mrf.mxu1 }
 0x165   : > { %v16945_v47 = vcombine.high %v1444_v32, %v1448_v34  ;;  %v1308_v49 = vld [vmem:[%s18208_s22 + $0x2100] sm:$0xff]  ;;  %13104 = vmatprep.subr.bf16.mxu0 %v16817_v43  ;;  %v16944_v63 = vcombine.low %v1444_v32, %v1448_v34 }
 0x166   : > { %v1312_v51 = vld [vmem:[%s18208_s22 + $0x2120] sm:$0xff]  ;;  %13105 = vmatpush1.bf16.msra.mxu0 %v16816_v59 }
 0x167   : > { %v1436_v55 = vld [vmem:[%s18208_s22 + $0x2500] sm:$0xff]  ;;  %v16809_v1 = vcombine.high %v1308_v49, %v1312_v51  ;;  %13145 = vmatprep.subr.bf16.mxu1 %v16945_v47  ;;  %v16808_v9 = vcombine.low %v1308_v49, %v1312_v51 }
 0x168   : > { %v1440_v56 = vld [vmem:[%s18208_s22 + $0x2520] sm:$0xff]  ;;  %13146 = vmatpush1.bf16.msra.mxu1 %v16944_v63 }
 0x169   : > { %v16937_v3 = vcombine.high %v1436_v55, %v1440_v56  ;;  %v1300_v5 = vld [vmem:[%s18208_s22 + $0x20c0] sm:$0xff]  ;;  %13106 = vmatprep.subr.bf16.mxu0 %v16809_v1  ;;  %v16936_v60 = vcombine.low %v1436_v55, %v1440_v56 }
 0x16a   : > { %v1304_v6 = vld [vmem:[%s18208_s22 + $0x20e0] sm:$0xff]  ;;  %13107 = vmatpush1.bf16.msra.mxu0 %v16808_v9 }
 0x16b   : > { %v1428_v7 = vld [vmem:[%s18208_s22 + $0x24c0] sm:$0xff]  ;;  %v16801_v13 = vcombine.high %v1300_v5, %v1304_v6  ;;  %13147 = vmatprep.subr.bf16.mxu1 %v16937_v3  ;;  %v16800_v21 = vcombine.low %v1300_v5, %v1304_v6 }
 0x16c   : > { %v1432_v8 = vld [vmem:[%s18208_s22 + $0x24e0] sm:$0xff]  ;;  %13148 = vmatpush1.bf16.msra.mxu1 %v16936_v60 }
 0x16d   : > { %v16929_v15 = vcombine.high %v1428_v7, %v1432_v8  ;;  %v1292_v16 = vld [vmem:[%s18208_s22 + $0x2080] sm:$0xff]  ;;  %13108 = vmatprep.subr.bf16.mxu0 %v16801_v13  ;;  %v16928_v24 = vcombine.low %v1428_v7, %v1432_v8 }
 0x16e   : > { %v1296_v17 = vld [vmem:[%s18208_s22 + $0x20a0] sm:$0xff]  ;;  %13109 = vmatpush1.bf16.msra.mxu0 %v16800_v21 }
 0x16f   : > { %v1420_v18 = vld [vmem:[%s18208_s22 + $0x2480] sm:$0xff]  ;;  %v16793_v25 = vcombine.high %v1292_v16, %v1296_v17  ;;  %13149 = vmatprep.subr.bf16.mxu1 %v16929_v15  ;;  %v16792_v34 = vcombine.low %v1292_v16, %v1296_v17 }
 0x170   : > { %v1424_v19 = vld [vmem:[%s18208_s22 + $0x24a0] sm:$0xff]  ;;  %13150 = vmatpush1.bf16.msra.mxu1 %v16928_v24 }
 0x171   : > { %v16921_v27 = vcombine.high %v1420_v18, %v1424_v19  ;;  %v1284_v28 = vld [vmem:[%s18208_s22 + $0x2040] sm:$0xff]  ;;  %13110 = vmatprep.subr.bf16.mxu0 %v16793_v25  ;;  %v16920_v37 = vcombine.low %v1420_v18, %v1424_v19 }
 0x172   : > { %v1288_v29 = vld [vmem:[%s18208_s22 + $0x2060] sm:$0xff]  ;;  %13111 = vmatpush1.bf16.msra.mxu0 %v16792_v34 }
 0x173   : > { %v1412_v30 = vld [vmem:[%s18208_s22 + $0x2440] sm:$0xff]  ;;  %v16785_v38 = vcombine.high %v1284_v28, %v1288_v29  ;;  %13151 = vmatprep.subr.bf16.mxu1 %v16921_v27  ;;  %v16784_v49 = vcombine.low %v1284_v28, %v1288_v29 }
 0x174   : > { %v1416_v32 = vld [vmem:[%s18208_s22 + $0x2460] sm:$0xff]  ;;  %13152 = vmatpush1.bf16.msra.mxu1 %v16920_v37 }
 0x175   : > { %v16913_v41 = vcombine.high %v1412_v30, %v1416_v32  ;;  %v1276_v42 = vld [vmem:[%s18208_s22 + $0x2000] sm:$0xff]  ;;  %13112 = vmatprep.subr.bf16.mxu0 %v16785_v38  ;;  %v16912_v51 = vcombine.low %v1412_v30, %v1416_v32 }
 0x176   : > { %v1280_v43 = vld [vmem:[%s18208_s22 + $0x2020] sm:$0xff]  ;;  %13113 = vmatpush1.bf16.msra.mxu0 %v16784_v49 }
 0x177   : > { %v1404_v46 = vld [vmem:[%s18208_s22 + $0x2400] sm:$0xff]  ;;  %v16777_v53 = vcombine.high %v1276_v42, %v1280_v43  ;;  %13153 = vmatprep.subr.bf16.mxu1 %v16913_v41  ;;  %v16776_v63 = vcombine.low %v1276_v42, %v1280_v43 }
 0x178   : > { %v1408_v47 = vld [vmem:[%s18208_s22 + $0x2420] sm:$0xff]  ;;  %13154 = vmatpush1.bf16.msra.mxu1 %v16912_v51 }
 0x179   : > { %v16905_v55 = vcombine.high %v1404_v46, %v1408_v47  ;;  %v1396_v56 = vld [vmem:[%s18208_s22 + $0x23c0] sm:$0xff]  ;;  %13114 = vmatprep.subr.bf16.mxu0 %v16777_v53  ;;  %v16904_v1 = vcombine.low %v1404_v46, %v1408_v47 }
 0x17a   : > { %v1400_v58 = vld [vmem:[%s18208_s22 + $0x23e0] sm:$0xff]  ;;  %13115 = vmatpush1.bf16.msra.mxu0 %v16776_v63 }
 0x17b   : > { %v1524_v59 = vld [vmem:[%s18208_s22 + $0x27c0] sm:$0xff]  ;;  %v16897_v2 = vcombine.high %v1396_v56, %v1400_v58  ;;  %13155 = vmatprep.subr.bf16.mxu1 %v16905_v55  ;;  %v16896_v9 = vcombine.low %v1396_v56, %v1400_v58 }
 0x17c   : > { %v1528_v62 = vld [vmem:[%s18208_s22 + $0x27e0] sm:$0xff]  ;;  %13156 = vmatpush1.bf16.msra.mxu1 %v16904_v1 }
 0x17d   : > { %v17025_v3 = vcombine.high %v1524_v59, %v1528_v62  ;;  %v1388_v5 = vld [vmem:[%s18208_s22 + $0x2380] sm:$0xff]  ;;  %13116 = vmatprep.subr.bf16.mxu0 %v16897_v2  ;;  %v17024_v60 = vcombine.low %v1524_v59, %v1528_v62 }
 0x17e   : > { %v1392_v6 = vld [vmem:[%s18208_s22 + $0x23a0] sm:$0xff]  ;;  %13117 = vmatpush2.bf16.msra.mxu0 %v16896_v9  ;;  %v2402_v9 = vcombine.high %v18578_v50, %v18578_v50 }
 0x17f   : > { %v1516_v7 = vld [vmem:[%s18208_s22 + $0x2780] sm:$0xff]  ;;  %v16889_v13 = vcombine.high %v1388_v5, %v1392_v6  ;;  %13157 = vmatprep.subr.bf16.mxu1 %v17025_v3  ;;  %v16888_v21 = vcombine.low %v1388_v5, %v1392_v6 }
 0x180   : > { %v1520_v8 = vld [vmem:[%s18208_s22 + $0x27a0] sm:$0xff]  ;;  %13158 = vmatpush2.bf16.msra.mxu1 %v17024_v60 }
 0x181   : > { %v17017_v15 = vcombine.high %v1516_v7, %v1520_v8  ;;  %v1380_v16 = vld [vmem:[%s18208_s22 + $0x2340] sm:$0xff]  ;;  %13118 = vmatprep.subr.bf16.mxu0 %v16889_v13  ;;  %v17016_v24 = vcombine.low %v1516_v7, %v1520_v8 }
 0x182   : > { %v1384_v17 = vld [vmem:[%s18208_s22 + $0x2360] sm:$0xff]  ;;  %13119 = vmatpush2.bf16.msra.mxu0 %v16888_v21 }
 0x183   : > { %v1508_v18 = vld [vmem:[%s18208_s22 + $0x2740] sm:$0xff]  ;;  %v16881_v25 = vcombine.high %v1380_v16, %v1384_v17  ;;  %13159 = vmatprep.subr.bf16.mxu1 %v17017_v15  ;;  %v16880_v34 = vcombine.low %v1380_v16, %v1384_v17 }
 0x184   : > { %v1512_v19 = vld [vmem:[%s18208_s22 + $0x2760] sm:$0xff]  ;;  %13160 = vmatpush2.bf16.msra.mxu1 %v17016_v24  ;;  %v18680_v24 = vrot.slane %v2402_v9, %v18249_v54 }
 0x185   : > { %v17009_v27 = vcombine.high %v1508_v18, %v1512_v19  ;;  %v1372_v28 = vld [vmem:[%s18208_s22 + $0x2300] sm:$0xff]  ;;  %13120 = vmatprep.subr.bf16.mxu0 %v16881_v25  ;;  %v17008_v37 = vcombine.low %v1508_v18, %v1512_v19 }
 0x186   : > { %v1376_v29 = vld [vmem:[%s18208_s22 + $0x2320] sm:$0xff]  ;;  %13121 = vmatpush2.bf16.msra.mxu0 %v16880_v34 }
 0x187   : > { %v1500_v30 = vld [vmem:[%s18208_s22 + $0x2700] sm:$0xff]  ;;  %v16873_v38 = vcombine.high %v1372_v28, %v1376_v29  ;;  %13161 = vmatprep.subr.bf16.mxu1 %v17009_v27  ;;  %v16872_v49 = vcombine.low %v1372_v28, %v1376_v29 }
 0x188   : > { %v1504_v32 = vld [vmem:[%s18208_s22 + $0x2720] sm:$0xff]  ;;  %13162 = vmatpush2.bf16.msra.mxu1 %v17008_v37  ;;  %v2418_v37 = vcombine.high %v18680_v24, %v18680_v24 }
 0x189   : > { %v17001_v41 = vcombine.high %v1500_v30, %v1504_v32  ;;  %v1364_v42 = vld [vmem:[%s18208_s22 + $0x22c0] sm:$0xff]  ;;  %13122 = vmatprep.subr.bf16.mxu0 %v16873_v38  ;;  %v17000_v51 = vcombine.low %v1500_v30, %v1504_v32 }
 0x18a   : > { %v1368_v43 = vld [vmem:[%s18208_s22 + $0x22e0] sm:$0xff]  ;;  %13123 = vmatpush2.bf16.msra.mxu0 %v16872_v49 }
 0x18b   : > { %v1492_v46 = vld [vmem:[%s18208_s22 + $0x26c0] sm:$0xff]  ;;  %v16865_v53 = vcombine.high %v1364_v42, %v1368_v43  ;;  %13163 = vmatprep.subr.bf16.mxu1 %v17001_v41  ;;  %v16864_v63 = vcombine.low %v1364_v42, %v1368_v43  ;;  %v18690_v41 = vrot.slane %v18586_v61, %v18249_v54 }
 0x18c   : > { %v1496_v47 = vld [vmem:[%s18208_s22 + $0x26e0] sm:$0xff]  ;;  %13164 = vmatpush2.bf16.msra.mxu1 %v17000_v51 }
 0x18d   : > { %v16993_v55 = vcombine.high %v1492_v46, %v1496_v47  ;;  %v1356_v56 = vld [vmem:[%s18208_s22 + $0x2280] sm:$0xff]  ;;  %13124 = vmatprep.subr.bf16.mxu0 %v16865_v53  ;;  %v16992_v1 = vcombine.low %v1492_v46, %v1496_v47  ;;  %v18701_v61 = vcombine.high %v18690_v41, %v18690_v41 }
 0x18e   : > { %v1360_v58 = vld [vmem:[%s18208_s22 + $0x22a0] sm:$0xff]  ;;  %13125 = vmatpush2.bf16.msra.mxu0 %v16864_v63 }
 0x18f   : > { %v1484_v59 = vld [vmem:[%s18208_s22 + $0x2680] sm:$0xff]  ;;  %v16857_v2 = vcombine.high %v1356_v56, %v1360_v58  ;;  %13165 = vmatprep.subr.bf16.mxu1 %v16993_v55  ;;  %v16856_v60 = vcombine.low %v1356_v56, %v1360_v58  ;;  %v18697_v55 = vrot.slane %v2418_v37, %v18249_v54 }
 0x190   : > { %v1488_v62 = vld [vmem:[%s18208_s22 + $0x26a0] sm:$0xff]  ;;  %13166 = vmatpush2.bf16.msra.mxu1 %v16992_v1 }
 0x191   : > { %v16985_v3 = vcombine.high %v1484_v59, %v1488_v62  ;;  %v1348_v5 = vld [vmem:[%s18208_s22 + $0x2240] sm:$0xff]  ;;  %13126 = vmatprep.subr.bf16.mxu0 %v16857_v2  ;;  %v16984_v13 = vcombine.low %v1484_v59, %v1488_v62 }
 0x192   : > { %v1352_v6 = vld [vmem:[%s18208_s22 + $0x2260] sm:$0xff]  ;;  %13127 = vmatpush2.bf16.msra.mxu0 %v16856_v60 }
 0x193   : > { %v1476_v7 = vld [vmem:[%s18208_s22 + $0x2640] sm:$0xff]  ;;  %v16849_v15 = vcombine.high %v1348_v5, %v1352_v6  ;;  %13167 = vmatprep.subr.bf16.mxu1 %v16985_v3  ;;  %v16848_v50 = vcombine.low %v1348_v5, %v1352_v6  ;;  %v18710_v6 = vcombine.high %v18697_v55, %v18697_v55 }
 0x194   : > { %v1480_v8 = vld [vmem:[%s18208_s22 + $0x2660] sm:$0xff]  ;;  %13168 = vmatpush2.bf16.msra.mxu1 %v16984_v13 }
 0x195   : > { %v16977_v16 = vcombine.high %v1476_v7, %v1480_v8  ;;  %v1340_v17 = vld [vmem:[%s18208_s22 + $0x2200] sm:$0xff]  ;;  %13128 = vmatprep.subr.bf16.mxu0 %v16849_v15  ;;  %v16976_v25 = vcombine.low %v1476_v7, %v1480_v8 }
 0x196   : > { %v1344_v18 = vld [vmem:[%s18208_s22 + $0x2220] sm:$0xff]  ;;  %13129 = vmatpush2.bf16.msra.mxu0 %v16848_v50 }
 0x197   : > { %v1468_v19 = vld [vmem:[%s18208_s22 + $0x2600] sm:$0xff]  ;;  %v16841_v27 = vcombine.high %v1340_v17, %v1344_v18  ;;  %13169 = vmatprep.subr.bf16.mxu1 %v16977_v16  ;;  %v16840_v38 = vcombine.low %v1340_v17, %v1344_v18 }
 0x198   : > { %v1472_v21 = vld [vmem:[%s18208_s22 + $0x2620] sm:$0xff]  ;;  %13170 = vmatpush2.bf16.msra.mxu1 %v16976_v25 }
 0x199   : > { %v16969_v28 = vcombine.high %v1468_v19, %v1472_v21  ;;  %v1588_v29 = vld [vmem:[%s18208_s22 + $0x29c0] sm:$0xff]  ;;  %13130 = vmatprep.subr.bf16.mxu0 %v16841_v27  ;;  %v16968_v42 = vcombine.low %v1468_v19, %v1472_v21 }
 0x19a   : > { %v1592_v30 = vld [vmem:[%s18208_s22 + $0x29e0] sm:$0xff]  ;;  %13131 = vmatpush2.bf16.msra.mxu0 %v16840_v38 }
 0x19b   : > { %v1716_v32 = vld [vmem:[%s18208_s22 + $0x2dc0] sm:$0xff]  ;;  %v17089_v43 = vcombine.high %v1588_v29, %v1592_v30  ;;  %13171 = vmatprep.subr.bf16.mxu1 %v16969_v28  ;;  %v17088_v56 = vcombine.low %v1588_v29, %v1592_v30 }
 0x19c   : > { %v1720_v34 = vld [vmem:[%s18208_s22 + $0x2de0] sm:$0xff]  ;;  %13172 = vmatpush2.bf16.msra.mxu1 %v16968_v42  ;;  %v12888_v2 = vpop.f32.mrf.mxu0 }
 0x19d   : > { %v17217_v46 = vcombine.high %v1716_v32, %v1720_v34  ;;  %v1580_v47 = vld [vmem:[%s18208_s22 + $0x2980] sm:$0xff]  ;;  %13182 = vmatprep.subr.bf16.mxu0 %v17089_v43  ;;  %v17216_v58 = vcombine.low %v1716_v32, %v1720_v34  ;;  %13133 = vmatmul.mubr.bf16.vlgmr.msra.gmra.mxu0 %v18690_v41  ;;  %v12889_v7 = vadd.f32 %v12888_v2, %v18619_v39 }
 0x19e   : > { %v1584_v49 = vld [vmem:[%s18208_s22 + $0x29a0] sm:$0xff]  ;;  %v12929_v8 = vpop.f32.mrf.mxu1  ;;  %13183 = vmatpush1.bf16.msra.mxu0 %v17088_v56  ;;  %v12890_v60 = vpop.f32.mrf.mxu0  ;;  %13214 = vmatprep.mubr.bf16.mxu0 %v18697_v55 }
 0x19f   : > { %v1708_v51 = vld [vmem:[%s18208_s22 + $0x2d80] sm:$0xff]  ;;  %v17081_v59 = vcombine.high %v1580_v47, %v1584_v49  ;;  %13223 = vmatprep.subr.bf16.mxu1 %v17217_v46  ;;  %13174 = vmatmul.mubr.bf16.vlgmr.msra.gmra.mxu1 %v18701_v61  ;;  %v17080_v9 = vcombine.low %v1580_v47, %v1584_v49  ;;  %v18714_v16 = vadd.f32 %v12929_v8, %v12889_v7 }
 0x1a0   : > { %v1712_v53 = vld [vmem:[%s18208_s22 + $0x2da0] sm:$0xff]  ;;  %13224 = vmatpush1.bf16.msra.mxu1 %v17216_v58  ;;  %v12891_v17 = vadd.f32 %v12890_v60, %v18624_v52  ;;  %v12931_v18 = vpop.f32.mrf.mxu1  ;;  %v12892_v50 = vpop.f32.mrf.mxu0  ;;  %13255 = vmatprep.mubr.bf16.mxu1 %v18710_v6 }
 0x1a1   : > { %v17209_v62 = vcombine.high %v1708_v51, %v1712_v53  ;;  %v1572_v63 = vld [vmem:[%s18208_s22 + $0x2940] sm:$0xff]  ;;  %13184 = vmatprep.subr.bf16.mxu0 %v17081_v59  ;;  %v17208_v13 = vcombine.low %v1708_v51, %v1712_v53 }
 0x1a2   : > { %v1576_v1 = vld [vmem:[%s18208_s22 + $0x2960] sm:$0xff]  ;;  %v18723_v28 = vadd.f32 %v12931_v18, %v12891_v17  ;;  %v12933_v29 = vpop.f32.mrf.mxu1  ;;  %13185 = vmatpush1.bf16.msra.mxu0 %v17080_v9  ;;  %v12893_v30 = vpop.f32.mrf.mxu0 }
 0x1a3   : > { %v1700_v3 = vld [vmem:[%s18208_s22 + $0x2d40] sm:$0xff]  ;;  %v17073_v15 = vcombine.high %v1572_v63, %v1576_v1  ;;  %13225 = vmatprep.subr.bf16.mxu1 %v17209_v62  ;;  %v17072_v52 = vcombine.low %v1572_v63, %v1576_v1 }
 0x1a4   : > { %v1704_v5 = vld [vmem:[%s18208_s22 + $0x2d60] sm:$0xff]  ;;  %13226 = vmatpush1.bf16.msra.mxu1 %v17208_v13  ;;  %v12934_v37 = vpop.f32.mrf.mxu1 }
 0x1a5   : > { %v17201_v39 = vcombine.high %v1700_v3, %v1704_v5  ;;  %v1564_v19 = vld [vmem:[%s18208_s22 + $0x2900] sm:$0xff]  ;;  %13186 = vmatprep.subr.bf16.mxu0 %v17073_v15  ;;  %v17200_v32 = vcombine.low %v1700_v3, %v1704_v5 }
 0x1a6   : > { %v1568_v21 = vld [vmem:[%s18208_s22 + $0x2920] sm:$0xff]  ;;  %13187 = vmatpush1.bf16.msra.mxu0 %v17072_v52 }
 0x1a7   : > { %v1692_v25 = vld [vmem:[%s18208_s22 + $0x2d00] sm:$0xff]  ;;  %v17065_v34 = vcombine.high %v1564_v19, %v1568_v21  ;;  %13227 = vmatprep.subr.bf16.mxu1 %v17201_v39  ;;  %v17064_v49 = vcombine.low %v1564_v19, %v1568_v21 }
 0x1a8   : > { %v1696_v27 = vld [vmem:[%s18208_s22 + $0x2d20] sm:$0xff]  ;;  %13228 = vmatpush1.bf16.msra.mxu1 %v17200_v32 }
 0x1a9   : > { %v17193_v38 = vcombine.high %v1692_v25, %v1696_v27  ;;  %v1556_v42 = vld [vmem:[%s18208_s22 + $0x28c0] sm:$0xff]  ;;  %13188 = vmatprep.subr.bf16.mxu0 %v17065_v34  ;;  %v17192_v51 = vcombine.low %v1692_v25, %v1696_v27 }
 0x1aa   : > { %v1560_v43 = vld [vmem:[%s18208_s22 + $0x28e0] sm:$0xff]  ;;  %13189 = vmatpush1.bf16.msra.mxu0 %v17064_v49 }
 0x1ab   : > { %v1684_v46 = vld [vmem:[%s18208_s22 + $0x2cc0] sm:$0xff]  ;;  %v17057_v53 = vcombine.high %v1556_v42, %v1560_v43  ;;  %13229 = vmatprep.subr.bf16.mxu1 %v17193_v38  ;;  %v17056_v1 = vcombine.low %v1556_v42, %v1560_v43 }
 0x1ac   : > { %v1688_v47 = vld [vmem:[%s18208_s22 + $0x2ce0] sm:$0xff]  ;;  %13230 = vmatpush1.bf16.msra.mxu1 %v17192_v51 }
 0x1ad   : > { %v17185_v56 = vcombine.high %v1684_v46, %v1688_v47  ;;  %v1548_v58 = vld [vmem:[%s18208_s22 + $0x2880] sm:$0xff]  ;;  %13190 = vmatprep.subr.bf16.mxu0 %v17057_v53  ;;  %v17184_v2 = vcombine.low %v1684_v46, %v1688_v47 }
 0x1ae   : > { %v1552_v59 = vld [vmem:[%s18208_s22 + $0x28a0] sm:$0xff]  ;;  %13191 = vmatpush1.bf16.msra.mxu0 %v17056_v1 }
 0x1af   : > { %v1676_v62 = vld [vmem:[%s18208_s22 + $0x2c80] sm:$0xff]  ;;  %v17049_v3 = vcombine.high %v1548_v58, %v1552_v59  ;;  %13231 = vmatprep.subr.bf16.mxu1 %v17185_v56  ;;  %v17048_v13 = vcombine.low %v1548_v58, %v1552_v59 }
 0x1b0   : > { %v1680_v63 = vld [vmem:[%s18208_s22 + $0x2ca0] sm:$0xff]  ;;  %13232 = vmatpush1.bf16.msra.mxu1 %v17184_v2 }
 0x1b1   : > { %v17177_v5 = vcombine.high %v1676_v62, %v1680_v63  ;;  %v1540_v7 = vld [vmem:[%s18208_s22 + $0x2840] sm:$0xff]  ;;  %13192 = vmatprep.subr.bf16.mxu0 %v17049_v3  ;;  %v17176_v15 = vcombine.low %v1676_v62, %v1680_v63 }
 0x1b2   : > { %v1544_v8 = vld [vmem:[%s18208_s22 + $0x2860] sm:$0xff]  ;;  %13193 = vmatpush1.bf16.msra.mxu0 %v17048_v13 }
 0x1b3   : > { %v1668_v9 = vld [vmem:[%s18208_s22 + $0x2c40] sm:$0xff]  ;;  %v17041_v17 = vcombine.high %v1540_v7, %v1544_v8  ;;  %13233 = vmatprep.subr.bf16.mxu1 %v17177_v5  ;;  %v17040_v25 = vcombine.low %v1540_v7, %v1544_v8 }
 0x1b4   : > { %v1672_v60 = vld [vmem:[%s18208_s22 + $0x2c60] sm:$0xff]  ;;  %13234 = vmatpush1.bf16.msra.mxu1 %v17176_v15 }
 0x1b5   : > { %v17169_v18 = vcombine.high %v1668_v9, %v1672_v60  ;;  %v1532_v39 = vld [vmem:[%s18208_s22 + $0x2800] sm:$0xff]  ;;  %13194 = vmatprep.subr.bf16.mxu0 %v17041_v17  ;;  %v17168_v27 = vcombine.low %v1668_v9, %v1672_v60 }
 0x1b6   : > { %v1536_v19 = vld [vmem:[%s18208_s22 + $0x2820] sm:$0xff]  ;;  %13195 = vmatpush1.bf16.msra.mxu0 %v17040_v25 }
 0x1b7   : > { %v1660_v21 = vld [vmem:[%s18208_s22 + $0x2c00] sm:$0xff]  ;;  %v17033_v29 = vcombine.high %v1532_v39, %v1536_v19  ;;  %13235 = vmatprep.subr.bf16.mxu1 %v17169_v18  ;;  %v17032_v38 = vcombine.low %v1532_v39, %v1536_v19 }
 0x1b8   : > { %v1664_v50 = vld [vmem:[%s18208_s22 + $0x2c20] sm:$0xff]  ;;  %13236 = vmatpush1.bf16.msra.mxu1 %v17168_v27 }
 0x1b9   : > { %v17161_v52 = vcombine.high %v1660_v21, %v1664_v50  ;;  %v1652_v30 = vld [vmem:[%s18208_s22 + $0x2bc0] sm:$0xff]  ;;  %13196 = vmatprep.subr.bf16.mxu0 %v17033_v29  ;;  %v17160_v42 = vcombine.low %v1660_v21, %v1664_v50 }
 0x1ba   : > { %v1656_v32 = vld [vmem:[%s18208_s22 + $0x2be0] sm:$0xff]  ;;  %13197 = vmatpush1.bf16.msra.mxu0 %v17032_v38 }
 0x1bb   : > { %v1780_v34 = vld [vmem:[%s18208_s22 + $0x2fc0] sm:$0xff]  ;;  %v17153_v43 = vcombine.high %v1652_v30, %v1656_v32  ;;  %13237 = vmatprep.subr.bf16.mxu1 %v17161_v52  ;;  %v17152_v56 = vcombine.low %v1652_v30, %v1656_v32 }
 0x1bc   : > { %v1784_v37 = vld [vmem:[%s18208_s22 + $0x2fe0] sm:$0xff]  ;;  %13238 = vmatpush1.bf16.msra.mxu1 %v17160_v42 }
 0x1bd   : > { %v17281_v46 = vcombine.high %v1780_v34, %v1784_v37  ;;  %v1644_v47 = vld [vmem:[%s18208_s22 + $0x2b80] sm:$0xff]  ;;  %13198 = vmatprep.subr.bf16.mxu0 %v17153_v43  ;;  %v17280_v58 = vcombine.low %v1780_v34, %v1784_v37 }
 0x1be   : > { %v1648_v49 = vld [vmem:[%s18208_s22 + $0x2ba0] sm:$0xff]  ;;  %13199 = vmatpush2.bf16.msra.mxu0 %v17152_v56 }
 0x1bf   : > { %v1772_v51 = vld [vmem:[%s18208_s22 + $0x2f80] sm:$0xff]  ;;  %v17145_v59 = vcombine.high %v1644_v47, %v1648_v49  ;;  %13239 = vmatprep.subr.bf16.mxu1 %v17281_v46  ;;  %v17144_v5 = vcombine.low %v1644_v47, %v1648_v49 }
 0x1c0   : > { %v1776_v53 = vld [vmem:[%s18208_s22 + $0x2fa0] sm:$0xff]  ;;  %13240 = vmatpush2.bf16.msra.mxu1 %v17280_v58 }
 0x1c1   : > { %v17273_v62 = vcombine.high %v1772_v51, %v1776_v53  ;;  %v1636_v63 = vld [vmem:[%s18208_s22 + $0x2b40] sm:$0xff]  ;;  %13200 = vmatprep.subr.bf16.mxu0 %v17145_v59  ;;  %v17272_v7 = vcombine.low %v1772_v51, %v1776_v53 }
 0x1c2   : > { %v1640_v1 = vld [vmem:[%s18208_s22 + $0x2b60] sm:$0xff]  ;;  %13201 = vmatpush2.bf16.msra.mxu0 %v17144_v5 }
 0x1c3   : > { %v1764_v2 = vld [vmem:[%s18208_s22 + $0x2f40] sm:$0xff]  ;;  %v17137_v8 = vcombine.high %v1636_v63, %v1640_v1  ;;  %13241 = vmatprep.subr.bf16.mxu1 %v17273_v62  ;;  %v17136_v18 = vcombine.low %v1636_v63, %v1640_v1  ;;  %v18770_v63 = vld [vmem:[%s18253_s25 + $0x18] sm:$0xff] }
 0x1c4   : > { %v1768_v3 = vld [vmem:[%s18208_s22 + $0x2f60] sm:$0xff]  ;;  %13242 = vmatpush2.bf16.msra.mxu1 %v17272_v7 }
 0x1c5   : > { %v17265_v9 = vcombine.high %v1764_v2, %v1768_v3  ;;  %v1628_v60 = vld [vmem:[%s18208_s22 + $0x2b00] sm:$0xff]  ;;  %13202 = vmatprep.subr.bf16.mxu0 %v17137_v8  ;;  %v17264_v39 = vcombine.low %v1764_v2, %v1768_v3 }
 0x1c6   : > { %v1632_v13 = vld [vmem:[%s18208_s22 + $0x2b20] sm:$0xff]  ;;  %13203 = vmatpush2.bf16.msra.mxu0 %v17136_v18 }
 0x1c7   : > { %v1756_v15 = vld [vmem:[%s18208_s22 + $0x2f00] sm:$0xff]  ;;  %v17129_v19 = vcombine.high %v1628_v60, %v1632_v13  ;;  %13243 = vmatprep.subr.bf16.mxu1 %v17265_v9  ;;  %v17128_v52 = vcombine.low %v1628_v60, %v1632_v13  ;;  %v18778_v60 = vrot.slane %v18770_v63, %v18249_v54 }
 0x1c8   : > { %v1760_v17 = vld [vmem:[%s18208_s22 + $0x2f20] sm:$0xff]  ;;  %13244 = vmatpush2.bf16.msra.mxu1 %v17264_v39 }
 0x1c9   : > { %v17257_v21 = vcombine.high %v1756_v15, %v1760_v17  ;;  %v1620_v50 = vld [vmem:[%s18208_s22 + $0x2ac0] sm:$0xff]  ;;  %13204 = vmatprep.subr.bf16.mxu0 %v17129_v19  ;;  %v17256_v30 = vcombine.low %v1756_v15, %v1760_v17 }
 0x1ca   : > { %v1624_v25 = vld [vmem:[%s18208_s22 + $0x2ae0] sm:$0xff]  ;;  %13205 = vmatpush2.bf16.msra.mxu0 %v17128_v52 }
 0x1cb   : > { %v1748_v27 = vld [vmem:[%s18208_s22 + $0x2ec0] sm:$0xff]  ;;  %v17121_v32 = vcombine.high %v1620_v50, %v1624_v25  ;;  %13245 = vmatprep.subr.bf16.mxu1 %v17257_v21  ;;  %v17120_v46 = vcombine.low %v1620_v50, %v1624_v25  ;;  %v2466_v25 = vcombine.high %v18778_v60, %v18778_v60 }
 0x1cc   : > { %v1752_v29 = vld [vmem:[%s18208_s22 + $0x2ee0] sm:$0xff]  ;;  %13246 = vmatpush2.bf16.msra.mxu1 %v17256_v30 }
 0x1cd   : > { %v17249_v34 = vcombine.high %v1748_v27, %v1752_v29  ;;  %v1612_v37 = vld [vmem:[%s18208_s22 + $0x2a80] sm:$0xff]  ;;  %13206 = vmatprep.subr.bf16.mxu0 %v17121_v32  ;;  %v17248_v47 = vcombine.low %v1748_v27, %v1752_v29  ;;  %v18788_v29 = vrot.slane %v18680_v24, %v18249_v54 }
 0x1ce   : > { %v1616_v38 = vld [vmem:[%s18208_s22 + $0x2aa0] sm:$0xff]  ;;  %13207 = vmatpush2.bf16.msra.mxu0 %v17120_v46 }
 0x1cf   : > { %v1740_v42 = vld [vmem:[%s18208_s22 + $0x2e80] sm:$0xff]  ;;  %v17113_v49 = vcombine.high %v1612_v37, %v1616_v38  ;;  %13247 = vmatprep.subr.bf16.mxu1 %v17249_v34  ;;  %v17112_v62 = vcombine.low %v1612_v37, %v1616_v38  ;;  %v18799_v24 = vcombine.high %v18788_v29, %v18788_v29 }
 0x1d0   : > { %v1744_v43 = vld [vmem:[%s18208_s22 + $0x2ea0] sm:$0xff]  ;;  %13248 = vmatpush2.bf16.msra.mxu1 %v17248_v47 }
 0x1d1   : > { %v17241_v51 = vcombine.high %v1740_v42, %v1744_v43  ;;  %v1604_v53 = vld [vmem:[%s18208_s22 + $0x2a40] sm:$0xff]  ;;  %13208 = vmatprep.subr.bf16.mxu0 %v17113_v49  ;;  %v17240_v1 = vcombine.low %v1740_v42, %v1744_v43  ;;  %v18795_v43 = vrot.slane %v2466_v25, %v18249_v54 }
 0x1d2   : > { %v1608_v56 = vld [vmem:[%s18208_s22 + $0x2a60] sm:$0xff]  ;;  %13209 = vmatpush2.bf16.msra.mxu0 %v17112_v62 }
 0x1d3   : > { %v1732_v58 = vld [vmem:[%s18208_s22 + $0x2e40] sm:$0xff]  ;;  %v17105_v2 = vcombine.high %v1604_v53, %v1608_v56  ;;  %13249 = vmatprep.subr.bf16.mxu1 %v17241_v51  ;;  %v17104_v13 = vcombine.low %v1604_v53, %v1608_v56 }
 0x1d4   : > { %v1736_v59 = vld [vmem:[%s18208_s22 + $0x2e60] sm:$0xff]  ;;  %13250 = vmatpush2.bf16.msra.mxu1 %v17240_v1  ;;  %v18808_v1 = vcombine.high %v18795_v43, %v18795_v43 }
 0x1d5   : > { %v17233_v3 = vcombine.high %v1732_v58, %v1736_v59  ;;  %v1596_v5 = vld [vmem:[%s18208_s22 + $0x2a00] sm:$0xff]  ;;  %13210 = vmatprep.subr.bf16.mxu0 %v17105_v2  ;;  %v17232_v15 = vcombine.low %v1732_v58, %v1736_v59 }
 0x1d6   : > { %v1600_v7 = vld [vmem:[%s18208_s22 + $0x2a20] sm:$0xff]  ;;  %13211 = vmatpush2.bf16.msra.mxu0 %v17104_v13 }
 0x1d7   : > { %v1724_v8 = vld [vmem:[%s18208_s22 + $0x2e00] sm:$0xff]  ;;  %v17097_v17 = vcombine.high %v1596_v5, %v1600_v7  ;;  %13251 = vmatprep.subr.bf16.mxu1 %v17233_v3  ;;  %v17096_v27 = vcombine.low %v1596_v5, %v1600_v7 }
 0x1d8   : > { %v1728_v9 = vld [vmem:[%s18208_s22 + $0x2e20] sm:$0xff]  ;;  %13252 = vmatpush2.bf16.msra.mxu1 %v17232_v15 }
 0x1d9   : > { %v17225_v18 = vcombine.high %v1724_v8, %v1728_v9  ;;  %v1844_v39 = vld [vmem:[%s18208_s22 + $0x31c0] sm:$0xff]  ;;  %13212 = vmatprep.subr.bf16.mxu0 %v17097_v17  ;;  %v17224_v52 = vcombine.low %v1724_v8, %v1728_v9 }
 0x1da   : > { %v1848_v19 = vld [vmem:[%s18208_s22 + $0x31e0] sm:$0xff]  ;;  %13213 = vmatpush2.bf16.msra.mxu0 %v17096_v27 }
 0x1db   : > { %v1972_v21 = vld [vmem:[%s18208_s22 + $0x35c0] sm:$0xff]  ;;  %v17345_v30 = vcombine.high %v1844_v39, %v1848_v19  ;;  %13253 = vmatprep.subr.bf16.mxu1 %v17225_v18  ;;  %v17344_v46 = vcombine.low %v1844_v39, %v1848_v19 }
 0x1dc   : > { %v1976_v50 = vld [vmem:[%s18208_s22 + $0x35e0] sm:$0xff]  ;;  %13254 = vmatpush2.bf16.msra.mxu1 %v17224_v52  ;;  %v12970_v58 = vpop.f32.mrf.mxu0 }
 0x1dd   : > { %v17473_v32 = vcombine.high %v1972_v21, %v1976_v50  ;;  %v1836_v34 = vld [vmem:[%s18208_s22 + $0x3180] sm:$0xff]  ;;  %13264 = vmatprep.subr.bf16.mxu0 %v17345_v30  ;;  %v17472_v47 = vcombine.low %v1972_v21, %v1976_v50  ;;  %13215 = vmatmul.mubr.bf16.vlgmr.msra.gmra.mxu0 %v18788_v29  ;;  %v12971_v2 = vadd.f32 %v12970_v58, %v18714_v16 }
 0x1de   : > { %v1840_v37 = vld [vmem:[%s18208_s22 + $0x31a0] sm:$0xff]  ;;  %v13011_v3 = vpop.f32.mrf.mxu1  ;;  %13265 = vmatpush1.bf16.msra.mxu0 %v17344_v46  ;;  %v12972_v7 = vpop.f32.mrf.mxu0  ;;  %13296 = vmatprep.mubr.bf16.mxu0 %v18795_v43 }
 0x1df   : > { %v1964_v38 = vld [vmem:[%s18208_s22 + $0x3580] sm:$0xff]  ;;  %v17337_v49 = vcombine.high %v1836_v34, %v1840_v37  ;;  %13305 = vmatprep.subr.bf16.mxu1 %v17473_v32  ;;  %13256 = vmatmul.mubr.bf16.vlgmr.msra.gmra.mxu1 %v18799_v24  ;;  %v17336_v5 = vcombine.low %v1836_v34, %v1840_v37  ;;  %v18812_v13 = vadd.f32 %v13011_v3, %v12971_v2 }
 0x1e0   : > { %v1968_v42 = vld [vmem:[%s18208_s22 + $0x35a0] sm:$0xff]  ;;  %13306 = vmatpush1.bf16.msra.mxu1 %v17472_v47  ;;  %v12973_v15 = vadd.f32 %v12972_v7, %v18723_v28  ;;  %v13013_v17 = vpop.f32.mrf.mxu1  ;;  %v12974_v19 = vpop.f32.mrf.mxu0  ;;  %13337 = vmatprep.mubr.bf16.mxu1 %v18808_v1 }
 0x1e1   : > { %v17465_v51 = vcombine.high %v1964_v38, %v1968_v42  ;;  %v1828_v53 = vld [vmem:[%s18208_s22 + $0x3140] sm:$0xff]  ;;  %13266 = vmatprep.subr.bf16.mxu0 %v17337_v49  ;;  %v17464_v8 = vcombine.low %v1964_v38, %v1968_v42 }
 0x1e2   : > { %v1832_v56 = vld [vmem:[%s18208_s22 + $0x3160] sm:$0xff]  ;;  %v18821_v25 = vadd.f32 %v13013_v17, %v12973_v15  ;;  %v13015_v27 = vpop.f32.mrf.mxu1  ;;  %13267 = vmatpush1.bf16.msra.mxu0 %v17336_v5  ;;  %v12975_v52 = vpop.f32.mrf.mxu0 }
 0x1e3   : > { %v1956_v59 = vld [vmem:[%s18208_s22 + $0x3540] sm:$0xff]  ;;  %v17329_v9 = vcombine.high %v1828_v53, %v1832_v56  ;;  %13307 = vmatprep.subr.bf16.mxu1 %v17465_v51  ;;  %v17328_v28 = vcombine.low %v1828_v53, %v1832_v56 }
 0x1e4   : > { %v1960_v62 = vld [vmem:[%s18208_s22 + $0x3560] sm:$0xff]  ;;  %13308 = vmatpush1.bf16.msra.mxu1 %v17464_v8  ;;  %v13016_v34 = vpop.f32.mrf.mxu1 }
 0x1e5   : > { %v17457_v16 = vcombine.high %v1956_v59, %v1960_v62  ;;  %v1820_v18 = vld [vmem:[%s18208_s22 + $0x3100] sm:$0xff]  ;;  %13268 = vmatprep.subr.bf16.mxu0 %v17329_v9  ;;  %v17456_v30 = vcombine.low %v1956_v59, %v1960_v62 }
 0x1e6   : > { %v1824_v39 = vld [vmem:[%s18208_s22 + $0x3120] sm:$0xff]  ;;  %13269 = vmatpush1.bf16.msra.mxu0 %v17328_v28 }
 0x1e7   : > { %v1948_v21 = vld [vmem:[%s18208_s22 + $0x3500] sm:$0xff]  ;;  %v17321_v32 = vcombine.high %v1820_v18, %v1824_v39  ;;  %13309 = vmatprep.subr.bf16.mxu1 %v17457_v16  ;;  %v17320_v49 = vcombine.low %v1820_v18, %v1824_v39 }
 0x1e8   : > { %v1952_v50 = vld [vmem:[%s18208_s22 + $0x3520] sm:$0xff]  ;;  %13310 = vmatpush1.bf16.msra.mxu1 %v17456_v30 }
 0x1e9   : > { %v17449_v37 = vcombine.high %v1948_v21, %v1952_v50  ;;  %v1812_v38 = vld [vmem:[%s18208_s22 + $0x30c0] sm:$0xff]  ;;  %13270 = vmatprep.subr.bf16.mxu0 %v17321_v32  ;;  %v17448_v51 = vcombine.low %v1948_v21, %v1952_v50 }
 0x1ea   : > { %v1816_v42 = vld [vmem:[%s18208_s22 + $0x30e0] sm:$0xff]  ;;  %13271 = vmatpush1.bf16.msra.mxu0 %v17320_v49 }
 0x1eb   : > { %v1940_v46 = vld [vmem:[%s18208_s22 + $0x34c0] sm:$0xff]  ;;  %v17313_v53 = vcombine.high %v1812_v38, %v1816_v42  ;;  %13311 = vmatprep.subr.bf16.mxu1 %v17449_v37  ;;  %v17312_v3 = vcombine.low %v1812_v38, %v1816_v42 }
 0x1ec   : > { %v1944_v47 = vld [vmem:[%s18208_s22 + $0x34e0] sm:$0xff]  ;;  %13312 = vmatpush1.bf16.msra.mxu1 %v17448_v51 }
 0x1ed   : > { %v17441_v56 = vcombine.high %v1940_v46, %v1944_v47  ;;  %v1804_v58 = vld [vmem:[%s18208_s22 + $0x3080] sm:$0xff]  ;;  %13272 = vmatprep.subr.bf16.mxu0 %v17313_v53  ;;  %v17440_v5 = vcombine.low %v1940_v46, %v1944_v47 }
 0x1ee   : > { %v1808_v59 = vld [vmem:[%s18208_s22 + $0x30a0] sm:$0xff]  ;;  %13273 = vmatpush1.bf16.msra.mxu0 %v17312_v3 }
 0x1ef   : > { %v1932_v62 = vld [vmem:[%s18208_s22 + $0x3480] sm:$0xff]  ;;  %v17305_v7 = vcombine.high %v1804_v58, %v1808_v59  ;;  %13313 = vmatprep.subr.bf16.mxu1 %v17441_v56  ;;  %v17304_v18 = vcombine.low %v1804_v58, %v1808_v59 }
 0x1f0   : > { %v1936_v2 = vld [vmem:[%s18208_s22 + $0x34a0] sm:$0xff]  ;;  %13314 = vmatpush1.bf16.msra.mxu1 %v17440_v5 }
 0x1f1   : > { %v17433_v8 = vcombine.high %v1932_v62, %v1936_v2  ;;  %v1796_v9 = vld [vmem:[%s18208_s22 + $0x3040] sm:$0xff]  ;;  %13274 = vmatprep.subr.bf16.mxu0 %v17305_v7  ;;  %v17432_v39 = vcombine.low %v1932_v62, %v1936_v2 }
 0x1f2   : > { %v1800_v15 = vld [vmem:[%s18208_s22 + $0x3060] sm:$0xff]  ;;  %13275 = vmatpush1.bf16.msra.mxu0 %v17304_v18 }
 0x1f3   : > { %v1924_v17 = vld [vmem:[%s18208_s22 + $0x3440] sm:$0xff]  ;;  %v17297_v19 = vcombine.high %v1796_v9, %v1800_v15  ;;  %13315 = vmatprep.subr.bf16.mxu1 %v17433_v8  ;;  %v17296_v30 = vcombine.low %v1796_v9, %v1800_v15 }
 0x1f4   : > { %v1928_v16 = vld [vmem:[%s18208_s22 + $0x3460] sm:$0xff]  ;;  %13316 = vmatpush1.bf16.msra.mxu1 %v17432_v39 }
 0x1f5   : > { %v17425_v21 = vcombine.high %v1924_v17, %v1928_v16  ;;  %v1788_v50 = vld [vmem:[%s18208_s22 + $0x3000] sm:$0xff]  ;;  %13276 = vmatprep.subr.bf16.mxu0 %v17297_v19  ;;  %v17424_v32 = vcombine.low %v1924_v17, %v1928_v16 }
 0x1f6   : > { %v1792_v27 = vld [vmem:[%s18208_s22 + $0x3020] sm:$0xff]  ;;  %13277 = vmatpush1.bf16.msra.mxu0 %v17296_v30 }
 0x1f7   : > { %v1916_v28 = vld [vmem:[%s18208_s22 + $0x3400] sm:$0xff]  ;;  %v17289_v34 = vcombine.high %v1788_v50, %v1792_v27  ;;  %13317 = vmatprep.subr.bf16.mxu1 %v17425_v21  ;;  %v17288_v49 = vcombine.low %v1788_v50, %v1792_v27 }
 0x1f8   : > { %v1920_v52 = vld [vmem:[%s18208_s22 + $0x3420] sm:$0xff]  ;;  %13318 = vmatpush1.bf16.msra.mxu1 %v17424_v32 }
 0x1f9   : > { %v17417_v37 = vcombine.high %v1916_v28, %v1920_v52  ;;  %v1908_v38 = vld [vmem:[%s18208_s22 + $0x33c0] sm:$0xff]  ;;  %13278 = vmatprep.subr.bf16.mxu0 %v17289_v34  ;;  %v17416_v51 = vcombine.low %v1916_v28, %v1920_v52 }
 0x1fa   : > { %v1912_v42 = vld [vmem:[%s18208_s22 + $0x33e0] sm:$0xff]  ;;  %13279 = vmatpush1.bf16.msra.mxu0 %v17288_v49 }
 0x1fb   : > { %v2036_v46 = vld [vmem:[%s18208_s22 + $0x37c0] sm:$0xff]  ;;  %v17409_v53 = vcombine.high %v1908_v38, %v1912_v42  ;;  %13319 = vmatprep.subr.bf16.mxu1 %v17417_v37  ;;  %v17408_v3 = vcombine.low %v1908_v38, %v1912_v42 }
 0x1fc   : > { %v2040_v47 = vld [vmem:[%s18208_s22 + $0x37e0] sm:$0xff]  ;;  %13320 = vmatpush1.bf16.msra.mxu1 %v17416_v51 }
 0x1fd   : > { %v17537_v56 = vcombine.high %v2036_v46, %v2040_v47  ;;  %v1900_v58 = vld [vmem:[%s18208_s22 + $0x3380] sm:$0xff]  ;;  %13280 = vmatprep.subr.bf16.mxu0 %v17409_v53  ;;  %v17536_v5 = vcombine.low %v2036_v46, %v2040_v47 }
 0x1fe   : > { %v1904_v59 = vld [vmem:[%s18208_s22 + $0x33a0] sm:$0xff]  ;;  %13281 = vmatpush2.bf16.msra.mxu0 %v17408_v3 }
 0x1ff   : > { %v2028_v62 = vld [vmem:[%s18208_s22 + $0x3780] sm:$0xff]  ;;  %v17401_v7 = vcombine.high %v1900_v58, %v1904_v59  ;;  %13321 = vmatprep.subr.bf16.mxu1 %v17537_v56  ;;  %v17400_v18 = vcombine.low %v1900_v58, %v1904_v59 }
 0x200   : > { %v2032_v2 = vld [vmem:[%s18208_s22 + $0x37a0] sm:$0xff]  ;;  %13322 = vmatpush2.bf16.msra.mxu1 %v17536_v5 }
 0x201   : > { %v17529_v8 = vcombine.high %v2028_v62, %v2032_v2  ;;  %v1892_v9 = vld [vmem:[%s18208_s22 + $0x3340] sm:$0xff]  ;;  %13282 = vmatprep.subr.bf16.mxu0 %v17401_v7  ;;  %v17528_v39 = vcombine.low %v2028_v62, %v2032_v2 }
 0x202   : > { %v1896_v15 = vld [vmem:[%s18208_s22 + $0x3360] sm:$0xff]  ;;  %13283 = vmatpush2.bf16.msra.mxu0 %v17400_v18  ;;  %v2451_v18 = vcombine.high %v18770_v63, %v18770_v63 }
 0x203   : > { %v2020_v17 = vld [vmem:[%s18208_s22 + $0x3740] sm:$0xff]  ;;  %v17393_v19 = vcombine.high %v1892_v9, %v1896_v15  ;;  %13323 = vmatprep.subr.bf16.mxu1 %v17529_v8  ;;  %v17392_v30 = vcombine.low %v1892_v9, %v1896_v15 }
 0x204   : > { %v2024_v16 = vld [vmem:[%s18208_s22 + $0x3760] sm:$0xff]  ;;  %13324 = vmatpush2.bf16.msra.mxu1 %v17528_v39 }
 0x205   : > { %v17521_v21 = vcombine.high %v2020_v17, %v2024_v16  ;;  %v1884_v50 = vld [vmem:[%s18208_s22 + $0x3300] sm:$0xff]  ;;  %13284 = vmatprep.subr.bf16.mxu0 %v17393_v19  ;;  %v17520_v32 = vcombine.low %v2020_v17, %v2024_v16 }
 0x206   : > { %v1888_v27 = vld [vmem:[%s18208_s22 + $0x3320] sm:$0xff]  ;;  %13285 = vmatpush2.bf16.msra.mxu0 %v17392_v30 }
 0x207   : > { %v2012_v28 = vld [vmem:[%s18208_s22 + $0x3700] sm:$0xff]  ;;  %v17385_v34 = vcombine.high %v1884_v50, %v1888_v27  ;;  %13325 = vmatprep.subr.bf16.mxu1 %v17521_v21  ;;  %v17384_v49 = vcombine.low %v1884_v50, %v1888_v27 }
 0x208   : > { %v2016_v52 = vld [vmem:[%s18208_s22 + $0x3720] sm:$0xff]  ;;  %13326 = vmatpush2.bf16.msra.mxu1 %v17520_v32  ;;  %v18874_v32 = vrot.slane %v2451_v18, %v18249_v54 }
 0x209   : > { %v17513_v37 = vcombine.high %v2012_v28, %v2016_v52  ;;  %v1876_v38 = vld [vmem:[%s18208_s22 + $0x32c0] sm:$0xff]  ;;  %13286 = vmatprep.subr.bf16.mxu0 %v17385_v34  ;;  %v17512_v51 = vcombine.low %v2012_v28, %v2016_v52 }
 0x20a   : > { %v1880_v42 = vld [vmem:[%s18208_s22 + $0x32e0] sm:$0xff]  ;;  %13287 = vmatpush2.bf16.msra.mxu0 %v17384_v49 }
 0x20b   : > { %v2004_v46 = vld [vmem:[%s18208_s22 + $0x36c0] sm:$0xff]  ;;  %v17377_v53 = vcombine.high %v1876_v38, %v1880_v42  ;;  %13327 = vmatprep.subr.bf16.mxu1 %v17513_v37  ;;  %v17376_v3 = vcombine.low %v1876_v38, %v1880_v42 }
 0x20c   : > { %v2008_v47 = vld [vmem:[%s18208_s22 + $0x36e0] sm:$0xff]  ;;  %13328 = vmatpush2.bf16.msra.mxu1 %v17512_v51  ;;  %v2467_v51 = vcombine.high %v18874_v32, %v18874_v32 }
 0x20d   : > { %v17505_v56 = vcombine.high %v2004_v46, %v2008_v47  ;;  %v1868_v58 = vld [vmem:[%s18208_s22 + $0x3280] sm:$0xff]  ;;  %13288 = vmatprep.subr.bf16.mxu0 %v17377_v53  ;;  %v17504_v5 = vcombine.low %v2004_v46, %v2008_v47 }
 0x20e   : > { %v1872_v59 = vld [vmem:[%s18208_s22 + $0x32a0] sm:$0xff]  ;;  %13289 = vmatpush2.bf16.msra.mxu0 %v17376_v3 }
 0x20f   : > { %v1996_v62 = vld [vmem:[%s18208_s22 + $0x3680] sm:$0xff]  ;;  %v17369_v7 = vcombine.high %v1868_v58, %v1872_v59  ;;  %13329 = vmatprep.subr.bf16.mxu1 %v17505_v56  ;;  %v17368_v39 = vcombine.low %v1868_v58, %v1872_v59  ;;  %v18884_v56 = vrot.slane %v18778_v60, %v18249_v54 }
 0x210   : > { %v2000_v2 = vld [vmem:[%s18208_s22 + $0x36a0] sm:$0xff]  ;;  %13330 = vmatpush2.bf16.msra.mxu1 %v17504_v5 }
 0x211   : > { %v17497_v8 = vcombine.high %v1996_v62, %v2000_v2  ;;  %v1860_v9 = vld [vmem:[%s18208_s22 + $0x3240] sm:$0xff]  ;;  %13290 = vmatprep.subr.bf16.mxu0 %v17369_v7  ;;  %v17496_v19 = vcombine.low %v1996_v62, %v2000_v2  ;;  %v18895_v60 = vcombine.high %v18884_v56, %v18884_v56 }
 0x212   : > { %v1864_v15 = vld [vmem:[%s18208_s22 + $0x3260] sm:$0xff]  ;;  %13291 = vmatpush2.bf16.msra.mxu0 %v17368_v39 }
 0x213   : > { %v1988_v17 = vld [vmem:[%s18208_s22 + $0x3640] sm:$0xff]  ;;  %v17361_v21 = vcombine.high %v1860_v9, %v1864_v15  ;;  %13331 = vmatprep.subr.bf16.mxu1 %v17497_v8  ;;  %v17360_v63 = vcombine.low %v1860_v9, %v1864_v15  ;;  %v18891_v8 = vrot.slane %v2467_v51, %v18249_v54 }
 0x214   : > { %v1992_v16 = vld [vmem:[%s18208_s22 + $0x3660] sm:$0xff]  ;;  %13332 = vmatpush2.bf16.msra.mxu1 %v17496_v19 }
 0x215   : > { %v17489_v50 = vcombine.high %v1988_v17, %v1992_v16  ;;  %v1852_v27 = vld [vmem:[%s18208_s22 + $0x3200] sm:$0xff]  ;;  %13292 = vmatprep.subr.bf16.mxu0 %v17361_v21  ;;  %v17488_v34 = vcombine.low %v1988_v17, %v1992_v16 }
 0x216   : > { %v1856_v28 = vld [vmem:[%s18208_s22 + $0x3220] sm:$0xff]  ;;  %13293 = vmatpush2.bf16.msra.mxu0 %v17360_v63 }
 0x217   : > { %v1980_v52 = vld [vmem:[%s18208_s22 + $0x3600] sm:$0xff]  ;;  %v17353_v37 = vcombine.high %v1852_v27, %v1856_v28  ;;  %13333 = vmatprep.subr.bf16.mxu1 %v17489_v50  ;;  %v17352_v53 = vcombine.low %v1852_v27, %v1856_v28  ;;  %v18904_v27 = vcombine.high %v18891_v8, %v18891_v8 }
 0x218   : > { %v1984_v30 = vld [vmem:[%s18208_s22 + $0x3620] sm:$0xff]  ;;  %13334 = vmatpush2.bf16.msra.mxu1 %v17488_v34 }
 0x219   : > { %v17481_v38 = vcombine.high %v1980_v52, %v1984_v30  ;;  %v2100_v42 = vld [vmem:[%s18208_s22 + $0x39c0] sm:$0xff]  ;;  %13294 = vmatprep.subr.bf16.mxu0 %v17353_v37  ;;  %v17480_v58 = vcombine.low %v1980_v52, %v1984_v30 }
 0x21a   : > { %v2104_v46 = vld [vmem:[%s18208_s22 + $0x39e0] sm:$0xff]  ;;  %13295 = vmatpush2.bf16.msra.mxu0 %v17352_v53 }
 0x21b   : > { %v2228_v47 = vld [vmem:[%s18208_s22 + $0x3dc0] sm:$0xff]  ;;  %v17601_v59 = vcombine.high %v2100_v42, %v2104_v46  ;;  %13335 = vmatprep.subr.bf16.mxu1 %v17481_v38  ;;  %v17600_v9 = vcombine.low %v2100_v42, %v2104_v46 }
 0x21c   : > { %v2232_v49 = vld [vmem:[%s18208_s22 + $0x3de0] sm:$0xff]  ;;  %13336 = vmatpush2.bf16.msra.mxu1 %v17480_v58 }
 0x21d   : > { %v17729_v62 = vcombine.high %v2228_v47, %v2232_v49  ;;  %v2092_v2 = vld [vmem:[%s18208_s22 + $0x3980] sm:$0xff]  ;;  %13346 = vmatprep.subr.bf16.mxu0 %v17601_v59  ;;  %v17728_v15 = vcombine.low %v2228_v47, %v2232_v49  ;;  %v13052_v19 = vpop.f32.mrf.mxu0  ;;  %13297 = vmatmul.mubr.bf16.vlgmr.msra.gmra.mxu0 %v18884_v56 }
 0x21e   : > { %v2096_v3 = vld [vmem:[%s18208_s22 + $0x39a0] sm:$0xff]  ;;  %v13053_v28 = vadd.f32 %v13052_v19, %v18812_v13  ;;  %13347 = vmatpush1.bf16.msra.mxu0 %v17600_v9  ;;  %13378 = vmatprep.mubr.bf16.mxu0 %v18891_v8 }
 0x21f   : > { %v2220_v5 = vld [vmem:[%s18208_s22 + $0x3d80] sm:$0xff]  ;;  %v17593_v17 = vcombine.high %v2092_v2, %v2096_v3  ;;  %13387 = vmatprep.subr.bf16.mxu1 %v17729_v62  ;;  %v13093_v52 = vpop.f32.mrf.mxu1  ;;  %13338 = vmatmul.mubr.bf16.vlgmr.msra.gmra.mxu1 %v18895_v60  ;;  %v17592_v30 = vcombine.low %v2092_v2, %v2096_v3  ;;  %v13054_v63 = vpop.f32.mrf.mxu0 }
 0x220   : > { %v2224_v7 = vld [vmem:[%s18208_s22 + $0x3da0] sm:$0xff]  ;;  %13388 = vmatpush1.bf16.msra.mxu1 %v17728_v15  ;;  %v18908_v38 = vadd.f32 %v13093_v52, %v13053_v28  ;;  %v13055_v42 = vadd.f32 %v13054_v63, %v18821_v25  ;;  %13419 = vmatprep.mubr.bf16.mxu1 %v18904_v27 }
 0x221   : > { %v17721_v16 = vcombine.high %v2220_v5, %v2224_v7  ;;  %v2084_v18 = vld [vmem:[%s18208_s22 + $0x3940] sm:$0xff]  ;;  %13348 = vmatprep.subr.bf16.mxu0 %v17593_v17  ;;  %v17720_v34 = vcombine.low %v2220_v5, %v2224_v7  ;;  %v13095_v46 = vpop.f32.mrf.mxu1  ;;  %v13056_v51 = vpop.f32.mrf.mxu0 }
 0x222   : > { %v2088_v39 = vld [vmem:[%s18208_s22 + $0x3960] sm:$0xff]  ;;  %v18917_v59 = vadd.f32 %v13095_v46, %v13055_v42  ;;  %13349 = vmatpush1.bf16.msra.mxu0 %v17592_v30 }
 0x223   : > { %v2212_v21 = vld [vmem:[%s18208_s22 + $0x3d40] sm:$0xff]  ;;  %v17585_v37 = vcombine.high %v2084_v18, %v2088_v39  ;;  %13389 = vmatprep.subr.bf16.mxu1 %v17721_v16  ;;  %v13097_v62 = vpop.f32.mrf.mxu1  ;;  %v17584_v25 = vcombine.low %v2084_v18, %v2088_v39  ;;  %v13057_v2 = vpop.f32.mrf.mxu0 }
 0x224   : > { %v2216_v50 = vld [vmem:[%s18208_s22 + $0x3d60] sm:$0xff]  ;;  %13390 = vmatpush1.bf16.msra.mxu1 %v17720_v34 }
 0x225   : > { %v17713_v13 = vcombine.high %v2212_v21, %v2216_v50  ;;  %v2076_v47 = vld [vmem:[%s18208_s22 + $0x3900] sm:$0xff]  ;;  %13350 = vmatprep.subr.bf16.mxu0 %v17585_v37  ;;  %v17712_v3 = vcombine.low %v2212_v21, %v2216_v50  ;;  %v13098_v7 = vpop.f32.mrf.mxu1 }
 0x226   : > { %v2080_v49 = vld [vmem:[%s18208_s22 + $0x3920] sm:$0xff]  ;;  %13351 = vmatpush1.bf16.msra.mxu0 %v17584_v25 }
 0x227   : > { %v2204_v53 = vld [vmem:[%s18208_s22 + $0x3d00] sm:$0xff]  ;;  %v17577_v5 = vcombine.high %v2076_v47, %v2080_v49  ;;  %13391 = vmatprep.subr.bf16.mxu1 %v17713_v13  ;;  %v17576_v28 = vcombine.low %v2076_v47, %v2080_v49 }
 0x228   : > { %v2208_v58 = vld [vmem:[%s18208_s22 + $0x3d20] sm:$0xff]  ;;  %13392 = vmatpush1.bf16.msra.mxu1 %v17712_v3 }
 0x229   : > { %v17705_v9 = vcombine.high %v2204_v53, %v2208_v58  ;;  %v2068_v15 = vld [vmem:[%s18208_s22 + $0x38c0] sm:$0xff]  ;;  %13352 = vmatprep.subr.bf16.mxu0 %v17577_v5  ;;  %v17704_v18 = vcombine.low %v2204_v53, %v2208_v58 }
 0x22a   : > { %v2072_v17 = vld [vmem:[%s18208_s22 + $0x38e0] sm:$0xff]  ;;  %13353 = vmatpush1.bf16.msra.mxu0 %v17576_v28 }
 0x22b   : > { %v2196_v16 = vld [vmem:[%s18208_s22 + $0x3cc0] sm:$0xff]  ;;  %v17569_v39 = vcombine.high %v2068_v15, %v2072_v17  ;;  %13393 = vmatprep.subr.bf16.mxu1 %v17705_v9  ;;  %v17568_v34 = vcombine.low %v2068_v15, %v2072_v17 }
 0x22c   : > { %v2200_v19 = vld [vmem:[%s18208_s22 + $0x3ce0] sm:$0xff]  ;;  %13394 = vmatpush1.bf16.msra.mxu1 %v17704_v18 }
 0x22d   : > { %v17697_v21 = vcombine.high %v2196_v16, %v2200_v19  ;;  %v2060_v50 = vld [vmem:[%s18208_s22 + $0x3880] sm:$0xff]  ;;  %13354 = vmatprep.subr.bf16.mxu0 %v17569_v39  ;;  %v17696_v37 = vcombine.low %v2196_v16, %v2200_v19 }
 0x22e   : > { %v2064_v52 = vld [vmem:[%s18208_s22 + $0x38a0] sm:$0xff]  ;;  %13355 = vmatpush1.bf16.msra.mxu0 %v17568_v34 }
 0x22f   : > { %v2188_v30 = vld [vmem:[%s18208_s22 + $0x3c80] sm:$0xff]  ;;  %v17561_v42 = vcombine.high %v2060_v50, %v2064_v52  ;;  %13395 = vmatprep.subr.bf16.mxu1 %v17697_v21  ;;  %v17560_v53 = vcombine.low %v2060_v50, %v2064_v52 }
 0x230   : > { %v2192_v63 = vld [vmem:[%s18208_s22 + $0x3ca0] sm:$0xff]  ;;  %13396 = vmatpush1.bf16.msra.mxu1 %v17696_v37 }
 0x231   : > { %v17689_v46 = vcombine.high %v2188_v30, %v2192_v63  ;;  %v2052_v13 = vld [vmem:[%s18208_s22 + $0x3840] sm:$0xff]  ;;  %13356 = vmatprep.subr.bf16.mxu0 %v17561_v42  ;;  %v17688_v58 = vcombine.low %v2188_v30, %v2192_v63 }
 0x232   : > { %v2056_v47 = vld [vmem:[%s18208_s22 + $0x3860] sm:$0xff]  ;;  %13357 = vmatpush1.bf16.msra.mxu0 %v17560_v53 }
 0x233   : > { %v2180_v49 = vld [vmem:[%s18208_s22 + $0x3c40] sm:$0xff]  ;;  %v17553_v62 = vcombine.high %v2052_v13, %v2056_v47  ;;  %13397 = vmatprep.subr.bf16.mxu1 %v17689_v46  ;;  %v17552_v9 = vcombine.low %v2052_v13, %v2056_v47 }
 0x234   : > { %v2184_v51 = vld [vmem:[%s18208_s22 + $0x3c60] sm:$0xff]  ;;  %13398 = vmatpush1.bf16.msra.mxu1 %v17688_v58 }
 0x235   : > { %v17681_v25 = vcombine.high %v2180_v49, %v2184_v51  ;;  %v2044_v2 = vld [vmem:[%s18208_s22 + $0x3800] sm:$0xff]  ;;  %13358 = vmatprep.subr.bf16.mxu0 %v17553_v62  ;;  %v17680_v15 = vcombine.low %v2180_v49, %v2184_v51 }
 0x236   : > { %v2048_v3 = vld [vmem:[%s18208_s22 + $0x3820] sm:$0xff]  ;;  %13359 = vmatpush1.bf16.msra.mxu0 %v17552_v9 }
 0x237   : > { %v2172_v5 = vld [vmem:[%s18208_s22 + $0x3c00] sm:$0xff]  ;;  %v17545_v17 = vcombine.high %v2044_v2, %v2048_v3  ;;  %13399 = vmatprep.subr.bf16.mxu1 %v17681_v25  ;;  %v17544_v21 = vcombine.low %v2044_v2, %v2048_v3 }
 0x238   : > { %v2176_v7 = vld [vmem:[%s18208_s22 + $0x3c20] sm:$0xff]  ;;  %13400 = vmatpush1.bf16.msra.mxu1 %v17680_v15 }
 0x239   : > { %v17673_v16 = vcombine.high %v2172_v5, %v2176_v7  ;;  %v2164_v19 = vld [vmem:[%s18208_s22 + $0x3bc0] sm:$0xff]  ;;  %13360 = vmatprep.subr.bf16.mxu0 %v17545_v17  ;;  %v17672_v50 = vcombine.low %v2172_v5, %v2176_v7 }
 0x23a   : > { %v2168_v28 = vld [vmem:[%s18208_s22 + $0x3be0] sm:$0xff]  ;;  %13361 = vmatpush1.bf16.msra.mxu0 %v17544_v21 }
 0x23b   : > { %v2292_v18 = vld [vmem:[%s18208_s22 + $0x3fc0] sm:$0xff]  ;;  %v17665_v52 = vcombine.high %v2164_v19, %v2168_v28  ;;  %13401 = vmatprep.subr.bf16.mxu1 %v17673_v16  ;;  %v17664_v46 = vcombine.low %v2164_v19, %v2168_v28 }
 0x23c   : > { %v2296_v39 = vld [vmem:[%s18208_s22 + $0x3fe0] sm:$0xff]  ;;  %13402 = vmatpush1.bf16.msra.mxu1 %v17672_v50 }
 0x23d   : > { %v17793_v30 = vcombine.high %v2292_v18, %v2296_v39  ;;  %v2156_v63 = vld [vmem:[%s18208_s22 + $0x3b80] sm:$0xff]  ;;  %13362 = vmatprep.subr.bf16.mxu0 %v17665_v52  ;;  %v17792_v13 = vcombine.low %v2292_v18, %v2296_v39 }
 0x23e   : > { %v2160_v34 = vld [vmem:[%s18208_s22 + $0x3ba0] sm:$0xff]  ;;  %13363 = vmatpush2.bf16.msra.mxu0 %v17664_v46 }
 0x23f   : > { %v2284_v37 = vld [vmem:[%s18208_s22 + $0x3f80] sm:$0xff]  ;;  %v17657_v47 = vcombine.high %v2156_v63, %v2160_v34  ;;  %13403 = vmatprep.subr.bf16.mxu1 %v17793_v30  ;;  %v17656_v25 = vcombine.low %v2156_v63, %v2160_v34 }
 0x240   : > { %v2288_v42 = vld [vmem:[%s18208_s22 + $0x3fa0] sm:$0xff]  ;;  %13404 = vmatpush2.bf16.msra.mxu1 %v17792_v13 }
 0x241   : > { %v17785_v49 = vcombine.high %v2284_v37, %v2288_v42  ;;  %v2148_v51 = vld [vmem:[%s18208_s22 + $0x3b40] sm:$0xff]  ;;  %13364 = vmatprep.subr.bf16.mxu0 %v17657_v47  ;;  %v17784_v2 = vcombine.low %v2284_v37, %v2288_v42 }
 0x242   : > { %v2152_v53 = vld [vmem:[%s18208_s22 + $0x3b60] sm:$0xff]  ;;  %13365 = vmatpush2.bf16.msra.mxu0 %v17656_v25 }
 0x243   : > { %v2276_v58 = vld [vmem:[%s18208_s22 + $0x3f40] sm:$0xff]  ;;  %v17649_v3 = vcombine.high %v2148_v51, %v2152_v53  ;;  %13405 = vmatprep.subr.bf16.mxu1 %v17785_v49  ;;  %v17648_v16 = vcombine.low %v2148_v51, %v2152_v53 }
 0x244   : > { %v2280_v62 = vld [vmem:[%s18208_s22 + $0x3f60] sm:$0xff]  ;;  %13406 = vmatpush2.bf16.msra.mxu1 %v17784_v2 }
 0x245   : > { %v17777_v5 = vcombine.high %v2276_v58, %v2280_v62  ;;  %v2140_v7 = vld [vmem:[%s18208_s22 + $0x3b00] sm:$0xff]  ;;  %13366 = vmatprep.subr.bf16.mxu0 %v17649_v3  ;;  %v17776_v19 = vcombine.low %v2276_v58, %v2280_v62 }
 0x246   : > { %v2144_v9 = vld [vmem:[%s18208_s22 + $0x3b20] sm:$0xff]  ;;  %13367 = vmatpush2.bf16.msra.mxu0 %v17648_v16 }
 0x247   : > { %v2268_v15 = vld [vmem:[%s18208_s22 + $0x3f00] sm:$0xff]  ;;  %v17641_v28 = vcombine.high %v2140_v7, %v2144_v9  ;;  %13407 = vmatprep.subr.bf16.mxu1 %v17777_v5  ;;  %v17640_v30 = vcombine.low %v2140_v7, %v2144_v9 }
 0x248   : > { %v2272_v17 = vld [vmem:[%s18208_s22 + $0x3f20] sm:$0xff]  ;;  %13408 = vmatpush2.bf16.msra.mxu1 %v17776_v19 }
 0x249   : > { %v17769_v18 = vcombine.high %v2268_v15, %v2272_v17  ;;  %v2132_v39 = vld [vmem:[%s18208_s22 + $0x3ac0] sm:$0xff]  ;;  %13368 = vmatprep.subr.bf16.mxu0 %v17641_v28  ;;  %v17768_v63 = vcombine.low %v2268_v15, %v2272_v17 }
 0x24a   : > { %v2136_v21 = vld [vmem:[%s18208_s22 + $0x3ae0] sm:$0xff]  ;;  %13369 = vmatpush2.bf16.msra.mxu0 %v17640_v30  ;;  %v313_v30 = vld [vmem:[%s18208_s22 + $0x1e8] sm:$0xff] }
 0x24b   : > { %v2260_v50 = vld [vmem:[%s18208_s22 + $0x3ec0] sm:$0xff]  ;;  %v17633_v34 = vcombine.high %v2132_v39, %v2136_v21  ;;  %13409 = vmatprep.subr.bf16.mxu1 %v17769_v18  ;;  %v17632_v49 = vcombine.low %v2132_v39, %v2136_v21 }
 0x24c   : > { %v2264_v52 = vld [vmem:[%s18208_s22 + $0x3ee0] sm:$0xff]  ;;  %13410 = vmatpush2.bf16.msra.mxu1 %v17768_v63  ;;  %v437_v63 = vld [vmem:[%s18208_s22 + $0x5c8] sm:$0xff] }
 0x24d   : > { %v17761_v37 = vcombine.high %v2260_v50, %v2264_v52  ;;  %v2124_v42 = vld [vmem:[%s18208_s22 + $0x3a80] sm:$0xff]  ;;  %13370 = vmatprep.subr.bf16.mxu0 %v17633_v34  ;;  %v17760_v51 = vcombine.low %v2260_v50, %v2264_v52  ;;  %v309_v52 = vld [vmem:[%s18208_s22 + $0x1c8] sm:$0xff] }
 0x24e   : > { %v2128_v46 = vld [vmem:[%s18208_s22 + $0x3aa0] sm:$0xff]  ;;  %13371 = vmatpush2.bf16.msra.mxu0 %v17632_v49  ;;  %v441_v34 = vld [vmem:[%s18208_s22 + $0x5e8] sm:$0xff] }
 0x24f   : > { %v2252_v13 = vld [vmem:[%s18208_s22 + $0x3e80] sm:$0xff]  ;;  %v17625_v53 = vcombine.high %v2124_v42, %v2128_v46  ;;  %13411 = vmatprep.subr.bf16.mxu1 %v17761_v37  ;;  %v17624_v5 = vcombine.low %v2124_v42, %v2128_v46  ;;  %v18973_v42 = vrot.slane %v18874_v32, %v18249_v54  ;;  %v301_v49 = vld [vmem:[%s18208_s22 + $0x188] sm:$0xff]  ;;  %v15810_v32 = vcombine.low %v309_v52, %v313_v30  ;;  %v922_v54 = vld [vmem:[%s18208_s22 + $0x14f0] sm:$0xff] }
 0x250   : > { %v2256_v47 = vld [vmem:[%s18208_s22 + $0x3ea0] sm:$0xff]  ;;  %13412 = vmatpush2.bf16.msra.mxu1 %v17760_v51  ;;  %v305_v51 = vld [vmem:[%s18208_s22 + $0x1a8] sm:$0xff] }
 0x251   : > { %v17753_v58 = vcombine.high %v2252_v13, %v2256_v47  ;;  %v2116_v62 = vld [vmem:[%s18208_s22 + $0x3a40] sm:$0xff]  ;;  %13372 = vmatprep.subr.bf16.mxu0 %v17625_v53  ;;  %v17752_v7 = vcombine.low %v2252_v13, %v2256_v47  ;;  %v15811_v13 = vcombine.high %v309_v52, %v313_v30  ;;  %v15939_v47 = vcombine.high %v437_v63, %v441_v34  ;;  %v429_v53 = vld [vmem:[%s18208_s22 + $0x588] sm:$0xff] }
 0x252   : > { %v2120_v25 = vld [vmem:[%s18208_s22 + $0x3a60] sm:$0xff]  ;;  %13373 = vmatpush2.bf16.msra.mxu0 %v17624_v5  ;;  %v293_v5 = vld [vmem:[%s18208_s22 + $0x148] sm:$0xff] }
 0x253   : > { %v2244_v2 = vld [vmem:[%s18208_s22 + $0x3e40] sm:$0xff]  ;;  %v17617_v9 = vcombine.high %v2116_v62, %v2120_v25  ;;  %13413 = vmatprep.subr.bf16.mxu1 %v17753_v58  ;;  %v17616_v18 = vcombine.low %v2116_v62, %v2120_v25  ;;  %v433_v58 = vld [vmem:[%s18208_s22 + $0x5a8] sm:$0xff]  ;;  %v18981_v62 = vcombine.high %v18973_v42, %v18973_v42  ;;  %v15938_v25 = vcombine.low %v437_v63, %v441_v34 }
 0x254   : > { %v2248_v3 = vld [vmem:[%s18208_s22 + $0x3e60] sm:$0xff]  ;;  %13414 = vmatpush2.bf16.msra.mxu1 %v17752_v7  ;;  %v297_v7 = vld [vmem:[%s18208_s22 + $0x168] sm:$0xff] }
 0x255   : > { %v17745_v15 = vcombine.high %v2244_v2, %v2248_v3  ;;  %v2108_v17 = vld [vmem:[%s18208_s22 + $0x3a00] sm:$0xff]  ;;  %13374 = vmatprep.subr.bf16.mxu0 %v17617_v9  ;;  %v17744_v39 = vcombine.low %v2244_v2, %v2248_v3  ;;  %v15803_v2 = vcombine.high %v301_v49, %v305_v51  ;;  %v15931_v3 = vcombine.high %v429_v53, %v433_v58  ;;  %v285_v63 = vld [vmem:[%s18208_s22 + $0x108] sm:$0xff] }
 0x256   : > { %v2112_v16 = vld [vmem:[%s18208_s22 + $0x3a20] sm:$0xff]  ;;  %13375 = vmatpush2.bf16.msra.mxu0 %v17616_v18  ;;  %v289_v34 = vld [vmem:[%s18208_s22 + $0x128] sm:$0xff] }
 0x257   : > { %v2236_v19 = vld [vmem:[%s18208_s22 + $0x3e00] sm:$0xff]  ;;  %v17609_v21 = vcombine.high %v2108_v17, %v2112_v16  ;;  %13415 = vmatprep.subr.bf16.mxu1 %v17745_v15  ;;  %v17608_v37 = vcombine.low %v2108_v17, %v2112_v16  ;;  %v421_v15 = vld [vmem:[%s18208_s22 + $0x548] sm:$0xff] }
 0x258   : > { %v2240_v28 = vld [vmem:[%s18208_s22 + $0x3e20] sm:$0xff]  ;;  %13416 = vmatpush2.bf16.msra.mxu1 %v17744_v39  ;;  %v425_v17 = vld [vmem:[%s18208_s22 + $0x568] sm:$0xff]  ;;  %v15930_v39 = vcombine.low %v429_v53, %v433_v58  ;;  %v15787_v58 = vcombine.high %v285_v63, %v289_v34 }
 0x259   : > { %v17737_v50 = vcombine.high %v2236_v19, %v2240_v28  ;;  %13376 = vmatprep.subr.bf16.mxu0 %v17609_v21  ;;  %v17736_v46 = vcombine.low %v2236_v19, %v2240_v28  ;;  %v15802_v28 = vcombine.low %v301_v49, %v305_v51  ;;  %v15795_v21 = vcombine.high %v293_v5, %v297_v7 }
 0x25a   : > { %13377 = vmatpush2.bf16.msra.mxu0 %v17608_v37  ;;  %v15922_v53 = vcombine.low %v421_v15, %v425_v17 }
 0x25b   : > { %13417 = vmatprep.subr.bf16.mxu1 %v17737_v50  ;;  %13428 = vmatprep.subr.bf16.mxu0 %v15811_v13  ;;  %v417_v13 = vld [vmem:[%s18208_s22 + $0x528] sm:$0xff] }
 0x25c   : > { %13418 = vmatpush2.bf16.msra.mxu1 %v17736_v46  ;;  %v413_v46 = vld [vmem:[%s18208_s22 + $0x508] sm:$0xff] }
 0x25d   : > { %13469 = vmatprep.subr.bf16.mxu1 %v15939_v47  ;;  %v13134_v9 = vpop.f32.mrf.mxu0  ;;  %13379 = vmatmul.mubr.bf16.vlgmr.msra.gmra.mxu0 %v18973_v42 }
 0x25e   : > { %v13135_v16 = vadd.f32 %v13134_v9, %v18908_v38  ;;  %13429 = vmatpush1.bf16.msra.mxu0 %v15810_v32  ;;  %v15923_v38 = vcombine.high %v421_v15, %v425_v17  ;;  %13460 = vmatprep.mubr.bf16.mxu0 %v18271_v10  ;;  %v405_v9 = vld [vmem:[%s18208_s22 + $0x4c8] sm:$0xff] }
 0x25f   : > { %v13175_v19 = vpop.f32.mrf.mxu1  ;;  %13420 = vmatmul.mubr.bf16.vlgmr.msra.gmra.mxu1 %v18981_v62  ;;  %v13136_v18 = vpop.f32.mrf.mxu0  ;;  %13430 = vmatprep.subr.bf16.mxu0 %v15803_v2  ;;  %v277_v2 = vld [vmem:[%s18208_s22 + $0xc8] sm:$0xff] }
 0x260   : > { %13470 = vmatpush1.bf16.msra.mxu1 %v15938_v25  ;;  %v18990_v50 = vadd.f32 %v13175_v19, %v13135_v16  ;;  %v13137_v52 = vadd.f32 %v13136_v18, %v18917_v59  ;;  %13501 = vmatprep.mubr.bf16.mxu1 %v18278_v14  ;;  %v15794_v59 = vcombine.low %v293_v5, %v297_v7  ;;  %v409_v16 = vld [vmem:[%s18208_s22 + $0x4e8] sm:$0xff] }
 0x261   : > { %v13177_v30 = vpop.f32.mrf.mxu1  ;;  %13471 = vmatprep.subr.bf16.mxu1 %v15931_v3  ;;  %v13138_v37 = vpop.f32.mrf.mxu0  ;;  %v15915_v25 = vcombine.high %v413_v46, %v417_v13  ;;  %v281_v3 = vld [vmem:[%s18208_s22 + $0xe8] sm:$0xff]  ;;  %v15786_v19 = vcombine.low %v285_v63, %v289_v34  ;;  %v15914_v5 = vcombine.low %v413_v46, %v417_v13  ;;  %v15907_v15 = vcombine.high %v405_v9, %v409_v16 }
 0x262   : > { %v18999_v47 = vadd.f32 %v13177_v30, %v13137_v52  ;;  %13431 = vmatpush1.bf16.msra.mxu0 %v15802_v28  ;;  %v15779_v7 = vcombine.high %v277_v2, %v281_v3  ;;  %v269_v17 = vld [vmem:[%s18208_s22 + $0x88] sm:$0xff]  ;;  %v15906_v52 = vcombine.low %v405_v9, %v409_v16 }
 0x263   : > { %v13179_v49 = vpop.f32.mrf.mxu1  ;;  %v13139_v51 = vpop.f32.mrf.mxu0  ;;  %13432 = vmatprep.subr.bf16.mxu0 %v15795_v21  ;;  %v273_v28 = vld [vmem:[%s18208_s22 + $0xa8] sm:$0xff]  ;;  %v15778_v21 = vcombine.low %v277_v2, %v281_v3 }
 0x264   : > { %13472 = vmatpush1.bf16.msra.mxu1 %v15930_v39  ;;  %v397_v18 = vld [vmem:[%s18208_s22 + $0x488] sm:$0xff]  ;;  %v15771_v30 = vcombine.high %v269_v17, %v273_v28  ;;  %v15770_v13 = vcombine.low %v269_v17, %v273_v28 }
 0x265   : > { %v13180_v32 = vpop.f32.mrf.mxu1  ;;  %13473 = vmatprep.subr.bf16.mxu1 %v15923_v38  ;;  %v401_v39 = vld [vmem:[%s18208_s22 + $0x4a8] sm:$0xff] }
 0x266   : > { %13433 = vmatpush1.bf16.msra.mxu0 %v15794_v59  ;;  %v15899_v38 = vcombine.high %v397_v18, %v401_v39  ;;  %v261_v63 = vld [vmem:[%s18208_s22 + $0x48] sm:$0xff]  ;;  %v15898_v49 = vcombine.low %v397_v18, %v401_v39 }
 0x267   : > { %13434 = vmatprep.subr.bf16.mxu0 %v15787_v58  ;;  %v265_v34 = vld [vmem:[%s18208_s22 + $0x68] sm:$0xff] }
 0x268   : > { %13474 = vmatpush1.bf16.msra.mxu1 %v15922_v53  ;;  %v389_v37 = vld [vmem:[%s18208_s22 + $0x448] sm:$0xff]  ;;  %v15763_v59 = vcombine.high %v261_v63, %v265_v34  ;;  %v15762_v2 = vcombine.low %v261_v63, %v265_v34 }
 0x269   : > { %13475 = vmatprep.subr.bf16.mxu1 %v15915_v25  ;;  %v393_v46 = vld [vmem:[%s18208_s22 + $0x468] sm:$0xff] }
 0x26a   : > { %13435 = vmatpush1.bf16.msra.mxu0 %v15786_v19  ;;  %v15891_v51 = vcombine.high %v389_v37, %v393_v46  ;;  %v253_v53 = vld [vmem:[%s18208_s22 + $0x8] sm:$0xff]  ;;  %v15890_v3 = vcombine.low %v389_v37, %v393_v46 }
 0x26b   : > { %13436 = vmatprep.subr.bf16.mxu0 %v15779_v7  ;;  %v257_v58 = vld [vmem:[%s18208_s22 + $0x28] sm:$0xff] }
 0x26c   : > { %13476 = vmatpush1.bf16.msra.mxu1 %v15914_v5  ;;  %v381_v32 = vld [vmem:[%s18208_s22 + $0x408] sm:$0xff]  ;;  %v15755_v9 = vcombine.high %v253_v53, %v257_v58  ;;  %v15754_v17 = vcombine.low %v253_v53, %v257_v58 }
 0x26d   : > { %13477 = vmatprep.subr.bf16.mxu1 %v15907_v15  ;;  %v385_v25 = vld [vmem:[%s18208_s22 + $0x428] sm:$0xff] }
 0x26e   : > { %13437 = vmatpush1.bf16.msra.mxu0 %v15778_v21  ;;  %v15883_v16 = vcombine.high %v381_v32, %v385_v25  ;;  %v373_v19 = vld [vmem:[%s18208_s22 + $0x3c8] sm:$0xff]  ;;  %v15882_v28 = vcombine.low %v381_v32, %v385_v25 }
 0x26f   : > { %13438 = vmatprep.subr.bf16.mxu0 %v15771_v30  ;;  %v377_v5 = vld [vmem:[%s18208_s22 + $0x3e8] sm:$0xff] }
 0x270   : > { %13478 = vmatpush1.bf16.msra.mxu1 %v15906_v52  ;;  %v501_v7 = vld [vmem:[%s18208_s22 + $0x7c8] sm:$0xff]  ;;  %v15875_v18 = vcombine.high %v373_v19, %v377_v5  ;;  %v15874_v63 = vcombine.low %v373_v19, %v377_v5 }
 0x271   : > { %13479 = vmatprep.subr.bf16.mxu1 %v15899_v38  ;;  %v505_v15 = vld [vmem:[%s18208_s22 + $0x7e8] sm:$0xff] }
 0x272   : > { %13439 = vmatpush1.bf16.msra.mxu0 %v15770_v13  ;;  %v16003_v39 = vcombine.high %v501_v7, %v505_v15  ;;  %v365_v21 = vld [vmem:[%s18208_s22 + $0x388] sm:$0xff]  ;;  %v16002_v34 = vcombine.low %v501_v7, %v505_v15 }
 0x273   : > { %13440 = vmatprep.subr.bf16.mxu0 %v15763_v59  ;;  %v369_v52 = vld [vmem:[%s18208_s22 + $0x3a8] sm:$0xff] }
 0x274   : > { %13480 = vmatpush1.bf16.msra.mxu1 %v15898_v49  ;;  %v493_v30 = vld [vmem:[%s18208_s22 + $0x788] sm:$0xff]  ;;  %v15867_v37 = vcombine.high %v365_v21, %v369_v52  ;;  %v15866_v53 = vcombine.low %v365_v21, %v369_v52 }
 0x275   : > { %13481 = vmatprep.subr.bf16.mxu1 %v15891_v51  ;;  %v497_v38 = vld [vmem:[%s18208_s22 + $0x7a8] sm:$0xff] }
 0x276   : > { %13441 = vmatpush1.bf16.msra.mxu0 %v15762_v2  ;;  %v15995_v46 = vcombine.high %v493_v30, %v497_v38  ;;  %v357_v13 = vld [vmem:[%s18208_s22 + $0x348] sm:$0xff]  ;;  %v15994_v58 = vcombine.low %v493_v30, %v497_v38 }
 0x277   : > { %13442 = vmatprep.subr.bf16.mxu0 %v15755_v9  ;;  %v361_v49 = vld [vmem:[%s18208_s22 + $0x368] sm:$0xff] }
 0x278   : > { %13482 = vmatpush1.bf16.msra.mxu1 %v15890_v3  ;;  %v485_v59 = vld [vmem:[%s18208_s22 + $0x748] sm:$0xff]  ;;  %v15859_v32 = vcombine.high %v357_v13, %v361_v49  ;;  %v15858_v19 = vcombine.low %v357_v13, %v361_v49 }
 0x279   : > { %13483 = vmatprep.subr.bf16.mxu1 %v15883_v16  ;;  %v489_v51 = vld [vmem:[%s18208_s22 + $0x768] sm:$0xff] }
 0x27a   : > { %13443 = vmatpush1.bf16.msra.mxu0 %v15754_v17  ;;  %v15987_v25 = vcombine.high %v485_v59, %v489_v51  ;;  %v349_v2 = vld [vmem:[%s18208_s22 + $0x308] sm:$0xff]  ;;  %v15986_v5 = vcombine.low %v485_v59, %v489_v51 }
 0x27b   : > { %13444 = vmatprep.subr.bf16.mxu0 %v15875_v18  ;;  %v353_v3 = vld [vmem:[%s18208_s22 + $0x328] sm:$0xff] }
 0x27c   : > { %13484 = vmatpush1.bf16.msra.mxu1 %v15882_v28  ;;  %v477_v9 = vld [vmem:[%s18208_s22 + $0x708] sm:$0xff]  ;;  %v15851_v7 = vcombine.high %v349_v2, %v353_v3  ;;  %v15850_v21 = vcombine.low %v349_v2, %v353_v3 }
 0x27d   : > { %13485 = vmatprep.subr.bf16.mxu1 %v16003_v39  ;;  %v481_v16 = vld [vmem:[%s18208_s22 + $0x728] sm:$0xff] }
 0x27e   : > { %13445 = vmatpush2.bf16.msra.mxu0 %v15874_v63  ;;  %v15979_v15 = vcombine.high %v477_v9, %v481_v16  ;;  %v341_v17 = vld [vmem:[%s18208_s22 + $0x2c8] sm:$0xff]  ;;  %v15978_v52 = vcombine.low %v477_v9, %v481_v16 }
 0x27f   : > { %13446 = vmatprep.subr.bf16.mxu0 %v15867_v37  ;;  %v345_v28 = vld [vmem:[%s18208_s22 + $0x2e8] sm:$0xff] }
 0x280   : > { %13486 = vmatpush2.bf16.msra.mxu1 %v16002_v34  ;;  %v469_v18 = vld [vmem:[%s18208_s22 + $0x6c8] sm:$0xff]  ;;  %v15843_v30 = vcombine.high %v341_v17, %v345_v28  ;;  %v15842_v13 = vcombine.low %v341_v17, %v345_v28 }
 0x281   : > { %13487 = vmatprep.subr.bf16.mxu1 %v15995_v46  ;;  %v473_v39 = vld [vmem:[%s18208_s22 + $0x6e8] sm:$0xff] }
 0x282   : > { %13447 = vmatpush2.bf16.msra.mxu0 %v15866_v53  ;;  %v15971_v38 = vcombine.high %v469_v18, %v473_v39  ;;  %v333_v63 = vld [vmem:[%s18208_s22 + $0x288] sm:$0xff]  ;;  %v15970_v49 = vcombine.low %v469_v18, %v473_v39 }
 0x283   : > { %13448 = vmatprep.subr.bf16.mxu0 %v15859_v32  ;;  %v337_v34 = vld [vmem:[%s18208_s22 + $0x2a8] sm:$0xff] }
 0x284   : > { %13488 = vmatpush2.bf16.msra.mxu1 %v15994_v58  ;;  %v461_v37 = vld [vmem:[%s18208_s22 + $0x688] sm:$0xff]  ;;  %v15835_v59 = vcombine.high %v333_v63, %v337_v34  ;;  %v15834_v2 = vcombine.low %v333_v63, %v337_v34 }
 0x285   : > { %13489 = vmatprep.subr.bf16.mxu1 %v15987_v25  ;;  %v465_v46 = vld [vmem:[%s18208_s22 + $0x6a8] sm:$0xff] }
 0x286   : > { %13449 = vmatpush2.bf16.msra.mxu0 %v15858_v19  ;;  %v15963_v51 = vcombine.high %v461_v37, %v465_v46  ;;  %v325_v53 = vld [vmem:[%s18208_s22 + $0x248] sm:$0xff]  ;;  %v15962_v3 = vcombine.low %v461_v37, %v465_v46 }
 0x287   : > { %13450 = vmatprep.subr.bf16.mxu0 %v15851_v7  ;;  %v329_v58 = vld [vmem:[%s18208_s22 + $0x268] sm:$0xff] }
 0x288   : > { %13490 = vmatpush2.bf16.msra.mxu1 %v15986_v5  ;;  %v453_v32 = vld [vmem:[%s18208_s22 + $0x648] sm:$0xff]  ;;  %v15827_v9 = vcombine.high %v325_v53, %v329_v58  ;;  %v15826_v17 = vcombine.low %v325_v53, %v329_v58 }
 0x289   : > { %13491 = vmatprep.subr.bf16.mxu1 %v15979_v15  ;;  %v457_v25 = vld [vmem:[%s18208_s22 + $0x668] sm:$0xff] }
 0x28a   : > { %13451 = vmatpush2.bf16.msra.mxu0 %v15850_v21  ;;  %v15955_v16 = vcombine.high %v453_v32, %v457_v25  ;;  %v317_v19 = vld [vmem:[%s18208_s22 + $0x208] sm:$0xff]  ;;  %v15954_v28 = vcombine.low %v453_v32, %v457_v25 }
 0x28b   : > { %13452 = vmatprep.subr.bf16.mxu0 %v15843_v30  ;;  %v321_v5 = vld [vmem:[%s18208_s22 + $0x228] sm:$0xff] }
 0x28c   : > { %13492 = vmatpush2.bf16.msra.mxu1 %v15978_v52  ;;  %v445_v7 = vld [vmem:[%s18208_s22 + $0x608] sm:$0xff]  ;;  %v15819_v18 = vcombine.high %v317_v19, %v321_v5  ;;  %v15818_v63 = vcombine.low %v317_v19, %v321_v5 }
 0x28d   : > { %13493 = vmatprep.subr.bf16.mxu1 %v15971_v38  ;;  %v449_v15 = vld [vmem:[%s18208_s22 + $0x628] sm:$0xff] }
 0x28e   : > { %13453 = vmatpush2.bf16.msra.mxu0 %v15842_v13  ;;  %v15947_v39 = vcombine.high %v445_v7, %v449_v15  ;;  %v565_v21 = vld [vmem:[%s18208_s22 + $0x9c8] sm:$0xff]  ;;  %v15946_v34 = vcombine.low %v445_v7, %v449_v15 }
 0x28f   : > { %13454 = vmatprep.subr.bf16.mxu0 %v15835_v59  ;;  %v569_v52 = vld [vmem:[%s18208_s22 + $0x9e8] sm:$0xff] }
 0x290   : > { %13494 = vmatpush2.bf16.msra.mxu1 %v15970_v49  ;;  %v693_v30 = vld [vmem:[%s18208_s22 + $0xdc8] sm:$0xff]  ;;  %v16067_v37 = vcombine.high %v565_v21, %v569_v52  ;;  %v16066_v53 = vcombine.low %v565_v21, %v569_v52 }
 0x291   : > { %13495 = vmatprep.subr.bf16.mxu1 %v15963_v51  ;;  %v697_v38 = vld [vmem:[%s18208_s22 + $0xde8] sm:$0xff] }
 0x292   : > { %13455 = vmatpush2.bf16.msra.mxu0 %v15834_v2  ;;  %v16195_v46 = vcombine.high %v693_v30, %v697_v38  ;;  %v557_v13 = vld [vmem:[%s18208_s22 + $0x988] sm:$0xff]  ;;  %v16194_v58 = vcombine.low %v693_v30, %v697_v38 }
 0x293   : > { %13456 = vmatprep.subr.bf16.mxu0 %v15827_v9  ;;  %v561_v49 = vld [vmem:[%s18208_s22 + $0x9a8] sm:$0xff] }
 0x294   : > { %13496 = vmatpush2.bf16.msra.mxu1 %v15962_v3  ;;  %v685_v59 = vld [vmem:[%s18208_s22 + $0xd88] sm:$0xff]  ;;  %v16059_v32 = vcombine.high %v557_v13, %v561_v49  ;;  %v16058_v15 = vcombine.low %v557_v13, %v561_v49 }
 0x295   : > { %13497 = vmatprep.subr.bf16.mxu1 %v15955_v16  ;;  %v689_v51 = vld [vmem:[%s18208_s22 + $0xda8] sm:$0xff] }
 0x296   : > { %13457 = vmatpush2.bf16.msra.mxu0 %v15826_v17  ;;  %v16187_v25 = vcombine.high %v685_v59, %v689_v51  ;;  %v549_v2 = vld [vmem:[%s18208_s22 + $0x948] sm:$0xff] }
 0x297   : > { %13458 = vmatprep.subr.bf16.mxu0 %v15819_v18  ;;  %v553_v3 = vld [vmem:[%s18208_s22 + $0x968] sm:$0xff] }
 0x298   : > { %13498 = vmatpush2.bf16.msra.mxu1 %v15954_v28  ;;  %v677_v16 = vld [vmem:[%s18208_s22 + $0xd48] sm:$0xff]  ;;  %v16186_v28 = vcombine.low %v685_v59, %v689_v51  ;;  %v16051_v18 = vcombine.high %v549_v2, %v553_v3 }
 0x299   : > { %13499 = vmatprep.subr.bf16.mxu1 %v15947_v39  ;;  %v681_v19 = vld [vmem:[%s18208_s22 + $0xd68] sm:$0xff] }
 0x29a   : > { %13459 = vmatpush2.bf16.msra.mxu0 %v15818_v63  ;;  %v541_v30 = vld [vmem:[%s18208_s22 + $0x908] sm:$0xff]  ;;  %v16178_v59 = vcombine.low %v677_v16, %v681_v19 }
 0x29b   : > { %13510 = vmatprep.subr.bf16.mxu0 %v16067_v37  ;;  %v545_v38 = vld [vmem:[%s18208_s22 + $0x928] sm:$0xff] }
 0x29c   : > { %13500 = vmatpush2.bf16.msra.mxu1 %v15946_v34  ;;  %v669_v34 = vld [vmem:[%s18208_s22 + $0xd08] sm:$0xff]  ;;  %v16043_v51 = vcombine.high %v541_v30, %v545_v38 }
 0x29d   : > { %13551 = vmatprep.subr.bf16.mxu1 %v16195_v46  ;;  %v13216_v9 = vpop.f32.mrf.mxu0  ;;  %13461 = vmatmul.mubr.bf16.vlgmr.msra.gmra.mxu0 %v18322_v23  ;;  %v673_v37 = vld [vmem:[%s18208_s22 + $0xd28] sm:$0xff] }
 0x29e   : > { %v13217_v5 = vadd.f32 %v13216_v9, %v18990_v50  ;;  %13511 = vmatpush1.bf16.msra.mxu0 %v16066_v53  ;;  %v16179_v50 = vcombine.high %v677_v16, %v681_v19  ;;  %13542 = vmatprep.mubr.bf16.mxu0 %v18329_v31  ;;  %v661_v9 = vld [vmem:[%s18208_s22 + $0xcc8] sm:$0xff] }
 0x29f   : > { %v13257_v7 = vpop.f32.mrf.mxu1  ;;  %13502 = vmatmul.mubr.bf16.vlgmr.msra.gmra.mxu1 %v18333_v0  ;;  %v13218_v17 = vpop.f32.mrf.mxu0  ;;  %13512 = vmatprep.subr.bf16.mxu0 %v16059_v32  ;;  %v533_v32 = vld [vmem:[%s18208_s22 + $0x8c8] sm:$0xff] }
 0x2a0   : > { %13552 = vmatpush1.bf16.msra.mxu1 %v16194_v58  ;;  %v19064_v39 = vadd.f32 %v13257_v7, %v13217_v5  ;;  %v13219_v21 = vadd.f32 %v13218_v17, %v18999_v47  ;;  %13583 = vmatprep.mubr.bf16.mxu1 %v18342_v40  ;;  %v16050_v47 = vcombine.low %v549_v2, %v553_v3  ;;  %v665_v5 = vld [vmem:[%s18208_s22 + $0xce8] sm:$0xff] }
 0x2a1   : > { %v13259_v52 = vpop.f32.mrf.mxu1  ;;  %13553 = vmatprep.subr.bf16.mxu1 %v16187_v25  ;;  %v13220_v63 = vpop.f32.mrf.mxu0  ;;  %v16171_v58 = vcombine.high %v669_v34, %v673_v37  ;;  %v537_v25 = vld [vmem:[%s18208_s22 + $0x8e8] sm:$0xff]  ;;  %v16042_v7 = vcombine.low %v541_v30, %v545_v38  ;;  %v16170_v2 = vcombine.low %v669_v34, %v673_v37  ;;  %v16163_v16 = vcombine.high %v661_v9, %v665_v5 }
 0x2a2   : > { %v19073_v46 = vadd.f32 %v13259_v52, %v13219_v21  ;;  %13513 = vmatpush1.bf16.msra.mxu0 %v16058_v15  ;;  %v16035_v3 = vcombine.high %v533_v32, %v537_v25  ;;  %v525_v19 = vld [vmem:[%s18208_s22 + $0x888] sm:$0xff]  ;;  %v16162_v21 = vcombine.low %v661_v9, %v665_v5 }
 0x2a3   : > { %v13261_v13 = vpop.f32.mrf.mxu1  ;;  %v13221_v49 = vpop.f32.mrf.mxu0  ;;  %13514 = vmatprep.subr.bf16.mxu0 %v16051_v18  ;;  %v529_v15 = vld [vmem:[%s18208_s22 + $0x8a8] sm:$0xff]  ;;  %v16034_v18 = vcombine.low %v533_v32, %v537_v25 }
 0x2a4   : > { %13554 = vmatpush1.bf16.msra.mxu1 %v16186_v28  ;;  %v653_v17 = vld [vmem:[%s18208_s22 + $0xc88] sm:$0xff]  ;;  %v16027_v52 = vcombine.high %v525_v19, %v529_v15  ;;  %v16026_v37 = vcombine.low %v525_v19, %v529_v15 }
 0x2a5   : > { %v13262_v53 = vpop.f32.mrf.mxu1  ;;  %13555 = vmatprep.subr.bf16.mxu1 %v16179_v50  ;;  %v657_v28 = vld [vmem:[%s18208_s22 + $0xca8] sm:$0xff] }
 0x2a6   : > { %13515 = vmatpush1.bf16.msra.mxu0 %v16050_v47  ;;  %v16155_v50 = vcombine.high %v653_v17, %v657_v28  ;;  %v517_v30 = vld [vmem:[%s18208_s22 + $0x848] sm:$0xff]  ;;  %v16154_v13 = vcombine.low %v653_v17, %v657_v28 }
 0x2a7   : > { %13516 = vmatprep.subr.bf16.mxu0 %v16043_v51  ;;  %v521_v38 = vld [vmem:[%s18208_s22 + $0x868] sm:$0xff] }
 0x2a8   : > { %13556 = vmatpush1.bf16.msra.mxu1 %v16178_v59  ;;  %v645_v63 = vld [vmem:[%s18208_s22 + $0xc48] sm:$0xff]  ;;  %v16019_v47 = vcombine.high %v517_v30, %v521_v38  ;;  %v16018_v32 = vcombine.low %v517_v30, %v521_v38 }
 0x2a9   : > { %13557 = vmatprep.subr.bf16.mxu1 %v16171_v58  ;;  %v649_v34 = vld [vmem:[%s18208_s22 + $0xc68] sm:$0xff] }
 0x2aa   : > { %13517 = vmatpush1.bf16.msra.mxu0 %v16042_v7  ;;  %v16147_v49 = vcombine.high %v645_v63, %v649_v34  ;;  %v509_v59 = vld [vmem:[%s18208_s22 + $0x808] sm:$0xff]  ;;  %v16146_v25 = vcombine.low %v645_v63, %v649_v34 }
 0x2ab   : > { %13518 = vmatprep.subr.bf16.mxu0 %v16035_v3  ;;  %v513_v51 = vld [vmem:[%s18208_s22 + $0x828] sm:$0xff] }
 0x2ac   : > { %13558 = vmatpush1.bf16.msra.mxu1 %v16170_v2  ;;  %v637_v53 = vld [vmem:[%s18208_s22 + $0xc08] sm:$0xff]  ;;  %v16011_v9 = vcombine.high %v509_v59, %v513_v51  ;;  %v16010_v19 = vcombine.low %v509_v59, %v513_v51 }
 0x2ad   : > { %13559 = vmatprep.subr.bf16.mxu1 %v16163_v16  ;;  %v641_v58 = vld [vmem:[%s18208_s22 + $0xc28] sm:$0xff] }
 0x2ae   : > { %13519 = vmatpush1.bf16.msra.mxu0 %v16034_v18  ;;  %v16139_v5 = vcombine.high %v637_v53, %v641_v58  ;;  %v629_v7 = vld [vmem:[%s18208_s22 + $0xbc8] sm:$0xff]  ;;  %v16138_v15 = vcombine.low %v637_v53, %v641_v58 }
 0x2af   : > { %13520 = vmatprep.subr.bf16.mxu0 %v16027_v52  ;;  %v633_v2 = vld [vmem:[%s18208_s22 + $0xbe8] sm:$0xff] }
 0x2b0   : > { %13560 = vmatpush1.bf16.msra.mxu1 %v16162_v21  ;;  %v757_v3 = vld [vmem:[%s18208_s22 + $0xfc8] sm:$0xff]  ;;  %v16131_v17 = vcombine.high %v629_v7, %v633_v2  ;;  %v16130_v30 = vcombine.low %v629_v7, %v633_v2 }
 0x2b1   : > { %13561 = vmatprep.subr.bf16.mxu1 %v16155_v50  ;;  %v761_v16 = vld [vmem:[%s18208_s22 + $0xfe8] sm:$0xff] }
 0x2b2   : > { %13521 = vmatpush1.bf16.msra.mxu0 %v16026_v37  ;;  %v16259_v28 = vcombine.high %v757_v3, %v761_v16  ;;  %v621_v18 = vld [vmem:[%s18208_s22 + $0xb88] sm:$0xff]  ;;  %v16258_v38 = vcombine.low %v757_v3, %v761_v16 }
 0x2b3   : > { %13522 = vmatprep.subr.bf16.mxu0 %v16019_v47  ;;  %v625_v21 = vld [vmem:[%s18208_s22 + $0xba8] sm:$0xff] }
 0x2b4   : > { %13562 = vmatpush1.bf16.msra.mxu1 %v16154_v13  ;;  %v749_v52 = vld [vmem:[%s18208_s22 + $0xf88] sm:$0xff]  ;;  %v16123_v63 = vcombine.high %v621_v18, %v625_v21  ;;  %v16122_v59 = vcombine.low %v621_v18, %v625_v21 }
 0x2b5   : > { %13563 = vmatprep.subr.bf16.mxu1 %v16147_v49  ;;  %v753_v50 = vld [vmem:[%s18208_s22 + $0xfa8] sm:$0xff] }
 0x2b6   : > { %13523 = vmatpush1.bf16.msra.mxu0 %v16018_v32  ;;  %v16251_v34 = vcombine.high %v749_v52, %v753_v50  ;;  %v613_v37 = vld [vmem:[%s18208_s22 + $0xb48] sm:$0xff]  ;;  %v16250_v51 = vcombine.low %v749_v52, %v753_v50 }
 0x2b7   : > { %13524 = vmatprep.subr.bf16.mxu0 %v16011_v9  ;;  %v617_v13 = vld [vmem:[%s18208_s22 + $0xb68] sm:$0xff] }
 0x2b8   : > { %13564 = vmatpush1.bf16.msra.mxu1 %v16146_v25  ;;  %v741_v47 = vld [vmem:[%s18208_s22 + $0xf48] sm:$0xff]  ;;  %v16115_v53 = vcombine.high %v613_v37, %v617_v13  ;;  %v16114_v7 = vcombine.low %v613_v37, %v617_v13 }
 0x2b9   : > { %13565 = vmatprep.subr.bf16.mxu1 %v16139_v5  ;;  %v745_v49 = vld [vmem:[%s18208_s22 + $0xf68] sm:$0xff] }
 0x2ba   : > { %13525 = vmatpush1.bf16.msra.mxu0 %v16010_v19  ;;  %v16243_v58 = vcombine.high %v741_v47, %v745_v49  ;;  %v605_v32 = vld [vmem:[%s18208_s22 + $0xb08] sm:$0xff]  ;;  %v16242_v2 = vcombine.low %v741_v47, %v745_v49 }
 0x2bb   : > { %13526 = vmatprep.subr.bf16.mxu0 %v16131_v17  ;;  %v609_v25 = vld [vmem:[%s18208_s22 + $0xb28] sm:$0xff] }
 0x2bc   : > { %13566 = vmatpush1.bf16.msra.mxu1 %v16138_v15  ;;  %v733_v9 = vld [vmem:[%s18208_s22 + $0xf08] sm:$0xff]  ;;  %v16107_v3 = vcombine.high %v605_v32, %v609_v25  ;;  %v16106_v18 = vcombine.low %v605_v32, %v609_v25 }
 0x2bd   : > { %13567 = vmatprep.subr.bf16.mxu1 %v16259_v28  ;;  %v737_v5 = vld [vmem:[%s18208_s22 + $0xf28] sm:$0xff] }
 0x2be   : > { %13527 = vmatpush2.bf16.msra.mxu0 %v16130_v30  ;;  %v16235_v16 = vcombine.high %v733_v9, %v737_v5  ;;  %v597_v19 = vld [vmem:[%s18208_s22 + $0xac8] sm:$0xff]  ;;  %v16234_v21 = vcombine.low %v733_v9, %v737_v5 }
 0x2bf   : > { %13528 = vmatprep.subr.bf16.mxu0 %v16123_v63  ;;  %v601_v15 = vld [vmem:[%s18208_s22 + $0xae8] sm:$0xff] }
 0x2c0   : > { %13568 = vmatpush2.bf16.msra.mxu1 %v16258_v38  ;;  %v725_v17 = vld [vmem:[%s18208_s22 + $0xec8] sm:$0xff]  ;;  %v16099_v52 = vcombine.high %v597_v19, %v601_v15  ;;  %v16098_v37 = vcombine.low %v597_v19, %v601_v15 }
 0x2c1   : > { %13569 = vmatprep.subr.bf16.mxu1 %v16251_v34  ;;  %v729_v28 = vld [vmem:[%s18208_s22 + $0xee8] sm:$0xff] }
 0x2c2   : > { %13529 = vmatpush2.bf16.msra.mxu0 %v16122_v59  ;;  %v16227_v50 = vcombine.high %v725_v17, %v729_v28  ;;  %v589_v30 = vld [vmem:[%s18208_s22 + $0xa88] sm:$0xff]  ;;  %v16226_v13 = vcombine.low %v725_v17, %v729_v28 }
 0x2c3   : > { %13530 = vmatprep.subr.bf16.mxu0 %v16115_v53  ;;  %v593_v38 = vld [vmem:[%s18208_s22 + $0xaa8] sm:$0xff] }
 0x2c4   : > { %13570 = vmatpush2.bf16.msra.mxu1 %v16250_v51  ;;  %v717_v63 = vld [vmem:[%s18208_s22 + $0xe88] sm:$0xff]  ;;  %v16091_v47 = vcombine.high %v589_v30, %v593_v38  ;;  %v16090_v32 = vcombine.low %v589_v30, %v593_v38 }
 0x2c5   : > { %13571 = vmatprep.subr.bf16.mxu1 %v16243_v58  ;;  %v721_v34 = vld [vmem:[%s18208_s22 + $0xea8] sm:$0xff] }
 0x2c6   : > { %13531 = vmatpush2.bf16.msra.mxu0 %v16114_v7  ;;  %v16219_v49 = vcombine.high %v717_v63, %v721_v34  ;;  %v581_v59 = vld [vmem:[%s18208_s22 + $0xa48] sm:$0xff]  ;;  %v16218_v25 = vcombine.low %v717_v63, %v721_v34 }
 0x2c7   : > { %13532 = vmatprep.subr.bf16.mxu0 %v16107_v3  ;;  %v585_v51 = vld [vmem:[%s18208_s22 + $0xa68] sm:$0xff] }
 0x2c8   : > { %13572 = vmatpush2.bf16.msra.mxu1 %v16242_v2  ;;  %v709_v53 = vld [vmem:[%s18208_s22 + $0xe48] sm:$0xff]  ;;  %v16083_v9 = vcombine.high %v581_v59, %v585_v51  ;;  %v16082_v19 = vcombine.low %v581_v59, %v585_v51 }
 0x2c9   : > { %13573 = vmatprep.subr.bf16.mxu1 %v16235_v16  ;;  %v713_v58 = vld [vmem:[%s18208_s22 + $0xe68] sm:$0xff] }
 0x2ca   : > { %13533 = vmatpush2.bf16.msra.mxu0 %v16106_v18  ;;  %v16211_v5 = vcombine.high %v709_v53, %v713_v58  ;;  %v573_v7 = vld [vmem:[%s18208_s22 + $0xa08] sm:$0xff]  ;;  %v16210_v15 = vcombine.low %v709_v53, %v713_v58 }
 0x2cb   : > { %13534 = vmatprep.subr.bf16.mxu0 %v16099_v52  ;;  %v577_v2 = vld [vmem:[%s18208_s22 + $0xa28] sm:$0xff] }
 0x2cc   : > { %13574 = vmatpush2.bf16.msra.mxu1 %v16234_v21  ;;  %v701_v3 = vld [vmem:[%s18208_s22 + $0xe08] sm:$0xff]  ;;  %v16075_v17 = vcombine.high %v573_v7, %v577_v2  ;;  %v16074_v30 = vcombine.low %v573_v7, %v577_v2 }
 0x2cd   : > { %13575 = vmatprep.subr.bf16.mxu1 %v16227_v50  ;;  %v705_v16 = vld [vmem:[%s18208_s22 + $0xe28] sm:$0xff] }
 0x2ce   : > { %13535 = vmatpush2.bf16.msra.mxu0 %v16098_v37  ;;  %v16203_v28 = vcombine.high %v701_v3, %v705_v16  ;;  %v821_v18 = vld [vmem:[%s18208_s22 + $0x11c8] sm:$0xff]  ;;  %v16202_v38 = vcombine.low %v701_v3, %v705_v16 }
 0x2cf   : > { %13536 = vmatprep.subr.bf16.mxu0 %v16091_v47  ;;  %v825_v21 = vld [vmem:[%s18208_s22 + $0x11e8] sm:$0xff] }
 0x2d0   : > { %13576 = vmatpush2.bf16.msra.mxu1 %v16226_v13  ;;  %v949_v52 = vld [vmem:[%s18208_s22 + $0x15c8] sm:$0xff]  ;;  %v16323_v63 = vcombine.high %v821_v18, %v825_v21  ;;  %v16322_v59 = vcombine.low %v821_v18, %v825_v21 }
 0x2d1   : > { %13577 = vmatprep.subr.bf16.mxu1 %v16219_v49  ;;  %v953_v50 = vld [vmem:[%s18208_s22 + $0x15e8] sm:$0xff] }
 0x2d2   : > { %13537 = vmatpush2.bf16.msra.mxu0 %v16090_v32  ;;  %v16451_v34 = vcombine.high %v949_v52, %v953_v50  ;;  %v813_v37 = vld [vmem:[%s18208_s22 + $0x1188] sm:$0xff]  ;;  %v16450_v51 = vcombine.low %v949_v52, %v953_v50 }
 0x2d3   : > { %13538 = vmatprep.subr.bf16.mxu0 %v16083_v9  ;;  %v817_v13 = vld [vmem:[%s18208_s22 + $0x11a8] sm:$0xff] }
 0x2d4   : > { %13578 = vmatpush2.bf16.msra.mxu1 %v16218_v25  ;;  %v941_v47 = vld [vmem:[%s18208_s22 + $0x1588] sm:$0xff]  ;;  %v16315_v53 = vcombine.high %v813_v37, %v817_v13  ;;  %v16314_v16 = vcombine.low %v813_v37, %v817_v13 }
 0x2d5   : > { %13579 = vmatprep.subr.bf16.mxu1 %v16211_v5  ;;  %v945_v49 = vld [vmem:[%s18208_s22 + $0x15a8] sm:$0xff] }
 0x2d6   : > { %13539 = vmatpush2.bf16.msra.mxu0 %v16082_v19  ;;  %v16443_v58 = vcombine.high %v941_v47, %v945_v49  ;;  %v805_v32 = vld [vmem:[%s18208_s22 + $0x1148] sm:$0xff] }
 0x2d7   : > { %13540 = vmatprep.subr.bf16.mxu0 %v16075_v17  ;;  %v809_v25 = vld [vmem:[%s18208_s22 + $0x1168] sm:$0xff] }
 0x2d8   : > { %13580 = vmatpush2.bf16.msra.mxu1 %v16210_v15  ;;  %v933_v5 = vld [vmem:[%s18208_s22 + $0x1548] sm:$0xff]  ;;  %v16442_v15 = vcombine.low %v941_v47, %v945_v49  ;;  %v16307_v17 = vcombine.high %v805_v32, %v809_v25 }
 0x2d9   : > { %13581 = vmatprep.subr.bf16.mxu1 %v16203_v28  ;;  %v937_v7 = vld [vmem:[%s18208_s22 + $0x1568] sm:$0xff] }
 0x2da   : > { %13541 = vmatpush2.bf16.msra.mxu0 %v16074_v30  ;;  %v797_v52 = vld [vmem:[%s18208_s22 + $0x1108] sm:$0xff]  ;;  %v16434_v47 = vcombine.low %v933_v5, %v937_v7 }
 0x2db   : > { %13592 = vmatprep.subr.bf16.mxu0 %v16323_v63  ;;  %v801_v50 = vld [vmem:[%s18208_s22 + $0x1128] sm:$0xff] }
 0x2dc   : > { %13582 = vmatpush2.bf16.msra.mxu1 %v16202_v38  ;;  %v925_v38 = vld [vmem:[%s18208_s22 + $0x1508] sm:$0xff]  ;;  %v16299_v49 = vcombine.high %v797_v52, %v801_v50 }
 0x2dd   : > { %13633 = vmatprep.subr.bf16.mxu1 %v16451_v34  ;;  %v13298_v9 = vpop.f32.mrf.mxu0  ;;  %13543 = vmatmul.mubr.bf16.vlgmr.msra.gmra.mxu0 %v18414_v48  ;;  %v929_v63 = vld [vmem:[%s18208_s22 + $0x1528] sm:$0xff] }
 0x2de   : > { %v13299_v2 = vadd.f32 %v13298_v9, %v19064_v39  ;;  %13593 = vmatpush1.bf16.msra.mxu0 %v16322_v59  ;;  %v16435_v39 = vcombine.high %v933_v5, %v937_v7  ;;  %13624 = vmatprep.mubr.bf16.mxu0 %v18421_v57  ;;  %v917_v9 = vld [vmem:[%s18208_s22 + $0x14c8] sm:$0xff] }
 0x2df   : > { %v13339_v3 = vpop.f32.mrf.mxu1  ;;  %13584 = vmatmul.mubr.bf16.vlgmr.msra.gmra.mxu1 %v18425_v12  ;;  %v13300_v19 = vpop.f32.mrf.mxu0  ;;  %13594 = vmatprep.subr.bf16.mxu0 %v16315_v53  ;;  %v789_v53 = vld [vmem:[%s18208_s22 + $0x10c8] sm:$0xff] }
 0x2e0   : > { %13634 = vmatpush1.bf16.msra.mxu1 %v16450_v51  ;;  %v19138_v28 = vadd.f32 %v13339_v3, %v13299_v2  ;;  %v13301_v18 = vadd.f32 %v13300_v19, %v19073_v46  ;;  %13665 = vmatprep.mubr.bf16.mxu1 %v18434_v4  ;;  %v16306_v46 = vcombine.low %v805_v32, %v809_v25  ;;  %v921_v2 = vld [vmem:[%s18208_s22 + $0x14e8] sm:$0xff] }
 0x2e1   : > { %v13341_v21 = vpop.f32.mrf.mxu1  ;;  %13635 = vmatprep.subr.bf16.mxu1 %v16443_v58  ;;  %v13302_v30 = vpop.f32.mrf.mxu0  ;;  %v16427_v51 = vcombine.high %v925_v38, %v929_v63  ;;  %v793_v58 = vld [vmem:[%s18208_s22 + $0x10e8] sm:$0xff]  ;;  %v16298_v3 = vcombine.low %v797_v52, %v801_v50  ;;  %v16426_v32 = vcombine.low %v925_v38, %v929_v63  ;;  %v16419_v5 = vcombine.high %v917_v9, %v921_v2 }
 0x2e2   : > { %v19147_v34 = vadd.f32 %v13341_v21, %v13301_v18  ;;  %13595 = vmatpush1.bf16.msra.mxu0 %v16314_v16  ;;  %v16291_v25 = vcombine.high %v789_v53, %v793_v58  ;;  %v781_v7 = vld [vmem:[%s18208_s22 + $0x1088] sm:$0xff]  ;;  %v16418_v18 = vcombine.low %v917_v9, %v921_v2 }
 0x2e3   : > { %v13343_v37 = vpop.f32.mrf.mxu1  ;;  %v13303_v13 = vpop.f32.mrf.mxu0  ;;  %13596 = vmatprep.subr.bf16.mxu0 %v16307_v17  ;;  %v785_v16 = vld [vmem:[%s18208_s22 + $0x10a8] sm:$0xff]  ;;  %v16290_v17 = vcombine.low %v789_v53, %v793_v58 }
 0x2e4   : > { %13636 = vmatpush1.bf16.msra.mxu1 %v16442_v15  ;;  %v909_v19 = vld [vmem:[%s18208_s22 + $0x1488] sm:$0xff]  ;;  %v16283_v21 = vcombine.high %v781_v7, %v785_v16  ;;  %v16282_v63 = vcombine.low %v781_v7, %v785_v16 }
 0x2e5   : > { %v13344_v59 = vpop.f32.mrf.mxu1  ;;  %13637 = vmatprep.subr.bf16.mxu1 %v16435_v39  ;;  %v913_v15 = vld [vmem:[%s18208_s22 + $0x14a8] sm:$0xff] }
 0x2e6   : > { %13597 = vmatpush1.bf16.msra.mxu0 %v16306_v46  ;;  %v16411_v39 = vcombine.high %v909_v19, %v913_v15  ;;  %v773_v52 = vld [vmem:[%s18208_s22 + $0x1048] sm:$0xff]  ;;  %v16410_v37 = vcombine.low %v909_v19, %v913_v15 }
 0x2e7   : > { %13598 = vmatprep.subr.bf16.mxu0 %v16299_v49  ;;  %v777_v50 = vld [vmem:[%s18208_s22 + $0x1068] sm:$0xff] }
 0x2e8   : > { %13638 = vmatpush1.bf16.msra.mxu1 %v16434_v47  ;;  %v901_v30 = vld [vmem:[%s18208_s22 + $0x1448] sm:$0xff]  ;;  %v16275_v46 = vcombine.high %v773_v52, %v777_v50  ;;  %v16274_v53 = vcombine.low %v773_v52, %v777_v50 }
 0x2e9   : > { %13639 = vmatprep.subr.bf16.mxu1 %v16427_v51  ;;  %v905_v38 = vld [vmem:[%s18208_s22 + $0x1468] sm:$0xff] }
 0x2ea   : > { %13599 = vmatpush1.bf16.msra.mxu0 %v16298_v3  ;;  %v16403_v13 = vcombine.high %v901_v30, %v905_v38  ;;  %v765_v47 = vld [vmem:[%s18208_s22 + $0x1008] sm:$0xff]  ;;  %v16402_v58 = vcombine.low %v901_v30, %v905_v38 }
 0x2eb   : > { %13600 = vmatprep.subr.bf16.mxu0 %v16291_v25  ;;  %v769_v49 = vld [vmem:[%s18208_s22 + $0x1028] sm:$0xff] }
 0x2ec   : > { %13640 = vmatpush1.bf16.msra.mxu1 %v16426_v32  ;;  %v893_v59 = vld [vmem:[%s18208_s22 + $0x1408] sm:$0xff]  ;;  %v16267_v9 = vcombine.high %v765_v47, %v769_v49  ;;  %v16266_v7 = vcombine.low %v765_v47, %v769_v49 }
 0x2ed   : > { %13641 = vmatprep.subr.bf16.mxu1 %v16419_v5  ;;  %v897_v51 = vld [vmem:[%s18208_s22 + $0x1428] sm:$0xff] }
 0x2ee   : > { %13601 = vmatpush1.bf16.msra.mxu0 %v16290_v17  ;;  %v16395_v2 = vcombine.high %v893_v59, %v897_v51  ;;  %v885_v3 = vld [vmem:[%s18208_s22 + $0x13c8] sm:$0xff]  ;;  %v16394_v16 = vcombine.low %v893_v59, %v897_v51 }
 0x2ef   : > { %13602 = vmatprep.subr.bf16.mxu0 %v16283_v21  ;;  %v889_v32 = vld [vmem:[%s18208_s22 + $0x13e8] sm:$0xff] }
 0x2f0   : > { %13642 = vmatpush1.bf16.msra.mxu1 %v16418_v18  ;;  %v1013_v25 = vld [vmem:[%s18208_s22 + $0x17c8] sm:$0xff]  ;;  %v16387_v19 = vcombine.high %v885_v3, %v889_v32  ;;  %v16386_v52 = vcombine.low %v885_v3, %v889_v32 }
 0x2f1   : > { %13643 = vmatprep.subr.bf16.mxu1 %v16411_v39  ;;  %v1017_v5 = vld [vmem:[%s18208_s22 + $0x17e8] sm:$0xff] }
 0x2f2   : > { %13603 = vmatpush1.bf16.msra.mxu0 %v16282_v63  ;;  %v16515_v15 = vcombine.high %v1013_v25, %v1017_v5  ;;  %v877_v17 = vld [vmem:[%s18208_s22 + $0x1388] sm:$0xff]  ;;  %v16514_v50 = vcombine.low %v1013_v25, %v1017_v5 }
 0x2f3   : > { %13604 = vmatprep.subr.bf16.mxu0 %v16275_v46  ;;  %v881_v18 = vld [vmem:[%s18208_s22 + $0x13a8] sm:$0xff] }
 0x2f4   : > { %13644 = vmatpush1.bf16.msra.mxu1 %v16410_v37  ;;  %v1005_v21 = vld [vmem:[%s18208_s22 + $0x1788] sm:$0xff]  ;;  %v16379_v30 = vcombine.high %v877_v17, %v881_v18  ;;  %v16378_v47 = vcombine.low %v877_v17, %v881_v18 }
 0x2f5   : > { %13645 = vmatprep.subr.bf16.mxu1 %v16403_v13  ;;  %v1009_v39 = vld [vmem:[%s18208_s22 + $0x17a8] sm:$0xff] }
 0x2f6   : > { %13605 = vmatpush1.bf16.msra.mxu0 %v16274_v53  ;;  %v16507_v38 = vcombine.high %v1005_v21, %v1009_v39  ;;  %v869_v63 = vld [vmem:[%s18208_s22 + $0x1348] sm:$0xff]  ;;  %v16506_v49 = vcombine.low %v1005_v21, %v1009_v39 }
 0x2f7   : > { %13606 = vmatprep.subr.bf16.mxu0 %v16267_v9  ;;  %v873_v37 = vld [vmem:[%s18208_s22 + $0x1368] sm:$0xff] }
 0x2f8   : > { %13646 = vmatpush1.bf16.msra.mxu1 %v16402_v58  ;;  %v997_v46 = vld [vmem:[%s18208_s22 + $0x1748] sm:$0xff]  ;;  %v16371_v59 = vcombine.high %v869_v63, %v873_v37  ;;  %v16370_v3 = vcombine.low %v869_v63, %v873_v37 }
 0x2f9   : > { %13647 = vmatprep.subr.bf16.mxu1 %v16395_v2  ;;  %v1001_v13 = vld [vmem:[%s18208_s22 + $0x1768] sm:$0xff] }
 0x2fa   : > { %13607 = vmatpush1.bf16.msra.mxu0 %v16266_v7  ;;  %v16499_v51 = vcombine.high %v997_v46, %v1001_v13  ;;  %v861_v53 = vld [vmem:[%s18208_s22 + $0x1308] sm:$0xff]  ;;  %v16498_v32 = vcombine.low %v997_v46, %v1001_v13 }
 0x2fb   : > { %13608 = vmatprep.subr.bf16.mxu0 %v16387_v19  ;;  %v865_v58 = vld [vmem:[%s18208_s22 + $0x1328] sm:$0xff] }
 0x2fc   : > { %13648 = vmatpush1.bf16.msra.mxu1 %v16394_v16  ;;  %v989_v9 = vld [vmem:[%s18208_s22 + $0x1708] sm:$0xff]  ;;  %v16363_v25 = vcombine.high %v861_v53, %v865_v58  ;;  %v16362_v17 = vcombine.low %v861_v53, %v865_v58 }
 0x2fd   : > { %13649 = vmatprep.subr.bf16.mxu1 %v16515_v15  ;;  %v993_v2 = vld [vmem:[%s18208_s22 + $0x1728] sm:$0xff] }
 0x2fe   : > { %13609 = vmatpush2.bf16.msra.mxu0 %v16386_v52  ;;  %v16491_v5 = vcombine.high %v989_v9, %v993_v2  ;;  %v853_v7 = vld [vmem:[%s18208_s22 + $0x12c8] sm:$0xff]  ;;  %v16490_v18 = vcombine.low %v989_v9, %v993_v2 }
 0x2ff   : > { %13610 = vmatprep.subr.bf16.mxu0 %v16379_v30  ;;  %v857_v16 = vld [vmem:[%s18208_s22 + $0x12e8] sm:$0xff] }
 0x300   : > { %13650 = vmatpush2.bf16.msra.mxu1 %v16514_v50  ;;  %v981_v19 = vld [vmem:[%s18208_s22 + $0x16c8] sm:$0xff]  ;;  %v16355_v21 = vcombine.high %v853_v7, %v857_v16  ;;  %v16354_v63 = vcombine.low %v853_v7, %v857_v16 }
 0x301   : > { %13651 = vmatprep.subr.bf16.mxu1 %v16507_v38  ;;  %v985_v15 = vld [vmem:[%s18208_s22 + $0x16e8] sm:$0xff] }
 0x302   : > { %13611 = vmatpush2.bf16.msra.mxu0 %v16378_v47  ;;  %v16483_v39 = vcombine.high %v981_v19, %v985_v15  ;;  %v845_v52 = vld [vmem:[%s18208_s22 + $0x1288] sm:$0xff]  ;;  %v16482_v37 = vcombine.low %v981_v19, %v985_v15 }
 0x303   : > { %13612 = vmatprep.subr.bf16.mxu0 %v16371_v59  ;;  %v849_v50 = vld [vmem:[%s18208_s22 + $0x12a8] sm:$0xff] }
 0x304   : > { %13652 = vmatpush2.bf16.msra.mxu1 %v16506_v49  ;;  %v973_v30 = vld [vmem:[%s18208_s22 + $0x1688] sm:$0xff]  ;;  %v16347_v46 = vcombine.high %v845_v52, %v849_v50  ;;  %v16346_v53 = vcombine.low %v845_v52, %v849_v50 }
 0x305   : > { %13653 = vmatprep.subr.bf16.mxu1 %v16499_v51  ;;  %v977_v38 = vld [vmem:[%s18208_s22 + $0x16a8] sm:$0xff] }
 0x306   : > { %13613 = vmatpush2.bf16.msra.mxu0 %v16370_v3  ;;  %v16475_v13 = vcombine.high %v973_v30, %v977_v38  ;;  %v837_v47 = vld [vmem:[%s18208_s22 + $0x1248] sm:$0xff]  ;;  %v16474_v58 = vcombine.low %v973_v30, %v977_v38 }
 0x307   : > { %13614 = vmatprep.subr.bf16.mxu0 %v16363_v25  ;;  %v841_v49 = vld [vmem:[%s18208_s22 + $0x1268] sm:$0xff] }
 0x308   : > { %13654 = vmatpush2.bf16.msra.mxu1 %v16498_v32  ;;  %v965_v59 = vld [vmem:[%s18208_s22 + $0x1648] sm:$0xff]  ;;  %v16339_v9 = vcombine.high %v837_v47, %v841_v49  ;;  %v16338_v7 = vcombine.low %v837_v47, %v841_v49 }
 0x309   : > { %13655 = vmatprep.subr.bf16.mxu1 %v16491_v5  ;;  %v969_v51 = vld [vmem:[%s18208_s22 + $0x1668] sm:$0xff] }
 0x30a   : > { %13615 = vmatpush2.bf16.msra.mxu0 %v16362_v17  ;;  %v16467_v2 = vcombine.high %v965_v59, %v969_v51  ;;  %v829_v3 = vld [vmem:[%s18208_s22 + $0x1208] sm:$0xff]  ;;  %v16466_v16 = vcombine.low %v965_v59, %v969_v51 }
 0x30b   : > { %13616 = vmatprep.subr.bf16.mxu0 %v16355_v21  ;;  %v833_v32 = vld [vmem:[%s18208_s22 + $0x1228] sm:$0xff] }
 0x30c   : > { %13656 = vmatpush2.bf16.msra.mxu1 %v16490_v18  ;;  %v957_v25 = vld [vmem:[%s18208_s22 + $0x1608] sm:$0xff]  ;;  %v16331_v19 = vcombine.high %v829_v3, %v833_v32  ;;  %v16330_v52 = vcombine.low %v829_v3, %v833_v32 }
 0x30d   : > { %13657 = vmatprep.subr.bf16.mxu1 %v16483_v39  ;;  %v961_v5 = vld [vmem:[%s18208_s22 + $0x1628] sm:$0xff] }
 0x30e   : > { %13617 = vmatpush2.bf16.msra.mxu0 %v16354_v63  ;;  %v16459_v15 = vcombine.high %v957_v25, %v961_v5  ;;  %v1077_v17 = vld [vmem:[%s18208_s22 + $0x19c8] sm:$0xff]  ;;  %v16458_v50 = vcombine.low %v957_v25, %v961_v5 }
 0x30f   : > { %13618 = vmatprep.subr.bf16.mxu0 %v16347_v46  ;;  %v1081_v18 = vld [vmem:[%s18208_s22 + $0x19e8] sm:$0xff] }
 0x310   : > { %13658 = vmatpush2.bf16.msra.mxu1 %v16482_v37  ;;  %v1205_v21 = vld [vmem:[%s18208_s22 + $0x1dc8] sm:$0xff]  ;;  %v16579_v30 = vcombine.high %v1077_v17, %v1081_v18  ;;  %v16578_v47 = vcombine.low %v1077_v17, %v1081_v18 }
 0x311   : > { %13659 = vmatprep.subr.bf16.mxu1 %v16475_v13  ;;  %v1209_v39 = vld [vmem:[%s18208_s22 + $0x1de8] sm:$0xff] }
 0x312   : > { %13619 = vmatpush2.bf16.msra.mxu0 %v16346_v53  ;;  %v16707_v38 = vcombine.high %v1205_v21, %v1209_v39  ;;  %v1069_v63 = vld [vmem:[%s18208_s22 + $0x1988] sm:$0xff]  ;;  %v16706_v49 = vcombine.low %v1205_v21, %v1209_v39 }
 0x313   : > { %13620 = vmatprep.subr.bf16.mxu0 %v16339_v9  ;;  %v1073_v37 = vld [vmem:[%s18208_s22 + $0x19a8] sm:$0xff] }
 0x314   : > { %13660 = vmatpush2.bf16.msra.mxu1 %v16474_v58  ;;  %v1197_v46 = vld [vmem:[%s18208_s22 + $0x1d88] sm:$0xff]  ;;  %v16571_v59 = vcombine.high %v1069_v63, %v1073_v37  ;;  %v16570_v5 = vcombine.low %v1069_v63, %v1073_v37 }
 0x315   : > { %13661 = vmatprep.subr.bf16.mxu1 %v16467_v2  ;;  %v1201_v13 = vld [vmem:[%s18208_s22 + $0x1da8] sm:$0xff] }
 0x316   : > { %13621 = vmatpush2.bf16.msra.mxu0 %v16338_v7  ;;  %v16699_v51 = vcombine.high %v1197_v46, %v1201_v13  ;;  %v1061_v53 = vld [vmem:[%s18208_s22 + $0x1948] sm:$0xff] }
 0x317   : > { %13622 = vmatprep.subr.bf16.mxu0 %v16331_v19  ;;  %v1065_v58 = vld [vmem:[%s18208_s22 + $0x1968] sm:$0xff] }
 0x318   : > { %13662 = vmatpush2.bf16.msra.mxu1 %v16466_v16  ;;  %v1189_v2 = vld [vmem:[%s18208_s22 + $0x1d48] sm:$0xff]  ;;  %v16698_v16 = vcombine.low %v1197_v46, %v1201_v13  ;;  %v16563_v19 = vcombine.high %v1061_v53, %v1065_v58 }
 0x319   : > { %13663 = vmatprep.subr.bf16.mxu1 %v16459_v15  ;;  %v1193_v3 = vld [vmem:[%s18208_s22 + $0x1d68] sm:$0xff] }
 0x31a   : > { %13623 = vmatpush2.bf16.msra.mxu0 %v16330_v52  ;;  %v1053_v21 = vld [vmem:[%s18208_s22 + $0x1908] sm:$0xff]  ;;  %v16690_v46 = vcombine.low %v1189_v2, %v1193_v3 }
 0x31b   : > { %13674 = vmatprep.subr.bf16.mxu0 %v16579_v30  ;;  %v1057_v39 = vld [vmem:[%s18208_s22 + $0x1928] sm:$0xff] }
 0x31c   : > { %13664 = vmatpush2.bf16.msra.mxu1 %v16458_v50  ;;  %v1181_v50 = vld [vmem:[%s18208_s22 + $0x1d08] sm:$0xff]  ;;  %v16555_v13 = vcombine.high %v1053_v21, %v1057_v39 }
 0x31d   : > { %13715 = vmatprep.subr.bf16.mxu1 %v16707_v38  ;;  %v13380_v9 = vpop.f32.mrf.mxu0  ;;  %13625 = vmatmul.mubr.bf16.vlgmr.msra.gmra.mxu0 %v18504_v22  ;;  %v1185_v30 = vld [vmem:[%s18208_s22 + $0x1d28] sm:$0xff] }
 0x31e   : > { %v13381_v32 = vadd.f32 %v13380_v9, %v19138_v28  ;;  %13675 = vmatpush1.bf16.msra.mxu0 %v16578_v47  ;;  %v16691_v28 = vcombine.high %v1189_v2, %v1193_v3  ;;  %13706 = vmatprep.mubr.bf16.mxu0 %v18511_v33  ;;  %v1049_v9 = vld [vmem:[%s18208_s22 + $0x18e8] sm:$0xff]  ;;  %v918_v47 = vld [vmem:[%s18208_s22 + $0x14d0] sm:$0xff] }
 0x31f   : > { %v13421_v25 = vpop.f32.mrf.mxu1  ;;  %13666 = vmatmul.mubr.bf16.vlgmr.msra.gmra.mxu1 %v18515_v35  ;;  %v13382_v7 = vpop.f32.mrf.mxu0  ;;  %13676 = vmatprep.subr.bf16.mxu0 %v16571_v59  ;;  %v16683_v59 = vcombine.high %v1181_v50, %v1185_v30 }
 0x320   : > { %13716 = vmatpush1.bf16.msra.mxu1 %v16706_v49  ;;  %v19212_v15 = vadd.f32 %v13421_v25, %v13381_v32  ;;  %v13383_v17 = vadd.f32 %v13382_v7, %v19147_v34  ;;  %13747 = vmatprep.mubr.bf16.mxu1 %v18524_v44  ;;  %v16562_v34 = vcombine.low %v1061_v53, %v1065_v58  ;;  %v1173_v32 = vld [vmem:[%s18208_s22 + $0x1cc8] sm:$0xff] }
 0x321   : > { %v13423_v18 = vpop.f32.mrf.mxu1  ;;  %13717 = vmatprep.subr.bf16.mxu1 %v16699_v51  ;;  %v13384_v52 = vpop.f32.mrf.mxu0  ;;  %v1045_v51 = vld [vmem:[%s18208_s22 + $0x18c8] sm:$0xff]  ;;  %v16554_v53 = vcombine.low %v1053_v21, %v1057_v39  ;;  %v16682_v58 = vcombine.low %v1181_v50, %v1185_v30 }
 0x322   : > { %v19221_v38 = vadd.f32 %v13423_v18, %v13383_v17  ;;  %13677 = vmatpush1.bf16.msra.mxu0 %v16570_v5  ;;  %v1177_v25 = vld [vmem:[%s18208_s22 + $0x1ce8] sm:$0xff]  ;;  %v16547_v2 = vcombine.high %v1045_v51, %v1049_v9  ;;  %v16546_v17 = vcombine.low %v1045_v51, %v1049_v9 }
 0x323   : > { %v13425_v63 = vpop.f32.mrf.mxu1  ;;  %v13385_v37 = vpop.f32.mrf.mxu0  ;;  %13678 = vmatprep.subr.bf16.mxu0 %v16563_v19  ;;  %v16675_v3 = vcombine.high %v1173_v32, %v1177_v25  ;;  %v1037_v5 = vld [vmem:[%s18208_s22 + $0x1888] sm:$0xff]  ;;  %v16674_v18 = vcombine.low %v1173_v32, %v1177_v25 }
 0x324   : > { %13718 = vmatpush1.bf16.msra.mxu1 %v16698_v16  ;;  %v1041_v7 = vld [vmem:[%s18208_s22 + $0x18a8] sm:$0xff] }
 0x325   : > { %v13426_v49 = vpop.f32.mrf.mxu1  ;;  %13719 = vmatprep.subr.bf16.mxu1 %v16691_v28  ;;  %v1165_v16 = vld [vmem:[%s18208_s22 + $0x1c88] sm:$0xff]  ;;  %v16539_v28 = vcombine.high %v1037_v5, %v1041_v7  ;;  %v16538_v63 = vcombine.low %v1037_v5, %v1041_v7 }
 0x326   : > { %13679 = vmatpush1.bf16.msra.mxu0 %v16562_v34  ;;  %v1169_v19 = vld [vmem:[%s18208_s22 + $0x1ca8] sm:$0xff] }
 0x327   : > { %13680 = vmatprep.subr.bf16.mxu0 %v16555_v13  ;;  %v16667_v21 = vcombine.high %v1165_v16, %v1169_v19  ;;  %v1029_v39 = vld [vmem:[%s18208_s22 + $0x1848] sm:$0xff]  ;;  %v16666_v34 = vcombine.low %v1165_v16, %v1169_v19 }
 0x328   : > { %13720 = vmatpush1.bf16.msra.mxu1 %v16690_v46  ;;  %v1033_v52 = vld [vmem:[%s18208_s22 + $0x1868] sm:$0xff] }
 0x329   : > { %13721 = vmatprep.subr.bf16.mxu1 %v16683_v59  ;;  %v1157_v50 = vld [vmem:[%s18208_s22 + $0x1c48] sm:$0xff]  ;;  %v16531_v37 = vcombine.high %v1029_v39, %v1033_v52  ;;  %v16530_v9 = vcombine.low %v1029_v39, %v1033_v52 }
 0x32a   : > { %13681 = vmatpush1.bf16.msra.mxu0 %v16554_v53  ;;  %v1161_v30 = vld [vmem:[%s18208_s22 + $0x1c68] sm:$0xff] }
 0x32b   : > { %13682 = vmatprep.subr.bf16.mxu0 %v16547_v2  ;;  %v16659_v46 = vcombine.high %v1157_v50, %v1161_v30  ;;  %v1021_v13 = vld [vmem:[%s18208_s22 + $0x1808] sm:$0xff]  ;;  %v16658_v32 = vcombine.low %v1157_v50, %v1161_v30 }
 0x32c   : > { %13722 = vmatpush1.bf16.msra.mxu1 %v16682_v58  ;;  %v1025_v49 = vld [vmem:[%s18208_s22 + $0x1828] sm:$0xff] }
 0x32d   : > { %13723 = vmatprep.subr.bf16.mxu1 %v16675_v3  ;;  %v1149_v59 = vld [vmem:[%s18208_s22 + $0x1c08] sm:$0xff]  ;;  %v16523_v25 = vcombine.high %v1021_v13, %v1025_v49  ;;  %v16522_v7 = vcombine.low %v1021_v13, %v1025_v49 }
 0x32e   : > { %13683 = vmatpush1.bf16.msra.mxu0 %v16546_v17  ;;  %v1153_v51 = vld [vmem:[%s18208_s22 + $0x1c28] sm:$0xff] }
 0x32f   : > { %13684 = vmatprep.subr.bf16.mxu0 %v16539_v28  ;;  %v16651_v53 = vcombine.high %v1149_v59, %v1153_v51  ;;  %v1141_v58 = vld [vmem:[%s18208_s22 + $0x1bc8] sm:$0xff]  ;;  %v16650_v16 = vcombine.low %v1149_v59, %v1153_v51 }
 0x330   : > { %13724 = vmatpush1.bf16.msra.mxu1 %v16674_v18  ;;  %v1145_v2 = vld [vmem:[%s18208_s22 + $0x1be8] sm:$0xff] }
 0x331   : > { %13725 = vmatprep.subr.bf16.mxu1 %v16667_v21  ;;  %v1269_v3 = vld [vmem:[%s18208_s22 + $0x1fc8] sm:$0xff]  ;;  %v16643_v19 = vcombine.high %v1141_v58, %v1145_v2  ;;  %v16642_v52 = vcombine.low %v1141_v58, %v1145_v2 }
 0x332   : > { %13685 = vmatpush1.bf16.msra.mxu0 %v16538_v63  ;;  %v1273_v5 = vld [vmem:[%s18208_s22 + $0x1fe8] sm:$0xff] }
 0x333   : > { %13686 = vmatprep.subr.bf16.mxu0 %v16531_v37  ;;  %v16771_v17 = vcombine.high %v1269_v3, %v1273_v5  ;;  %v1133_v18 = vld [vmem:[%s18208_s22 + $0x1b88] sm:$0xff]  ;;  %v16770_v50 = vcombine.low %v1269_v3, %v1273_v5 }
 0x334   : > { %13726 = vmatpush1.bf16.msra.mxu1 %v16666_v34  ;;  %v1137_v28 = vld [vmem:[%s18208_s22 + $0x1ba8] sm:$0xff] }
 0x335   : > { %13727 = vmatprep.subr.bf16.mxu1 %v16659_v46  ;;  %v1261_v21 = vld [vmem:[%s18208_s22 + $0x1f88] sm:$0xff]  ;;  %v16635_v30 = vcombine.high %v1133_v18, %v1137_v28  ;;  %v16634_v49 = vcombine.low %v1133_v18, %v1137_v28 }
 0x336   : > { %13687 = vmatpush1.bf16.msra.mxu0 %v16530_v9  ;;  %v1265_v39 = vld [vmem:[%s18208_s22 + $0x1fa8] sm:$0xff] }
 0x337   : > { %13688 = vmatprep.subr.bf16.mxu0 %v16523_v25  ;;  %v16763_v63 = vcombine.high %v1261_v21, %v1265_v39  ;;  %v1125_v34 = vld [vmem:[%s18208_s22 + $0x1b48] sm:$0xff]  ;;  %v16762_v59 = vcombine.low %v1261_v21, %v1265_v39 }
 0x338   : > { %13728 = vmatpush1.bf16.msra.mxu1 %v16658_v32  ;;  %v1129_v37 = vld [vmem:[%s18208_s22 + $0x1b68] sm:$0xff] }
 0x339   : > { %13729 = vmatprep.subr.bf16.mxu1 %v16651_v53  ;;  %v1253_v46 = vld [vmem:[%s18208_s22 + $0x1f48] sm:$0xff]  ;;  %v16627_v51 = vcombine.high %v1125_v34, %v1129_v37  ;;  %v16626_v2 = vcombine.low %v1125_v34, %v1129_v37 }
 0x33a   : > { %13689 = vmatpush1.bf16.msra.mxu0 %v16522_v7  ;;  %v1257_v13 = vld [vmem:[%s18208_s22 + $0x1f68] sm:$0xff] }
 0x33b   : > { %13690 = vmatprep.subr.bf16.mxu0 %v16643_v19  ;;  %v16755_v9 = vcombine.high %v1253_v46, %v1257_v13  ;;  %v1117_v32 = vld [vmem:[%s18208_s22 + $0x1b08] sm:$0xff]  ;;  %v16754_v3 = vcombine.low %v1253_v46, %v1257_v13 }
 0x33c   : > { %13730 = vmatpush1.bf16.msra.mxu1 %v16650_v16  ;;  %v1121_v25 = vld [vmem:[%s18208_s22 + $0x1b28] sm:$0xff] }
 0x33d   : > { %13731 = vmatprep.subr.bf16.mxu1 %v16771_v17  ;;  %v1245_v53 = vld [vmem:[%s18208_s22 + $0x1f08] sm:$0xff]  ;;  %v16619_v5 = vcombine.high %v1117_v32, %v1121_v25  ;;  %v16618_v28 = vcombine.low %v1117_v32, %v1121_v25 }
 0x33e   : > { %13691 = vmatpush2.bf16.msra.mxu0 %v16642_v52  ;;  %v1249_v58 = vld [vmem:[%s18208_s22 + $0x1f28] sm:$0xff] }
 0x33f   : > { %13692 = vmatprep.subr.bf16.mxu0 %v16635_v30  ;;  %v16747_v7 = vcombine.high %v1245_v53, %v1249_v58  ;;  %v1109_v16 = vld [vmem:[%s18208_s22 + $0x1ac8] sm:$0xff]  ;;  %v16746_v21 = vcombine.low %v1245_v53, %v1249_v58 }
 0x340   : > { %13732 = vmatpush2.bf16.msra.mxu1 %v16770_v50  ;;  %v1113_v19 = vld [vmem:[%s18208_s22 + $0x1ae8] sm:$0xff] }
 0x341   : > { %13733 = vmatprep.subr.bf16.mxu1 %v16763_v63  ;;  %v1237_v17 = vld [vmem:[%s18208_s22 + $0x1ec8] sm:$0xff]  ;;  %v16611_v39 = vcombine.high %v1109_v16, %v1113_v19  ;;  %v16610_v37 = vcombine.low %v1109_v16, %v1113_v19 }
 0x342   : > { %13693 = vmatpush2.bf16.msra.mxu0 %v16634_v49  ;;  %v1241_v18 = vld [vmem:[%s18208_s22 + $0x1ee8] sm:$0xff] }
 0x343   : > { %13694 = vmatprep.subr.bf16.mxu0 %v16627_v51  ;;  %v16739_v52 = vcombine.high %v1237_v17, %v1241_v18  ;;  %v1101_v50 = vld [vmem:[%s18208_s22 + $0x1a88] sm:$0xff]  ;;  %v16738_v46 = vcombine.low %v1237_v17, %v1241_v18 }
 0x344   : > { %13734 = vmatpush2.bf16.msra.mxu1 %v16762_v59  ;;  %v1105_v30 = vld [vmem:[%s18208_s22 + $0x1aa8] sm:$0xff] }
 0x345   : > { %13735 = vmatprep.subr.bf16.mxu1 %v16755_v9  ;;  %v1229_v63 = vld [vmem:[%s18208_s22 + $0x1e88] sm:$0xff]  ;;  %v16603_v13 = vcombine.high %v1101_v50, %v1105_v30  ;;  %v16602_v25 = vcombine.low %v1101_v50, %v1105_v30 }
 0x346   : > { %13695 = vmatpush2.bf16.msra.mxu0 %v16626_v2  ;;  %v1233_v34 = vld [vmem:[%s18208_s22 + $0x1ea8] sm:$0xff] }
 0x347   : > { %13696 = vmatprep.subr.bf16.mxu0 %v16619_v5  ;;  %v16731_v49 = vcombine.high %v1229_v63, %v1233_v34  ;;  %v1093_v59 = vld [vmem:[%s18208_s22 + $0x1a48] sm:$0xff]  ;;  %v16730_v53 = vcombine.low %v1229_v63, %v1233_v34 }
 0x348   : > { %13736 = vmatpush2.bf16.msra.mxu1 %v16754_v3  ;;  %v1097_v51 = vld [vmem:[%s18208_s22 + $0x1a68] sm:$0xff] }
 0x349   : > { %13737 = vmatprep.subr.bf16.mxu1 %v16747_v7  ;;  %v1221_v9 = vld [vmem:[%s18208_s22 + $0x1e48] sm:$0xff]  ;;  %v16595_v58 = vcombine.high %v1093_v59, %v1097_v51  ;;  %v16594_v19 = vcombine.low %v1093_v59, %v1097_v51 }
 0x34a   : > { %13697 = vmatpush2.bf16.msra.mxu0 %v16618_v28  ;;  %v1225_v32 = vld [vmem:[%s18208_s22 + $0x1e68] sm:$0xff] }
 0x34b   : > { %13698 = vmatprep.subr.bf16.mxu0 %v16611_v39  ;;  %v16723_v2 = vcombine.high %v1221_v9, %v1225_v32  ;;  %v1085_v3 = vld [vmem:[%s18208_s22 + $0x1a08] sm:$0xff]  ;;  %v16722_v17 = vcombine.low %v1221_v9, %v1225_v32 }
 0x34c   : > { %13738 = vmatpush2.bf16.msra.mxu1 %v16746_v21  ;;  %v1089_v5 = vld [vmem:[%s18208_s22 + $0x1a28] sm:$0xff] }
 0x34d   : > { %13739 = vmatprep.subr.bf16.mxu1 %v16739_v52  ;;  %v1213_v7 = vld [vmem:[%s18208_s22 + $0x1e08] sm:$0xff]  ;;  %v16587_v18 = vcombine.high %v1085_v3, %v1089_v5  ;;  %v16586_v30 = vcombine.low %v1085_v3, %v1089_v5 }
 0x34e   : > { %13699 = vmatpush2.bf16.msra.mxu0 %v16610_v37  ;;  %v1217_v16 = vld [vmem:[%s18208_s22 + $0x1e28] sm:$0xff] }
 0x34f   : > { %13700 = vmatprep.subr.bf16.mxu0 %v16603_v13  ;;  %v16715_v28 = vcombine.high %v1213_v7, %v1217_v16  ;;  %v1333_v21 = vld [vmem:[%s18208_s22 + $0x21c8] sm:$0xff]  ;;  %v16714_v63 = vcombine.low %v1213_v7, %v1217_v16 }
 0x350   : > { %13740 = vmatpush2.bf16.msra.mxu1 %v16738_v46  ;;  %v1337_v39 = vld [vmem:[%s18208_s22 + $0x21e8] sm:$0xff] }
 0x351   : > { %13741 = vmatprep.subr.bf16.mxu1 %v16731_v49  ;;  %v1461_v52 = vld [vmem:[%s18208_s22 + $0x25c8] sm:$0xff]  ;;  %v16835_v34 = vcombine.high %v1333_v21, %v1337_v39  ;;  %v16834_v51 = vcombine.low %v1333_v21, %v1337_v39 }
 0x352   : > { %13701 = vmatpush2.bf16.msra.mxu0 %v16602_v25  ;;  %v1465_v50 = vld [vmem:[%s18208_s22 + $0x25e8] sm:$0xff] }
 0x353   : > { %13702 = vmatprep.subr.bf16.mxu0 %v16595_v58  ;;  %v16963_v37 = vcombine.high %v1461_v52, %v1465_v50  ;;  %v1325_v46 = vld [vmem:[%s18208_s22 + $0x2188] sm:$0xff]  ;;  %v16962_v9 = vcombine.low %v1461_v52, %v1465_v50 }
 0x354   : > { %13742 = vmatpush2.bf16.msra.mxu1 %v16730_v53  ;;  %v1329_v13 = vld [vmem:[%s18208_s22 + $0x21a8] sm:$0xff] }
 0x355   : > { %13743 = vmatprep.subr.bf16.mxu1 %v16723_v2  ;;  %v1453_v49 = vld [vmem:[%s18208_s22 + $0x2588] sm:$0xff]  ;;  %v16827_v32 = vcombine.high %v1325_v46, %v1329_v13  ;;  %v16826_v16 = vcombine.low %v1325_v46, %v1329_v13 }
 0x356   : > { %13703 = vmatpush2.bf16.msra.mxu0 %v16594_v19  ;;  %v1457_v59 = vld [vmem:[%s18208_s22 + $0x25a8] sm:$0xff] }
 0x357   : > { %13704 = vmatprep.subr.bf16.mxu0 %v16587_v18  ;;  %v16955_v25 = vcombine.high %v1453_v49, %v1457_v59  ;;  %v1317_v53 = vld [vmem:[%s18208_s22 + $0x2148] sm:$0xff]  ;;  %v16954_v18 = vcombine.low %v1453_v49, %v1457_v59 }
 0x358   : > { %13744 = vmatpush2.bf16.msra.mxu1 %v16722_v17  ;;  %v1321_v58 = vld [vmem:[%s18208_s22 + $0x2168] sm:$0xff] }
 0x359   : > { %13745 = vmatprep.subr.bf16.mxu1 %v16715_v28  ;;  %v1445_v3 = vld [vmem:[%s18208_s22 + $0x2548] sm:$0xff]  ;;  %v16819_v28 = vcombine.high %v1317_v53, %v1321_v58  ;;  %v16818_v13 = vcombine.low %v1317_v53, %v1321_v58 }
 0x35a   : > { %13705 = vmatpush2.bf16.msra.mxu0 %v16586_v30  ;;  %v1449_v5 = vld [vmem:[%s18208_s22 + $0x2568] sm:$0xff] }
 0x35b   : > { %13756 = vmatprep.subr.bf16.mxu0 %v16835_v34  ;;  %v16947_v39 = vcombine.high %v1445_v3, %v1449_v5  ;;  %v1309_v52 = vld [vmem:[%s18208_s22 + $0x2108] sm:$0xff]  ;;  %v16946_v59 = vcombine.low %v1445_v3, %v1449_v5 }
 0x35c   : > { %13746 = vmatpush2.bf16.msra.mxu1 %v16714_v63  ;;  %v1313_v50 = vld [vmem:[%s18208_s22 + $0x2128] sm:$0xff] }
 0x35d   : > { %13797 = vmatprep.subr.bf16.mxu1 %v16963_v37  ;;  %v13462_v2 = vpop.f32.mrf.mxu0  ;;  %13707 = vmatmul.mubr.bf16.vlgmr.msra.gmra.mxu0 %v18596_v26  ;;  %v1437_v34 = vld [vmem:[%s18208_s22 + $0x2508] sm:$0xff] }
 0x35e   : > { %13757 = vmatpush1.bf16.msra.mxu0 %v16834_v51  ;;  %13788 = vmatprep.mubr.bf16.mxu0 %v18603_v20  ;;  %v1441_v37 = vld [vmem:[%s18208_s22 + $0x2528] sm:$0xff]  ;;  %v16811_v51 = vcombine.high %v1309_v52, %v1313_v50 }
 0x35f   : > { %v13503_v7 = vpop.f32.mrf.mxu1  ;;  %13748 = vmatmul.mubr.bf16.vlgmr.msra.gmra.mxu1 %v18607_v11  ;;  %v13464_v17 = vpop.f32.mrf.mxu0  ;;  %13758 = vmatprep.subr.bf16.mxu0 %v16827_v32  ;;  %v16939_v32 = vcombine.high %v1437_v34, %v1441_v37  ;;  %v16938_v53 = vcombine.low %v1437_v34, %v1441_v37  ;;  %v1293_v5 = vld [vmem:[%s18208_s22 + $0x2088] sm:$0xff] }
 0x360   : > { %v19287_v19 = vadd.f32 %v13503_v7, %v13462_v2  ;;  %13798 = vmatpush1.bf16.msra.mxu1 %v16962_v9  ;;  %13829 = vmatprep.mubr.bf16.mxu1 %v18616_v36  ;;  %v1305_v2 = vld [vmem:[%s18208_s22 + $0x20e8] sm:$0xff] }
 0x361   : > { %v13505_v21 = vpop.f32.mrf.mxu1  ;;  %13799 = vmatprep.subr.bf16.mxu1 %v16955_v25  ;;  %v13466_v63 = vpop.f32.mrf.mxu0  ;;  %v1301_v25 = vld [vmem:[%s18208_s22 + $0x20c8] sm:$0xff] }
 0x362   : > { %v19292_v30 = vadd.f32 %v13505_v21, %v13464_v17  ;;  %13759 = vmatpush1.bf16.msra.mxu0 %v16826_v16  ;;  %v1429_v7 = vld [vmem:[%s18208_s22 + $0x24c8] sm:$0xff]  ;;  %v16810_v21 = vcombine.low %v1309_v52, %v1313_v50  ;;  %v16803_v58 = vcombine.high %v1301_v25, %v1305_v2 }
 0x363   : > { %v13507_v46 = vpop.f32.mrf.mxu1  ;;  %v13467_v49 = vpop.f32.mrf.mxu0  ;;  %13760 = vmatprep.subr.bf16.mxu0 %v16819_v28  ;;  %v1433_v17 = vld [vmem:[%s18208_s22 + $0x24e8] sm:$0xff] }
 0x364   : > { %13800 = vmatpush1.bf16.msra.mxu1 %v16954_v18  ;;  %v16931_v3 = vcombine.high %v1429_v7, %v1433_v17  ;;  %v1297_v16 = vld [vmem:[%s18208_s22 + $0x20a8] sm:$0xff]  ;;  %v16930_v63 = vcombine.low %v1429_v7, %v1433_v17 }
 0x365   : > { %v13508_v9 = vpop.f32.mrf.mxu1  ;;  %13801 = vmatprep.subr.bf16.mxu1 %v16947_v39  ;;  %v1421_v18 = vld [vmem:[%s18208_s22 + $0x2488] sm:$0xff]  ;;  %v16802_v39 = vcombine.low %v1301_v25, %v1305_v2  ;;  %v16795_v52 = vcombine.high %v1293_v5, %v1297_v16  ;;  %v16794_v49 = vcombine.low %v1293_v5, %v1297_v16 }
 0x366   : > { %13761 = vmatpush1.bf16.msra.mxu0 %v16818_v13  ;;  %v1425_v28 = vld [vmem:[%s18208_s22 + $0x24a8] sm:$0xff] }
 0x367   : > { %13762 = vmatprep.subr.bf16.mxu0 %v16811_v51  ;;  %v16923_v50 = vcombine.high %v1421_v18, %v1425_v28  ;;  %v1285_v34 = vld [vmem:[%s18208_s22 + $0x2048] sm:$0xff] }
 0x368   : > { %13802 = vmatpush1.bf16.msra.mxu1 %v16946_v59  ;;  %v1289_v37 = vld [vmem:[%s18208_s22 + $0x2068] sm:$0xff]  ;;  %v16922_v59 = vcombine.low %v1421_v18, %v1425_v28 }
 0x369   : > { %13803 = vmatprep.subr.bf16.mxu1 %v16939_v32  ;;  %v1413_v46 = vld [vmem:[%s18208_s22 + $0x2448] sm:$0xff]  ;;  %v16787_v51 = vcombine.high %v1285_v34, %v1289_v37  ;;  %v16786_v17 = vcombine.low %v1285_v34, %v1289_v37 }
 0x36a   : > { %13763 = vmatpush1.bf16.msra.mxu0 %v16810_v21  ;;  %v1417_v13 = vld [vmem:[%s18208_s22 + $0x2468] sm:$0xff] }
 0x36b   : > { %13764 = vmatprep.subr.bf16.mxu0 %v16803_v58  ;;  %v16915_v9 = vcombine.high %v1413_v46, %v1417_v13  ;;  %v1277_v32 = vld [vmem:[%s18208_s22 + $0x2008] sm:$0xff]  ;;  %v16914_v21 = vcombine.low %v1413_v46, %v1417_v13 }
 0x36c   : > { %13804 = vmatpush1.bf16.msra.mxu1 %v16938_v53  ;;  %v1281_v25 = vld [vmem:[%s18208_s22 + $0x2028] sm:$0xff] }
 0x36d   : > { %13805 = vmatprep.subr.bf16.mxu1 %v16931_v3  ;;  %v1405_v2 = vld [vmem:[%s18208_s22 + $0x2408] sm:$0xff]  ;;  %v16779_v53 = vcombine.high %v1277_v32, %v1281_v25  ;;  %v16778_v28 = vcombine.low %v1277_v32, %v1281_v25 }
 0x36e   : > { %13765 = vmatpush1.bf16.msra.mxu0 %v16802_v39  ;;  %v1409_v7 = vld [vmem:[%s18208_s22 + $0x2428] sm:$0xff] }
 0x36f   : > { %13766 = vmatprep.subr.bf16.mxu0 %v16795_v52  ;;  %v16907_v58 = vcombine.high %v1405_v2, %v1409_v7  ;;  %v1397_v3 = vld [vmem:[%s18208_s22 + $0x23c8] sm:$0xff]  ;;  %v16906_v39 = vcombine.low %v1405_v2, %v1409_v7 }
 0x370   : > { %13806 = vmatpush1.bf16.msra.mxu1 %v16930_v63  ;;  %v1401_v5 = vld [vmem:[%s18208_s22 + $0x23e8] sm:$0xff] }
 0x371   : > { %13807 = vmatprep.subr.bf16.mxu1 %v16923_v50  ;;  %v1525_v16 = vld [vmem:[%s18208_s22 + $0x27c8] sm:$0xff]  ;;  %v16899_v63 = vcombine.high %v1397_v3, %v1401_v5  ;;  %v16898_v13 = vcombine.low %v1397_v3, %v1401_v5 }
 0x372   : > { %13767 = vmatpush1.bf16.msra.mxu0 %v16794_v49  ;;  %v1529_v18 = vld [vmem:[%s18208_s22 + $0x27e8] sm:$0xff] }
 0x373   : > { %13768 = vmatprep.subr.bf16.mxu0 %v16787_v51  ;;  %v17027_v52 = vcombine.high %v1525_v16, %v1529_v18  ;;  %v1389_v50 = vld [vmem:[%s18208_s22 + $0x2388] sm:$0xff]  ;;  %v17026_v49 = vcombine.low %v1525_v16, %v1529_v18 }
 0x374   : > { %13808 = vmatpush1.bf16.msra.mxu1 %v16922_v59  ;;  %v1393_v34 = vld [vmem:[%s18208_s22 + $0x23a8] sm:$0xff] }
 0x375   : > { %13809 = vmatprep.subr.bf16.mxu1 %v16915_v9  ;;  %v1517_v37 = vld [vmem:[%s18208_s22 + $0x2788] sm:$0xff]  ;;  %v16891_v59 = vcombine.high %v1389_v50, %v1393_v34  ;;  %v16890_v7 = vcombine.low %v1389_v50, %v1393_v34 }
 0x376   : > { %13769 = vmatpush1.bf16.msra.mxu0 %v16786_v17  ;;  %v1521_v46 = vld [vmem:[%s18208_s22 + $0x27a8] sm:$0xff] }
 0x377   : > { %13770 = vmatprep.subr.bf16.mxu0 %v16779_v53  ;;  %v17019_v51 = vcombine.high %v1517_v37, %v1521_v46  ;;  %v1381_v9 = vld [vmem:[%s18208_s22 + $0x2348] sm:$0xff]  ;;  %v17018_v17 = vcombine.low %v1517_v37, %v1521_v46 }
 0x378   : > { %13810 = vmatpush1.bf16.msra.mxu1 %v16914_v21  ;;  %v1385_v32 = vld [vmem:[%s18208_s22 + $0x2368] sm:$0xff] }
 0x379   : > { %13811 = vmatprep.subr.bf16.mxu1 %v16907_v58  ;;  %v1509_v25 = vld [vmem:[%s18208_s22 + $0x2748] sm:$0xff]  ;;  %v16883_v21 = vcombine.high %v1381_v9, %v1385_v32  ;;  %v16882_v18 = vcombine.low %v1381_v9, %v1385_v32 }
 0x37a   : > { %13771 = vmatpush1.bf16.msra.mxu0 %v16778_v28  ;;  %v1513_v2 = vld [vmem:[%s18208_s22 + $0x2768] sm:$0xff] }
 0x37b   : > { %13772 = vmatprep.subr.bf16.mxu0 %v16899_v63  ;;  %v17011_v53 = vcombine.high %v1509_v25, %v1513_v2  ;;  %v1373_v58 = vld [vmem:[%s18208_s22 + $0x2308] sm:$0xff]  ;;  %v17010_v28 = vcombine.low %v1509_v25, %v1513_v2 }
 0x37c   : > { %13812 = vmatpush1.bf16.msra.mxu1 %v16906_v39  ;;  %v1377_v3 = vld [vmem:[%s18208_s22 + $0x2328] sm:$0xff] }
 0x37d   : > { %13813 = vmatprep.subr.bf16.mxu1 %v17027_v52  ;;  %v1501_v5 = vld [vmem:[%s18208_s22 + $0x2708] sm:$0xff]  ;;  %v16875_v39 = vcombine.high %v1373_v58, %v1377_v3  ;;  %v16874_v46 = vcombine.low %v1373_v58, %v1377_v3 }
 0x37e   : > { %13773 = vmatpush2.bf16.msra.mxu0 %v16898_v13  ;;  %v1505_v16 = vld [vmem:[%s18208_s22 + $0x2728] sm:$0xff] }
 0x37f   : > { %13774 = vmatprep.subr.bf16.mxu0 %v16891_v59  ;;  %v17003_v63 = vcombine.high %v1501_v5, %v1505_v16  ;;  %v1365_v52 = vld [vmem:[%s18208_s22 + $0x22c8] sm:$0xff]  ;;  %v17002_v13 = vcombine.low %v1501_v5, %v1505_v16 }
 0x380   : > { %13814 = vmatpush2.bf16.msra.mxu1 %v17026_v49  ;;  %v1369_v50 = vld [vmem:[%s18208_s22 + $0x22e8] sm:$0xff] }
 0x381   : > { %13815 = vmatprep.subr.bf16.mxu1 %v17019_v51  ;;  %v1493_v34 = vld [vmem:[%s18208_s22 + $0x26c8] sm:$0xff]  ;;  %v16867_v49 = vcombine.high %v1365_v52, %v1369_v50  ;;  %v16866_v2 = vcombine.low %v1365_v52, %v1369_v50 }
 0x382   : > { %13775 = vmatpush2.bf16.msra.mxu0 %v16890_v7  ;;  %v1497_v37 = vld [vmem:[%s18208_s22 + $0x26e8] sm:$0xff] }
 0x383   : > { %13776 = vmatprep.subr.bf16.mxu0 %v16883_v21  ;;  %v16995_v59 = vcombine.high %v1493_v34, %v1497_v37  ;;  %v1357_v51 = vld [vmem:[%s18208_s22 + $0x2288] sm:$0xff]  ;;  %v16994_v7 = vcombine.low %v1493_v34, %v1497_v37 }
 0x384   : > { %13816 = vmatpush2.bf16.msra.mxu1 %v17018_v17  ;;  %v1361_v9 = vld [vmem:[%s18208_s22 + $0x22a8] sm:$0xff] }
 0x385   : > { %13817 = vmatprep.subr.bf16.mxu1 %v17011_v53  ;;  %v1485_v32 = vld [vmem:[%s18208_s22 + $0x2688] sm:$0xff]  ;;  %v16859_v17 = vcombine.high %v1357_v51, %v1361_v9  ;;  %v16858_v16 = vcombine.low %v1357_v51, %v1361_v9 }
 0x386   : > { %13777 = vmatpush2.bf16.msra.mxu0 %v16882_v18  ;;  %v1489_v25 = vld [vmem:[%s18208_s22 + $0x26a8] sm:$0xff] }
 0x387   : > { %13778 = vmatprep.subr.bf16.mxu0 %v16875_v39  ;;  %v16987_v21 = vcombine.high %v1485_v32, %v1489_v25  ;;  %v1349_v53 = vld [vmem:[%s18208_s22 + $0x2248] sm:$0xff]  ;;  %v16986_v18 = vcombine.low %v1485_v32, %v1489_v25 }
 0x388   : > { %13818 = vmatpush2.bf16.msra.mxu1 %v17010_v28  ;;  %v1353_v58 = vld [vmem:[%s18208_s22 + $0x2268] sm:$0xff] }
 0x389   : > { %13819 = vmatprep.subr.bf16.mxu1 %v17003_v63  ;;  %v1477_v3 = vld [vmem:[%s18208_s22 + $0x2648] sm:$0xff]  ;;  %v16851_v28 = vcombine.high %v1349_v53, %v1353_v58  ;;  %v16850_v37 = vcombine.low %v1349_v53, %v1353_v58 }
 0x38a   : > { %13779 = vmatpush2.bf16.msra.mxu0 %v16874_v46  ;;  %v1481_v5 = vld [vmem:[%s18208_s22 + $0x2668] sm:$0xff] }
 0x38b   : > { %13780 = vmatprep.subr.bf16.mxu0 %v16867_v49  ;;  %v16979_v39 = vcombine.high %v1477_v3, %v1481_v5  ;;  %v1341_v63 = vld [vmem:[%s18208_s22 + $0x2208] sm:$0xff]  ;;  %v16978_v46 = vcombine.low %v1477_v3, %v1481_v5 }
 0x38c   : > { %13820 = vmatpush2.bf16.msra.mxu1 %v17002_v13  ;;  %v1345_v52 = vld [vmem:[%s18208_s22 + $0x2228] sm:$0xff] }
 0x38d   : > { %13821 = vmatprep.subr.bf16.mxu1 %v16995_v59  ;;  %v1469_v50 = vld [vmem:[%s18208_s22 + $0x2608] sm:$0xff]  ;;  %v16843_v13 = vcombine.high %v1341_v63, %v1345_v52  ;;  %v16842_v25 = vcombine.low %v1341_v63, %v1345_v52 }
 0x38e   : > { %13781 = vmatpush2.bf16.msra.mxu0 %v16866_v2  ;;  %v1473_v34 = vld [vmem:[%s18208_s22 + $0x2628] sm:$0xff] }
 0x38f   : > { %13782 = vmatprep.subr.bf16.mxu0 %v16859_v17  ;;  %v16971_v49 = vcombine.high %v1469_v50, %v1473_v34  ;;  %v1589_v59 = vld [vmem:[%s18208_s22 + $0x29c8] sm:$0xff]  ;;  %v16970_v2 = vcombine.low %v1469_v50, %v1473_v34 }
 0x390   : > { %13822 = vmatpush2.bf16.msra.mxu1 %v16994_v7  ;;  %v1593_v51 = vld [vmem:[%s18208_s22 + $0x29e8] sm:$0xff] }
 0x391   : > { %13823 = vmatprep.subr.bf16.mxu1 %v16987_v21  ;;  %v1717_v9 = vld [vmem:[%s18208_s22 + $0x2dc8] sm:$0xff]  ;;  %v17091_v7 = vcombine.high %v1589_v59, %v1593_v51  ;;  %v17090_v5 = vcombine.low %v1589_v59, %v1593_v51 }
 0x392   : > { %13783 = vmatpush2.bf16.msra.mxu0 %v16858_v16  ;;  %v1721_v32 = vld [vmem:[%s18208_s22 + $0x2de8] sm:$0xff] }
 0x393   : > { %13784 = vmatprep.subr.bf16.mxu0 %v16851_v28  ;;  %v17219_v17 = vcombine.high %v1717_v9, %v1721_v32  ;;  %v1581_v21 = vld [vmem:[%s18208_s22 + $0x2988] sm:$0xff]  ;;  %v17218_v16 = vcombine.low %v1717_v9, %v1721_v32 }
 0x394   : > { %13824 = vmatpush2.bf16.msra.mxu1 %v16986_v18  ;;  %v1585_v53 = vld [vmem:[%s18208_s22 + $0x29a8] sm:$0xff] }
 0x395   : > { %13825 = vmatprep.subr.bf16.mxu1 %v16979_v39  ;;  %v1709_v58 = vld [vmem:[%s18208_s22 + $0x2d88] sm:$0xff]  ;;  %v17083_v18 = vcombine.high %v1581_v21, %v1585_v53 }
 0x396   : > { %13785 = vmatpush2.bf16.msra.mxu0 %v16850_v37  ;;  %v1713_v3 = vld [vmem:[%s18208_s22 + $0x2da8] sm:$0xff] }
 0x397   : > { %13786 = vmatprep.subr.bf16.mxu0 %v16843_v13  ;;  %v17211_v28 = vcombine.high %v1709_v58, %v1713_v3  ;;  %v1573_v39 = vld [vmem:[%s18208_s22 + $0x2948] sm:$0xff]  ;;  %v17082_v13 = vcombine.low %v1581_v21, %v1585_v53  ;;  %v17210_v59 = vcombine.low %v1709_v58, %v1713_v3 }
 0x398   : > { %13826 = vmatpush2.bf16.msra.mxu1 %v16978_v46  ;;  %v1577_v63 = vld [vmem:[%s18208_s22 + $0x2968] sm:$0xff] }
 0x399   : > { %13827 = vmatprep.subr.bf16.mxu1 %v16971_v49  ;;  %v1701_v50 = vld [vmem:[%s18208_s22 + $0x2d48] sm:$0xff]  ;;  %v17075_v51 = vcombine.high %v1573_v39, %v1577_v63 }
 0x39a   : > { %13787 = vmatpush2.bf16.msra.mxu0 %v16842_v25  ;;  %v1705_v34 = vld [vmem:[%s18208_s22 + $0x2d68] sm:$0xff] }
 0x39b   : > { %13838 = vmatprep.subr.bf16.mxu0 %v17091_v7  ;;  %v1569_v7 = vld [vmem:[%s18208_s22 + $0x2928] sm:$0xff] }
 0x39c   : > { %13828 = vmatpush2.bf16.msra.mxu1 %v16970_v2  ;;  %v1565_v2 = vld [vmem:[%s18208_s22 + $0x2908] sm:$0xff] }
 0x39d   : > { %13879 = vmatprep.subr.bf16.mxu1 %v17219_v17  ;;  %v13544_v52 = vpop.f32.mrf.mxu0  ;;  %13789 = vmatmul.mubr.bf16.vlgmr.msra.gmra.mxu0 %v18690_v41  ;;  %v1693_v21 = vld [vmem:[%s18208_s22 + $0x2d08] sm:$0xff] }
 0x39e   : > { %v13545_v37 = vadd.f32 %v13544_v52, %v19287_v19  ;;  %13839 = vmatpush1.bf16.msra.mxu0 %v17090_v5  ;;  %v17203_v19 = vcombine.high %v1701_v50, %v1705_v34  ;;  %13870 = vmatprep.mubr.bf16.mxu0 %v18697_v55  ;;  %v1697_v53 = vld [vmem:[%s18208_s22 + $0x2d28] sm:$0xff] }
 0x39f   : > { %v13585_v46 = vpop.f32.mrf.mxu1  ;;  %13830 = vmatmul.mubr.bf16.vlgmr.msra.gmra.mxu1 %v18701_v61  ;;  %v13546_v49 = vpop.f32.mrf.mxu0  ;;  %13840 = vmatprep.subr.bf16.mxu0 %v17083_v18  ;;  %v17067_v18 = vcombine.high %v1565_v2, %v1569_v7  ;;  %v17195_v52 = vcombine.high %v1693_v21, %v1697_v53 }
 0x3a0   : > { %13880 = vmatpush1.bf16.msra.mxu1 %v17218_v16  ;;  %v19360_v9 = vadd.f32 %v13585_v46, %v13545_v37  ;;  %v13547_v32 = vadd.f32 %v13546_v49, %v19292_v30  ;;  %13911 = vmatprep.mubr.bf16.mxu1 %v18710_v6  ;;  %v17074_v30 = vcombine.low %v1573_v39, %v1577_v63  ;;  %v1557_v37 = vld [vmem:[%s18208_s22 + $0x28c8] sm:$0xff] }
 0x3a1   : > { %v13587_v25 = vpop.f32.mrf.mxu1  ;;  %13881 = vmatprep.subr.bf16.mxu1 %v17211_v28  ;;  %v13548_v17 = vpop.f32.mrf.mxu0  ;;  %v17202_v16 = vcombine.low %v1701_v50, %v1705_v34  ;;  %v1561_v46 = vld [vmem:[%s18208_s22 + $0x28e8] sm:$0xff]  ;;  %v17194_v39 = vcombine.low %v1693_v21, %v1697_v53 }
 0x3a2   : > { %v19369_v58 = vadd.f32 %v13587_v25, %v13547_v32  ;;  %13841 = vmatpush1.bf16.msra.mxu0 %v17082_v13  ;;  %v1685_v49 = vld [vmem:[%s18208_s22 + $0x2cc8] sm:$0xff]  ;;  %v17066_v25 = vcombine.low %v1565_v2, %v1569_v7  ;;  %v17059_v63 = vcombine.high %v1557_v37, %v1561_v46 }
 0x3a3   : > { %v13589_v3 = vpop.f32.mrf.mxu1  ;;  %v13549_v5 = vpop.f32.mrf.mxu0  ;;  %13842 = vmatprep.subr.bf16.mxu0 %v17075_v51  ;;  %v1689_v32 = vld [vmem:[%s18208_s22 + $0x2ce8] sm:$0xff] }
 0x3a4   : > { %13882 = vmatpush1.bf16.msra.mxu1 %v17210_v59  ;;  %v17187_v50 = vcombine.high %v1685_v49, %v1689_v32  ;;  %v1549_v34 = vld [vmem:[%s18208_s22 + $0x2888] sm:$0xff]  ;;  %v17186_v17 = vcombine.low %v1685_v49, %v1689_v32 }
 0x3a5   : > { %v13590_v28 = vpop.f32.mrf.mxu1  ;;  %13883 = vmatprep.subr.bf16.mxu1 %v17203_v19  ;;  %v1553_v13 = vld [vmem:[%s18208_s22 + $0x28a8] sm:$0xff]  ;;  %v17058_v19 = vcombine.low %v1557_v37, %v1561_v46 }
 0x3a6   : > { %13843 = vmatpush1.bf16.msra.mxu0 %v17074_v30  ;;  %v1677_v59 = vld [vmem:[%s18208_s22 + $0x2c88] sm:$0xff]  ;;  %v17051_v2 = vcombine.high %v1549_v34, %v1553_v13  ;;  %v17050_v5 = vcombine.low %v1549_v34, %v1553_v13 }
 0x3a7   : > { %13844 = vmatprep.subr.bf16.mxu0 %v17067_v18  ;;  %v1681_v51 = vld [vmem:[%s18208_s22 + $0x2ca8] sm:$0xff] }
 0x3a8   : > { %13884 = vmatpush1.bf16.msra.mxu1 %v17202_v16  ;;  %v17179_v7 = vcombine.high %v1677_v59, %v1681_v51  ;;  %v1541_v21 = vld [vmem:[%s18208_s22 + $0x2848] sm:$0xff]  ;;  %v17178_v16 = vcombine.low %v1677_v59, %v1681_v51 }
 0x3a9   : > { %13885 = vmatprep.subr.bf16.mxu1 %v17195_v52  ;;  %v1545_v53 = vld [vmem:[%s18208_s22 + $0x2868] sm:$0xff] }
 0x3aa   : > { %13845 = vmatpush1.bf16.msra.mxu0 %v17066_v25  ;;  %v1669_v3 = vld [vmem:[%s18208_s22 + $0x2c48] sm:$0xff]  ;;  %v17043_v18 = vcombine.high %v1541_v21, %v1545_v53  ;;  %v17042_v32 = vcombine.low %v1541_v21, %v1545_v53 }
 0x3ab   : > { %13846 = vmatprep.subr.bf16.mxu0 %v17059_v63  ;;  %v1673_v30 = vld [vmem:[%s18208_s22 + $0x2c68] sm:$0xff] }
 0x3ac   : > { %13886 = vmatpush1.bf16.msra.mxu1 %v17194_v39  ;;  %v17171_v28 = vcombine.high %v1669_v3, %v1673_v30  ;;  %v1533_v52 = vld [vmem:[%s18208_s22 + $0x2808] sm:$0xff]  ;;  %v17170_v25 = vcombine.low %v1669_v3, %v1673_v30 }
 0x3ad   : > { %13887 = vmatprep.subr.bf16.mxu1 %v17187_v50  ;;  %v1537_v37 = vld [vmem:[%s18208_s22 + $0x2828] sm:$0xff] }
 0x3ae   : > { %13847 = vmatpush1.bf16.msra.mxu0 %v17058_v19  ;;  %v1661_v46 = vld [vmem:[%s18208_s22 + $0x2c08] sm:$0xff]  ;;  %v17035_v39 = vcombine.high %v1533_v52, %v1537_v37  ;;  %v17034_v51 = vcombine.low %v1533_v52, %v1537_v37 }
 0x3af   : > { %13848 = vmatprep.subr.bf16.mxu0 %v17051_v2  ;;  %v1665_v49 = vld [vmem:[%s18208_s22 + $0x2c28] sm:$0xff] }
 0x3b0   : > { %13888 = vmatpush1.bf16.msra.mxu1 %v17186_v17  ;;  %v17163_v63 = vcombine.high %v1661_v46, %v1665_v49  ;;  %v1653_v50 = vld [vmem:[%s18208_s22 + $0x2bc8] sm:$0xff]  ;;  %v17162_v19 = vcombine.low %v1661_v46, %v1665_v49 }
 0x3b1   : > { %13889 = vmatprep.subr.bf16.mxu1 %v17179_v7  ;;  %v1657_v34 = vld [vmem:[%s18208_s22 + $0x2be8] sm:$0xff] }
 0x3b2   : > { %13849 = vmatpush1.bf16.msra.mxu0 %v17050_v5  ;;  %v1781_v13 = vld [vmem:[%s18208_s22 + $0x2fc8] sm:$0xff]  ;;  %v17155_v17 = vcombine.high %v1653_v50, %v1657_v34  ;;  %v17154_v30 = vcombine.low %v1653_v50, %v1657_v34 }
 0x3b3   : > { %13850 = vmatprep.subr.bf16.mxu0 %v17043_v18  ;;  %v1785_v59 = vld [vmem:[%s18208_s22 + $0x2fe8] sm:$0xff] }
 0x3b4   : > { %13890 = vmatpush1.bf16.msra.mxu1 %v17178_v16  ;;  %v17283_v2 = vcombine.high %v1781_v13, %v1785_v59  ;;  %v1645_v7 = vld [vmem:[%s18208_s22 + $0x2b88] sm:$0xff]  ;;  %v17282_v5 = vcombine.low %v1781_v13, %v1785_v59 }
 0x3b5   : > { %13891 = vmatprep.subr.bf16.mxu1 %v17171_v28  ;;  %v1649_v21 = vld [vmem:[%s18208_s22 + $0x2ba8] sm:$0xff] }
 0x3b6   : > { %13851 = vmatpush1.bf16.msra.mxu0 %v17042_v32  ;;  %v1773_v53 = vld [vmem:[%s18208_s22 + $0x2f88] sm:$0xff]  ;;  %v17147_v16 = vcombine.high %v1645_v7, %v1649_v21  ;;  %v17146_v49 = vcombine.low %v1645_v7, %v1649_v21 }
 0x3b7   : > { %13852 = vmatprep.subr.bf16.mxu0 %v17035_v39  ;;  %v1777_v3 = vld [vmem:[%s18208_s22 + $0x2fa8] sm:$0xff] }
 0x3b8   : > { %13892 = vmatpush1.bf16.msra.mxu1 %v17170_v25  ;;  %v17275_v18 = vcombine.high %v1773_v53, %v1777_v3  ;;  %v1637_v28 = vld [vmem:[%s18208_s22 + $0x2b48] sm:$0xff]  ;;  %v17274_v32 = vcombine.low %v1773_v53, %v1777_v3 }
 0x3b9   : > { %13893 = vmatprep.subr.bf16.mxu1 %v17163_v63  ;;  %v1641_v52 = vld [vmem:[%s18208_s22 + $0x2b68] sm:$0xff] }
 0x3ba   : > { %13853 = vmatpush1.bf16.msra.mxu0 %v17034_v51  ;;  %v1765_v37 = vld [vmem:[%s18208_s22 + $0x2f48] sm:$0xff]  ;;  %v17139_v25 = vcombine.high %v1637_v28, %v1641_v52  ;;  %v17138_v59 = vcombine.low %v1637_v28, %v1641_v52 }
 0x3bb   : > { %13854 = vmatprep.subr.bf16.mxu0 %v17155_v17  ;;  %v1769_v46 = vld [vmem:[%s18208_s22 + $0x2f68] sm:$0xff] }
 0x3bc   : > { %13894 = vmatpush1.bf16.msra.mxu1 %v17162_v19  ;;  %v17267_v39 = vcombine.high %v1765_v37, %v1769_v46  ;;  %v1629_v63 = vld [vmem:[%s18208_s22 + $0x2b08] sm:$0xff]  ;;  %v17266_v51 = vcombine.low %v1765_v37, %v1769_v46 }
 0x3bd   : > { %13895 = vmatprep.subr.bf16.mxu1 %v17283_v2  ;;  %v1633_v50 = vld [vmem:[%s18208_s22 + $0x2b28] sm:$0xff] }
 0x3be   : > { %13855 = vmatpush2.bf16.msra.mxu0 %v17154_v30  ;;  %v1757_v34 = vld [vmem:[%s18208_s22 + $0x2f08] sm:$0xff]  ;;  %v17131_v19 = vcombine.high %v1629_v63, %v1633_v50  ;;  %v17130_v3 = vcombine.low %v1629_v63, %v1633_v50 }
 0x3bf   : > { %13856 = vmatprep.subr.bf16.mxu0 %v17147_v16  ;;  %v1761_v13 = vld [vmem:[%s18208_s22 + $0x2f28] sm:$0xff] }
 0x3c0   : > { %13896 = vmatpush2.bf16.msra.mxu1 %v17282_v5  ;;  %v17259_v17 = vcombine.high %v1757_v34, %v1761_v13  ;;  %v1621_v2 = vld [vmem:[%s18208_s22 + $0x2ac8] sm:$0xff]  ;;  %v17258_v30 = vcombine.low %v1757_v34, %v1761_v13 }
 0x3c1   : > { %13897 = vmatprep.subr.bf16.mxu1 %v17275_v18  ;;  %v1625_v7 = vld [vmem:[%s18208_s22 + $0x2ae8] sm:$0xff] }
 0x3c2   : > { %13857 = vmatpush2.bf16.msra.mxu0 %v17146_v49  ;;  %v1749_v21 = vld [vmem:[%s18208_s22 + $0x2ec8] sm:$0xff]  ;;  %v17123_v5 = vcombine.high %v1621_v2, %v1625_v7  ;;  %v17122_v46 = vcombine.low %v1621_v2, %v1625_v7 }
 0x3c3   : > { %13858 = vmatprep.subr.bf16.mxu0 %v17139_v25  ;;  %v1753_v53 = vld [vmem:[%s18208_s22 + $0x2ee8] sm:$0xff] }
 0x3c4   : > { %13898 = vmatpush2.bf16.msra.mxu1 %v17274_v32  ;;  %v17251_v16 = vcombine.high %v1749_v21, %v1753_v53  ;;  %v1613_v18 = vld [vmem:[%s18208_s22 + $0x2a88] sm:$0xff]  ;;  %v17250_v49 = vcombine.low %v1749_v21, %v1753_v53 }
 0x3c5   : > { %13899 = vmatprep.subr.bf16.mxu1 %v17267_v39  ;;  %v1617_v28 = vld [vmem:[%s18208_s22 + $0x2aa8] sm:$0xff] }
 0x3c6   : > { %13859 = vmatpush2.bf16.msra.mxu0 %v17138_v59  ;;  %v1741_v52 = vld [vmem:[%s18208_s22 + $0x2e88] sm:$0xff]  ;;  %v17115_v32 = vcombine.high %v1613_v18, %v1617_v28  ;;  %v17114_v13 = vcombine.low %v1613_v18, %v1617_v28 }
 0x3c7   : > { %13860 = vmatprep.subr.bf16.mxu0 %v17131_v19  ;;  %v1745_v37 = vld [vmem:[%s18208_s22 + $0x2ea8] sm:$0xff] }
 0x3c8   : > { %13900 = vmatpush2.bf16.msra.mxu1 %v17266_v51  ;;  %v17243_v25 = vcombine.high %v1741_v52, %v1745_v37  ;;  %v1605_v39 = vld [vmem:[%s18208_s22 + $0x2a48] sm:$0xff]  ;;  %v17242_v59 = vcombine.low %v1741_v52, %v1745_v37 }
 0x3c9   : > { %13901 = vmatprep.subr.bf16.mxu1 %v17259_v17  ;;  %v1609_v63 = vld [vmem:[%s18208_s22 + $0x2a68] sm:$0xff] }
 0x3ca   : > { %13861 = vmatpush2.bf16.msra.mxu0 %v17130_v3  ;;  %v1733_v50 = vld [vmem:[%s18208_s22 + $0x2e48] sm:$0xff]  ;;  %v17107_v51 = vcombine.high %v1605_v39, %v1609_v63  ;;  %v17106_v53 = vcombine.low %v1605_v39, %v1609_v63 }
 0x3cb   : > { %13862 = vmatprep.subr.bf16.mxu0 %v17123_v5  ;;  %v1737_v34 = vld [vmem:[%s18208_s22 + $0x2e68] sm:$0xff] }
 0x3cc   : > { %13902 = vmatpush2.bf16.msra.mxu1 %v17258_v30  ;;  %v17235_v19 = vcombine.high %v1733_v50, %v1737_v34  ;;  %v1597_v17 = vld [vmem:[%s18208_s22 + $0x2a08] sm:$0xff]  ;;  %v17234_v3 = vcombine.low %v1733_v50, %v1737_v34 }
 0x3cd   : > { %13903 = vmatprep.subr.bf16.mxu1 %v17251_v16  ;;  %v1601_v2 = vld [vmem:[%s18208_s22 + $0x2a28] sm:$0xff] }
 0x3ce   : > { %13863 = vmatpush2.bf16.msra.mxu0 %v17122_v46  ;;  %v1725_v7 = vld [vmem:[%s18208_s22 + $0x2e08] sm:$0xff]  ;;  %v17099_v30 = vcombine.high %v1597_v17, %v1601_v2  ;;  %v17098_v37 = vcombine.low %v1597_v17, %v1601_v2 }
 0x3cf   : > { %13864 = vmatprep.subr.bf16.mxu0 %v17115_v32  ;;  %v1729_v21 = vld [vmem:[%s18208_s22 + $0x2e28] sm:$0xff] }
 0x3d0   : > { %13904 = vmatpush2.bf16.msra.mxu1 %v17250_v49  ;;  %v17227_v5 = vcombine.high %v1725_v7, %v1729_v21  ;;  %v1845_v16 = vld [vmem:[%s18208_s22 + $0x31c8] sm:$0xff]  ;;  %v17226_v46 = vcombine.low %v1725_v7, %v1729_v21 }
 0x3d1   : > { %13905 = vmatprep.subr.bf16.mxu1 %v17243_v25  ;;  %v1849_v18 = vld [vmem:[%s18208_s22 + $0x31e8] sm:$0xff] }
 0x3d2   : > { %13865 = vmatpush2.bf16.msra.mxu0 %v17114_v13  ;;  %v1973_v28 = vld [vmem:[%s18208_s22 + $0x35c8] sm:$0xff]  ;;  %v17347_v49 = vcombine.high %v1845_v16, %v1849_v18  ;;  %v17346_v34 = vcombine.low %v1845_v16, %v1849_v18 }
 0x3d3   : > { %13866 = vmatprep.subr.bf16.mxu0 %v17107_v51  ;;  %v1977_v52 = vld [vmem:[%s18208_s22 + $0x35e8] sm:$0xff] }
 0x3d4   : > { %13906 = vmatpush2.bf16.msra.mxu1 %v17242_v59  ;;  %v17475_v32 = vcombine.high %v1973_v28, %v1977_v52  ;;  %v1837_v25 = vld [vmem:[%s18208_s22 + $0x3188] sm:$0xff]  ;;  %v17474_v13 = vcombine.low %v1973_v28, %v1977_v52 }
 0x3d5   : > { %13907 = vmatprep.subr.bf16.mxu1 %v17235_v19  ;;  %v1841_v39 = vld [vmem:[%s18208_s22 + $0x31a8] sm:$0xff] }
 0x3d6   : > { %13867 = vmatpush2.bf16.msra.mxu0 %v17106_v53  ;;  %v1965_v63 = vld [vmem:[%s18208_s22 + $0x3588] sm:$0xff]  ;;  %v17339_v59 = vcombine.high %v1837_v25, %v1841_v39 }
 0x3d7   : > { %13868 = vmatprep.subr.bf16.mxu0 %v17099_v30  ;;  %v1969_v50 = vld [vmem:[%s18208_s22 + $0x35a8] sm:$0xff]  ;;  %v17338_v30 = vcombine.low %v1837_v25, %v1841_v39 }
 0x3d8   : > { %13908 = vmatpush2.bf16.msra.mxu1 %v17234_v3  ;;  %v17467_v51 = vcombine.high %v1965_v63, %v1969_v50  ;;  %v1829_v19 = vld [vmem:[%s18208_s22 + $0x3148] sm:$0xff]  ;;  %v17466_v16 = vcombine.low %v1965_v63, %v1969_v50 }
 0x3d9   : > { %13909 = vmatprep.subr.bf16.mxu1 %v17227_v5  ;;  %v1833_v17 = vld [vmem:[%s18208_s22 + $0x3168] sm:$0xff] }
 0x3da   : > { %13869 = vmatpush2.bf16.msra.mxu0 %v17098_v37  ;;  %v1957_v7 = vld [vmem:[%s18208_s22 + $0x3548] sm:$0xff]  ;;  %v17331_v18 = vcombine.high %v1829_v19, %v1833_v17 }
 0x3db   : > { %13920 = vmatprep.subr.bf16.mxu0 %v17347_v49  ;;  %v1961_v21 = vld [vmem:[%s18208_s22 + $0x3568] sm:$0xff] }
 0x3dc   : > { %13910 = vmatpush2.bf16.msra.mxu1 %v17226_v46  ;;  %v1821_v46 = vld [vmem:[%s18208_s22 + $0x3108] sm:$0xff] }
 0x3dd   : > { %13961 = vmatprep.subr.bf16.mxu1 %v17475_v32  ;;  %v13626_v2 = vpop.f32.mrf.mxu0  ;;  %13871 = vmatmul.mubr.bf16.vlgmr.msra.gmra.mxu0 %v18788_v29  ;;  %v1825_v49 = vld [vmem:[%s18208_s22 + $0x3128] sm:$0xff] }
 0x3de   : > { %v13627_v53 = vadd.f32 %v13626_v2, %v19360_v9  ;;  %13921 = vmatpush1.bf16.msra.mxu0 %v17346_v34  ;;  %v17459_v9 = vcombine.high %v1957_v7, %v1961_v21  ;;  %13952 = vmatprep.mubr.bf16.mxu0 %v18795_v43  ;;  %v1949_v25 = vld [vmem:[%s18208_s22 + $0x3508] sm:$0xff] }
 0x3df   : > { %v13667_v3 = vpop.f32.mrf.mxu1  ;;  %13912 = vmatmul.mubr.bf16.vlgmr.msra.gmra.mxu1 %v18799_v24  ;;  %v13628_v5 = vpop.f32.mrf.mxu0  ;;  %13922 = vmatprep.subr.bf16.mxu0 %v17339_v59  ;;  %v1953_v39 = vld [vmem:[%s18208_s22 + $0x3528] sm:$0xff]  ;;  %v17323_v59 = vcombine.high %v1821_v46, %v1825_v49 }
 0x3e0   : > { %13962 = vmatpush1.bf16.msra.mxu1 %v17474_v13  ;;  %v19434_v28 = vadd.f32 %v13667_v3, %v13627_v53  ;;  %v13629_v52 = vadd.f32 %v13628_v5, %v19369_v58  ;;  %13993 = vmatprep.mubr.bf16.mxu1 %v18808_v1  ;;  %v17330_v58 = vcombine.low %v1829_v19, %v1833_v17  ;;  %v1813_v53 = vld [vmem:[%s18208_s22 + $0x30c8] sm:$0xff] }
 0x3e1   : > { %v13669_v37 = vpop.f32.mrf.mxu1  ;;  %13963 = vmatprep.subr.bf16.mxu1 %v17467_v51  ;;  %v13630_v32 = vpop.f32.mrf.mxu0  ;;  %v17458_v13 = vcombine.low %v1957_v7, %v1961_v21  ;;  %v17451_v2 = vcombine.high %v1949_v25, %v1953_v39  ;;  %v1817_v3 = vld [vmem:[%s18208_s22 + $0x30e8] sm:$0xff]  ;;  %v17450_v19 = vcombine.low %v1949_v25, %v1953_v39 }
 0x3e2   : > { %v19443_v63 = vadd.f32 %v13669_v37, %v13629_v52  ;;  %13923 = vmatpush1.bf16.msra.mxu0 %v17338_v30  ;;  %v1941_v5 = vld [vmem:[%s18208_s22 + $0x34c8] sm:$0xff]  ;;  %v17322_v37 = vcombine.low %v1821_v46, %v1825_v49  ;;  %v17315_v17 = vcombine.high %v1813_v53, %v1817_v3 }
 0x3e3   : > { %v13671_v50 = vpop.f32.mrf.mxu1  ;;  %v13631_v34 = vpop.f32.mrf.mxu0  ;;  %13924 = vmatprep.subr.bf16.mxu0 %v17331_v18  ;;  %v1945_v52 = vld [vmem:[%s18208_s22 + $0x34e8] sm:$0xff] }
 0x3e4   : > { %13964 = vmatpush1.bf16.msra.mxu1 %v17466_v16  ;;  %v17443_v7 = vcombine.high %v1941_v5, %v1945_v52  ;;  %v1805_v21 = vld [vmem:[%s18208_s22 + $0x3088] sm:$0xff]  ;;  %v17442_v32 = vcombine.low %v1941_v5, %v1945_v52 }
 0x3e5   : > { %v13672_v51 = vpop.f32.mrf.mxu1  ;;  %13965 = vmatprep.subr.bf16.mxu1 %v17459_v9  ;;  %v1809_v30 = vld [vmem:[%s18208_s22 + $0x30a8] sm:$0xff]  ;;  %v17314_v9 = vcombine.low %v1813_v53, %v1817_v3 }
 0x3e6   : > { %13925 = vmatpush1.bf16.msra.mxu0 %v17330_v58  ;;  %v1933_v16 = vld [vmem:[%s18208_s22 + $0x3488] sm:$0xff]  ;;  %v17307_v46 = vcombine.high %v1805_v21, %v1809_v30  ;;  %v17306_v34 = vcombine.low %v1805_v21, %v1809_v30 }
 0x3e7   : > { %13926 = vmatprep.subr.bf16.mxu0 %v17323_v59  ;;  %v1937_v18 = vld [vmem:[%s18208_s22 + $0x34a8] sm:$0xff] }
 0x3e8   : > { %13966 = vmatpush1.bf16.msra.mxu1 %v17458_v13  ;;  %v17435_v49 = vcombine.high %v1933_v16, %v1937_v18  ;;  %v1797_v25 = vld [vmem:[%s18208_s22 + $0x3048] sm:$0xff]  ;;  %v17434_v13 = vcombine.low %v1933_v16, %v1937_v18 }
 0x3e9   : > { %13967 = vmatprep.subr.bf16.mxu1 %v17451_v2  ;;  %v1801_v39 = vld [vmem:[%s18208_s22 + $0x3068] sm:$0xff] }
 0x3ea   : > { %13927 = vmatpush1.bf16.msra.mxu0 %v17322_v37  ;;  %v1925_v50 = vld [vmem:[%s18208_s22 + $0x3448] sm:$0xff]  ;;  %v17299_v59 = vcombine.high %v1797_v25, %v1801_v39  ;;  %v17298_v52 = vcombine.low %v1797_v25, %v1801_v39 }
 0x3eb   : > { %13928 = vmatprep.subr.bf16.mxu0 %v17315_v17  ;;  %v1929_v58 = vld [vmem:[%s18208_s22 + $0x3468] sm:$0xff] }
 0x3ec   : > { %13968 = vmatpush1.bf16.msra.mxu1 %v17450_v19  ;;  %v17427_v51 = vcombine.high %v1925_v50, %v1929_v58  ;;  %v1789_v2 = vld [vmem:[%s18208_s22 + $0x3008] sm:$0xff]  ;;  %v17426_v37 = vcombine.low %v1925_v50, %v1929_v58 }
 0x3ed   : > { %13969 = vmatprep.subr.bf16.mxu1 %v17443_v7  ;;  %v1793_v53 = vld [vmem:[%s18208_s22 + $0x3028] sm:$0xff] }
 0x3ee   : > { %13929 = vmatpush1.bf16.msra.mxu0 %v17314_v9  ;;  %v1917_v3 = vld [vmem:[%s18208_s22 + $0x3408] sm:$0xff]  ;;  %v17291_v19 = vcombine.high %v1789_v2, %v1793_v53  ;;  %v17290_v18 = vcombine.low %v1789_v2, %v1793_v53 }
 0x3ef   : > { %13930 = vmatprep.subr.bf16.mxu0 %v17307_v46  ;;  %v1921_v5 = vld [vmem:[%s18208_s22 + $0x3428] sm:$0xff] }
 0x3f0   : > { %13970 = vmatpush1.bf16.msra.mxu1 %v17442_v32  ;;  %v17419_v17 = vcombine.high %v1917_v3, %v1921_v5  ;;  %v1909_v7 = vld [vmem:[%s18208_s22 + $0x33c8] sm:$0xff]  ;;  %v17418_v9 = vcombine.low %v1917_v3, %v1921_v5 }
 0x3f1   : > { %13971 = vmatprep.subr.bf16.mxu1 %v17435_v49  ;;  %v1913_v21 = vld [vmem:[%s18208_s22 + $0x33e8] sm:$0xff] }
 0x3f2   : > { %13931 = vmatpush1.bf16.msra.mxu0 %v17306_v34  ;;  %v2037_v30 = vld [vmem:[%s18208_s22 + $0x37c8] sm:$0xff]  ;;  %v17411_v32 = vcombine.high %v1909_v7, %v1913_v21  ;;  %v17410_v58 = vcombine.low %v1909_v7, %v1913_v21 }
 0x3f3   : > { %13932 = vmatprep.subr.bf16.mxu0 %v17299_v59  ;;  %v2041_v16 = vld [vmem:[%s18208_s22 + $0x37e8] sm:$0xff] }
 0x3f4   : > { %13972 = vmatpush1.bf16.msra.mxu1 %v17434_v13  ;;  %v17539_v46 = vcombine.high %v2037_v30, %v2041_v16  ;;  %v1901_v49 = vld [vmem:[%s18208_s22 + $0x3388] sm:$0xff]  ;;  %v17538_v34 = vcombine.low %v2037_v30, %v2041_v16 }
 0x3f5   : > { %13973 = vmatprep.subr.bf16.mxu1 %v17427_v51  ;;  %v1905_v25 = vld [vmem:[%s18208_s22 + $0x33a8] sm:$0xff] }
 0x3f6   : > { %13933 = vmatpush1.bf16.msra.mxu0 %v17298_v52  ;;  %v2029_v39 = vld [vmem:[%s18208_s22 + $0x3788] sm:$0xff]  ;;  %v17403_v13 = vcombine.high %v1901_v49, %v1905_v25  ;;  %v17402_v5 = vcombine.low %v1901_v49, %v1905_v25 }
 0x3f7   : > { %13934 = vmatprep.subr.bf16.mxu0 %v17291_v19  ;;  %v2033_v50 = vld [vmem:[%s18208_s22 + $0x37a8] sm:$0xff] }
 0x3f8   : > { %13974 = vmatpush1.bf16.msra.mxu1 %v17426_v37  ;;  %v17531_v59 = vcombine.high %v2029_v39, %v2033_v50  ;;  %v1893_v51 = vld [vmem:[%s18208_s22 + $0x3348] sm:$0xff]  ;;  %v17530_v52 = vcombine.low %v2029_v39, %v2033_v50 }
 0x3f9   : > { %13975 = vmatprep.subr.bf16.mxu1 %v17419_v17  ;;  %v1897_v2 = vld [vmem:[%s18208_s22 + $0x3368] sm:$0xff] }
 0x3fa   : > { %13935 = vmatpush1.bf16.msra.mxu0 %v17290_v18  ;;  %v2021_v53 = vld [vmem:[%s18208_s22 + $0x3748] sm:$0xff]  ;;  %v17395_v37 = vcombine.high %v1893_v51, %v1897_v2  ;;  %v17394_v16 = vcombine.low %v1893_v51, %v1897_v2 }
 0x3fb   : > { %13936 = vmatprep.subr.bf16.mxu0 %v17411_v32  ;;  %v2025_v3 = vld [vmem:[%s18208_s22 + $0x3768] sm:$0xff] }
 0x3fc   : > { %13976 = vmatpush1.bf16.msra.mxu1 %v17418_v9  ;;  %v17523_v19 = vcombine.high %v2021_v53, %v2025_v3  ;;  %v1885_v17 = vld [vmem:[%s18208_s22 + $0x3308] sm:$0xff]  ;;  %v17522_v18 = vcombine.low %v2021_v53, %v2025_v3 }
 0x3fd   : > { %13977 = vmatprep.subr.bf16.mxu1 %v17539_v46  ;;  %v1889_v7 = vld [vmem:[%s18208_s22 + $0x3328] sm:$0xff] }
 0x3fe   : > { %13937 = vmatpush2.bf16.msra.mxu0 %v17410_v58  ;;  %v2013_v21 = vld [vmem:[%s18208_s22 + $0x3708] sm:$0xff]  ;;  %v17387_v9 = vcombine.high %v1885_v17, %v1889_v7  ;;  %v17386_v50 = vcombine.low %v1885_v17, %v1889_v7 }
 0x3ff   : > { %13938 = vmatprep.subr.bf16.mxu0 %v17403_v13  ;;  %v2017_v30 = vld [vmem:[%s18208_s22 + $0x3728] sm:$0xff] }
 0x400   : > { %13978 = vmatpush2.bf16.msra.mxu1 %v17538_v34  ;;  %v17515_v32 = vcombine.high %v2013_v21, %v2017_v30  ;;  %v1877_v46 = vld [vmem:[%s18208_s22 + $0x32c8] sm:$0xff]  ;;  %v17514_v58 = vcombine.low %v2013_v21, %v2017_v30 }
 0x401   : > { %13979 = vmatprep.subr.bf16.mxu1 %v17531_v59  ;;  %v1881_v49 = vld [vmem:[%s18208_s22 + $0x32e8] sm:$0xff] }
 0x402   : > { %13939 = vmatpush2.bf16.msra.mxu0 %v17402_v5  ;;  %v2005_v25 = vld [vmem:[%s18208_s22 + $0x36c8] sm:$0xff]  ;;  %v17379_v34 = vcombine.high %v1877_v46, %v1881_v49  ;;  %v17378_v3 = vcombine.low %v1877_v46, %v1881_v49 }
 0x403   : > { %13940 = vmatprep.subr.bf16.mxu0 %v17395_v37  ;;  %v2009_v39 = vld [vmem:[%s18208_s22 + $0x36e8] sm:$0xff] }
 0x404   : > { %13980 = vmatpush2.bf16.msra.mxu1 %v17530_v52  ;;  %v17507_v13 = vcombine.high %v2005_v25, %v2009_v39  ;;  %v1869_v59 = vld [vmem:[%s18208_s22 + $0x3288] sm:$0xff]  ;;  %v17506_v5 = vcombine.low %v2005_v25, %v2009_v39 }
 0x405   : > { %13981 = vmatprep.subr.bf16.mxu1 %v17523_v19  ;;  %v1873_v51 = vld [vmem:[%s18208_s22 + $0x32a8] sm:$0xff] }
 0x406   : > { %13941 = vmatpush2.bf16.msra.mxu0 %v17394_v16  ;;  %v1997_v2 = vld [vmem:[%s18208_s22 + $0x3688] sm:$0xff]  ;;  %v17371_v52 = vcombine.high %v1869_v59, %v1873_v51  ;;  %v17370_v30 = vcombine.low %v1869_v59, %v1873_v51 }
 0x407   : > { %13942 = vmatprep.subr.bf16.mxu0 %v17387_v9  ;;  %v2001_v53 = vld [vmem:[%s18208_s22 + $0x36a8] sm:$0xff] }
 0x408   : > { %13982 = vmatpush2.bf16.msra.mxu1 %v17522_v18  ;;  %v17499_v37 = vcombine.high %v1997_v2, %v2001_v53  ;;  %v1861_v19 = vld [vmem:[%s18208_s22 + $0x3248] sm:$0xff]  ;;  %v17498_v16 = vcombine.low %v1997_v2, %v2001_v53 }
 0x409   : > { %13983 = vmatprep.subr.bf16.mxu1 %v17515_v32  ;;  %v1865_v17 = vld [vmem:[%s18208_s22 + $0x3268] sm:$0xff] }
 0x40a   : > { %13943 = vmatpush2.bf16.msra.mxu0 %v17386_v50  ;;  %v1989_v7 = vld [vmem:[%s18208_s22 + $0x3648] sm:$0xff]  ;;  %v17363_v18 = vcombine.high %v1861_v19, %v1865_v17  ;;  %v17362_v39 = vcombine.low %v1861_v19, %v1865_v17 }
 0x40b   : > { %13944 = vmatprep.subr.bf16.mxu0 %v17379_v34  ;;  %v1993_v21 = vld [vmem:[%s18208_s22 + $0x3668] sm:$0xff] }
 0x40c   : > { %13984 = vmatpush2.bf16.msra.mxu1 %v17514_v58  ;;  %v17491_v9 = vcombine.high %v1989_v7, %v1993_v21  ;;  %v1853_v32 = vld [vmem:[%s18208_s22 + $0x3208] sm:$0xff]  ;;  %v17490_v50 = vcombine.low %v1989_v7, %v1993_v21 }
 0x40d   : > { %13985 = vmatprep.subr.bf16.mxu1 %v17507_v13  ;;  %v1857_v46 = vld [vmem:[%s18208_s22 + $0x3228] sm:$0xff] }
 0x40e   : > { %13945 = vmatpush2.bf16.msra.mxu0 %v17378_v3  ;;  %v1981_v49 = vld [vmem:[%s18208_s22 + $0x3608] sm:$0xff]  ;;  %v17355_v58 = vcombine.high %v1853_v32, %v1857_v46  ;;  %v17354_v53 = vcombine.low %v1853_v32, %v1857_v46 }
 0x40f   : > { %13946 = vmatprep.subr.bf16.mxu0 %v17371_v52  ;;  %v1985_v25 = vld [vmem:[%s18208_s22 + $0x3628] sm:$0xff] }
 0x410   : > { %13986 = vmatpush2.bf16.msra.mxu1 %v17506_v5  ;;  %v17483_v34 = vcombine.high %v1981_v49, %v1985_v25  ;;  %v2101_v13 = vld [vmem:[%s18208_s22 + $0x39c8] sm:$0xff]  ;;  %v17482_v3 = vcombine.low %v1981_v49, %v1985_v25 }
 0x411   : > { %13987 = vmatprep.subr.bf16.mxu1 %v17499_v37  ;;  %v2105_v59 = vld [vmem:[%s18208_s22 + $0x39e8] sm:$0xff] }
 0x412   : > { %13947 = vmatpush2.bf16.msra.mxu0 %v17370_v30  ;;  %v2229_v51 = vld [vmem:[%s18208_s22 + $0x3dc8] sm:$0xff]  ;;  %v17603_v5 = vcombine.high %v2101_v13, %v2105_v59  ;;  %v17602_v21 = vcombine.low %v2101_v13, %v2105_v59 }
 0x413   : > { %13948 = vmatprep.subr.bf16.mxu0 %v17363_v18  ;;  %v2233_v2 = vld [vmem:[%s18208_s22 + $0x3de8] sm:$0xff] }
 0x414   : > { %13988 = vmatpush2.bf16.msra.mxu1 %v17498_v16  ;;  %v17731_v52 = vcombine.high %v2229_v51, %v2233_v2  ;;  %v2093_v37 = vld [vmem:[%s18208_s22 + $0x3988] sm:$0xff]  ;;  %v17730_v30 = vcombine.low %v2229_v51, %v2233_v2 }
 0x415   : > { %13989 = vmatprep.subr.bf16.mxu1 %v17491_v9  ;;  %v2097_v19 = vld [vmem:[%s18208_s22 + $0x39a8] sm:$0xff] }
 0x416   : > { %13949 = vmatpush2.bf16.msra.mxu0 %v17362_v39  ;;  %v2221_v17 = vld [vmem:[%s18208_s22 + $0x3d88] sm:$0xff]  ;;  %v17595_v16 = vcombine.high %v2093_v37, %v2097_v19 }
 0x417   : > { %13950 = vmatprep.subr.bf16.mxu0 %v17355_v58  ;;  %v2225_v7 = vld [vmem:[%s18208_s22 + $0x3da8] sm:$0xff]  ;;  %v17594_v58 = vcombine.low %v2093_v37, %v2097_v19 }
 0x418   : > { %13990 = vmatpush2.bf16.msra.mxu1 %v17490_v50  ;;  %v17723_v18 = vcombine.high %v2221_v17, %v2225_v7  ;;  %v2085_v9 = vld [vmem:[%s18208_s22 + $0x3948] sm:$0xff]  ;;  %v17722_v13 = vcombine.low %v2221_v17, %v2225_v7 }
 0x419   : > { %13991 = vmatprep.subr.bf16.mxu1 %v17483_v34  ;;  %v2089_v32 = vld [vmem:[%s18208_s22 + $0x3968] sm:$0xff] }
 0x41a   : > { %13951 = vmatpush2.bf16.msra.mxu0 %v17354_v53  ;;  %v2213_v49 = vld [vmem:[%s18208_s22 + $0x3d48] sm:$0xff]  ;;  %v17587_v59 = vcombine.high %v2085_v9, %v2089_v32 }
 0x41b   : > { %14002 = vmatprep.subr.bf16.mxu0 %v17603_v5  ;;  %v2217_v25 = vld [vmem:[%s18208_s22 + $0x3d68] sm:$0xff] }
 0x41c   : > { %13992 = vmatpush2.bf16.msra.mxu1 %v17482_v3  ;;  %v2077_v3 = vld [vmem:[%s18208_s22 + $0x3908] sm:$0xff] }
 0x41d   : > { %14043 = vmatprep.subr.bf16.mxu1 %v17731_v52  ;;  %v13708_v46 = vpop.f32.mrf.mxu0  ;;  %13953 = vmatmul.mubr.bf16.vlgmr.msra.gmra.mxu0 %v18884_v56  ;;  %v2081_v5 = vld [vmem:[%s18208_s22 + $0x3928] sm:$0xff] }
 0x41e   : > { %v13709_v39 = vadd.f32 %v13708_v46, %v19434_v28  ;;  %14003 = vmatpush1.bf16.msra.mxu0 %v17602_v21  ;;  %v17715_v28 = vcombine.high %v2213_v49, %v2217_v25  ;;  %14034 = vmatprep.mubr.bf16.mxu0 %v18891_v8  ;;  %v2205_v37 = vld [vmem:[%s18208_s22 + $0x3d08] sm:$0xff] }
 0x41f   : > { %v13749_v50 = vpop.f32.mrf.mxu1  ;;  %13994 = vmatmul.mubr.bf16.vlgmr.msra.gmra.mxu1 %v18895_v60  ;;  %v13710_v34 = vpop.f32.mrf.mxu0  ;;  %14004 = vmatprep.subr.bf16.mxu0 %v17595_v16  ;;  %v2209_v19 = vld [vmem:[%s18208_s22 + $0x3d28] sm:$0xff]  ;;  %v17579_v16 = vcombine.high %v2077_v3, %v2081_v5 }
 0x420   : > { %14044 = vmatpush1.bf16.msra.mxu1 %v17730_v30  ;;  %v19508_v51 = vadd.f32 %v13749_v50, %v13709_v39  ;;  %v13711_v2 = vadd.f32 %v13710_v34, %v19443_v63  ;;  %14075 = vmatprep.mubr.bf16.mxu1 %v18904_v27  ;;  %v17586_v63 = vcombine.low %v2085_v9, %v2089_v32  ;;  %v2069_v39 = vld [vmem:[%s18208_s22 + $0x38c8] sm:$0xff] }
 0x421   : > { %v13751_v53 = vpop.f32.mrf.mxu1  ;;  %14045 = vmatprep.subr.bf16.mxu1 %v17723_v18  ;;  %v13712_v52 = vpop.f32.mrf.mxu0  ;;  %v17714_v30 = vcombine.low %v2213_v49, %v2217_v25  ;;  %v17707_v46 = vcombine.high %v2205_v37, %v2209_v19  ;;  %v2073_v50 = vld [vmem:[%s18208_s22 + $0x38e8] sm:$0xff]  ;;  %v17706_v9 = vcombine.low %v2205_v37, %v2209_v19 }
 0x422   : > { %v19517_v17 = vadd.f32 %v13751_v53, %v13711_v2  ;;  %14005 = vmatpush1.bf16.msra.mxu0 %v17594_v58  ;;  %v2197_v34 = vld [vmem:[%s18208_s22 + $0x3cc8] sm:$0xff]  ;;  %v17578_v53 = vcombine.low %v2077_v3, %v2081_v5  ;;  %v17571_v32 = vcombine.high %v2069_v39, %v2073_v50 }
 0x423   : > { %v13753_v7 = vpop.f32.mrf.mxu1  ;;  %v13713_v21 = vpop.f32.mrf.mxu0  ;;  %14006 = vmatprep.subr.bf16.mxu0 %v17587_v59  ;;  %v2201_v2 = vld [vmem:[%s18208_s22 + $0x3ce8] sm:$0xff] }
 0x424   : > { %14046 = vmatpush1.bf16.msra.mxu1 %v17722_v13  ;;  %v17699_v49 = vcombine.high %v2197_v34, %v2201_v2  ;;  %v2061_v25 = vld [vmem:[%s18208_s22 + $0x3888] sm:$0xff]  ;;  %v17698_v52 = vcombine.low %v2197_v34, %v2201_v2 }
 0x425   : > { %v13754_v18 = vpop.f32.mrf.mxu1  ;;  %14047 = vmatprep.subr.bf16.mxu1 %v17715_v28  ;;  %v2065_v58 = vld [vmem:[%s18208_s22 + $0x38a8] sm:$0xff]  ;;  %v17570_v28 = vcombine.low %v2069_v39, %v2073_v50 }
 0x426   : > { %14007 = vmatpush1.bf16.msra.mxu0 %v17586_v63  ;;  %v2189_v13 = vld [vmem:[%s18208_s22 + $0x3c88] sm:$0xff]  ;;  %v17563_v3 = vcombine.high %v2061_v25, %v2065_v58  ;;  %v17562_v21 = vcombine.low %v2061_v25, %v2065_v58 }
 0x427   : > { %14008 = vmatprep.subr.bf16.mxu0 %v17579_v16  ;;  %v2193_v59 = vld [vmem:[%s18208_s22 + $0x3ca8] sm:$0xff] }
 0x428   : > { %14048 = vmatpush1.bf16.msra.mxu1 %v17714_v30  ;;  %v17691_v5 = vcombine.high %v2189_v13, %v2193_v59  ;;  %v2053_v37 = vld [vmem:[%s18208_s22 + $0x3848] sm:$0xff]  ;;  %v17690_v30 = vcombine.low %v2189_v13, %v2193_v59 }
 0x429   : > { %14049 = vmatprep.subr.bf16.mxu1 %v17707_v46  ;;  %v2057_v19 = vld [vmem:[%s18208_s22 + $0x3868] sm:$0xff] }
 0x42a   : > { %14009 = vmatpush1.bf16.msra.mxu0 %v17578_v53  ;;  %v2181_v7 = vld [vmem:[%s18208_s22 + $0x3c48] sm:$0xff]  ;;  %v17555_v16 = vcombine.high %v2053_v37, %v2057_v19  ;;  %v17554_v2 = vcombine.low %v2053_v37, %v2057_v19 }
 0x42b   : > { %14010 = vmatprep.subr.bf16.mxu0 %v17571_v32  ;;  %v2185_v63 = vld [vmem:[%s18208_s22 + $0x3c68] sm:$0xff] }
 0x42c   : > { %14050 = vmatpush1.bf16.msra.mxu1 %v17706_v9  ;;  %v17683_v18 = vcombine.high %v2181_v7, %v2185_v63  ;;  %v2045_v46 = vld [vmem:[%s18208_s22 + $0x3808] sm:$0xff]  ;;  %v17682_v53 = vcombine.low %v2181_v7, %v2185_v63 }
 0x42d   : > { %14051 = vmatprep.subr.bf16.mxu1 %v17699_v49  ;;  %v2049_v39 = vld [vmem:[%s18208_s22 + $0x3828] sm:$0xff] }
 0x42e   : > { %14011 = vmatpush1.bf16.msra.mxu0 %v17570_v28  ;;  %v2173_v50 = vld [vmem:[%s18208_s22 + $0x3c08] sm:$0xff]  ;;  %v17547_v9 = vcombine.high %v2045_v46, %v2049_v39  ;;  %v17546_v59 = vcombine.low %v2045_v46, %v2049_v39 }
 0x42f   : > { %14012 = vmatprep.subr.bf16.mxu0 %v17563_v3  ;;  %v2177_v34 = vld [vmem:[%s18208_s22 + $0x3c28] sm:$0xff] }
 0x430   : > { %14052 = vmatpush1.bf16.msra.mxu1 %v17698_v52  ;;  %v17675_v32 = vcombine.high %v2173_v50, %v2177_v34  ;;  %v2165_v49 = vld [vmem:[%s18208_s22 + $0x3bc8] sm:$0xff]  ;;  %v17674_v28 = vcombine.low %v2173_v50, %v2177_v34 }
 0x431   : > { %14053 = vmatprep.subr.bf16.mxu1 %v17691_v5  ;;  %v2169_v25 = vld [vmem:[%s18208_s22 + $0x3be8] sm:$0xff] }
 0x432   : > { %14013 = vmatpush1.bf16.msra.mxu0 %v17562_v21  ;;  %v2293_v58 = vld [vmem:[%s18208_s22 + $0x3fc8] sm:$0xff]  ;;  %v17667_v52 = vcombine.high %v2165_v49, %v2169_v25  ;;  %v17666_v63 = vcombine.low %v2165_v49, %v2169_v25 }
 0x433   : > { %14014 = vmatprep.subr.bf16.mxu0 %v17555_v16  ;;  %v2297_v13 = vld [vmem:[%s18208_s22 + $0x3fe8] sm:$0xff] }
 0x434   : > { %14054 = vmatpush1.bf16.msra.mxu1 %v17690_v30  ;;  %v17795_v3 = vcombine.high %v2293_v58, %v2297_v13  ;;  %v2157_v5 = vld [vmem:[%s18208_s22 + $0x3b88] sm:$0xff]  ;;  %v17794_v21 = vcombine.low %v2293_v58, %v2297_v13 }
 0x435   : > { %14055 = vmatprep.subr.bf16.mxu1 %v17683_v18  ;;  %v2161_v37 = vld [vmem:[%s18208_s22 + $0x3ba8] sm:$0xff] }
 0x436   : > { %14015 = vmatpush1.bf16.msra.mxu0 %v17554_v2  ;;  %v2285_v19 = vld [vmem:[%s18208_s22 + $0x3f88] sm:$0xff]  ;;  %v17659_v30 = vcombine.high %v2157_v5, %v2161_v37  ;;  %v17658_v34 = vcombine.low %v2157_v5, %v2161_v37 }
 0x437   : > { %14016 = vmatprep.subr.bf16.mxu0 %v17547_v9  ;;  %v2289_v7 = vld [vmem:[%s18208_s22 + $0x3fa8] sm:$0xff] }
 0x438   : > { %14056 = vmatpush1.bf16.msra.mxu1 %v17682_v53  ;;  %v17787_v16 = vcombine.high %v2285_v19, %v2289_v7  ;;  %v2149_v18 = vld [vmem:[%s18208_s22 + $0x3b48] sm:$0xff]  ;;  %v17786_v2 = vcombine.low %v2285_v19, %v2289_v7 }
 0x439   : > { %14057 = vmatprep.subr.bf16.mxu1 %v17675_v32  ;;  %v2153_v46 = vld [vmem:[%s18208_s22 + $0x3b68] sm:$0xff] }
 0x43a   : > { %14017 = vmatpush1.bf16.msra.mxu0 %v17546_v59  ;;  %v2277_v39 = vld [vmem:[%s18208_s22 + $0x3f48] sm:$0xff]  ;;  %v17651_v53 = vcombine.high %v2149_v18, %v2153_v46  ;;  %v17650_v13 = vcombine.low %v2149_v18, %v2153_v46 }
 0x43b   : > { %14018 = vmatprep.subr.bf16.mxu0 %v17667_v52  ;;  %v2281_v50 = vld [vmem:[%s18208_s22 + $0x3f68] sm:$0xff] }
 0x43c   : > { %14058 = vmatpush1.bf16.msra.mxu1 %v17674_v28  ;;  %v17779_v9 = vcombine.high %v2277_v39, %v2281_v50  ;;  %v2141_v32 = vld [vmem:[%s18208_s22 + $0x3b08] sm:$0xff]  ;;  %v17778_v59 = vcombine.low %v2277_v39, %v2281_v50 }
 0x43d   : > { %14059 = vmatprep.subr.bf16.mxu1 %v17795_v3  ;;  %v2145_v49 = vld [vmem:[%s18208_s22 + $0x3b28] sm:$0xff] }
 0x43e   : > { %14019 = vmatpush2.bf16.msra.mxu0 %v17666_v63  ;;  %v2269_v25 = vld [vmem:[%s18208_s22 + $0x3f08] sm:$0xff]  ;;  %v17643_v28 = vcombine.high %v2141_v32, %v2145_v49  ;;  %v17642_v7 = vcombine.low %v2141_v32, %v2145_v49 }
 0x43f   : > { %14020 = vmatprep.subr.bf16.mxu0 %v17659_v30  ;;  %v2273_v58 = vld [vmem:[%s18208_s22 + $0x3f28] sm:$0xff] }
 0x440   : > { %14060 = vmatpush2.bf16.msra.mxu1 %v17794_v21  ;;  %v17771_v52 = vcombine.high %v2269_v25, %v2273_v58  ;;  %v2133_v3 = vld [vmem:[%s18208_s22 + $0x3ac8] sm:$0xff]  ;;  %v17770_v63 = vcombine.low %v2269_v25, %v2273_v58 }
 0x441   : > { %14061 = vmatprep.subr.bf16.mxu1 %v17787_v16  ;;  %v2137_v5 = vld [vmem:[%s18208_s22 + $0x3ae8] sm:$0xff] }
 0x442   : > { %14021 = vmatpush2.bf16.msra.mxu0 %v17658_v34  ;;  %v2261_v37 = vld [vmem:[%s18208_s22 + $0x3ec8] sm:$0xff]  ;;  %v17635_v21 = vcombine.high %v2133_v3, %v2137_v5  ;;  %v17634_v50 = vcombine.low %v2133_v3, %v2137_v5 }
 0x443   : > { %14022 = vmatprep.subr.bf16.mxu0 %v17651_v53  ;;  %v2265_v19 = vld [vmem:[%s18208_s22 + $0x3ee8] sm:$0xff] }
 0x444   : > { %14062 = vmatpush2.bf16.msra.mxu1 %v17786_v2  ;;  %v17763_v30 = vcombine.high %v2261_v37, %v2265_v19  ;;  %v2125_v16 = vld [vmem:[%s18208_s22 + $0x3a88] sm:$0xff]  ;;  %v17762_v34 = vcombine.low %v2261_v37, %v2265_v19 }
 0x445   : > { %14063 = vmatprep.subr.bf16.mxu1 %v17779_v9  ;;  %v2129_v18 = vld [vmem:[%s18208_s22 + $0x3aa8] sm:$0xff] }
 0x446   : > { %14023 = vmatpush2.bf16.msra.mxu0 %v17650_v13  ;;  %v2253_v46 = vld [vmem:[%s18208_s22 + $0x3e88] sm:$0xff]  ;;  %v17627_v2 = vcombine.high %v2125_v16, %v2129_v18  ;;  %v17626_v58 = vcombine.low %v2125_v16, %v2129_v18  ;;  %v314_v16 = vld [vmem:[%s18208_s22 + $0x1f0] sm:$0xff] }
 0x447   : > { %14024 = vmatprep.subr.bf16.mxu0 %v17643_v28  ;;  %v2257_v39 = vld [vmem:[%s18208_s22 + $0x3ea8] sm:$0xff]  ;;  %v438_v18 = vld [vmem:[%s18208_s22 + $0x5d0] sm:$0xff] }
 0x448   : > { %14064 = vmatpush2.bf16.msra.mxu1 %v17778_v59  ;;  %v17755_v53 = vcombine.high %v2253_v46, %v2257_v39  ;;  %v2117_v9 = vld [vmem:[%s18208_s22 + $0x3a48] sm:$0xff]  ;;  %v17754_v13 = vcombine.low %v2253_v46, %v2257_v39  ;;  %v442_v46 = vld [vmem:[%s18208_s22 + $0x5f0] sm:$0xff] }
 0x449   : > { %14065 = vmatprep.subr.bf16.mxu1 %v17771_v52  ;;  %v2121_v32 = vld [vmem:[%s18208_s22 + $0x3a68] sm:$0xff] }
 0x44a   : > { %14025 = vmatpush2.bf16.msra.mxu0 %v17642_v7  ;;  %v2245_v49 = vld [vmem:[%s18208_s22 + $0x3e48] sm:$0xff]  ;;  %v17619_v59 = vcombine.high %v2117_v9, %v2121_v32  ;;  %v17618_v19 = vcombine.low %v2117_v9, %v2121_v32  ;;  %v306_v9 = vld [vmem:[%s18208_s22 + $0x1b0] sm:$0xff] }
 0x44b   : > { %14026 = vmatprep.subr.bf16.mxu0 %v17635_v21  ;;  %v2249_v25 = vld [vmem:[%s18208_s22 + $0x3e68] sm:$0xff]  ;;  %v430_v32 = vld [vmem:[%s18208_s22 + $0x590] sm:$0xff] }
 0x44c   : > { %14066 = vmatpush2.bf16.msra.mxu1 %v17770_v63  ;;  %v17747_v28 = vcombine.high %v2245_v49, %v2249_v25  ;;  %v2109_v52 = vld [vmem:[%s18208_s22 + $0x3a08] sm:$0xff]  ;;  %v17746_v7 = vcombine.low %v2245_v49, %v2249_v25  ;;  %v434_v49 = vld [vmem:[%s18208_s22 + $0x5b0] sm:$0xff] }
 0x44d   : > { %14067 = vmatprep.subr.bf16.mxu1 %v17763_v30  ;;  %v2113_v3 = vld [vmem:[%s18208_s22 + $0x3a28] sm:$0xff]  ;;  %v310_v30 = vld [vmem:[%s18208_s22 + $0x1d0] sm:$0xff] }
 0x44e   : > { %14027 = vmatpush2.bf16.msra.mxu0 %v17634_v50  ;;  %v2237_v5 = vld [vmem:[%s18208_s22 + $0x3e08] sm:$0xff]  ;;  %v17611_v63 = vcombine.high %v2109_v52, %v2113_v3  ;;  %v17610_v39 = vcombine.low %v2109_v52, %v2113_v3  ;;  %v15812_v25 = vcombine.low %v310_v30, %v314_v16  ;;  %v298_v52 = vld [vmem:[%s18208_s22 + $0x170] sm:$0xff] }
 0x44f   : > { %14028 = vmatprep.subr.bf16.mxu0 %v17627_v2  ;;  %v2241_v37 = vld [vmem:[%s18208_s22 + $0x3e28] sm:$0xff]  ;;  %v15941_v2 = vcombine.high %v438_v18, %v442_v46 }
 0x450   : > { %14068 = vmatpush2.bf16.msra.mxu1 %v17762_v34  ;;  %v17739_v21 = vcombine.high %v2237_v5, %v2241_v37  ;;  %v17738_v50 = vcombine.low %v2237_v5, %v2241_v37  ;;  %v15813_v34 = vcombine.high %v310_v30, %v314_v16  ;;  %v422_v5 = vld [vmem:[%s18208_s22 + $0x550] sm:$0xff]  ;;  %v15932_v30 = vcombine.low %v430_v32, %v434_v49 }
 0x451   : > { %14069 = vmatprep.subr.bf16.mxu1 %v17755_v53  ;;  %v302_v53 = vld [vmem:[%s18208_s22 + $0x190] sm:$0xff] }
 0x452   : > { %14029 = vmatpush2.bf16.msra.mxu0 %v17626_v58  ;;  %v15940_v58 = vcombine.low %v438_v18, %v442_v46  ;;  %v426_v37 = vld [vmem:[%s18208_s22 + $0x570] sm:$0xff] }
 0x453   : > { %14030 = vmatprep.subr.bf16.mxu0 %v17619_v59  ;;  %v15933_v59 = vcombine.high %v430_v32, %v434_v49 }
 0x454   : > { %14070 = vmatpush2.bf16.msra.mxu1 %v17754_v13  ;;  %v15805_v13 = vcombine.high %v302_v53, %v306_v9 }
 0x455   : > { %14071 = vmatprep.subr.bf16.mxu1 %v17747_v28  ;;  %v294_v28 = vld [vmem:[%s18208_s22 + $0x150] sm:$0xff] }
 0x456   : > { %14031 = vmatpush2.bf16.msra.mxu0 %v17618_v19  ;;  %v15797_v16 = vcombine.high %v294_v28, %v298_v52 }
 0x457   : > { %14032 = vmatprep.subr.bf16.mxu0 %v17611_v63  ;;  %v15804_v63 = vcombine.low %v302_v53, %v306_v9  ;;  %v414_v53 = vld [vmem:[%s18208_s22 + $0x510] sm:$0xff] }
 0x458   : > { %14072 = vmatpush2.bf16.msra.mxu1 %v17746_v7  ;;  %v418_v9 = vld [vmem:[%s18208_s22 + $0x530] sm:$0xff] }
 0x459   : > { %14073 = vmatprep.subr.bf16.mxu1 %v17739_v21 }
 0x45a   : > { %14033 = vmatpush2.bf16.msra.mxu0 %v17610_v39 }
 0x45b   : > { %14084 = vmatprep.subr.bf16.mxu0 %v15813_v34  ;;  %v290_v34 = vld [vmem:[%s18208_s22 + $0x130] sm:$0xff] }
 0x45c   : > { %14074 = vmatpush2.bf16.msra.mxu1 %v17738_v50  ;;  %v286_v50 = vld [vmem:[%s18208_s22 + $0x110] sm:$0xff] }
 0x45d   : > { %14125 = vmatprep.subr.bf16.mxu1 %v15941_v2  ;;  %v13790_v3 = vpop.f32.mrf.mxu0  ;;  %14035 = vmatmul.mubr.bf16.vlgmr.msra.gmra.mxu0 %v18973_v42 }
 0x45e   : > { %v13791_v19 = vadd.f32 %v13790_v3, %v19508_v51  ;;  %14085 = vmatpush1.bf16.msra.mxu0 %v15812_v25  ;;  %v15925_v51 = vcombine.high %v422_v5, %v426_v37  ;;  %14116 = vmatprep.mubr.bf16.mxu0 %v18271_v10  ;;  %v15917_v3 = vcombine.high %v414_v53, %v418_v9 }
 0x45f   : > { %v13831_v7 = vpop.f32.mrf.mxu1  ;;  %14076 = vmatmul.mubr.bf16.vlgmr.msra.gmra.mxu1 %v18981_v62  ;;  %v13792_v21 = vpop.f32.mrf.mxu0  ;;  %14086 = vmatprep.subr.bf16.mxu0 %v15805_v13  ;;  %v15789_v13 = vcombine.high %v286_v50, %v290_v34 }
 0x460   : > { %14126 = vmatpush1.bf16.msra.mxu1 %v15940_v58  ;;  %v19582_v18 = vadd.f32 %v13831_v7, %v13791_v19  ;;  %v13793_v46 = vadd.f32 %v13792_v21, %v19517_v17  ;;  %14157 = vmatprep.mubr.bf16.mxu1 %v18278_v14  ;;  %v15796_v17 = vcombine.low %v294_v28, %v298_v52  ;;  %v278_v19 = vld [vmem:[%s18208_s22 + $0xd0] sm:$0xff] }
 0x461   : > { %v13833_v39 = vpop.f32.mrf.mxu1  ;;  %14127 = vmatprep.subr.bf16.mxu1 %v15933_v59  ;;  %v13794_v2 = vpop.f32.mrf.mxu0  ;;  %v15924_v58 = vcombine.low %v422_v5, %v426_v37  ;;  %v282_v7 = vld [vmem:[%s18208_s22 + $0xf0] sm:$0xff]  ;;  %v15916_v28 = vcombine.low %v414_v53, %v418_v9 }
 0x462   : > { %v19591_v32 = vadd.f32 %v13833_v39, %v13793_v46  ;;  %14087 = vmatpush1.bf16.msra.mxu0 %v15804_v63  ;;  %v406_v21 = vld [vmem:[%s18208_s22 + $0x4d0] sm:$0xff]  ;;  %v15788_v39 = vcombine.low %v286_v50, %v290_v34  ;;  %v15781_v52 = vcombine.high %v278_v19, %v282_v7 }
 0x463   : > { %v13835_v49 = vpop.f32.mrf.mxu1  ;;  %v13795_v25 = vpop.f32.mrf.mxu0  ;;  %14088 = vmatprep.subr.bf16.mxu0 %v15797_v16  ;;  %v410_v46 = vld [vmem:[%s18208_s22 + $0x4f0] sm:$0xff] }
 0x464   : > { %14128 = vmatpush1.bf16.msra.mxu1 %v15932_v30  ;;  %v15909_v5 = vcombine.high %v406_v21, %v410_v46  ;;  %v270_v37 = vld [vmem:[%s18208_s22 + $0x90] sm:$0xff]  ;;  %v15908_v2 = vcombine.low %v406_v21, %v410_v46 }
 0x465   : > { %v13836_v59 = vpop.f32.mrf.mxu1  ;;  %14129 = vmatprep.subr.bf16.mxu1 %v15925_v51  ;;  %v274_v63 = vld [vmem:[%s18208_s22 + $0xb0] sm:$0xff]  ;;  %v15780_v51 = vcombine.low %v278_v19, %v282_v7 }
 0x466   : > { %14089 = vmatpush1.bf16.msra.mxu0 %v15796_v17  ;;  %v398_v30 = vld [vmem:[%s18208_s22 + $0x490] sm:$0xff]  ;;  %v15773_v50 = vcombine.high %v270_v37, %v274_v63  ;;  %v15772_v25 = vcombine.low %v270_v37, %v274_v63 }
 0x467   : > { %14090 = vmatprep.subr.bf16.mxu0 %v15789_v13  ;;  %v402_v16 = vld [vmem:[%s18208_s22 + $0x4b0] sm:$0xff] }
 0x468   : > { %14130 = vmatpush1.bf16.msra.mxu1 %v15924_v58  ;;  %v15901_v34 = vcombine.high %v398_v30, %v402_v16  ;;  %v262_v53 = vld [vmem:[%s18208_s22 + $0x50] sm:$0xff]  ;;  %v15900_v58 = vcombine.low %v398_v30, %v402_v16 }
 0x469   : > { %14131 = vmatprep.subr.bf16.mxu1 %v15917_v3  ;;  %v266_v9 = vld [vmem:[%s18208_s22 + $0x70] sm:$0xff] }
 0x46a   : > { %14091 = vmatpush1.bf16.msra.mxu0 %v15788_v39  ;;  %v390_v49 = vld [vmem:[%s18208_s22 + $0x450] sm:$0xff]  ;;  %v15765_v13 = vcombine.high %v262_v53, %v266_v9  ;;  %v15764_v46 = vcombine.low %v262_v53, %v266_v9 }
 0x46b   : > { %14092 = vmatprep.subr.bf16.mxu0 %v15781_v52  ;;  %v394_v17 = vld [vmem:[%s18208_s22 + $0x470] sm:$0xff] }
 0x46c   : > { %14132 = vmatpush1.bf16.msra.mxu1 %v15916_v28  ;;  %v15893_v59 = vcombine.high %v390_v49, %v394_v17  ;;  %v254_v3 = vld [vmem:[%s18208_s22 + $0x10] sm:$0xff]  ;;  %v15892_v39 = vcombine.low %v390_v49, %v394_v17 }
 0x46d   : > { %14133 = vmatprep.subr.bf16.mxu1 %v15909_v5  ;;  %v258_v19 = vld [vmem:[%s18208_s22 + $0x30] sm:$0xff] }
 0x46e   : > { %14093 = vmatpush1.bf16.msra.mxu0 %v15780_v51  ;;  %v382_v7 = vld [vmem:[%s18208_s22 + $0x410] sm:$0xff]  ;;  %v15757_v28 = vcombine.high %v254_v3, %v258_v19  ;;  %v15756_v16 = vcombine.low %v254_v3, %v258_v19 }
 0x46f   : > { %14094 = vmatprep.subr.bf16.mxu0 %v15773_v50  ;;  %v386_v21 = vld [vmem:[%s18208_s22 + $0x430] sm:$0xff] }
 0x470   : > { %14134 = vmatpush1.bf16.msra.mxu1 %v15908_v2  ;;  %v15885_v52 = vcombine.high %v382_v7, %v386_v21  ;;  %v374_v5 = vld [vmem:[%s18208_s22 + $0x3d0] sm:$0xff]  ;;  %v15884_v51 = vcombine.low %v382_v7, %v386_v21 }
 0x471   : > { %14135 = vmatprep.subr.bf16.mxu1 %v15901_v34  ;;  %v378_v37 = vld [vmem:[%s18208_s22 + $0x3f0] sm:$0xff] }
 0x472   : > { %14095 = vmatpush1.bf16.msra.mxu0 %v15772_v25  ;;  %v502_v63 = vld [vmem:[%s18208_s22 + $0x7d0] sm:$0xff]  ;;  %v15877_v2 = vcombine.high %v374_v5, %v378_v37  ;;  %v15876_v17 = vcombine.low %v374_v5, %v378_v37 }
 0x473   : > { %14096 = vmatprep.subr.bf16.mxu0 %v15765_v13  ;;  %v506_v30 = vld [vmem:[%s18208_s22 + $0x7f0] sm:$0xff] }
 0x474   : > { %14136 = vmatpush1.bf16.msra.mxu1 %v15900_v58  ;;  %v16005_v50 = vcombine.high %v502_v63, %v506_v30  ;;  %v366_v34 = vld [vmem:[%s18208_s22 + $0x390] sm:$0xff]  ;;  %v16004_v25 = vcombine.low %v502_v63, %v506_v30 }
 0x475   : > { %14137 = vmatprep.subr.bf16.mxu1 %v15893_v59  ;;  %v370_v53 = vld [vmem:[%s18208_s22 + $0x3b0] sm:$0xff] }
 0x476   : > { %14097 = vmatpush1.bf16.msra.mxu0 %v15764_v46  ;;  %v494_v9 = vld [vmem:[%s18208_s22 + $0x790] sm:$0xff]  ;;  %v15869_v58 = vcombine.high %v366_v34, %v370_v53  ;;  %v15868_v21 = vcombine.low %v366_v34, %v370_v53 }
 0x477   : > { %14098 = vmatprep.subr.bf16.mxu0 %v15757_v28  ;;  %v498_v49 = vld [vmem:[%s18208_s22 + $0x7b0] sm:$0xff] }
 0x478   : > { %14138 = vmatpush1.bf16.msra.mxu1 %v15892_v39  ;;  %v15997_v13 = vcombine.high %v494_v9, %v498_v49  ;;  %v358_v59 = vld [vmem:[%s18208_s22 + $0x350] sm:$0xff]  ;;  %v15996_v46 = vcombine.low %v494_v9, %v498_v49 }
 0x479   : > { %14139 = vmatprep.subr.bf16.mxu1 %v15885_v52  ;;  %v362_v3 = vld [vmem:[%s18208_s22 + $0x370] sm:$0xff] }
 0x47a   : > { %14099 = vmatpush1.bf16.msra.mxu0 %v15756_v16  ;;  %v486_v19 = vld [vmem:[%s18208_s22 + $0x750] sm:$0xff]  ;;  %v15861_v39 = vcombine.high %v358_v59, %v362_v3  ;;  %v15860_v30 = vcombine.low %v358_v59, %v362_v3 }
 0x47b   : > { %14100 = vmatprep.subr.bf16.mxu0 %v15877_v2  ;;  %v490_v7 = vld [vmem:[%s18208_s22 + $0x770] sm:$0xff] }
 0x47c   : > { %14140 = vmatpush1.bf16.msra.mxu1 %v15884_v51  ;;  %v15989_v28 = vcombine.high %v486_v19, %v490_v7  ;;  %v350_v52 = vld [vmem:[%s18208_s22 + $0x310] sm:$0xff]  ;;  %v15988_v16 = vcombine.low %v486_v19, %v490_v7 }
 0x47d   : > { %14141 = vmatprep.subr.bf16.mxu1 %v16005_v50  ;;  %v354_v5 = vld [vmem:[%s18208_s22 + $0x330] sm:$0xff] }
 0x47e   : > { %14101 = vmatpush2.bf16.msra.mxu0 %v15876_v17  ;;  %v478_v37 = vld [vmem:[%s18208_s22 + $0x710] sm:$0xff]  ;;  %v15853_v51 = vcombine.high %v350_v52, %v354_v5  ;;  %v15852_v49 = vcombine.low %v350_v52, %v354_v5 }
 0x47f   : > { %14102 = vmatprep.subr.bf16.mxu0 %v15869_v58  ;;  %v482_v63 = vld [vmem:[%s18208_s22 + $0x730] sm:$0xff] }
 0x480   : > { %14142 = vmatpush2.bf16.msra.mxu1 %v16004_v25  ;;  %v15981_v2 = vcombine.high %v478_v37, %v482_v63  ;;  %v342_v50 = vld [vmem:[%s18208_s22 + $0x2d0] sm:$0xff]  ;;  %v15980_v17 = vcombine.low %v478_v37, %v482_v63 }
 0x481   : > { %14143 = vmatprep.subr.bf16.mxu1 %v15997_v13  ;;  %v346_v34 = vld [vmem:[%s18208_s22 + $0x2f0] sm:$0xff] }
 0x482   : > { %14103 = vmatpush2.bf16.msra.mxu0 %v15868_v21  ;;  %v470_v53 = vld [vmem:[%s18208_s22 + $0x6d0] sm:$0xff]  ;;  %v15845_v25 = vcombine.high %v342_v50, %v346_v34  ;;  %v15844_v7 = vcombine.low %v342_v50, %v346_v34 }
 0x483   : > { %14104 = vmatprep.subr.bf16.mxu0 %v15861_v39  ;;  %v474_v9 = vld [vmem:[%s18208_s22 + $0x6f0] sm:$0xff] }
 0x484   : > { %14144 = vmatpush2.bf16.msra.mxu1 %v15996_v46  ;;  %v15973_v58 = vcombine.high %v470_v53, %v474_v9  ;;  %v334_v13 = vld [vmem:[%s18208_s22 + $0x290] sm:$0xff]  ;;  %v15972_v21 = vcombine.low %v470_v53, %v474_v9 }
 0x485   : > { %14145 = vmatprep.subr.bf16.mxu1 %v15989_v28  ;;  %v338_v59 = vld [vmem:[%s18208_s22 + $0x2b0] sm:$0xff] }
 0x486   : > { %14105 = vmatpush2.bf16.msra.mxu0 %v15860_v30  ;;  %v462_v3 = vld [vmem:[%s18208_s22 + $0x690] sm:$0xff]  ;;  %v15837_v46 = vcombine.high %v334_v13, %v338_v59  ;;  %v15836_v63 = vcombine.low %v334_v13, %v338_v59 }
 0x487   : > { %14106 = vmatprep.subr.bf16.mxu0 %v15853_v51  ;;  %v466_v19 = vld [vmem:[%s18208_s22 + $0x6b0] sm:$0xff] }
 0x488   : > { %14146 = vmatpush2.bf16.msra.mxu1 %v15988_v16  ;;  %v15965_v39 = vcombine.high %v462_v3, %v466_v19  ;;  %v326_v28 = vld [vmem:[%s18208_s22 + $0x250] sm:$0xff]  ;;  %v15964_v30 = vcombine.low %v462_v3, %v466_v19 }
 0x489   : > { %14147 = vmatprep.subr.bf16.mxu1 %v15981_v2  ;;  %v330_v52 = vld [vmem:[%s18208_s22 + $0x270] sm:$0xff] }
 0x48a   : > { %14107 = vmatpush2.bf16.msra.mxu0 %v15852_v49  ;;  %v454_v5 = vld [vmem:[%s18208_s22 + $0x650] sm:$0xff]  ;;  %v15829_v16 = vcombine.high %v326_v28, %v330_v52  ;;  %v15828_v9 = vcombine.low %v326_v28, %v330_v52 }
 0x48b   : > { %14108 = vmatprep.subr.bf16.mxu0 %v15845_v25  ;;  %v458_v37 = vld [vmem:[%s18208_s22 + $0x670] sm:$0xff] }
 0x48c   : > { %14148 = vmatpush2.bf16.msra.mxu1 %v15980_v17  ;;  %v15957_v51 = vcombine.high %v454_v5, %v458_v37  ;;  %v318_v2 = vld [vmem:[%s18208_s22 + $0x210] sm:$0xff]  ;;  %v15956_v49 = vcombine.low %v454_v5, %v458_v37 }
 0x48d   : > { %14149 = vmatprep.subr.bf16.mxu1 %v15973_v58  ;;  %v322_v50 = vld [vmem:[%s18208_s22 + $0x230] sm:$0xff] }
 0x48e   : > { %14109 = vmatpush2.bf16.msra.mxu0 %v15844_v7  ;;  %v446_v34 = vld [vmem:[%s18208_s22 + $0x610] sm:$0xff]  ;;  %v15821_v17 = vcombine.high %v318_v2, %v322_v50  ;;  %v15820_v19 = vcombine.low %v318_v2, %v322_v50 }
 0x48f   : > { %14110 = vmatprep.subr.bf16.mxu0 %v15837_v46  ;;  %v450_v53 = vld [vmem:[%s18208_s22 + $0x630] sm:$0xff] }
 0x490   : > { %14150 = vmatpush2.bf16.msra.mxu1 %v15972_v21  ;;  %v15949_v25 = vcombine.high %v446_v34, %v450_v53  ;;  %v566_v58 = vld [vmem:[%s18208_s22 + $0x9d0] sm:$0xff]  ;;  %v15948_v7 = vcombine.low %v446_v34, %v450_v53 }
 0x491   : > { %14151 = vmatprep.subr.bf16.mxu1 %v15965_v39  ;;  %v570_v13 = vld [vmem:[%s18208_s22 + $0x9f0] sm:$0xff] }
 0x492   : > { %14111 = vmatpush2.bf16.msra.mxu0 %v15836_v63  ;;  %v694_v59 = vld [vmem:[%s18208_s22 + $0xdd0] sm:$0xff]  ;;  %v16069_v21 = vcombine.high %v566_v58, %v570_v13  ;;  %v16068_v37 = vcombine.low %v566_v58, %v570_v13 }
 0x493   : > { %14112 = vmatprep.subr.bf16.mxu0 %v15829_v16  ;;  %v698_v3 = vld [vmem:[%s18208_s22 + $0xdf0] sm:$0xff] }
 0x494   : > { %14152 = vmatpush2.bf16.msra.mxu1 %v15964_v30  ;;  %v16197_v46 = vcombine.high %v694_v59, %v698_v3  ;;  %v558_v39 = vld [vmem:[%s18208_s22 + $0x990] sm:$0xff]  ;;  %v16196_v63 = vcombine.low %v694_v59, %v698_v3 }
 0x495   : > { %14153 = vmatprep.subr.bf16.mxu1 %v15957_v51  ;;  %v562_v28 = vld [vmem:[%s18208_s22 + $0x9b0] sm:$0xff] }
 0x496   : > { %14113 = vmatpush2.bf16.msra.mxu0 %v15828_v9  ;;  %v686_v52 = vld [vmem:[%s18208_s22 + $0xd90] sm:$0xff]  ;;  %v16061_v30 = vcombine.high %v558_v39, %v562_v28 }
 0x497   : > { %14114 = vmatprep.subr.bf16.mxu0 %v15821_v17  ;;  %v690_v5 = vld [vmem:[%s18208_s22 + $0xdb0] sm:$0xff]  ;;  %v16060_v17 = vcombine.low %v558_v39, %v562_v28 }
 0x498   : > { %14154 = vmatpush2.bf16.msra.mxu1 %v15956_v49  ;;  %v16189_v16 = vcombine.high %v686_v52, %v690_v5  ;;  %v550_v51 = vld [vmem:[%s18208_s22 + $0x950] sm:$0xff]  ;;  %v16188_v58 = vcombine.low %v686_v52, %v690_v5 }
 0x499   : > { %14155 = vmatprep.subr.bf16.mxu1 %v15949_v25  ;;  %v554_v2 = vld [vmem:[%s18208_s22 + $0x970] sm:$0xff] }
 0x49a   : > { %14115 = vmatpush2.bf16.msra.mxu0 %v15820_v19  ;;  %v678_v34 = vld [vmem:[%s18208_s22 + $0xd50] sm:$0xff]  ;;  %v16053_v13 = vcombine.high %v550_v51, %v554_v2 }
 0x49b   : > { %14166 = vmatprep.subr.bf16.mxu0 %v16069_v21  ;;  %v682_v53 = vld [vmem:[%s18208_s22 + $0xd70] sm:$0xff] }
 0x49c   : > { %14156 = vmatpush2.bf16.msra.mxu1 %v15948_v7  ;;  %v542_v7 = vld [vmem:[%s18208_s22 + $0x910] sm:$0xff] }
 0x49d   : > { %14207 = vmatprep.subr.bf16.mxu1 %v16197_v46  ;;  %v13872_v50 = vpop.f32.mrf.mxu0  ;;  %14117 = vmatmul.mubr.bf16.vlgmr.msra.gmra.mxu0 %v18322_v23  ;;  %v546_v21 = vld [vmem:[%s18208_s22 + $0x930] sm:$0xff] }
 0x49e   : > { %v13873_v9 = vadd.f32 %v13872_v50, %v19582_v18  ;;  %14167 = vmatpush1.bf16.msra.mxu0 %v16068_v37  ;;  %v16181_v18 = vcombine.high %v678_v34, %v682_v53  ;;  %14198 = vmatprep.mubr.bf16.mxu0 %v18329_v31  ;;  %v670_v39 = vld [vmem:[%s18208_s22 + $0xd10] sm:$0xff] }
 0x49f   : > { %v13913_v49 = vpop.f32.mrf.mxu1  ;;  %14158 = vmatmul.mubr.bf16.vlgmr.msra.gmra.mxu1 %v18333_v0  ;;  %v13874_v25 = vpop.f32.mrf.mxu0  ;;  %14168 = vmatprep.subr.bf16.mxu0 %v16061_v30  ;;  %v674_v28 = vld [vmem:[%s18208_s22 + $0xd30] sm:$0xff]  ;;  %v16045_v30 = vcombine.high %v542_v7, %v546_v21 }
 0x4a0   : > { %14208 = vmatpush1.bf16.msra.mxu1 %v16196_v63  ;;  %v19656_v59 = vadd.f32 %v13913_v49, %v13873_v9  ;;  %v13875_v3 = vadd.f32 %v13874_v25, %v19591_v32  ;;  %14239 = vmatprep.mubr.bf16.mxu1 %v18342_v40  ;;  %v16052_v32 = vcombine.low %v550_v51, %v554_v2  ;;  %v534_v9 = vld [vmem:[%s18208_s22 + $0x8d0] sm:$0xff] }
 0x4a1   : > { %v13915_v19 = vpop.f32.mrf.mxu1  ;;  %14209 = vmatprep.subr.bf16.mxu1 %v16189_v16  ;;  %v13876_v46 = vpop.f32.mrf.mxu0  ;;  %v16180_v63 = vcombine.low %v678_v34, %v682_v53  ;;  %v16173_v50 = vcombine.high %v670_v39, %v674_v28  ;;  %v538_v49 = vld [vmem:[%s18208_s22 + $0x8f0] sm:$0xff]  ;;  %v16172_v51 = vcombine.low %v670_v39, %v674_v28 }
 0x4a2   : > { %v19665_v52 = vadd.f32 %v13915_v19, %v13875_v3  ;;  %14169 = vmatpush1.bf16.msra.mxu0 %v16060_v17  ;;  %v662_v25 = vld [vmem:[%s18208_s22 + $0xcd0] sm:$0xff]  ;;  %v16044_v19 = vcombine.low %v542_v7, %v546_v21  ;;  %v16037_v2 = vcombine.high %v534_v9, %v538_v49 }
 0x4a3   : > { %v13917_v5 = vpop.f32.mrf.mxu1  ;;  %v13877_v37 = vpop.f32.mrf.mxu0  ;;  %14170 = vmatprep.subr.bf16.mxu0 %v16053_v13  ;;  %v666_v3 = vld [vmem:[%s18208_s22 + $0xcf0] sm:$0xff] }
 0x4a4   : > { %14210 = vmatpush1.bf16.msra.mxu1 %v16188_v58  ;;  %v16165_v34 = vcombine.high %v662_v25, %v666_v3  ;;  %v526_v53 = vld [vmem:[%s18208_s22 + $0x890] sm:$0xff]  ;;  %v16164_v46 = vcombine.low %v662_v25, %v666_v3 }
 0x4a5   : > { %v13918_v16 = vpop.f32.mrf.mxu1  ;;  %14211 = vmatprep.subr.bf16.mxu1 %v16181_v18  ;;  %v530_v17 = vld [vmem:[%s18208_s22 + $0x8b0] sm:$0xff]  ;;  %v16036_v18 = vcombine.low %v534_v9, %v538_v49 }
 0x4a6   : > { %14171 = vmatpush1.bf16.msra.mxu0 %v16052_v32  ;;  %v654_v58 = vld [vmem:[%s18208_s22 + $0xc90] sm:$0xff]  ;;  %v16029_v7 = vcombine.high %v526_v53, %v530_v17  ;;  %v16028_v37 = vcombine.low %v526_v53, %v530_v17 }
 0x4a7   : > { %14172 = vmatprep.subr.bf16.mxu0 %v16045_v30  ;;  %v658_v13 = vld [vmem:[%s18208_s22 + $0xcb0] sm:$0xff] }
 0x4a8   : > { %14212 = vmatpush1.bf16.msra.mxu1 %v16180_v63  ;;  %v16157_v21 = vcombine.high %v654_v58, %v658_v13  ;;  %v518_v39 = vld [vmem:[%s18208_s22 + $0x850] sm:$0xff]  ;;  %v16156_v63 = vcombine.low %v654_v58, %v658_v13 }
 0x4a9   : > { %14213 = vmatprep.subr.bf16.mxu1 %v16173_v50  ;;  %v522_v28 = vld [vmem:[%s18208_s22 + $0x870] sm:$0xff] }
 0x4aa   : > { %14173 = vmatpush1.bf16.msra.mxu0 %v16044_v19  ;;  %v646_v5 = vld [vmem:[%s18208_s22 + $0xc50] sm:$0xff]  ;;  %v16021_v30 = vcombine.high %v518_v39, %v522_v28  ;;  %v16020_v3 = vcombine.low %v518_v39, %v522_v28 }
 0x4ab   : > { %14174 = vmatprep.subr.bf16.mxu0 %v16037_v2  ;;  %v650_v32 = vld [vmem:[%s18208_s22 + $0xc70] sm:$0xff] }
 0x4ac   : > { %14214 = vmatpush1.bf16.msra.mxu1 %v16172_v51  ;;  %v16149_v16 = vcombine.high %v646_v5, %v650_v32  ;;  %v510_v50 = vld [vmem:[%s18208_s22 + $0x810] sm:$0xff]  ;;  %v16148_v19 = vcombine.low %v646_v5, %v650_v32 }
 0x4ad   : > { %14215 = vmatprep.subr.bf16.mxu1 %v16165_v34  ;;  %v514_v9 = vld [vmem:[%s18208_s22 + $0x830] sm:$0xff] }
 0x4ae   : > { %14175 = vmatpush1.bf16.msra.mxu0 %v16036_v18  ;;  %v638_v49 = vld [vmem:[%s18208_s22 + $0xc10] sm:$0xff]  ;;  %v16013_v51 = vcombine.high %v510_v50, %v514_v9  ;;  %v16012_v13 = vcombine.low %v510_v50, %v514_v9 }
 0x4af   : > { %14176 = vmatprep.subr.bf16.mxu0 %v16029_v7  ;;  %v642_v25 = vld [vmem:[%s18208_s22 + $0xc30] sm:$0xff] }
 0x4b0   : > { %14216 = vmatpush1.bf16.msra.mxu1 %v16164_v46  ;;  %v16141_v2 = vcombine.high %v638_v49, %v642_v25  ;;  %v630_v34 = vld [vmem:[%s18208_s22 + $0xbd0] sm:$0xff]  ;;  %v16140_v18 = vcombine.low %v638_v49, %v642_v25 }
 0x4b1   : > { %14217 = vmatprep.subr.bf16.mxu1 %v16157_v21  ;;  %v634_v53 = vld [vmem:[%s18208_s22 + $0xbf0] sm:$0xff] }
 0x4b2   : > { %14177 = vmatpush1.bf16.msra.mxu0 %v16028_v37  ;;  %v758_v17 = vld [vmem:[%s18208_s22 + $0xfd0] sm:$0xff]  ;;  %v16133_v46 = vcombine.high %v630_v34, %v634_v53  ;;  %v16132_v32 = vcombine.low %v630_v34, %v634_v53 }
 0x4b3   : > { %14178 = vmatprep.subr.bf16.mxu0 %v16021_v30  ;;  %v762_v58 = vld [vmem:[%s18208_s22 + $0xff0] sm:$0xff] }
 0x4b4   : > { %14218 = vmatpush1.bf16.msra.mxu1 %v16156_v63  ;;  %v16261_v7 = vcombine.high %v758_v17, %v762_v58  ;;  %v622_v21 = vld [vmem:[%s18208_s22 + $0xb90] sm:$0xff]  ;;  %v16260_v37 = vcombine.low %v758_v17, %v762_v58 }
 0x4b5   : > { %14219 = vmatprep.subr.bf16.mxu1 %v16149_v16  ;;  %v626_v39 = vld [vmem:[%s18208_s22 + $0xbb0] sm:$0xff] }
 0x4b6   : > { %14179 = vmatpush1.bf16.msra.mxu0 %v16020_v3  ;;  %v750_v28 = vld [vmem:[%s18208_s22 + $0xf90] sm:$0xff]  ;;  %v16125_v63 = vcombine.high %v622_v21, %v626_v39  ;;  %v16124_v25 = vcombine.low %v622_v21, %v626_v39 }
 0x4b7   : > { %14180 = vmatprep.subr.bf16.mxu0 %v16013_v51  ;;  %v754_v5 = vld [vmem:[%s18208_s22 + $0xfb0] sm:$0xff] }
 0x4b8   : > { %14220 = vmatpush1.bf16.msra.mxu1 %v16148_v19  ;;  %v16253_v30 = vcombine.high %v750_v28, %v754_v5  ;;  %v614_v16 = vld [vmem:[%s18208_s22 + $0xb50] sm:$0xff]  ;;  %v16252_v3 = vcombine.low %v750_v28, %v754_v5 }
 0x4b9   : > { %14221 = vmatprep.subr.bf16.mxu1 %v16141_v2  ;;  %v618_v50 = vld [vmem:[%s18208_s22 + $0xb70] sm:$0xff] }
 0x4ba   : > { %14181 = vmatpush1.bf16.msra.mxu0 %v16012_v13  ;;  %v742_v9 = vld [vmem:[%s18208_s22 + $0xf50] sm:$0xff]  ;;  %v16117_v19 = vcombine.high %v614_v16, %v618_v50  ;;  %v16116_v58 = vcombine.low %v614_v16, %v618_v50 }
 0x4bb   : > { %14182 = vmatprep.subr.bf16.mxu0 %v16133_v46  ;;  %v746_v49 = vld [vmem:[%s18208_s22 + $0xf70] sm:$0xff] }
 0x4bc   : > { %14222 = vmatpush1.bf16.msra.mxu1 %v16140_v18  ;;  %v16245_v51 = vcombine.high %v742_v9, %v746_v49  ;;  %v606_v2 = vld [vmem:[%s18208_s22 + $0xb10] sm:$0xff]  ;;  %v16244_v13 = vcombine.low %v742_v9, %v746_v49 }
 0x4bd   : > { %14223 = vmatprep.subr.bf16.mxu1 %v16261_v7  ;;  %v610_v34 = vld [vmem:[%s18208_s22 + $0xb30] sm:$0xff] }
 0x4be   : > { %14183 = vmatpush2.bf16.msra.mxu0 %v16132_v32  ;;  %v734_v53 = vld [vmem:[%s18208_s22 + $0xf10] sm:$0xff]  ;;  %v16109_v18 = vcombine.high %v606_v2, %v610_v34  ;;  %v16108_v5 = vcombine.low %v606_v2, %v610_v34 }
 0x4bf   : > { %14184 = vmatprep.subr.bf16.mxu0 %v16125_v63  ;;  %v738_v17 = vld [vmem:[%s18208_s22 + $0xf30] sm:$0xff] }
 0x4c0   : > { %14224 = vmatpush2.bf16.msra.mxu1 %v16260_v37  ;;  %v16237_v46 = vcombine.high %v734_v53, %v738_v17  ;;  %v598_v7 = vld [vmem:[%s18208_s22 + $0xad0] sm:$0xff]  ;;  %v16236_v32 = vcombine.low %v734_v53, %v738_v17 }
 0x4c1   : > { %14225 = vmatprep.subr.bf16.mxu1 %v16253_v30  ;;  %v602_v21 = vld [vmem:[%s18208_s22 + $0xaf0] sm:$0xff] }
 0x4c2   : > { %14185 = vmatpush2.bf16.msra.mxu0 %v16124_v25  ;;  %v726_v39 = vld [vmem:[%s18208_s22 + $0xed0] sm:$0xff]  ;;  %v16101_v37 = vcombine.high %v598_v7, %v602_v21  ;;  %v16100_v49 = vcombine.low %v598_v7, %v602_v21 }
 0x4c3   : > { %14186 = vmatprep.subr.bf16.mxu0 %v16117_v19  ;;  %v730_v28 = vld [vmem:[%s18208_s22 + $0xef0] sm:$0xff] }
 0x4c4   : > { %14226 = vmatpush2.bf16.msra.mxu1 %v16252_v3  ;;  %v16229_v63 = vcombine.high %v726_v39, %v730_v28  ;;  %v590_v30 = vld [vmem:[%s18208_s22 + $0xa90] sm:$0xff]  ;;  %v16228_v25 = vcombine.low %v726_v39, %v730_v28 }
 0x4c5   : > { %14227 = vmatprep.subr.bf16.mxu1 %v16245_v51  ;;  %v594_v16 = vld [vmem:[%s18208_s22 + $0xab0] sm:$0xff] }
 0x4c6   : > { %14187 = vmatpush2.bf16.msra.mxu0 %v16116_v58  ;;  %v718_v50 = vld [vmem:[%s18208_s22 + $0xe90] sm:$0xff]  ;;  %v16093_v3 = vcombine.high %v590_v30, %v594_v16  ;;  %v16092_v17 = vcombine.low %v590_v30, %v594_v16 }
 0x4c7   : > { %14188 = vmatprep.subr.bf16.mxu0 %v16109_v18  ;;  %v722_v9 = vld [vmem:[%s18208_s22 + $0xeb0] sm:$0xff] }
 0x4c8   : > { %14228 = vmatpush2.bf16.msra.mxu1 %v16244_v13  ;;  %v16221_v19 = vcombine.high %v718_v50, %v722_v9  ;;  %v582_v51 = vld [vmem:[%s18208_s22 + $0xa50] sm:$0xff]  ;;  %v16220_v58 = vcombine.low %v718_v50, %v722_v9 }
 0x4c9   : > { %14229 = vmatprep.subr.bf16.mxu1 %v16237_v46  ;;  %v586_v2 = vld [vmem:[%s18208_s22 + $0xa70] sm:$0xff] }
 0x4ca   : > { %14189 = vmatpush2.bf16.msra.mxu0 %v16108_v5  ;;  %v710_v34 = vld [vmem:[%s18208_s22 + $0xe50] sm:$0xff]  ;;  %v16085_v13 = vcombine.high %v582_v51, %v586_v2  ;;  %v16084_v28 = vcombine.low %v582_v51, %v586_v2 }
 0x4cb   : > { %14190 = vmatprep.subr.bf16.mxu0 %v16101_v37  ;;  %v714_v53 = vld [vmem:[%s18208_s22 + $0xe70] sm:$0xff] }
 0x4cc   : > { %14230 = vmatpush2.bf16.msra.mxu1 %v16236_v32  ;;  %v16213_v18 = vcombine.high %v710_v34, %v714_v53  ;;  %v574_v46 = vld [vmem:[%s18208_s22 + $0xa10] sm:$0xff]  ;;  %v16212_v5 = vcombine.low %v710_v34, %v714_v53 }
 0x4cd   : > { %14231 = vmatprep.subr.bf16.mxu1 %v16229_v63  ;;  %v578_v7 = vld [vmem:[%s18208_s22 + $0xa30] sm:$0xff] }
 0x4ce   : > { %14191 = vmatpush2.bf16.msra.mxu0 %v16100_v49  ;;  %v702_v21 = vld [vmem:[%s18208_s22 + $0xe10] sm:$0xff]  ;;  %v16077_v32 = vcombine.high %v574_v46, %v578_v7  ;;  %v16076_v9 = vcombine.low %v574_v46, %v578_v7 }
 0x4cf   : > { %14192 = vmatprep.subr.bf16.mxu0 %v16093_v3  ;;  %v706_v39 = vld [vmem:[%s18208_s22 + $0xe30] sm:$0xff] }
 0x4d0   : > { %14232 = vmatpush2.bf16.msra.mxu1 %v16228_v25  ;;  %v16205_v37 = vcombine.high %v702_v21, %v706_v39  ;;  %v822_v63 = vld [vmem:[%s18208_s22 + $0x11d0] sm:$0xff]  ;;  %v16204_v49 = vcombine.low %v702_v21, %v706_v39 }
 0x4d1   : > { %14233 = vmatprep.subr.bf16.mxu1 %v16221_v19  ;;  %v826_v30 = vld [vmem:[%s18208_s22 + $0x11f0] sm:$0xff] }
 0x4d2   : > { %14193 = vmatpush2.bf16.msra.mxu0 %v16092_v17  ;;  %v950_v16 = vld [vmem:[%s18208_s22 + $0x15d0] sm:$0xff]  ;;  %v16325_v25 = vcombine.high %v822_v63, %v826_v30  ;;  %v16324_v53 = vcombine.low %v822_v63, %v826_v30 }
 0x4d3   : > { %14194 = vmatprep.subr.bf16.mxu0 %v16085_v13  ;;  %v954_v50 = vld [vmem:[%s18208_s22 + $0x15f0] sm:$0xff] }
 0x4d4   : > { %14234 = vmatpush2.bf16.msra.mxu1 %v16220_v58  ;;  %v16453_v3 = vcombine.high %v950_v16, %v954_v50  ;;  %v814_v19 = vld [vmem:[%s18208_s22 + $0x1190] sm:$0xff]  ;;  %v16452_v17 = vcombine.low %v950_v16, %v954_v50 }
 0x4d5   : > { %14235 = vmatprep.subr.bf16.mxu1 %v16213_v18  ;;  %v818_v51 = vld [vmem:[%s18208_s22 + $0x11b0] sm:$0xff] }
 0x4d6   : > { %14195 = vmatpush2.bf16.msra.mxu0 %v16084_v28  ;;  %v942_v2 = vld [vmem:[%s18208_s22 + $0x1590] sm:$0xff]  ;;  %v16317_v58 = vcombine.high %v814_v19, %v818_v51 }
 0x4d7   : > { %14196 = vmatprep.subr.bf16.mxu0 %v16077_v32  ;;  %v946_v34 = vld [vmem:[%s18208_s22 + $0x15b0] sm:$0xff] }
 0x4d8   : > { %14236 = vmatpush2.bf16.msra.mxu1 %v16212_v5  ;;  %v16445_v13 = vcombine.high %v942_v2, %v946_v34  ;;  %v806_v18 = vld [vmem:[%s18208_s22 + $0x1150] sm:$0xff]  ;;  %v16316_v5 = vcombine.low %v814_v19, %v818_v51 }
 0x4d9   : > { %14237 = vmatprep.subr.bf16.mxu1 %v16205_v37  ;;  %v810_v46 = vld [vmem:[%s18208_s22 + $0x1170] sm:$0xff]  ;;  %v16444_v37 = vcombine.low %v942_v2, %v946_v34 }
 0x4da   : > { %14197 = vmatpush2.bf16.msra.mxu0 %v16076_v9  ;;  %v934_v21 = vld [vmem:[%s18208_s22 + $0x1550] sm:$0xff]  ;;  %v16309_v63 = vcombine.high %v806_v18, %v810_v46  ;;  %v16308_v51 = vcombine.low %v806_v18, %v810_v46 }
 0x4db   : > { %14248 = vmatprep.subr.bf16.mxu0 %v16325_v25  ;;  %v938_v39 = vld [vmem:[%s18208_s22 + $0x1570] sm:$0xff] }
 0x4dc   : > { %14238 = vmatpush2.bf16.msra.mxu1 %v16204_v49  ;;  %v16437_v16 = vcombine.high %v934_v21, %v938_v39  ;;  %v798_v50 = vld [vmem:[%s18208_s22 + $0x1110] sm:$0xff]  ;;  %v16436_v34 = vcombine.low %v934_v21, %v938_v39  ;;  %v16421_v21 = vcombine.high %v918_v47, %v922_v54 }
 0x4dd   : > { %14289 = vmatprep.subr.bf16.mxu1 %v16453_v3  ;;  %v19725_v7 = vpop.f32.mrf.mxu0  ;;  %14199 = vmatmul.mubr.bf16.vlgmr.msra.gmra.mxu0 %v18414_v48  ;;  %v802_v9 = vld [vmem:[%s18208_s22 + $0x1130] sm:$0xff] }
 0x4de   : > { %14249 = vmatpush1.bf16.msra.mxu0 %v16324_v53  ;;  %14280 = vmatprep.mubr.bf16.mxu0 %v18421_v57  ;;  %v926_v25 = vld [vmem:[%s18208_s22 + $0x1510] sm:$0xff]  ;;  %v16301_v53 = vcombine.high %v798_v50, %v802_v9 }
 0x4df   : > { %v19730_v28 = vpop.f32.mrf.mxu1  ;;  %14240 = vmatmul.mubr.bf16.vlgmr.msra.gmra.mxu1 %v18425_v12  ;;  %v19733_v32 = vpop.f32.mrf.mxu0  ;;  %14250 = vmatprep.subr.bf16.mxu0 %v16317_v58  ;;  %v930_v3 = vld [vmem:[%s18208_s22 + $0x1530] sm:$0xff] }
 0x4e0   : > { %14290 = vmatpush1.bf16.msra.mxu1 %v16452_v17  ;;  %14321 = vmatprep.mubr.bf16.mxu1 %v18434_v4  ;;  %v16429_v58 = vcombine.high %v926_v25, %v930_v3  ;;  %v16428_v18 = vcombine.low %v926_v25, %v930_v3  ;;  %v782_v39 = vld [vmem:[%s18208_s22 + $0x1090] sm:$0xff] }
 0x4e1   : > { %v19735_v30 = vpop.f32.mrf.mxu1  ;;  %14291 = vmatprep.subr.bf16.mxu1 %v16445_v13  ;;  %v13958_v49 = vpop.f32.mrf.mxu0  ;;  %v790_v13 = vld [vmem:[%s18208_s22 + $0x10d0] sm:$0xff] }
 0x4e2   : > { %14251 = vmatpush1.bf16.msra.mxu0 %v16316_v5  ;;  %v794_v49 = vld [vmem:[%s18208_s22 + $0x10f0] sm:$0xff] }
 0x4e3   : > { %v13999_v19 = vpop.f32.mrf.mxu1  ;;  %v13959_v2 = vpop.f32.mrf.mxu0  ;;  %14252 = vmatprep.subr.bf16.mxu0 %v16309_v63  ;;  %v16293_v46 = vcombine.high %v790_v13, %v794_v49  ;;  %v786_v5 = vld [vmem:[%s18208_s22 + $0x10b0] sm:$0xff] }
 0x4e4   : > { %14292 = vmatpush1.bf16.msra.mxu1 %v16444_v37  ;;  %v16300_v19 = vcombine.low %v798_v50, %v802_v9  ;;  %v910_v37 = vld [vmem:[%s18208_s22 + $0x1490] sm:$0xff]  ;;  %v16285_v50 = vcombine.high %v782_v39, %v786_v5 }
 0x4e5   : > { %v14000_v17 = vpop.f32.mrf.mxu1  ;;  %14293 = vmatprep.subr.bf16.mxu1 %v16437_v16  ;;  %v914_v63 = vld [vmem:[%s18208_s22 + $0x14b0] sm:$0xff]  ;;  %v16292_v16 = vcombine.low %v790_v13, %v794_v49 }
 0x4e6   : > { %14253 = vmatpush1.bf16.msra.mxu0 %v16308_v51  ;;  %v16420_v51 = vcombine.low %v918_v47, %v922_v54  ;;  %v16413_v9 = vcombine.high %v910_v37, %v914_v63  ;;  %v774_v25 = vld [vmem:[%s18208_s22 + $0x1050] sm:$0xff]  ;;  %v16412_v17 = vcombine.low %v910_v37, %v914_v63 }
 0x4e7   : > { %14254 = vmatprep.subr.bf16.mxu0 %v16301_v53  ;;  %v778_v3 = vld [vmem:[%s18208_s22 + $0x1070] sm:$0xff]  ;;  %v16284_v53 = vcombine.low %v782_v39, %v786_v5 }
 0x4e8   : > { %14294 = vmatpush1.bf16.msra.mxu1 %v16436_v34  ;;  %v902_v2 = vld [vmem:[%s18208_s22 + $0x1450] sm:$0xff] }
 0x4e9   : > { %14295 = vmatprep.subr.bf16.mxu1 %v16429_v58  ;;  %v906_v34 = vld [vmem:[%s18208_s22 + $0x1470] sm:$0xff]  ;;  %v16277_v58 = vcombine.high %v774_v25, %v778_v3 }
 0x4ea   : > { %14255 = vmatpush1.bf16.msra.mxu0 %v16300_v19  ;;  %v16405_v54 = vcombine.high %v902_v2, %v906_v34  ;;  %v766_v47 = vld [vmem:[%s18208_s22 + $0x1010] sm:$0xff] }
 0x4eb   : > { %14256 = vmatprep.subr.bf16.mxu0 %v16293_v46  ;;  %v770_v13 = vld [vmem:[%s18208_s22 + $0x1030] sm:$0xff]  ;;  %v16404_v46 = vcombine.low %v902_v2, %v906_v34 }
 0x4ec   : > { %14296 = vmatpush1.bf16.msra.mxu1 %v16428_v18  ;;  %v894_v49 = vld [vmem:[%s18208_s22 + $0x1410] sm:$0xff]  ;;  %v16276_v18 = vcombine.low %v774_v25, %v778_v3 }
 0x4ed   : > { %14297 = vmatprep.subr.bf16.mxu1 %v16421_v21  ;;  %v898_v19 = vld [vmem:[%s18208_s22 + $0x1430] sm:$0xff]  ;;  %v16269_v21 = vcombine.high %v766_v47, %v770_v13 }
 0x4ee   : > { %14257 = vmatpush1.bf16.msra.mxu0 %v16292_v16  ;;  %v16397_v39 = vcombine.high %v894_v49, %v898_v19  ;;  %v886_v5 = vld [vmem:[%s18208_s22 + $0x13d0] sm:$0xff] }
 0x4ef   : > { %14258 = vmatprep.subr.bf16.mxu0 %v16285_v50  ;;  %v890_v37 = vld [vmem:[%s18208_s22 + $0x13f0] sm:$0xff]  ;;  %v16396_v50 = vcombine.low %v894_v49, %v898_v19 }
 0x4f0   : > { %14298 = vmatpush1.bf16.msra.mxu1 %v16420_v51  ;;  %v1014_v63 = vld [vmem:[%s18208_s22 + $0x17d0] sm:$0xff]  ;;  %v16268_v51 = vcombine.low %v766_v47, %v770_v13 }
 0x4f1   : > { %14299 = vmatprep.subr.bf16.mxu1 %v16413_v9  ;;  %v1018_v16 = vld [vmem:[%s18208_s22 + $0x17f0] sm:$0xff]  ;;  %v16389_v9 = vcombine.high %v886_v5, %v890_v37 }
 0x4f2   : > { %14259 = vmatpush1.bf16.msra.mxu0 %v16284_v53  ;;  %v16517_v25 = vcombine.high %v1014_v63, %v1018_v16  ;;  %v878_v3 = vld [vmem:[%s18208_s22 + $0x1390] sm:$0xff] }
 0x4f3   : > { %14260 = vmatprep.subr.bf16.mxu0 %v16277_v58  ;;  %v882_v2 = vld [vmem:[%s18208_s22 + $0x13b0] sm:$0xff]  ;;  %v16516_v58 = vcombine.low %v1014_v63, %v1018_v16 }
 0x4f4   : > { %14300 = vmatpush1.bf16.msra.mxu1 %v16412_v17  ;;  %v1006_v34 = vld [vmem:[%s18208_s22 + $0x1790] sm:$0xff]  ;;  %v16388_v17 = vcombine.low %v886_v5, %v890_v37 }
 0x4f5   : > { %14301 = vmatprep.subr.bf16.mxu1 %v16405_v54  ;;  %v1010_v53 = vld [vmem:[%s18208_s22 + $0x17b0] sm:$0xff]  ;;  %v16381_v54 = vcombine.high %v878_v3, %v882_v2 }
 0x4f6   : > { %14261 = vmatpush1.bf16.msra.mxu0 %v16276_v18  ;;  %v16509_v47 = vcombine.high %v1006_v34, %v1010_v53  ;;  %v870_v13 = vld [vmem:[%s18208_s22 + $0x1350] sm:$0xff] }
 0x4f7   : > { %14262 = vmatprep.subr.bf16.mxu0 %v16269_v21  ;;  %v874_v49 = vld [vmem:[%s18208_s22 + $0x1370] sm:$0xff]  ;;  %v16508_v21 = vcombine.low %v1006_v34, %v1010_v53 }
 0x4f8   : > { %14302 = vmatpush1.bf16.msra.mxu1 %v16404_v46  ;;  %v998_v19 = vld [vmem:[%s18208_s22 + $0x1750] sm:$0xff]  ;;  %v16380_v46 = vcombine.low %v878_v3, %v882_v2 }
 0x4f9   : > { %14303 = vmatprep.subr.bf16.mxu1 %v16397_v39  ;;  %v1002_v18 = vld [vmem:[%s18208_s22 + $0x1770] sm:$0xff]  ;;  %v16373_v39 = vcombine.high %v870_v13, %v874_v49 }
 0x4fa   : > { %14263 = vmatpush1.bf16.msra.mxu0 %v16268_v51  ;;  %v16501_v5 = vcombine.high %v998_v19, %v1002_v18  ;;  %v862_v37 = vld [vmem:[%s18208_s22 + $0x1310] sm:$0xff] }
 0x4fb   : > { %14264 = vmatprep.subr.bf16.mxu0 %v16389_v9  ;;  %v866_v63 = vld [vmem:[%s18208_s22 + $0x1330] sm:$0xff]  ;;  %v16500_v9 = vcombine.low %v998_v19, %v1002_v18 }
 0x4fc   : > { %14304 = vmatpush1.bf16.msra.mxu1 %v16396_v50  ;;  %v990_v16 = vld [vmem:[%s18208_s22 + $0x1710] sm:$0xff]  ;;  %v16372_v50 = vcombine.low %v870_v13, %v874_v49 }
 0x4fd   : > { %14305 = vmatprep.subr.bf16.mxu1 %v16517_v25  ;;  %v994_v51 = vld [vmem:[%s18208_s22 + $0x1730] sm:$0xff]  ;;  %v16365_v25 = vcombine.high %v862_v37, %v866_v63 }
 0x4fe   : > { %14265 = vmatpush2.bf16.msra.mxu0 %v16388_v17  ;;  %v16493_v3 = vcombine.high %v990_v16, %v994_v51  ;;  %v854_v2 = vld [vmem:[%s18208_s22 + $0x12d0] sm:$0xff] }
 0x4ff   : > { %14266 = vmatprep.subr.bf16.mxu0 %v16381_v54  ;;  %v858_v34 = vld [vmem:[%s18208_s22 + $0x12f0] sm:$0xff]  ;;  %v16492_v54 = vcombine.low %v990_v16, %v994_v51 }
 0x500   : > { %14306 = vmatpush2.bf16.msra.mxu1 %v16516_v58  ;;  %v982_v53 = vld [vmem:[%s18208_s22 + $0x16d0] sm:$0xff]  ;;  %v16364_v58 = vcombine.low %v862_v37, %v866_v63 }
 0x501   : > { %14307 = vmatprep.subr.bf16.mxu1 %v16509_v47  ;;  %v986_v17 = vld [vmem:[%s18208_s22 + $0x16f0] sm:$0xff]  ;;  %v16357_v47 = vcombine.high %v854_v2, %v858_v34 }
 0x502   : > { %14267 = vmatpush2.bf16.msra.mxu0 %v16380_v46  ;;  %v16485_v13 = vcombine.high %v982_v53, %v986_v17  ;;  %v846_v49 = vld [vmem:[%s18208_s22 + $0x1290] sm:$0xff] }
 0x503   : > { %14268 = vmatprep.subr.bf16.mxu0 %v16373_v39  ;;  %v850_v19 = vld [vmem:[%s18208_s22 + $0x12b0] sm:$0xff]  ;;  %v16484_v39 = vcombine.low %v982_v53, %v986_v17 }
 0x504   : > { %14308 = vmatpush2.bf16.msra.mxu1 %v16508_v21  ;;  %v974_v18 = vld [vmem:[%s18208_s22 + $0x1690] sm:$0xff]  ;;  %v16356_v21 = vcombine.low %v854_v2, %v858_v34 }
 0x505   : > { %14309 = vmatprep.subr.bf16.mxu1 %v16501_v5  ;;  %v978_v46 = vld [vmem:[%s18208_s22 + $0x16b0] sm:$0xff]  ;;  %v16349_v5 = vcombine.high %v846_v49, %v850_v19 }
 0x506   : > { %14269 = vmatpush2.bf16.msra.mxu0 %v16372_v50  ;;  %v16477_v37 = vcombine.high %v974_v18, %v978_v46  ;;  %v838_v63 = vld [vmem:[%s18208_s22 + $0x1250] sm:$0xff] }
 0x507   : > { %14270 = vmatprep.subr.bf16.mxu0 %v16365_v25  ;;  %v842_v16 = vld [vmem:[%s18208_s22 + $0x1270] sm:$0xff]  ;;  %v16476_v25 = vcombine.low %v974_v18, %v978_v46 }
 0x508   : > { %14310 = vmatpush2.bf16.msra.mxu1 %v16500_v9  ;;  %v966_v51 = vld [vmem:[%s18208_s22 + $0x1650] sm:$0xff]  ;;  %v16348_v9 = vcombine.low %v846_v49, %v850_v19 }
 0x509   : > { %14311 = vmatprep.subr.bf16.mxu1 %v16493_v3  ;;  %v970_v50 = vld [vmem:[%s18208_s22 + $0x1670] sm:$0xff]  ;;  %v16341_v3 = vcombine.high %v838_v63, %v842_v16 }
 0x50a   : > { %14271 = vmatpush2.bf16.msra.mxu0 %v16364_v58  ;;  %v16469_v2 = vcombine.high %v966_v51, %v970_v50  ;;  %v830_v34 = vld [vmem:[%s18208_s22 + $0x1210] sm:$0xff] }
 0x50b   : > { %14272 = vmatprep.subr.bf16.mxu0 %v16357_v47  ;;  %v834_v53 = vld [vmem:[%s18208_s22 + $0x1230] sm:$0xff]  ;;  %v16468_v47 = vcombine.low %v966_v51, %v970_v50 }
 0x50c   : > { %14312 = vmatpush2.bf16.msra.mxu1 %v16492_v54  ;;  %v958_v17 = vld [vmem:[%s18208_s22 + $0x1610] sm:$0xff]  ;;  %v16340_v54 = vcombine.low %v838_v63, %v842_v16  ;;  %v13955_v63 = vadd.f32 %v19725_v7, %v19656_v59 }
 0x50d   : > { %14313 = vmatprep.subr.bf16.mxu1 %v16485_v13  ;;  %v962_v58 = vld [vmem:[%s18208_s22 + $0x1630] sm:$0xff]  ;;  %v16333_v13 = vcombine.high %v830_v34, %v834_v53 }
 0x50e   : > { %14273 = vmatpush2.bf16.msra.mxu0 %v16356_v21  ;;  %v16461_v49 = vcombine.high %v958_v17, %v962_v58  ;;  %v1078_v19 = vld [vmem:[%s18208_s22 + $0x19d0] sm:$0xff] }
 0x50f   : > { %14274 = vmatprep.subr.bf16.mxu0 %v16349_v5  ;;  %v1082_v18 = vld [vmem:[%s18208_s22 + $0x19f0] sm:$0xff]  ;;  %v16460_v5 = vcombine.low %v958_v17, %v962_v58  ;;  %v13996_v17 = vadd.f32 %v19730_v28, %v13955_v63 }
 0x510   : > { %14314 = vmatpush2.bf16.msra.mxu1 %v16484_v39  ;;  %v1206_v46 = vld [vmem:[%s18208_s22 + $0x1dd0] sm:$0xff]  ;;  %v16332_v39 = vcombine.low %v830_v34, %v834_v53  ;;  %v13957_v34 = vadd.f32 %v19733_v32, %v19665_v52  ;;  %v16580_v53 = vcombine.low %v1078_v19, %v1082_v18 }
 0x511   : > { %14315 = vmatprep.subr.bf16.mxu1 %v16477_v37  ;;  %v1210_v21 = vld [vmem:[%s18208_s22 + $0x1df0] sm:$0xff]  ;;  %v16581_v37 = vcombine.high %v1078_v19, %v1082_v18 }
 0x512   : > { %14275 = vmatpush2.bf16.msra.mxu0 %v16348_v9  ;;  %v16709_v16 = vcombine.high %v1206_v46, %v1210_v21  ;;  %v1070_v51 = vld [vmem:[%s18208_s22 + $0x1990] sm:$0xff]  ;;  %v16708_v59 = vcombine.low %v1206_v46, %v1210_v21  ;;  %v13998_v52 = vadd.f32 %v19735_v30, %v13957_v34 }
 0x513   : > { %14276 = vmatprep.subr.bf16.mxu0 %v16341_v3  ;;  %v1074_v50 = vld [vmem:[%s18208_s22 + $0x19b0] sm:$0xff]  ;;  %v18078_v3 = vmov 1983009808  }
 0x514   : > { %14316 = vmatpush2.bf16.msra.mxu1 %v16476_v25  ;;  %v1198_v9 = vld [vmem:[%s18208_s22 + $0x1d90] sm:$0xff]  ;;  %v16573_v7 = vcombine.high %v1070_v51, %v1074_v50  ;;  %v16572_v28 = vcombine.low %v1070_v51, %v1074_v50 }
 0x515   : > { %14317 = vmatprep.subr.bf16.mxu1 %v16469_v2  ;;  %v1202_v25 = vld [vmem:[%s18208_s22 + $0x1db0] sm:$0xff]  ;;  %v15407_v2 = vunpack.c.l.s4 %v18078_v3 }
 0x516   : > { %14277 = vmatpush2.bf16.msra.mxu0 %v16340_v54  ;;  %v16701_v58 = vcombine.high %v1198_v9, %v1202_v25  ;;  %v1062_v54 = vld [vmem:[%s18208_s22 + $0x1950] sm:$0xff]  ;;  %v16700_v46 = vcombine.low %v1198_v9, %v1202_v25 }
 0x517   : > { %14278 = vmatprep.subr.bf16.mxu0 %v16333_v13  ;;  %v1194_v3 = vld [vmem:[%s18208_s22 + $0x1d70] sm:$0xff]  ;;  %v15408_v4 = vunpack.c.0.s8 %v15407_v2 }
 0x518   : > { %14318 = vmatpush2.bf16.msra.mxu1 %v16468_v47  ;;  %v1066_v47 = vld [vmem:[%s18208_s22 + $0x1970] sm:$0xff] }
 0x519   : > { %14319 = vmatprep.subr.bf16.mxu1 %v16461_v49  ;;  %v1190_v49 = vld [vmem:[%s18208_s22 + $0x1d50] sm:$0xff]  ;;  %v16565_v21 = vcombine.high %v1062_v54, %v1066_v47  ;;  %v19818_v51 = vsub.s32 %v15408_v4, %v18242_v45 }
 0x51a   : > { %14279 = vmatpush2.bf16.msra.mxu0 %v16332_v39  ;;  %v1054_v63 = vld [vmem:[%s18208_s22 + $0x1910] sm:$0xff] }
 0x51b   : > { %14330 = vmatprep.subr.bf16.mxu0 %v16581_v37  ;;  %v16693_v37 = vcombine.high %v1190_v49, %v1194_v3  ;;  %v1058_v30 = vld [vmem:[%s18208_s22 + $0x1930] sm:$0xff] }
 0x51c   : > { %14320 = vmatpush2.bf16.msra.mxu1 %v16460_v5  ;;  %v1182_v2 = vld [vmem:[%s18208_s22 + $0x1d10] sm:$0xff] }
 0x51d   : > { %14371 = vmatprep.subr.bf16.mxu1 %v16709_v16  ;;  %v14036_v13 = vpop.f32.mrf.mxu0  ;;  %14281 = vmatmul.mubr.bf16.vlgmr.msra.gmra.mxu0 %v18504_v22  ;;  %v1186_v34 = vld [vmem:[%s18208_s22 + $0x1d30] sm:$0xff] }
 0x51e   : > { %v14037_v32 = vadd.f32 %v14036_v13, %v13996_v17  ;;  %14331 = vmatpush1.bf16.msra.mxu0 %v16580_v53  ;;  %14362 = vmatprep.mubr.bf16.mxu0 %v18511_v33  ;;  %v16564_v53 = vcombine.low %v1062_v54, %v1066_v47  ;;  %v16557_v17 = vcombine.high %v1054_v63, %v1058_v30  ;;  %v1050_v4 = vld [vmem:[%s18208_s22 + $0x18f0] sm:$0xff] }
 0x51f   : > { %v14077_v19 = vpop.f32.mrf.mxu1  ;;  %14322 = vmatmul.mubr.bf16.vlgmr.msra.gmra.mxu1 %v18515_v35  ;;  %v14038_v18 = vpop.f32.mrf.mxu0  ;;  %14332 = vmatprep.subr.bf16.mxu0 %v16573_v7  ;;  %v16692_v7 = vcombine.low %v1190_v49, %v1194_v3  ;;  %v20843_v54 = vcombine.low %v19212_v15, %v19221_v38  ;;  %v16556_v3 = vcombine.low %v1054_v63, %v1058_v30  ;;  %v1166_v15 = vld [vmem:[%s18208_s22 + $0x1c90] sm:$0xff] }
 0x520   : > { %14372 = vmatpush1.bf16.msra.mxu1 %v16708_v59  ;;  %v14039_v39 = vadd.f32 %v14038_v18, %v13998_v52  ;;  %14403 = vmatprep.mubr.bf16.mxu1 %v18524_v44  ;;  %v14078_v50 = vadd.f32 %v14077_v19, %v14037_v32  ;;  %v16685_v52 = vcombine.high %v1182_v2, %v1186_v34  ;;  %v1046_v18 = vld [vmem:[%s18208_s22 + $0x18d0] sm:$0xff] }
 0x521   : > { %v14079_v5 = vpop.f32.mrf.mxu1  ;;  %14373 = vmatprep.subr.bf16.mxu1 %v16701_v58  ;;  %v14040_v16 = vpop.f32.mrf.mxu0  ;;  %v1174_v32 = vld [vmem:[%s18208_s22 + $0x1cd0] sm:$0xff]  ;;  %v15412_v47 = vrot.slane %v20843_v54, %v19818_v51 }
 0x522   : > { %v14080_v9 = vadd.f32 %v14079_v5, %v14039_v39  ;;  %14333 = vmatpush1.bf16.msra.mxu0 %v16572_v28  ;;  %v1178_v19 = vld [vmem:[%s18208_s22 + $0x1cf0] sm:$0xff] }
 0x523   : > { %v14081_v25 = vpop.f32.mrf.mxu1  ;;  %v14041_v59 = vpop.f32.mrf.mxu0  ;;  %14334 = vmatprep.subr.bf16.mxu0 %v16565_v21  ;;  %v243_v28 = vld [vmem:[#allocation2] sm:$0xff]  ;;  %v16549_v21 = vcombine.high %v1046_v18, %v1050_v4  ;;  %v16677_v5 = vcombine.high %v1174_v32, %v1178_v19  ;;  %v16676_v63 = vcombine.low %v1174_v32, %v1178_v19 }
 0x524   : > { %14374 = vmatpush1.bf16.msra.mxu1 %v16700_v46  ;;  %v15405_v58 = vcombine.low %v14078_v50, %v14080_v9  ;;  %v16684_v46 = vcombine.low %v1182_v2, %v1186_v34  ;;  %v1042_v16 = vld [vmem:[%s18208_s22 + $0x18b0] sm:$0xff]  ;;  %v16548_v9 = vcombine.low %v1046_v18, %v1050_v4 }
 0x525   : > { %v14082_v13 = vpop.f32.mrf.mxu1  ;;  %14375 = vmatprep.subr.bf16.mxu1 %v16693_v37  ;;  %v1038_v37 = vld [vmem:[%s18208_s22 + $0x1890] sm:$0xff] }
 0x526   : > { %v15419_v49 = vrot.slane %v15405_v58, %v19818_v51  ;;  %14335 = vmatpush1.bf16.msra.mxu0 %v16564_v53  ;;  %v1170_v38 = vld [vmem:[%s18208_s22 + $0x1cb0] sm:$0xff]  ;;  %v16541_v30 = vcombine.high %v1038_v37, %v1042_v16 }
 0x527   : > { %14336 = vmatprep.subr.bf16.mxu0 %v16557_v17  ;;  %v16669_v2 = vcombine.high %v1166_v15, %v1170_v38  ;;  %v1030_v34 = vld [vmem:[%s18208_s22 + $0x1850] sm:$0xff]  ;;  %v16668_v17 = vcombine.low %v1166_v15, %v1170_v38 }
 0x528   : > { %14376 = vmatpush1.bf16.msra.mxu1 %v16692_v7  ;;  %v15420_v39 = vcombine.low %v15412_v47, %v15419_v49  ;;  %v1034_v25 = vld [vmem:[%s18208_s22 + $0x1870] sm:$0xff]  ;;  %v16540_v7 = vcombine.low %v1038_v37, %v1042_v16 }
 0x529   : > { %14377 = vmatprep.subr.bf16.mxu1 %v16685_v52  ;;  %v1158_v53 = vld [vmem:[%s18208_s22 + $0x1c50] sm:$0xff]  ;;  %v16533_v58 = vcombine.high %v1030_v34, %v1034_v25  ;;  %v16532_v19 = vcombine.low %v1030_v34, %v1034_v25 }
 0x52a   : > { %v15440_v50 = vadd.f32 %v15420_v39, %v243_v28  ;;  %14337 = vmatpush1.bf16.msra.mxu0 %v16556_v3  ;;  %v1162_v59 = vld [vmem:[%s18208_s22 + $0x1c70] sm:$0xff] }
 0x52b   : > { %14338 = vmatprep.subr.bf16.mxu0 %v16549_v21  ;;  %v16661_v13 = vcombine.high %v1158_v53, %v1162_v59  ;;  %v1022_v52 = vld [vmem:[%s18208_s22 + $0x1810] sm:$0xff]  ;;  %v16660_v54 = vcombine.low %v1158_v53, %v1162_v59 }
 0x52c   : > { %14378 = vmatpush1.bf16.msra.mxu1 %v16684_v46  ;;  %15442 = vst [vmem:[#allocation2] sm:$0xff] %v15440_v50  ;;  %v1026_v18 = vld [vmem:[%s18208_s22 + $0x1830] sm:$0xff] }
 0x52d   : > { %14379 = vmatprep.subr.bf16.mxu1 %v16677_v5  ;;  %v1150_v4 = vld [vmem:[%s18208_s22 + $0x1c10] sm:$0xff]  ;;  %v16525_v47 = vcombine.high %v1022_v52, %v1026_v18  ;;  %v16524_v39 = vcombine.low %v1022_v52, %v1026_v18 }
 0x52e   : > { %14339 = vmatpush1.bf16.msra.mxu0 %v16548_v9  ;;  %v1154_v32 = vld [vmem:[%s18208_s22 + $0x1c30] sm:$0xff] }
 0x52f   : > { %14340 = vmatprep.subr.bf16.mxu0 %v16541_v30  ;;  %v16653_v49 = vcombine.high %v1150_v4, %v1154_v32  ;;  %v1142_v3 = vld [vmem:[%s18208_s22 + $0x1bd0] sm:$0xff]  ;;  %v16652_v5 = vcombine.low %v1150_v4, %v1154_v32 }
 0x530   : > { %14380 = vmatpush1.bf16.msra.mxu1 %v16676_v63  ;;  %v1146_v28 = vld [vmem:[%s18208_s22 + $0x1bf0] sm:$0xff] }
 0x531   : > { %14381 = vmatprep.subr.bf16.mxu1 %v16669_v2  ;;  %v1270_v46 = vld [vmem:[%s18208_s22 + $0x1fd0] sm:$0xff]  ;;  %v16645_v37 = vcombine.high %v1142_v3, %v1146_v28  ;;  %v16644_v63 = vcombine.low %v1142_v3, %v1146_v28 }
 0x532   : > { %14341 = vmatpush1.bf16.msra.mxu0 %v16540_v7  ;;  %v1274_v21 = vld [vmem:[%s18208_s22 + $0x1ff0] sm:$0xff] }
 0x533   : > { %14342 = vmatprep.subr.bf16.mxu0 %v16533_v58  ;;  %v16773_v16 = vcombine.high %v1270_v46, %v1274_v21  ;;  %v1134_v15 = vld [vmem:[%s18208_s22 + $0x1b90] sm:$0xff]  ;;  %v16772_v30 = vcombine.low %v1270_v46, %v1274_v21 }
 0x534   : > { %14382 = vmatpush1.bf16.msra.mxu1 %v16668_v17  ;;  %v1138_v38 = vld [vmem:[%s18208_s22 + $0x1bb0] sm:$0xff] }
 0x535   : > { %14383 = vmatprep.subr.bf16.mxu1 %v16661_v13  ;;  %v1262_v50 = vld [vmem:[%s18208_s22 + $0x1f90] sm:$0xff]  ;;  %v16637_v2 = vcombine.high %v1134_v15, %v1138_v38  ;;  %v16636_v17 = vcombine.low %v1134_v15, %v1138_v38 }
 0x536   : > { %14343 = vmatpush1.bf16.msra.mxu0 %v16532_v19  ;;  %v1266_v9 = vld [vmem:[%s18208_s22 + $0x1fb0] sm:$0xff] }
 0x537   : > { %14344 = vmatprep.subr.bf16.mxu0 %v16525_v47  ;;  %v16765_v34 = vcombine.high %v1262_v50, %v1266_v9  ;;  %v1126_v25 = vld [vmem:[%s18208_s22 + $0x1b50] sm:$0xff]  ;;  %v16764_v58 = vcombine.low %v1262_v50, %v1266_v9 }
 0x538   : > { %14384 = vmatpush1.bf16.msra.mxu1 %v16660_v54  ;;  %v1130_v53 = vld [vmem:[%s18208_s22 + $0x1b70] sm:$0xff] }
 0x539   : > { %14385 = vmatprep.subr.bf16.mxu1 %v16653_v49  ;;  %v1254_v59 = vld [vmem:[%s18208_s22 + $0x1f50] sm:$0xff]  ;;  %v16629_v13 = vcombine.high %v1126_v25, %v1130_v53  ;;  %v16628_v54 = vcombine.low %v1126_v25, %v1130_v53 }
 0x53a   : > { %14345 = vmatpush1.bf16.msra.mxu0 %v16524_v39  ;;  %v1258_v7 = vld [vmem:[%s18208_s22 + $0x1f70] sm:$0xff] }
 0x53b   : > { %14346 = vmatprep.subr.bf16.mxu0 %v16645_v37  ;;  %v16757_v52 = vcombine.high %v1254_v59, %v1258_v7  ;;  %v1118_v18 = vld [vmem:[%s18208_s22 + $0x1b10] sm:$0xff]  ;;  %v16756_v47 = vcombine.low %v1254_v59, %v1258_v7 }
 0x53c   : > { %14386 = vmatpush1.bf16.msra.mxu1 %v16652_v5  ;;  %v1122_v4 = vld [vmem:[%s18208_s22 + $0x1b30] sm:$0xff] }
 0x53d   : > { %14387 = vmatprep.subr.bf16.mxu1 %v16773_v16  ;;  %v1246_v32 = vld [vmem:[%s18208_s22 + $0x1f10] sm:$0xff]  ;;  %v16621_v49 = vcombine.high %v1118_v18, %v1122_v4  ;;  %v16620_v5 = vcombine.low %v1118_v18, %v1122_v4 }
 0x53e   : > { %14347 = vmatpush2.bf16.msra.mxu0 %v16644_v63  ;;  %v1250_v19 = vld [vmem:[%s18208_s22 + $0x1f30] sm:$0xff] }
 0x53f   : > { %14348 = vmatprep.subr.bf16.mxu0 %v16637_v2  ;;  %v16749_v3 = vcombine.high %v1246_v32, %v1250_v19  ;;  %v1110_v28 = vld [vmem:[%s18208_s22 + $0x1ad0] sm:$0xff]  ;;  %v16748_v37 = vcombine.low %v1246_v32, %v1250_v19 }
 0x540   : > { %14388 = vmatpush2.bf16.msra.mxu1 %v16772_v30  ;;  %v1114_v46 = vld [vmem:[%s18208_s22 + $0x1af0] sm:$0xff] }
 0x541   : > { %14389 = vmatprep.subr.bf16.mxu1 %v16765_v34  ;;  %v1238_v21 = vld [vmem:[%s18208_s22 + $0x1ed0] sm:$0xff]  ;;  %v16613_v16 = vcombine.high %v1110_v28, %v1114_v46  ;;  %v16612_v30 = vcombine.low %v1110_v28, %v1114_v46 }
 0x542   : > { %14349 = vmatpush2.bf16.msra.mxu0 %v16636_v17  ;;  %v1242_v39 = vld [vmem:[%s18208_s22 + $0x1ef0] sm:$0xff] }
 0x543   : > { %14350 = vmatprep.subr.bf16.mxu0 %v16629_v13  ;;  %v16741_v15 = vcombine.high %v1238_v21, %v1242_v39  ;;  %v1102_v38 = vld [vmem:[%s18208_s22 + $0x1a90] sm:$0xff]  ;;  %v16740_v2 = vcombine.low %v1238_v21, %v1242_v39 }
 0x544   : > { %14390 = vmatpush2.bf16.msra.mxu1 %v16764_v58  ;;  %v1106_v50 = vld [vmem:[%s18208_s22 + $0x1ab0] sm:$0xff] }
 0x545   : > { %14391 = vmatprep.subr.bf16.mxu1 %v16757_v52  ;;  %v1230_v9 = vld [vmem:[%s18208_s22 + $0x1e90] sm:$0xff]  ;;  %v16605_v34 = vcombine.high %v1102_v38, %v1106_v50  ;;  %v16604_v58 = vcombine.low %v1102_v38, %v1106_v50 }
 0x546   : > { %14351 = vmatpush2.bf16.msra.mxu0 %v16628_v54  ;;  %v1234_v63 = vld [vmem:[%s18208_s22 + $0x1eb0] sm:$0xff] }
 0x547   : > { %14352 = vmatprep.subr.bf16.mxu0 %v16621_v49  ;;  %v16733_v25 = vcombine.high %v1230_v9, %v1234_v63  ;;  %v1094_v53 = vld [vmem:[%s18208_s22 + $0x1a50] sm:$0xff]  ;;  %v16732_v13 = vcombine.low %v1230_v9, %v1234_v63 }
 0x548   : > { %14392 = vmatpush2.bf16.msra.mxu1 %v16756_v47  ;;  %v1098_v59 = vld [vmem:[%s18208_s22 + $0x1a70] sm:$0xff] }
 0x549   : > { %14393 = vmatprep.subr.bf16.mxu1 %v16749_v3  ;;  %v1222_v7 = vld [vmem:[%s18208_s22 + $0x1e50] sm:$0xff]  ;;  %v16597_v52 = vcombine.high %v1094_v53, %v1098_v59  ;;  %v16596_v47 = vcombine.low %v1094_v53, %v1098_v59 }
 0x54a   : > { %14353 = vmatpush2.bf16.msra.mxu0 %v16620_v5  ;;  %v1226_v17 = vld [vmem:[%s18208_s22 + $0x1e70] sm:$0xff] }
 0x54b   : > { %14354 = vmatprep.subr.bf16.mxu0 %v16613_v16  ;;  %v16725_v18 = vcombine.high %v1222_v7, %v1226_v17  ;;  %v1086_v4 = vld [vmem:[%s18208_s22 + $0x1a10] sm:$0xff]  ;;  %v16724_v49 = vcombine.low %v1222_v7, %v1226_v17 }
 0x54c   : > { %14394 = vmatpush2.bf16.msra.mxu1 %v16748_v37  ;;  %v1090_v32 = vld [vmem:[%s18208_s22 + $0x1a30] sm:$0xff] }
 0x54d   : > { %14395 = vmatprep.subr.bf16.mxu1 %v16741_v15  ;;  %v1214_v19 = vld [vmem:[%s18208_s22 + $0x1e10] sm:$0xff]  ;;  %v16589_v3 = vcombine.high %v1086_v4, %v1090_v32  ;;  %v16588_v37 = vcombine.low %v1086_v4, %v1090_v32 }
 0x54e   : > { %14355 = vmatpush2.bf16.msra.mxu0 %v16612_v30  ;;  %v1218_v54 = vld [vmem:[%s18208_s22 + $0x1e30] sm:$0xff] }
 0x54f   : > { %14356 = vmatprep.subr.bf16.mxu0 %v16605_v34  ;;  %v16717_v28 = vcombine.high %v1214_v19, %v1218_v54  ;;  %v1334_v46 = vld [vmem:[%s18208_s22 + $0x21d0] sm:$0xff]  ;;  %v16716_v16 = vcombine.low %v1214_v19, %v1218_v54 }
 0x550   : > { %14396 = vmatpush2.bf16.msra.mxu1 %v16740_v2  ;;  %v1338_v21 = vld [vmem:[%s18208_s22 + $0x21f0] sm:$0xff] }
 0x551   : > { %14397 = vmatprep.subr.bf16.mxu1 %v16733_v25  ;;  %v1462_v39 = vld [vmem:[%s18208_s22 + $0x25d0] sm:$0xff]  ;;  %v16837_v15 = vcombine.high %v1334_v46, %v1338_v21  ;;  %v16836_v2 = vcombine.low %v1334_v46, %v1338_v21 }
 0x552   : > { %14357 = vmatpush2.bf16.msra.mxu0 %v16604_v58  ;;  %v1466_v5 = vld [vmem:[%s18208_s22 + $0x25f0] sm:$0xff] }
 0x553   : > { %14358 = vmatprep.subr.bf16.mxu0 %v16597_v52  ;;  %v16965_v38 = vcombine.high %v1462_v39, %v1466_v5  ;;  %v1326_v50 = vld [vmem:[%s18208_s22 + $0x2190] sm:$0xff]  ;;  %v16964_v34 = vcombine.low %v1462_v39, %v1466_v5 }
 0x554   : > { %14398 = vmatpush2.bf16.msra.mxu1 %v16732_v13  ;;  %v1330_v9 = vld [vmem:[%s18208_s22 + $0x21b0] sm:$0xff] }
 0x555   : > { %14399 = vmatprep.subr.bf16.mxu1 %v16725_v18  ;;  %v1454_v63 = vld [vmem:[%s18208_s22 + $0x2590] sm:$0xff]  ;;  %v16829_v25 = vcombine.high %v1326_v50, %v1330_v9  ;;  %v16828_v18 = vcombine.low %v1326_v50, %v1330_v9 }
 0x556   : > { %14359 = vmatpush2.bf16.msra.mxu0 %v16596_v47  ;;  %v1458_v30 = vld [vmem:[%s18208_s22 + $0x25b0] sm:$0xff] }
 0x557   : > { %14360 = vmatprep.subr.bf16.mxu0 %v16589_v3  ;;  %v16957_v53 = vcombine.high %v1454_v63, %v1458_v30  ;;  %v1318_v59 = vld [vmem:[%s18208_s22 + $0x2150] sm:$0xff]  ;;  %v16956_v19 = vcombine.low %v1454_v63, %v1458_v30 }
 0x558   : > { %14400 = vmatpush2.bf16.msra.mxu1 %v16724_v49  ;;  %v1322_v7 = vld [vmem:[%s18208_s22 + $0x2170] sm:$0xff] }
 0x559   : > { %14401 = vmatprep.subr.bf16.mxu1 %v16717_v28  ;;  %v1446_v58 = vld [vmem:[%s18208_s22 + $0x2550] sm:$0xff]  ;;  %v16821_v54 = vcombine.high %v1318_v59, %v1322_v7 }
 0x55a   : > { %14361 = vmatpush2.bf16.msra.mxu0 %v16588_v37  ;;  %v1450_v13 = vld [vmem:[%s18208_s22 + $0x2570] sm:$0xff] }
 0x55b   : > { %14412 = vmatprep.subr.bf16.mxu0 %v16837_v15  ;;  %v16949_v49 = vcombine.high %v1446_v58, %v1450_v13  ;;  %v1310_v3 = vld [vmem:[%s18208_s22 + $0x2110] sm:$0xff] }
 0x55c   : > { %14402 = vmatpush2.bf16.msra.mxu1 %v16716_v16  ;;  %v1314_v28 = vld [vmem:[%s18208_s22 + $0x2130] sm:$0xff]  ;;  %v16820_v16 = vcombine.low %v1318_v59, %v1322_v7 }
 0x55d   : > { %14453 = vmatprep.subr.bf16.mxu1 %v16965_v38  ;;  %v14118_v17 = vpop.f32.mrf.mxu0  ;;  %14363 = vmatmul.mubr.bf16.vlgmr.msra.gmra.mxu0 %v18596_v26  ;;  %v1438_v39 = vld [vmem:[%s18208_s22 + $0x2510] sm:$0xff]  ;;  %v16948_v38 = vcombine.low %v1446_v58, %v1450_v13  ;;  %v16813_v50 = vcombine.high %v1310_v3, %v1314_v28 }
 0x55e   : > { %14413 = vmatpush1.bf16.msra.mxu0 %v16836_v2  ;;  %14444 = vmatprep.mubr.bf16.mxu0 %v18603_v20  ;;  %v1442_v5 = vld [vmem:[%s18208_s22 + $0x2530] sm:$0xff] }
 0x55f   : > { %v14159_v52 = vpop.f32.mrf.mxu1  ;;  %14404 = vmatmul.mubr.bf16.vlgmr.msra.gmra.mxu1 %v18607_v11  ;;  %v14120_v32 = vpop.f32.mrf.mxu0  ;;  %14414 = vmatprep.subr.bf16.mxu0 %v16829_v25  ;;  %v16941_v63 = vcombine.high %v1438_v39, %v1442_v5  ;;  %v1302_v30 = vld [vmem:[%s18208_s22 + $0x20d0] sm:$0xff]  ;;  %v16940_v59 = vcombine.low %v1438_v39, %v1442_v5 }
 0x560   : > { %v19887_v4 = vadd.f32 %v14159_v52, %v14118_v17  ;;  %14454 = vmatpush1.bf16.msra.mxu1 %v16964_v34  ;;  %14485 = vmatprep.mubr.bf16.mxu1 %v18616_v36  ;;  %v1306_v2 = vld [vmem:[%s18208_s22 + $0x20f0] sm:$0xff] }
 0x561   : > { %v14161_v47 = vpop.f32.mrf.mxu1  ;;  %14455 = vmatprep.subr.bf16.mxu1 %v16957_v53  ;;  %v14122_v21 = vpop.f32.mrf.mxu0  ;;  %v1430_v34 = vld [vmem:[%s18208_s22 + $0x24d0] sm:$0xff]  ;;  %v16812_v53 = vcombine.low %v1310_v3, %v1314_v28  ;;  %v16805_v7 = vcombine.high %v1302_v30, %v1306_v2 }
 0x562   : > { %v19892_v46 = vadd.f32 %v14161_v47, %v14120_v32  ;;  %14415 = vmatpush1.bf16.msra.mxu0 %v16828_v18  ;;  %v1434_v25 = vld [vmem:[%s18208_s22 + $0x24f0] sm:$0xff]  ;;  %v16804_v32 = vcombine.low %v1302_v30, %v1306_v2 }
 0x563   : > { %v14163_v37 = vpop.f32.mrf.mxu1  ;;  %v14123_v15 = vpop.f32.mrf.mxu0  ;;  %14416 = vmatprep.subr.bf16.mxu0 %v16821_v54  ;;  %v16933_v17 = vcombine.high %v1430_v34, %v1434_v25  ;;  %v1294_v58 = vld [vmem:[%s18208_s22 + $0x2090] sm:$0xff] }
 0x564   : > { %14456 = vmatpush1.bf16.msra.mxu1 %v16956_v19  ;;  %v1298_v13 = vld [vmem:[%s18208_s22 + $0x20b0] sm:$0xff]  ;;  %v16932_v19 = vcombine.low %v1430_v34, %v1434_v25 }
 0x565   : > { %v14164_v9 = vpop.f32.mrf.mxu1  ;;  %14457 = vmatprep.subr.bf16.mxu1 %v16949_v49  ;;  %v1422_v52 = vld [vmem:[%s18208_s22 + $0x2490] sm:$0xff]  ;;  %v16797_v54 = vcombine.high %v1294_v58, %v1298_v13  ;;  %v16796_v39 = vcombine.low %v1294_v58, %v1298_v13 }
 0x566   : > { %14417 = vmatpush1.bf16.msra.mxu0 %v16820_v16  ;;  %v1426_v18 = vld [vmem:[%s18208_s22 + $0x24b0] sm:$0xff] }
 0x567   : > { %14418 = vmatprep.subr.bf16.mxu0 %v16813_v50  ;;  %v16925_v47 = vcombine.high %v1422_v52, %v1426_v18  ;;  %v1286_v49 = vld [vmem:[%s18208_s22 + $0x2050] sm:$0xff]  ;;  %v16924_v5 = vcombine.low %v1422_v52, %v1426_v18 }
 0x568   : > { %14458 = vmatpush1.bf16.msra.mxu1 %v16948_v38  ;;  %v1290_v3 = vld [vmem:[%s18208_s22 + $0x2070] sm:$0xff] }
 0x569   : > { %14459 = vmatprep.subr.bf16.mxu1 %v16941_v63  ;;  %v1414_v28 = vld [vmem:[%s18208_s22 + $0x2450] sm:$0xff]  ;;  %v16789_v37 = vcombine.high %v1286_v49, %v1290_v3  ;;  %v16788_v63 = vcombine.low %v1286_v49, %v1290_v3 }
 0x56a   : > { %14419 = vmatpush1.bf16.msra.mxu0 %v16812_v53  ;;  %v1418_v21 = vld [vmem:[%s18208_s22 + $0x2470] sm:$0xff] }
 0x56b   : > { %14420 = vmatprep.subr.bf16.mxu0 %v16805_v7  ;;  %v16917_v16 = vcombine.high %v1414_v28, %v1418_v21  ;;  %v1278_v15 = vld [vmem:[%s18208_s22 + $0x2010] sm:$0xff]  ;;  %v16916_v30 = vcombine.low %v1414_v28, %v1418_v21 }
 0x56c   : > { %14460 = vmatpush1.bf16.msra.mxu1 %v16940_v59  ;;  %v1282_v38 = vld [vmem:[%s18208_s22 + $0x2030] sm:$0xff] }
 0x56d   : > { %14461 = vmatprep.subr.bf16.mxu1 %v16933_v17  ;;  %v1406_v50 = vld [vmem:[%s18208_s22 + $0x2410] sm:$0xff]  ;;  %v16781_v2 = vcombine.high %v1278_v15, %v1282_v38  ;;  %v16780_v17 = vcombine.low %v1278_v15, %v1282_v38 }
 0x56e   : > { %14421 = vmatpush1.bf16.msra.mxu0 %v16804_v32  ;;  %v1410_v9 = vld [vmem:[%s18208_s22 + $0x2430] sm:$0xff] }
 0x56f   : > { %14422 = vmatprep.subr.bf16.mxu0 %v16797_v54  ;;  %v16909_v34 = vcombine.high %v1406_v50, %v1410_v9  ;;  %v1398_v25 = vld [vmem:[%s18208_s22 + $0x23d0] sm:$0xff]  ;;  %v16908_v58 = vcombine.low %v1406_v50, %v1410_v9 }
 0x570   : > { %14462 = vmatpush1.bf16.msra.mxu1 %v16932_v19  ;;  %v1402_v53 = vld [vmem:[%s18208_s22 + $0x23f0] sm:$0xff] }
 0x571   : > { %14463 = vmatprep.subr.bf16.mxu1 %v16925_v47  ;;  %v1526_v59 = vld [vmem:[%s18208_s22 + $0x27d0] sm:$0xff]  ;;  %v16901_v13 = vcombine.high %v1398_v25, %v1402_v53  ;;  %v16900_v47 = vcombine.low %v1398_v25, %v1402_v53 }
 0x572   : > { %14423 = vmatpush1.bf16.msra.mxu0 %v16796_v39  ;;  %v1530_v7 = vld [vmem:[%s18208_s22 + $0x27f0] sm:$0xff] }
 0x573   : > { %14424 = vmatprep.subr.bf16.mxu0 %v16789_v37  ;;  %v17029_v52 = vcombine.high %v1526_v59, %v1530_v7  ;;  %v1390_v18 = vld [vmem:[%s18208_s22 + $0x2390] sm:$0xff]  ;;  %v17028_v49 = vcombine.low %v1526_v59, %v1530_v7 }
 0x574   : > { %14464 = vmatpush1.bf16.msra.mxu1 %v16924_v5  ;;  %v1394_v32 = vld [vmem:[%s18208_s22 + $0x23b0] sm:$0xff] }
 0x575   : > { %14465 = vmatprep.subr.bf16.mxu1 %v16917_v16  ;;  %v1518_v19 = vld [vmem:[%s18208_s22 + $0x2790] sm:$0xff]  ;;  %v16893_v3 = vcombine.high %v1390_v18, %v1394_v32  ;;  %v16892_v16 = vcombine.low %v1390_v18, %v1394_v32 }
 0x576   : > { %14425 = vmatpush1.bf16.msra.mxu0 %v16788_v63  ;;  %v1522_v54 = vld [vmem:[%s18208_s22 + $0x27b0] sm:$0xff] }
 0x577   : > { %14426 = vmatprep.subr.bf16.mxu0 %v16781_v2  ;;  %v17021_v28 = vcombine.high %v1518_v19, %v1522_v54  ;;  %v1382_v21 = vld [vmem:[%s18208_s22 + $0x2350] sm:$0xff]  ;;  %v17020_v15 = vcombine.low %v1518_v19, %v1522_v54 }
 0x578   : > { %14466 = vmatpush1.bf16.msra.mxu1 %v16916_v30  ;;  %v1386_v39 = vld [vmem:[%s18208_s22 + $0x2370] sm:$0xff] }
 0x579   : > { %14467 = vmatprep.subr.bf16.mxu1 %v16909_v34  ;;  %v1510_v5 = vld [vmem:[%s18208_s22 + $0x2750] sm:$0xff]  ;;  %v16885_v38 = vcombine.high %v1382_v21, %v1386_v39  ;;  %v16884_v34 = vcombine.low %v1382_v21, %v1386_v39 }
 0x57a   : > { %14427 = vmatpush1.bf16.msra.mxu0 %v16780_v17  ;;  %v1514_v37 = vld [vmem:[%s18208_s22 + $0x2770] sm:$0xff] }
 0x57b   : > { %14428 = vmatprep.subr.bf16.mxu0 %v16901_v13  ;;  %v17013_v50 = vcombine.high %v1510_v5, %v1514_v37  ;;  %v1374_v9 = vld [vmem:[%s18208_s22 + $0x2310] sm:$0xff]  ;;  %v17012_v25 = vcombine.low %v1510_v5, %v1514_v37 }
 0x57c   : > { %14468 = vmatpush1.bf16.msra.mxu1 %v16908_v58  ;;  %v1378_v63 = vld [vmem:[%s18208_s22 + $0x2330] sm:$0xff] }
 0x57d   : > { %14469 = vmatprep.subr.bf16.mxu1 %v17029_v52  ;;  %v1502_v30 = vld [vmem:[%s18208_s22 + $0x2710] sm:$0xff]  ;;  %v16877_v53 = vcombine.high %v1374_v9, %v1378_v63  ;;  %v16876_v52 = vcombine.low %v1374_v9, %v1378_v63 }
 0x57e   : > { %14429 = vmatpush2.bf16.msra.mxu0 %v16900_v47  ;;  %v1506_v2 = vld [vmem:[%s18208_s22 + $0x2730] sm:$0xff] }
 0x57f   : > { %14430 = vmatprep.subr.bf16.mxu0 %v16893_v3  ;;  %v17005_v59 = vcombine.high %v1502_v30, %v1506_v2  ;;  %v1366_v7 = vld [vmem:[%s18208_s22 + $0x22d0] sm:$0xff]  ;;  %v17004_v18 = vcombine.low %v1502_v30, %v1506_v2 }
 0x580   : > { %14470 = vmatpush2.bf16.msra.mxu1 %v17028_v49  ;;  %v1370_v17 = vld [vmem:[%s18208_s22 + $0x22f0] sm:$0xff] }
 0x581   : > { %14471 = vmatprep.subr.bf16.mxu1 %v17021_v28  ;;  %v1494_v58 = vld [vmem:[%s18208_s22 + $0x26d0] sm:$0xff]  ;;  %v16869_v32 = vcombine.high %v1366_v7, %v1370_v17  ;;  %v16868_v28 = vcombine.low %v1366_v7, %v1370_v17 }
 0x582   : > { %14431 = vmatpush2.bf16.msra.mxu0 %v16892_v16  ;;  %v1498_v13 = vld [vmem:[%s18208_s22 + $0x26f0] sm:$0xff] }
 0x583   : > { %14432 = vmatprep.subr.bf16.mxu0 %v16885_v38  ;;  %v16997_v19 = vcombine.high %v1494_v58, %v1498_v13  ;;  %v1358_v54 = vld [vmem:[%s18208_s22 + $0x2290] sm:$0xff]  ;;  %v16996_v21 = vcombine.low %v1494_v58, %v1498_v13 }
 0x584   : > { %14472 = vmatpush2.bf16.msra.mxu1 %v17020_v15  ;;  %v1362_v47 = vld [vmem:[%s18208_s22 + $0x22b0] sm:$0xff] }
 0x585   : > { %14473 = vmatprep.subr.bf16.mxu1 %v17013_v50  ;;  %v1486_v49 = vld [vmem:[%s18208_s22 + $0x2690] sm:$0xff]  ;;  %v16861_v39 = vcombine.high %v1358_v54, %v1362_v47  ;;  %v16860_v50 = vcombine.low %v1358_v54, %v1362_v47 }
 0x586   : > { %14433 = vmatpush2.bf16.msra.mxu0 %v16884_v34  ;;  %v1490_v3 = vld [vmem:[%s18208_s22 + $0x26b0] sm:$0xff] }
 0x587   : > { %14434 = vmatprep.subr.bf16.mxu0 %v16877_v53  ;;  %v16989_v5 = vcombine.high %v1486_v49, %v1490_v3  ;;  %v1350_v37 = vld [vmem:[%s18208_s22 + $0x2250] sm:$0xff]  ;;  %v16988_v9 = vcombine.low %v1486_v49, %v1490_v3 }
 0x588   : > { %14474 = vmatpush2.bf16.msra.mxu1 %v17012_v25  ;;  %v1354_v16 = vld [vmem:[%s18208_s22 + $0x2270] sm:$0xff] }
 0x589   : > { %14475 = vmatprep.subr.bf16.mxu1 %v17005_v59  ;;  %v1478_v15 = vld [vmem:[%s18208_s22 + $0x2650] sm:$0xff]  ;;  %v16853_v63 = vcombine.high %v1350_v37, %v1354_v16  ;;  %v16852_v59 = vcombine.low %v1350_v37, %v1354_v16 }
 0x58a   : > { %14435 = vmatpush2.bf16.msra.mxu0 %v16876_v52  ;;  %v1482_v38 = vld [vmem:[%s18208_s22 + $0x2670] sm:$0xff] }
 0x58b   : > { %14436 = vmatprep.subr.bf16.mxu0 %v16869_v32  ;;  %v16981_v30 = vcombine.high %v1478_v15, %v1482_v38  ;;  %v1342_v2 = vld [vmem:[%s18208_s22 + $0x2210] sm:$0xff]  ;;  %v16980_v7 = vcombine.low %v1478_v15, %v1482_v38 }
 0x58c   : > { %14476 = vmatpush2.bf16.msra.mxu1 %v17004_v18  ;;  %v1346_v34 = vld [vmem:[%s18208_s22 + $0x2230] sm:$0xff] }
 0x58d   : > { %14477 = vmatprep.subr.bf16.mxu1 %v16997_v19  ;;  %v1470_v25 = vld [vmem:[%s18208_s22 + $0x2610] sm:$0xff]  ;;  %v16845_v17 = vcombine.high %v1342_v2, %v1346_v34  ;;  %v16844_v19 = vcombine.low %v1342_v2, %v1346_v34 }
 0x58e   : > { %14437 = vmatpush2.bf16.msra.mxu0 %v16868_v28  ;;  %v1474_v53 = vld [vmem:[%s18208_s22 + $0x2630] sm:$0xff] }
 0x58f   : > { %14438 = vmatprep.subr.bf16.mxu0 %v16861_v39  ;;  %v16973_v58 = vcombine.high %v1470_v25, %v1474_v53  ;;  %v1590_v13 = vld [vmem:[%s18208_s22 + $0x29d0] sm:$0xff]  ;;  %v16972_v54 = vcombine.low %v1470_v25, %v1474_v53 }
 0x590   : > { %14478 = vmatpush2.bf16.msra.mxu1 %v16996_v21  ;;  %v1594_v52 = vld [vmem:[%s18208_s22 + $0x29f0] sm:$0xff] }
 0x591   : > { %14479 = vmatprep.subr.bf16.mxu1 %v16989_v5  ;;  %v1718_v18 = vld [vmem:[%s18208_s22 + $0x2dd0] sm:$0xff]  ;;  %v17093_v47 = vcombine.high %v1590_v13, %v1594_v52  ;;  %v17092_v5 = vcombine.low %v1590_v13, %v1594_v52 }
 0x592   : > { %14439 = vmatpush2.bf16.msra.mxu0 %v16860_v50  ;;  %v1722_v32 = vld [vmem:[%s18208_s22 + $0x2df0] sm:$0xff] }
 0x593   : > { %14440 = vmatprep.subr.bf16.mxu0 %v16853_v63  ;;  %v17221_v49 = vcombine.high %v1718_v18, %v1722_v32  ;;  %v1582_v3 = vld [vmem:[%s18208_s22 + $0x2990] sm:$0xff]  ;;  %v17220_v37 = vcombine.low %v1718_v18, %v1722_v32 }
 0x594   : > { %14480 = vmatpush2.bf16.msra.mxu1 %v16988_v9  ;;  %v1586_v28 = vld [vmem:[%s18208_s22 + $0x29b0] sm:$0xff] }
 0x595   : > { %14481 = vmatprep.subr.bf16.mxu1 %v16981_v30  ;;  %v1710_v21 = vld [vmem:[%s18208_s22 + $0x2d90] sm:$0xff]  ;;  %v17085_v16 = vcombine.high %v1582_v3, %v1586_v28  ;;  %v17084_v25 = vcombine.low %v1582_v3, %v1586_v28 }
 0x596   : > { %14441 = vmatpush2.bf16.msra.mxu0 %v16852_v59  ;;  %v1714_v39 = vld [vmem:[%s18208_s22 + $0x2db0] sm:$0xff] }
 0x597   : > { %14442 = vmatprep.subr.bf16.mxu0 %v16845_v17  ;;  %v17213_v15 = vcombine.high %v1710_v21, %v1714_v39  ;;  %v1574_v38 = vld [vmem:[%s18208_s22 + $0x2950] sm:$0xff]  ;;  %v17212_v59 = vcombine.low %v1710_v21, %v1714_v39 }
 0x598   : > { %14482 = vmatpush2.bf16.msra.mxu1 %v16980_v7  ;;  %v1578_v50 = vld [vmem:[%s18208_s22 + $0x2970] sm:$0xff] }
 0x599   : > { %14483 = vmatprep.subr.bf16.mxu1 %v16973_v58  ;;  %v1702_v63 = vld [vmem:[%s18208_s22 + $0x2d50] sm:$0xff]  ;;  %v17077_v7 = vcombine.high %v1574_v38, %v1578_v50 }
 0x59a   : > { %14443 = vmatpush2.bf16.msra.mxu0 %v16844_v19  ;;  %v1706_v30 = vld [vmem:[%s18208_s22 + $0x2d70] sm:$0xff] }
 0x59b   : > { %14494 = vmatprep.subr.bf16.mxu0 %v17093_v47  ;;  %v1566_v52 = vld [vmem:[%s18208_s22 + $0x2910] sm:$0xff]  ;;  %v17204_v28 = vcombine.low %v1702_v63, %v1706_v30 }
 0x59c   : > { %14484 = vmatpush2.bf16.msra.mxu1 %v16972_v54  ;;  %v1570_v18 = vld [vmem:[%s18208_s22 + $0x2930] sm:$0xff] }
 0x59d   : > { %14535 = vmatprep.subr.bf16.mxu1 %v17221_v49  ;;  %v14200_v9 = vpop.f32.mrf.mxu0  ;;  %14445 = vmatmul.mubr.bf16.vlgmr.msra.gmra.mxu0 %v18690_v41  ;;  %v1694_v19 = vld [vmem:[%s18208_s22 + $0x2d10] sm:$0xff]  ;;  %v17069_v21 = vcombine.high %v1566_v52, %v1570_v18 }
 0x59e   : > { %v14201_v2 = vadd.f32 %v14200_v9, %v19887_v4  ;;  %14495 = vmatpush1.bf16.msra.mxu0 %v17092_v5  ;;  %v17205_v4 = vcombine.high %v1702_v63, %v1706_v30  ;;  %14526 = vmatprep.mubr.bf16.mxu0 %v18697_v55  ;;  %v1698_v54 = vld [vmem:[%s18208_s22 + $0x2d30] sm:$0xff] }
 0x59f   : > { %v14241_v34 = vpop.f32.mrf.mxu1  ;;  %14486 = vmatmul.mubr.bf16.vlgmr.msra.gmra.mxu1 %v18701_v61  ;;  %v14202_v53 = vpop.f32.mrf.mxu0  ;;  %14496 = vmatprep.subr.bf16.mxu0 %v17085_v16  ;;  %v17197_v5 = vcombine.high %v1694_v19, %v1698_v54  ;;  %v1562_v16 = vld [vmem:[%s18208_s22 + $0x28f0] sm:$0xff] }
 0x5a0   : > { %14536 = vmatpush1.bf16.msra.mxu1 %v17220_v37  ;;  %v19960_v17 = vadd.f32 %v14241_v34, %v14201_v2  ;;  %v14203_v58 = vadd.f32 %v14202_v53, %v19892_v46  ;;  %14567 = vmatprep.mubr.bf16.mxu1 %v18710_v6  ;;  %v17076_v46 = vcombine.low %v1574_v38, %v1578_v50  ;;  %v1558_v37 = vld [vmem:[%s18208_s22 + $0x28d0] sm:$0xff] }
 0x5a1   : > { %v14243_v13 = vpop.f32.mrf.mxu1  ;;  %14537 = vmatprep.subr.bf16.mxu1 %v17213_v15  ;;  %v14204_v32 = vpop.f32.mrf.mxu0  ;;  %v1686_v15 = vld [vmem:[%s18208_s22 + $0x2cd0] sm:$0xff]  ;;  %v17068_v2 = vcombine.low %v1566_v52, %v1570_v18  ;;  %v17196_v38 = vcombine.low %v1694_v19, %v1698_v54  ;;  %v17061_v50 = vcombine.high %v1558_v37, %v1562_v16 }
 0x5a2   : > { %v19969_v47 = vadd.f32 %v14243_v13, %v14203_v58  ;;  %14497 = vmatpush1.bf16.msra.mxu0 %v17084_v25  ;;  %v1690_v9 = vld [vmem:[%s18208_s22 + $0x2cf0] sm:$0xff] }
 0x5a3   : > { %v14245_v49 = vpop.f32.mrf.mxu1  ;;  %v14205_v3 = vpop.f32.mrf.mxu0  ;;  %14498 = vmatprep.subr.bf16.mxu0 %v17077_v7  ;;  %v17189_v63 = vcombine.high %v1686_v15, %v1690_v9  ;;  %v1550_v30 = vld [vmem:[%s18208_s22 + $0x2890] sm:$0xff]  ;;  %v17188_v7 = vcombine.low %v1686_v15, %v1690_v9 }
 0x5a4   : > { %14538 = vmatpush1.bf16.msra.mxu1 %v17212_v59  ;;  %v1554_v34 = vld [vmem:[%s18208_s22 + $0x28b0] sm:$0xff]  ;;  %v17060_v59 = vcombine.low %v1558_v37, %v1562_v16 }
 0x5a5   : > { %v14246_v39 = vpop.f32.mrf.mxu1  ;;  %14539 = vmatprep.subr.bf16.mxu1 %v17205_v4  ;;  %v1678_v25 = vld [vmem:[%s18208_s22 + $0x2c90] sm:$0xff]  ;;  %v17053_v58 = vcombine.high %v1550_v30, %v1554_v34  ;;  %v17052_v19 = vcombine.low %v1550_v30, %v1554_v34 }
 0x5a6   : > { %14499 = vmatpush1.bf16.msra.mxu0 %v17076_v46  ;;  %v1682_v53 = vld [vmem:[%s18208_s22 + $0x2cb0] sm:$0xff] }
 0x5a7   : > { %14500 = vmatprep.subr.bf16.mxu0 %v17069_v21  ;;  %v17181_v13 = vcombine.high %v1678_v25, %v1682_v53  ;;  %v1542_v4 = vld [vmem:[%s18208_s22 + $0x2850] sm:$0xff]  ;;  %v17180_v54 = vcombine.low %v1678_v25, %v1682_v53 }
 0x5a8   : > { %14540 = vmatpush1.bf16.msra.mxu1 %v17204_v28  ;;  %v1546_v52 = vld [vmem:[%s18208_s22 + $0x2870] sm:$0xff] }
 0x5a9   : > { %14541 = vmatprep.subr.bf16.mxu1 %v17197_v5  ;;  %v1670_v18 = vld [vmem:[%s18208_s22 + $0x2c50] sm:$0xff]  ;;  %v17045_v49 = vcombine.high %v1542_v4, %v1546_v52  ;;  %v17044_v5 = vcombine.low %v1542_v4, %v1546_v52 }
 0x5aa   : > { %14501 = vmatpush1.bf16.msra.mxu0 %v17068_v2  ;;  %v1674_v32 = vld [vmem:[%s18208_s22 + $0x2c70] sm:$0xff] }
 0x5ab   : > { %14502 = vmatprep.subr.bf16.mxu0 %v17061_v50  ;;  %v17173_v46 = vcombine.high %v1670_v18, %v1674_v32  ;;  %v1534_v3 = vld [vmem:[%s18208_s22 + $0x2810] sm:$0xff]  ;;  %v17172_v37 = vcombine.low %v1670_v18, %v1674_v32 }
 0x5ac   : > { %14542 = vmatpush1.bf16.msra.mxu1 %v17196_v38  ;;  %v1538_v28 = vld [vmem:[%s18208_s22 + $0x2830] sm:$0xff] }
 0x5ad   : > { %14543 = vmatprep.subr.bf16.mxu1 %v17189_v63  ;;  %v1662_v21 = vld [vmem:[%s18208_s22 + $0x2c10] sm:$0xff]  ;;  %v17037_v16 = vcombine.high %v1534_v3, %v1538_v28  ;;  %v17036_v63 = vcombine.low %v1534_v3, %v1538_v28 }
 0x5ae   : > { %14503 = vmatpush1.bf16.msra.mxu0 %v17060_v59  ;;  %v1666_v39 = vld [vmem:[%s18208_s22 + $0x2c30] sm:$0xff] }
 0x5af   : > { %14504 = vmatprep.subr.bf16.mxu0 %v17053_v58  ;;  %v17165_v15 = vcombine.high %v1662_v21, %v1666_v39  ;;  %v1654_v9 = vld [vmem:[%s18208_s22 + $0x2bd0] sm:$0xff]  ;;  %v17164_v30 = vcombine.low %v1662_v21, %v1666_v39 }
 0x5b0   : > { %14544 = vmatpush1.bf16.msra.mxu1 %v17188_v7  ;;  %v1658_v2 = vld [vmem:[%s18208_s22 + $0x2bf0] sm:$0xff] }
 0x5b1   : > { %14545 = vmatprep.subr.bf16.mxu1 %v17181_v13  ;;  %v1782_v38 = vld [vmem:[%s18208_s22 + $0x2fd0] sm:$0xff]  ;;  %v17157_v34 = vcombine.high %v1654_v9, %v1658_v2  ;;  %v17156_v13 = vcombine.low %v1654_v9, %v1658_v2 }
 0x5b2   : > { %14505 = vmatpush1.bf16.msra.mxu0 %v17052_v19  ;;  %v1786_v50 = vld [vmem:[%s18208_s22 + $0x2ff0] sm:$0xff] }
 0x5b3   : > { %14506 = vmatprep.subr.bf16.mxu0 %v17045_v49  ;;  %v17285_v25 = vcombine.high %v1782_v38, %v1786_v50  ;;  %v1646_v53 = vld [vmem:[%s18208_s22 + $0x2b90] sm:$0xff]  ;;  %v17284_v4 = vcombine.low %v1782_v38, %v1786_v50 }
 0x5b4   : > { %14546 = vmatpush1.bf16.msra.mxu1 %v17180_v54  ;;  %v1650_v59 = vld [vmem:[%s18208_s22 + $0x2bb0] sm:$0xff] }
 0x5b5   : > { %14547 = vmatprep.subr.bf16.mxu1 %v17173_v46  ;;  %v1774_v7 = vld [vmem:[%s18208_s22 + $0x2f90] sm:$0xff]  ;;  %v17149_v52 = vcombine.high %v1646_v53, %v1650_v59  ;;  %v17148_v46 = vcombine.low %v1646_v53, %v1650_v59 }
 0x5b6   : > { %14507 = vmatpush1.bf16.msra.mxu0 %v17044_v5  ;;  %v1778_v58 = vld [vmem:[%s18208_s22 + $0x2fb0] sm:$0xff] }
 0x5b7   : > { %14508 = vmatprep.subr.bf16.mxu0 %v17037_v16  ;;  %v17277_v18 = vcombine.high %v1774_v7, %v1778_v58  ;;  %v1638_v32 = vld [vmem:[%s18208_s22 + $0x2b50] sm:$0xff]  ;;  %v17276_v3 = vcombine.low %v1774_v7, %v1778_v58 }
 0x5b8   : > { %14548 = vmatpush1.bf16.msra.mxu1 %v17172_v37  ;;  %v1642_v19 = vld [vmem:[%s18208_s22 + $0x2b70] sm:$0xff] }
 0x5b9   : > { %14549 = vmatprep.subr.bf16.mxu1 %v17165_v15  ;;  %v1766_v54 = vld [vmem:[%s18208_s22 + $0x2f50] sm:$0xff]  ;;  %v17141_v28 = vcombine.high %v1638_v32, %v1642_v19  ;;  %v17140_v15 = vcombine.low %v1638_v32, %v1642_v19 }
 0x5ba   : > { %14509 = vmatpush1.bf16.msra.mxu0 %v17036_v63  ;;  %v1770_v49 = vld [vmem:[%s18208_s22 + $0x2f70] sm:$0xff] }
 0x5bb   : > { %14510 = vmatprep.subr.bf16.mxu0 %v17157_v34  ;;  %v17269_v21 = vcombine.high %v1766_v54, %v1770_v49  ;;  %v1630_v39 = vld [vmem:[%s18208_s22 + $0x2b10] sm:$0xff]  ;;  %v17268_v9 = vcombine.low %v1766_v54, %v1770_v49 }
 0x5bc   : > { %14550 = vmatpush1.bf16.msra.mxu1 %v17164_v30  ;;  %v1634_v5 = vld [vmem:[%s18208_s22 + $0x2b30] sm:$0xff] }
 0x5bd   : > { %14551 = vmatprep.subr.bf16.mxu1 %v17285_v25  ;;  %v1758_v37 = vld [vmem:[%s18208_s22 + $0x2f10] sm:$0xff]  ;;  %v17133_v2 = vcombine.high %v1630_v39, %v1634_v5  ;;  %v17132_v25 = vcombine.low %v1630_v39, %v1634_v5 }
 0x5be   : > { %14511 = vmatpush2.bf16.msra.mxu0 %v17156_v13  ;;  %v1762_v16 = vld [vmem:[%s18208_s22 + $0x2f30] sm:$0xff] }
 0x5bf   : > { %14512 = vmatprep.subr.bf16.mxu0 %v17149_v52  ;;  %v17261_v38 = vcombine.high %v1758_v37, %v1762_v16  ;;  %v1622_v50 = vld [vmem:[%s18208_s22 + $0x2ad0] sm:$0xff]  ;;  %v17260_v53 = vcombine.low %v1758_v37, %v1762_v16 }
 0x5c0   : > { %14552 = vmatpush2.bf16.msra.mxu1 %v17284_v4  ;;  %v1626_v63 = vld [vmem:[%s18208_s22 + $0x2af0] sm:$0xff] }
 0x5c1   : > { %14553 = vmatprep.subr.bf16.mxu1 %v17277_v18  ;;  %v1750_v30 = vld [vmem:[%s18208_s22 + $0x2ed0] sm:$0xff]  ;;  %v17125_v59 = vcombine.high %v1622_v50, %v1626_v63  ;;  %v17124_v18 = vcombine.low %v1622_v50, %v1626_v63 }
 0x5c2   : > { %14513 = vmatpush2.bf16.msra.mxu0 %v17148_v46  ;;  %v1754_v34 = vld [vmem:[%s18208_s22 + $0x2ef0] sm:$0xff] }
 0x5c3   : > { %14514 = vmatprep.subr.bf16.mxu0 %v17141_v28  ;;  %v17253_v7 = vcombine.high %v1750_v30, %v1754_v34  ;;  %v1614_v58 = vld [vmem:[%s18208_s22 + $0x2a90] sm:$0xff]  ;;  %v17252_v32 = vcombine.low %v1750_v30, %v1754_v34 }
 0x5c4   : > { %14554 = vmatpush2.bf16.msra.mxu1 %v17276_v3  ;;  %v1618_v13 = vld [vmem:[%s18208_s22 + $0x2ab0] sm:$0xff] }
 0x5c5   : > { %14555 = vmatprep.subr.bf16.mxu1 %v17269_v21  ;;  %v1742_v4 = vld [vmem:[%s18208_s22 + $0x2e90] sm:$0xff]  ;;  %v17117_v19 = vcombine.high %v1614_v58, %v1618_v13  ;;  %v17116_v21 = vcombine.low %v1614_v58, %v1618_v13 }
 0x5c6   : > { %14515 = vmatpush2.bf16.msra.mxu0 %v17140_v15  ;;  %v1746_v52 = vld [vmem:[%s18208_s22 + $0x2eb0] sm:$0xff] }
 0x5c7   : > { %14516 = vmatprep.subr.bf16.mxu0 %v17133_v2  ;;  %v17245_v54 = vcombine.high %v1742_v4, %v1746_v52  ;;  %v1606_v49 = vld [vmem:[%s18208_s22 + $0x2a50] sm:$0xff]  ;;  %v17244_v39 = vcombine.low %v1742_v4, %v1746_v52 }
 0x5c8   : > { %14556 = vmatpush2.bf16.msra.mxu1 %v17268_v9  ;;  %v1610_v46 = vld [vmem:[%s18208_s22 + $0x2a70] sm:$0xff] }
 0x5c9   : > { %14557 = vmatprep.subr.bf16.mxu1 %v17261_v38  ;;  %v1734_v3 = vld [vmem:[%s18208_s22 + $0x2e50] sm:$0xff]  ;;  %v17109_v5 = vcombine.high %v1606_v49, %v1610_v46  ;;  %v17108_v38 = vcombine.low %v1606_v49, %v1610_v46 }
 0x5ca   : > { %14517 = vmatpush2.bf16.msra.mxu0 %v17132_v25  ;;  %v1738_v28 = vld [vmem:[%s18208_s22 + $0x2e70] sm:$0xff] }
 0x5cb   : > { %14518 = vmatprep.subr.bf16.mxu0 %v17125_v59  ;;  %v17237_v37 = vcombine.high %v1734_v3, %v1738_v28  ;;  %v1598_v16 = vld [vmem:[%s18208_s22 + $0x2a10] sm:$0xff]  ;;  %v17236_v50 = vcombine.low %v1734_v3, %v1738_v28 }
 0x5cc   : > { %14558 = vmatpush2.bf16.msra.mxu1 %v17260_v53  ;;  %v1602_v15 = vld [vmem:[%s18208_s22 + $0x2a30] sm:$0xff] }
 0x5cd   : > { %14559 = vmatprep.subr.bf16.mxu1 %v17253_v7  ;;  %v1726_v9 = vld [vmem:[%s18208_s22 + $0x2e10] sm:$0xff]  ;;  %v17101_v63 = vcombine.high %v1598_v16, %v1602_v15  ;;  %v17100_v7 = vcombine.low %v1598_v16, %v1602_v15 }
 0x5ce   : > { %14519 = vmatpush2.bf16.msra.mxu0 %v17124_v18  ;;  %v1730_v2 = vld [vmem:[%s18208_s22 + $0x2e30] sm:$0xff] }
 0x5cf   : > { %14520 = vmatprep.subr.bf16.mxu0 %v17117_v19  ;;  %v17229_v30 = vcombine.high %v1726_v9, %v1730_v2  ;;  %v1846_v34 = vld [vmem:[%s18208_s22 + $0x31d0] sm:$0xff]  ;;  %v17228_v58 = vcombine.low %v1726_v9, %v1730_v2 }
 0x5d0   : > { %14560 = vmatpush2.bf16.msra.mxu1 %v17252_v32  ;;  %v1850_v25 = vld [vmem:[%s18208_s22 + $0x31f0] sm:$0xff] }
 0x5d1   : > { %14561 = vmatprep.subr.bf16.mxu1 %v17245_v54  ;;  %v1974_v53 = vld [vmem:[%s18208_s22 + $0x35d0] sm:$0xff]  ;;  %v17349_v13 = vcombine.high %v1846_v34, %v1850_v25  ;;  %v17348_v54 = vcombine.low %v1846_v34, %v1850_v25 }
 0x5d2   : > { %14521 = vmatpush2.bf16.msra.mxu0 %v17116_v21  ;;  %v1978_v59 = vld [vmem:[%s18208_s22 + $0x35f0] sm:$0xff] }
 0x5d3   : > { %14522 = vmatprep.subr.bf16.mxu0 %v17109_v5  ;;  %v17477_v4 = vcombine.high %v1974_v53, %v1978_v59  ;;  %v1838_v52 = vld [vmem:[%s18208_s22 + $0x3190] sm:$0xff]  ;;  %v17476_v49 = vcombine.low %v1974_v53, %v1978_v59 }
 0x5d4   : > { %14562 = vmatpush2.bf16.msra.mxu1 %v17244_v39  ;;  %v1842_v18 = vld [vmem:[%s18208_s22 + $0x31b0] sm:$0xff] }
 0x5d5   : > { %14563 = vmatprep.subr.bf16.mxu1 %v17237_v37  ;;  %v1966_v32 = vld [vmem:[%s18208_s22 + $0x3590] sm:$0xff]  ;;  %v17341_v46 = vcombine.high %v1838_v52, %v1842_v18  ;;  %v17340_v9 = vcombine.low %v1838_v52, %v1842_v18 }
 0x5d6   : > { %14523 = vmatpush2.bf16.msra.mxu0 %v17108_v38  ;;  %v1970_v19 = vld [vmem:[%s18208_s22 + $0x35b0] sm:$0xff] }
 0x5d7   : > { %14524 = vmatprep.subr.bf16.mxu0 %v17101_v63  ;;  %v17469_v3 = vcombine.high %v1966_v32, %v1970_v19  ;;  %v1830_v28 = vld [vmem:[%s18208_s22 + $0x3150] sm:$0xff]  ;;  %v17468_v38 = vcombine.low %v1966_v32, %v1970_v19 }
 0x5d8   : > { %14564 = vmatpush2.bf16.msra.mxu1 %v17236_v50  ;;  %v1834_v21 = vld [vmem:[%s18208_s22 + $0x3170] sm:$0xff] }
 0x5d9   : > { %14565 = vmatprep.subr.bf16.mxu1 %v17229_v30  ;;  %v1958_v5 = vld [vmem:[%s18208_s22 + $0x3550] sm:$0xff]  ;;  %v17333_v50 = vcombine.high %v1830_v28, %v1834_v21 }
 0x5da   : > { %14525 = vmatpush2.bf16.msra.mxu0 %v17100_v7  ;;  %v1962_v37 = vld [vmem:[%s18208_s22 + $0x3570] sm:$0xff] }
 0x5db   : > { %14576 = vmatprep.subr.bf16.mxu0 %v17349_v13  ;;  %v1822_v25 = vld [vmem:[%s18208_s22 + $0x3110] sm:$0xff]  ;;  %v17460_v18 = vcombine.low %v1958_v5, %v1962_v37 }
 0x5dc   : > { %14566 = vmatpush2.bf16.msra.mxu1 %v17228_v58  ;;  %v1826_v53 = vld [vmem:[%s18208_s22 + $0x3130] sm:$0xff] }
 0x5dd   : > { %14617 = vmatprep.subr.bf16.mxu1 %v17477_v4  ;;  %v14282_v39 = vpop.f32.mrf.mxu0  ;;  %14527 = vmatmul.mubr.bf16.vlgmr.msra.gmra.mxu0 %v18788_v29  ;;  %v1950_v7 = vld [vmem:[%s18208_s22 + $0x3510] sm:$0xff]  ;;  %v17325_v32 = vcombine.high %v1822_v25, %v1826_v53 }
 0x5de   : > { %v14283_v16 = vadd.f32 %v14282_v39, %v19960_v17  ;;  %14577 = vmatpush1.bf16.msra.mxu0 %v17348_v54  ;;  %v17461_v17 = vcombine.high %v1958_v5, %v1962_v37  ;;  %14608 = vmatprep.mubr.bf16.mxu0 %v18795_v43  ;;  %v1954_v58 = vld [vmem:[%s18208_s22 + $0x3530] sm:$0xff] }
 0x5df   : > { %v14323_v15 = vpop.f32.mrf.mxu1  ;;  %14568 = vmatmul.mubr.bf16.vlgmr.msra.gmra.mxu1 %v18799_v24  ;;  %v14284_v2 = vpop.f32.mrf.mxu0  ;;  %14578 = vmatprep.subr.bf16.mxu0 %v17341_v46  ;;  %v17453_v54 = vcombine.high %v1950_v7, %v1954_v58  ;;  %v1818_v46 = vld [vmem:[%s18208_s22 + $0x30f0] sm:$0xff] }
 0x5e0   : > { %14618 = vmatpush1.bf16.msra.mxu1 %v17476_v49  ;;  %v20034_v63 = vadd.f32 %v14323_v15, %v14283_v16  ;;  %v14285_v30 = vadd.f32 %v14284_v2, %v19969_v47  ;;  %14649 = vmatprep.mubr.bf16.mxu1 %v18808_v1  ;;  %v17332_v47 = vcombine.low %v1830_v28, %v1834_v21  ;;  %v1814_v49 = vld [vmem:[%s18208_s22 + $0x30d0] sm:$0xff] }
 0x5e1   : > { %v14325_v34 = vpop.f32.mrf.mxu1  ;;  %14619 = vmatprep.subr.bf16.mxu1 %v17469_v3  ;;  %v14286_v59 = vpop.f32.mrf.mxu0  ;;  %v1942_v3 = vld [vmem:[%s18208_s22 + $0x34d0] sm:$0xff]  ;;  %v17324_v16 = vcombine.low %v1822_v25, %v1826_v53  ;;  %v17452_v28 = vcombine.low %v1950_v7, %v1954_v58  ;;  %v17317_v21 = vcombine.high %v1814_v49, %v1818_v46 }
 0x5e2   : > { %v20043_v13 = vadd.f32 %v14325_v34, %v14285_v30  ;;  %14579 = vmatpush1.bf16.msra.mxu0 %v17340_v9  ;;  %v1946_v39 = vld [vmem:[%s18208_s22 + $0x34f0] sm:$0xff] }
 0x5e3   : > { %v14327_v4 = vpop.f32.mrf.mxu1  ;;  %v14287_v52 = vpop.f32.mrf.mxu0  ;;  %14580 = vmatprep.subr.bf16.mxu0 %v17333_v50  ;;  %v17445_v5 = vcombine.high %v1942_v3, %v1946_v39  ;;  %v1806_v37 = vld [vmem:[%s18208_s22 + $0x3090] sm:$0xff]  ;;  %v17444_v50 = vcombine.low %v1942_v3, %v1946_v39 }
 0x5e4   : > { %14620 = vmatpush1.bf16.msra.mxu1 %v17468_v38  ;;  %v1810_v15 = vld [vmem:[%s18208_s22 + $0x30b0] sm:$0xff]  ;;  %v17316_v38 = vcombine.low %v1814_v49, %v1818_v46 }
 0x5e5   : > { %v14328_v19 = vpop.f32.mrf.mxu1  ;;  %14621 = vmatprep.subr.bf16.mxu1 %v17461_v17  ;;  %v1934_v9 = vld [vmem:[%s18208_s22 + $0x3490] sm:$0xff]  ;;  %v17309_v30 = vcombine.high %v1806_v37, %v1810_v15  ;;  %v17308_v7 = vcombine.low %v1806_v37, %v1810_v15 }
 0x5e6   : > { %14581 = vmatpush1.bf16.msra.mxu0 %v17332_v47  ;;  %v1938_v2 = vld [vmem:[%s18208_s22 + $0x34b0] sm:$0xff] }
 0x5e7   : > { %14582 = vmatprep.subr.bf16.mxu0 %v17325_v32  ;;  %v17437_v34 = vcombine.high %v1934_v9, %v1938_v2  ;;  %v1798_v17 = vld [vmem:[%s18208_s22 + $0x3050] sm:$0xff]  ;;  %v17436_v58 = vcombine.low %v1934_v9, %v1938_v2 }
 0x5e8   : > { %14622 = vmatpush1.bf16.msra.mxu1 %v17460_v18  ;;  %v1802_v25 = vld [vmem:[%s18208_s22 + $0x3070] sm:$0xff] }
 0x5e9   : > { %14623 = vmatprep.subr.bf16.mxu1 %v17453_v54  ;;  %v1926_v53 = vld [vmem:[%s18208_s22 + $0x3450] sm:$0xff]  ;;  %v17301_v4 = vcombine.high %v1798_v17, %v1802_v25  ;;  %v17300_v54 = vcombine.low %v1798_v17, %v1802_v25 }
 0x5ea   : > { %14583 = vmatpush1.bf16.msra.mxu0 %v17324_v16  ;;  %v1930_v59 = vld [vmem:[%s18208_s22 + $0x3470] sm:$0xff] }
 0x5eb   : > { %14584 = vmatprep.subr.bf16.mxu0 %v17317_v21  ;;  %v17429_v47 = vcombine.high %v1926_v53, %v1930_v59  ;;  %v1790_v52 = vld [vmem:[%s18208_s22 + $0x3010] sm:$0xff]  ;;  %v17428_v49 = vcombine.low %v1926_v53, %v1930_v59 }
 0x5ec   : > { %14624 = vmatpush1.bf16.msra.mxu1 %v17452_v28  ;;  %v1794_v18 = vld [vmem:[%s18208_s22 + $0x3030] sm:$0xff] }
 0x5ed   : > { %14625 = vmatprep.subr.bf16.mxu1 %v17445_v5  ;;  %v1918_v32 = vld [vmem:[%s18208_s22 + $0x3410] sm:$0xff]  ;;  %v17293_v46 = vcombine.high %v1790_v52, %v1794_v18  ;;  %v17292_v5 = vcombine.low %v1790_v52, %v1794_v18 }
 0x5ee   : > { %14585 = vmatpush1.bf16.msra.mxu0 %v17316_v38  ;;  %v1922_v19 = vld [vmem:[%s18208_s22 + $0x3430] sm:$0xff] }
 0x5ef   : > { %14586 = vmatprep.subr.bf16.mxu0 %v17309_v30  ;;  %v17421_v3 = vcombine.high %v1918_v32, %v1922_v19  ;;  %v1910_v39 = vld [vmem:[%s18208_s22 + $0x33d0] sm:$0xff]  ;;  %v17420_v37 = vcombine.low %v1918_v32, %v1922_v19 }
 0x5f0   : > { %14626 = vmatpush1.bf16.msra.mxu1 %v17444_v50  ;;  %v1914_v16 = vld [vmem:[%s18208_s22 + $0x33f0] sm:$0xff] }
 0x5f1   : > { %14627 = vmatprep.subr.bf16.mxu1 %v17437_v34  ;;  %v2038_v28 = vld [vmem:[%s18208_s22 + $0x37d0] sm:$0xff]  ;;  %v17413_v15 = vcombine.high %v1910_v39, %v1914_v16  ;;  %v17412_v34 = vcombine.low %v1910_v39, %v1914_v16 }
 0x5f2   : > { %14587 = vmatpush1.bf16.msra.mxu0 %v17308_v7  ;;  %v2042_v21 = vld [vmem:[%s18208_s22 + $0x37f0] sm:$0xff] }
 0x5f3   : > { %14588 = vmatprep.subr.bf16.mxu0 %v17301_v4  ;;  %v17541_v9 = vcombine.high %v2038_v28, %v2042_v21  ;;  %v1902_v2 = vld [vmem:[%s18208_s22 + $0x3390] sm:$0xff]  ;;  %v17540_v17 = vcombine.low %v2038_v28, %v2042_v21 }
 0x5f4   : > { %14628 = vmatpush1.bf16.msra.mxu1 %v17436_v58  ;;  %v1906_v38 = vld [vmem:[%s18208_s22 + $0x33b0] sm:$0xff] }
 0x5f5   : > { %14629 = vmatprep.subr.bf16.mxu1 %v17429_v47  ;;  %v2030_v50 = vld [vmem:[%s18208_s22 + $0x3790] sm:$0xff]  ;;  %v17405_v25 = vcombine.high %v1902_v2, %v1906_v38  ;;  %v17404_v47 = vcombine.low %v1902_v2, %v1906_v38 }
 0x5f6   : > { %14589 = vmatpush1.bf16.msra.mxu0 %v17300_v54  ;;  %v2034_v30 = vld [vmem:[%s18208_s22 + $0x37b0] sm:$0xff] }
 0x5f7   : > { %14590 = vmatprep.subr.bf16.mxu0 %v17293_v46  ;;  %v17533_v53 = vcombine.high %v2030_v50, %v2034_v30  ;;  %v1894_v59 = vld [vmem:[%s18208_s22 + $0x3350] sm:$0xff]  ;;  %v17532_v52 = vcombine.low %v2030_v50, %v2034_v30 }
 0x5f8   : > { %14630 = vmatpush1.bf16.msra.mxu1 %v17428_v49  ;;  %v1898_v7 = vld [vmem:[%s18208_s22 + $0x3370] sm:$0xff] }
 0x5f9   : > { %14631 = vmatprep.subr.bf16.mxu1 %v17421_v3  ;;  %v2022_v58 = vld [vmem:[%s18208_s22 + $0x3750] sm:$0xff]  ;;  %v17397_v18 = vcombine.high %v1894_v59, %v1898_v7  ;;  %v17396_v3 = vcombine.low %v1894_v59, %v1898_v7 }
 0x5fa   : > { %14591 = vmatpush1.bf16.msra.mxu0 %v17292_v5  ;;  %v2026_v4 = vld [vmem:[%s18208_s22 + $0x3770] sm:$0xff] }
 0x5fb   : > { %14592 = vmatprep.subr.bf16.mxu0 %v17413_v15  ;;  %v17525_v32 = vcombine.high %v2022_v58, %v2026_v4  ;;  %v1886_v19 = vld [vmem:[%s18208_s22 + $0x3310] sm:$0xff]  ;;  %v17524_v39 = vcombine.low %v2022_v58, %v2026_v4 }
 0x5fc   : > { %14632 = vmatpush1.bf16.msra.mxu1 %v17420_v37  ;;  %v1890_v54 = vld [vmem:[%s18208_s22 + $0x3330] sm:$0xff] }
 0x5fd   : > { %14633 = vmatprep.subr.bf16.mxu1 %v17541_v9  ;;  %v2014_v49 = vld [vmem:[%s18208_s22 + $0x3710] sm:$0xff]  ;;  %v17389_v16 = vcombine.high %v1886_v19, %v1890_v54  ;;  %v17388_v9 = vcombine.low %v1886_v19, %v1890_v54 }
 0x5fe   : > { %14593 = vmatpush2.bf16.msra.mxu0 %v17412_v34  ;;  %v2018_v46 = vld [vmem:[%s18208_s22 + $0x3730] sm:$0xff] }
 0x5ff   : > { %14594 = vmatprep.subr.bf16.mxu0 %v17405_v25  ;;  %v17517_v28 = vcombine.high %v2014_v49, %v2018_v46  ;;  %v1878_v21 = vld [vmem:[%s18208_s22 + $0x32d0] sm:$0xff]  ;;  %v17516_v2 = vcombine.low %v2014_v49, %v2018_v46 }
 0x600   : > { %14634 = vmatpush2.bf16.msra.mxu1 %v17540_v17  ;;  %v1882_v5 = vld [vmem:[%s18208_s22 + $0x32f0] sm:$0xff] }
 0x601   : > { %14635 = vmatprep.subr.bf16.mxu1 %v17533_v53  ;;  %v2006_v37 = vld [vmem:[%s18208_s22 + $0x36d0] sm:$0xff]  ;;  %v17381_v38 = vcombine.high %v1878_v21, %v1882_v5  ;;  %v17380_v53 = vcombine.low %v1878_v21, %v1882_v5 }
 0x602   : > { %14595 = vmatpush2.bf16.msra.mxu0 %v17404_v47  ;;  %v2010_v15 = vld [vmem:[%s18208_s22 + $0x36f0] sm:$0xff] }
 0x603   : > { %14596 = vmatprep.subr.bf16.mxu0 %v17397_v18  ;;  %v17509_v50 = vcombine.high %v2006_v37, %v2010_v15  ;;  %v1870_v30 = vld [vmem:[%s18208_s22 + $0x3290] sm:$0xff]  ;;  %v17508_v59 = vcombine.low %v2006_v37, %v2010_v15 }
 0x604   : > { %14636 = vmatpush2.bf16.msra.mxu1 %v17532_v52  ;;  %v1874_v34 = vld [vmem:[%s18208_s22 + $0x32b0] sm:$0xff] }
 0x605   : > { %14637 = vmatprep.subr.bf16.mxu1 %v17525_v32  ;;  %v1998_v17 = vld [vmem:[%s18208_s22 + $0x3690] sm:$0xff]  ;;  %v17373_v7 = vcombine.high %v1870_v30, %v1874_v34  ;;  %v17372_v32 = vcombine.low %v1870_v30, %v1874_v34 }
 0x606   : > { %14597 = vmatpush2.bf16.msra.mxu0 %v17396_v3  ;;  %v2002_v25 = vld [vmem:[%s18208_s22 + $0x36b0] sm:$0xff] }
 0x607   : > { %14598 = vmatprep.subr.bf16.mxu0 %v17389_v16  ;;  %v17501_v58 = vcombine.high %v1998_v17, %v2002_v25  ;;  %v1862_v4 = vld [vmem:[%s18208_s22 + $0x3250] sm:$0xff]  ;;  %v17500_v19 = vcombine.low %v1998_v17, %v2002_v25 }
 0x608   : > { %14638 = vmatpush2.bf16.msra.mxu1 %v17524_v39  ;;  %v1866_v47 = vld [vmem:[%s18208_s22 + $0x3270] sm:$0xff] }
 0x609   : > { %14639 = vmatprep.subr.bf16.mxu1 %v17517_v28  ;;  %v1990_v52 = vld [vmem:[%s18208_s22 + $0x3650] sm:$0xff]  ;;  %v17365_v54 = vcombine.high %v1862_v4, %v1866_v47  ;;  %v17364_v28 = vcombine.low %v1862_v4, %v1866_v47 }
 0x60a   : > { %14599 = vmatpush2.bf16.msra.mxu0 %v17388_v9  ;;  %v1994_v18 = vld [vmem:[%s18208_s22 + $0x3670] sm:$0xff] }
 0x60b   : > { %14600 = vmatprep.subr.bf16.mxu0 %v17381_v38  ;;  %v17493_v49 = vcombine.high %v1990_v52, %v1994_v18  ;;  %v1854_v46 = vld [vmem:[%s18208_s22 + $0x3210] sm:$0xff]  ;;  %v17492_v21 = vcombine.low %v1990_v52, %v1994_v18 }
 0x60c   : > { %14640 = vmatpush2.bf16.msra.mxu1 %v17516_v2  ;;  %v1858_v3 = vld [vmem:[%s18208_s22 + $0x3230] sm:$0xff] }
 0x60d   : > { %14641 = vmatprep.subr.bf16.mxu1 %v17509_v50  ;;  %v1982_v39 = vld [vmem:[%s18208_s22 + $0x3610] sm:$0xff]  ;;  %v17357_v5 = vcombine.high %v1854_v46, %v1858_v3  ;;  %v17356_v50 = vcombine.low %v1854_v46, %v1858_v3 }
 0x60e   : > { %14601 = vmatpush2.bf16.msra.mxu0 %v17380_v53  ;;  %v1986_v16 = vld [vmem:[%s18208_s22 + $0x3630] sm:$0xff] }
 0x60f   : > { %14602 = vmatprep.subr.bf16.mxu0 %v17373_v7  ;;  %v17485_v37 = vcombine.high %v1982_v39, %v1986_v16  ;;  %v2102_v15 = vld [vmem:[%s18208_s22 + $0x39d0] sm:$0xff]  ;;  %v17484_v30 = vcombine.low %v1982_v39, %v1986_v16 }
 0x610   : > { %14642 = vmatpush2.bf16.msra.mxu1 %v17508_v59  ;;  %v2106_v9 = vld [vmem:[%s18208_s22 + $0x39f0] sm:$0xff] }
 0x611   : > { %14643 = vmatprep.subr.bf16.mxu1 %v17501_v58  ;;  %v2230_v2 = vld [vmem:[%s18208_s22 + $0x3dd0] sm:$0xff]  ;;  %v17605_v34 = vcombine.high %v2102_v15, %v2106_v9  ;;  %v17604_v58 = vcombine.low %v2102_v15, %v2106_v9 }
 0x612   : > { %14603 = vmatpush2.bf16.msra.mxu0 %v17372_v32  ;;  %v2234_v38 = vld [vmem:[%s18208_s22 + $0x3df0] sm:$0xff] }
 0x613   : > { %14604 = vmatprep.subr.bf16.mxu0 %v17365_v54  ;;  %v17733_v17 = vcombine.high %v2230_v2, %v2234_v38  ;;  %v2094_v25 = vld [vmem:[%s18208_s22 + $0x3990] sm:$0xff]  ;;  %v17732_v4 = vcombine.low %v2230_v2, %v2234_v38 }
 0x614   : > { %14644 = vmatpush2.bf16.msra.mxu1 %v17500_v19  ;;  %v2098_v53 = vld [vmem:[%s18208_s22 + $0x39b0] sm:$0xff] }
 0x615   : > { %14645 = vmatprep.subr.bf16.mxu1 %v17493_v49  ;;  %v2222_v59 = vld [vmem:[%s18208_s22 + $0x3d90] sm:$0xff]  ;;  %v17597_v47 = vcombine.high %v2094_v25, %v2098_v53  ;;  %v17596_v39 = vcombine.low %v2094_v25, %v2098_v53 }
 0x616   : > { %14605 = vmatpush2.bf16.msra.mxu0 %v17364_v28  ;;  %v2226_v7 = vld [vmem:[%s18208_s22 + $0x3db0] sm:$0xff] }
 0x617   : > { %14606 = vmatprep.subr.bf16.mxu0 %v17357_v5  ;;  %v17725_v52 = vcombine.high %v2222_v59, %v2226_v7  ;;  %v2086_v18 = vld [vmem:[%s18208_s22 + $0x3950] sm:$0xff]  ;;  %v17724_v28 = vcombine.low %v2222_v59, %v2226_v7 }
 0x618   : > { %14646 = vmatpush2.bf16.msra.mxu1 %v17492_v21  ;;  %v2090_v32 = vld [vmem:[%s18208_s22 + $0x3970] sm:$0xff] }
 0x619   : > { %14647 = vmatprep.subr.bf16.mxu1 %v17485_v37  ;;  %v2214_v54 = vld [vmem:[%s18208_s22 + $0x3d50] sm:$0xff]  ;;  %v17589_v21 = vcombine.high %v2086_v18, %v2090_v32 }
 0x61a   : > { %14607 = vmatpush2.bf16.msra.mxu0 %v17356_v50  ;;  %v2218_v49 = vld [vmem:[%s18208_s22 + $0x3d70] sm:$0xff] }
 0x61b   : > { %14658 = vmatprep.subr.bf16.mxu0 %v17605_v34  ;;  %v2078_v9 = vld [vmem:[%s18208_s22 + $0x3910] sm:$0xff]  ;;  %v17716_v53 = vcombine.low %v2214_v54, %v2218_v49 }
 0x61c   : > { %14648 = vmatpush2.bf16.msra.mxu1 %v17484_v30  ;;  %v2082_v2 = vld [vmem:[%s18208_s22 + $0x3930] sm:$0xff] }
 0x61d   : > { %14699 = vmatprep.subr.bf16.mxu1 %v17733_v17  ;;  %v14364_v19 = vpop.f32.mrf.mxu0  ;;  %14609 = vmatmul.mubr.bf16.vlgmr.msra.gmra.mxu0 %v18884_v56  ;;  %v2206_v50 = vld [vmem:[%s18208_s22 + $0x3d10] sm:$0xff]  ;;  %v17581_v59 = vcombine.high %v2078_v9, %v2082_v2 }
 0x61e   : > { %v14365_v46 = vadd.f32 %v14364_v19, %v20034_v63  ;;  %14659 = vmatpush1.bf16.msra.mxu0 %v17604_v58  ;;  %v17717_v63 = vcombine.high %v2214_v54, %v2218_v49  ;;  %14690 = vmatprep.mubr.bf16.mxu0 %v18891_v8  ;;  %v2210_v30 = vld [vmem:[%s18208_s22 + $0x3d30] sm:$0xff] }
 0x61f   : > { %v14405_v3 = vpop.f32.mrf.mxu1  ;;  %14650 = vmatmul.mubr.bf16.vlgmr.msra.gmra.mxu1 %v18895_v60  ;;  %v14366_v16 = vpop.f32.mrf.mxu0  ;;  %14660 = vmatprep.subr.bf16.mxu0 %v17597_v47  ;;  %v17709_v58 = vcombine.high %v2206_v50, %v2210_v30  ;;  %v2074_v47 = vld [vmem:[%s18208_s22 + $0x38f0] sm:$0xff] }
 0x620   : > { %14700 = vmatpush1.bf16.msra.mxu1 %v17732_v4  ;;  %v20108_v5 = vadd.f32 %v14405_v3, %v14365_v46  ;;  %v14367_v37 = vadd.f32 %v14366_v16, %v20043_v13  ;;  %14731 = vmatprep.mubr.bf16.mxu1 %v18904_v27  ;;  %v17588_v13 = vcombine.low %v2086_v18, %v2090_v32  ;;  %v2070_v4 = vld [vmem:[%s18208_s22 + $0x38d0] sm:$0xff] }
 0x621   : > { %v14407_v15 = vpop.f32.mrf.mxu1  ;;  %14701 = vmatprep.subr.bf16.mxu1 %v17725_v52  ;;  %v14368_v38 = vpop.f32.mrf.mxu0  ;;  %v2198_v52 = vld [vmem:[%s18208_s22 + $0x3cd0] sm:$0xff]  ;;  %v17580_v46 = vcombine.low %v2078_v9, %v2082_v2  ;;  %v17708_v18 = vcombine.low %v2206_v50, %v2210_v30  ;;  %v17573_v32 = vcombine.high %v2070_v4, %v2074_v47 }
 0x622   : > { %v20117_v34 = vadd.f32 %v14407_v15, %v14367_v37  ;;  %14661 = vmatpush1.bf16.msra.mxu0 %v17596_v39  ;;  %v2202_v19 = vld [vmem:[%s18208_s22 + $0x3cf0] sm:$0xff] }
 0x623   : > { %v14409_v17 = vpop.f32.mrf.mxu1  ;;  %v14369_v25 = vpop.f32.mrf.mxu0  ;;  %14662 = vmatprep.subr.bf16.mxu0 %v17589_v21  ;;  %v17701_v54 = vcombine.high %v2198_v52, %v2202_v19  ;;  %v2062_v49 = vld [vmem:[%s18208_s22 + $0x3890] sm:$0xff]  ;;  %v17700_v21 = vcombine.low %v2198_v52, %v2202_v19 }
 0x624   : > { %14702 = vmatpush1.bf16.msra.mxu1 %v17724_v28  ;;  %v2066_v3 = vld [vmem:[%s18208_s22 + $0x38b0] sm:$0xff]  ;;  %v17572_v28 = vcombine.low %v2070_v4, %v2074_v47 }
 0x625   : > { %v14410_v7 = vpop.f32.mrf.mxu1  ;;  %14703 = vmatprep.subr.bf16.mxu1 %v17717_v63  ;;  %v2190_v39 = vld [vmem:[%s18208_s22 + $0x3c90] sm:$0xff]  ;;  %v17565_v37 = vcombine.high %v2062_v49, %v2066_v3  ;;  %v17564_v50 = vcombine.low %v2062_v49, %v2066_v3 }
 0x626   : > { %14663 = vmatpush1.bf16.msra.mxu0 %v17588_v13  ;;  %v2194_v16 = vld [vmem:[%s18208_s22 + $0x3cb0] sm:$0xff] }
 0x627   : > { %14664 = vmatprep.subr.bf16.mxu0 %v17581_v59  ;;  %v17693_v15 = vcombine.high %v2190_v39, %v2194_v16  ;;  %v2054_v63 = vld [vmem:[%s18208_s22 + $0x3850] sm:$0xff]  ;;  %v17692_v30 = vcombine.low %v2190_v39, %v2194_v16 }
 0x628   : > { %14704 = vmatpush1.bf16.msra.mxu1 %v17716_v53  ;;  %v2058_v9 = vld [vmem:[%s18208_s22 + $0x3870] sm:$0xff] }
 0x629   : > { %14705 = vmatprep.subr.bf16.mxu1 %v17709_v58  ;;  %v2182_v2 = vld [vmem:[%s18208_s22 + $0x3c50] sm:$0xff]  ;;  %v17557_v17 = vcombine.high %v2054_v63, %v2058_v9  ;;  %v17556_v58 = vcombine.low %v2054_v63, %v2058_v9 }
 0x62a   : > { %14665 = vmatpush1.bf16.msra.mxu0 %v17580_v46  ;;  %v2186_v38 = vld [vmem:[%s18208_s22 + $0x3c70] sm:$0xff] }
 0x62b   : > { %14666 = vmatprep.subr.bf16.mxu0 %v17573_v32  ;;  %v17685_v13 = vcombine.high %v2182_v2, %v2186_v38  ;;  %v2046_v25 = vld [vmem:[%s18208_s22 + $0x3810] sm:$0xff]  ;;  %v17684_v4 = vcombine.low %v2182_v2, %v2186_v38 }
 0x62c   : > { %14706 = vmatpush1.bf16.msra.mxu1 %v17708_v18  ;;  %v2050_v53 = vld [vmem:[%s18208_s22 + $0x3830] sm:$0xff] }
 0x62d   : > { %14707 = vmatprep.subr.bf16.mxu1 %v17701_v54  ;;  %v2174_v59 = vld [vmem:[%s18208_s22 + $0x3c10] sm:$0xff]  ;;  %v17549_v47 = vcombine.high %v2046_v25, %v2050_v53  ;;  %v17548_v54 = vcombine.low %v2046_v25, %v2050_v53 }
 0x62e   : > { %14667 = vmatpush1.bf16.msra.mxu0 %v17572_v28  ;;  %v2178_v7 = vld [vmem:[%s18208_s22 + $0x3c30] sm:$0xff] }
 0x62f   : > { %14668 = vmatprep.subr.bf16.mxu0 %v17565_v37  ;;  %v17677_v52 = vcombine.high %v2174_v59, %v2178_v7  ;;  %v2166_v19 = vld [vmem:[%s18208_s22 + $0x3bd0] sm:$0xff]  ;;  %v17676_v49 = vcombine.low %v2174_v59, %v2178_v7 }
 0x630   : > { %14708 = vmatpush1.bf16.msra.mxu1 %v17700_v21  ;;  %v2170_v46 = vld [vmem:[%s18208_s22 + $0x3bf0] sm:$0xff] }
 0x631   : > { %14709 = vmatprep.subr.bf16.mxu1 %v17693_v15  ;;  %v2294_v18 = vld [vmem:[%s18208_s22 + $0x3fd0] sm:$0xff]  ;;  %v17669_v3 = vcombine.high %v2166_v19, %v2170_v46  ;;  %v17668_v15 = vcombine.low %v2166_v19, %v2170_v46 }
 0x632   : > { %14669 = vmatpush1.bf16.msra.mxu0 %v17564_v50  ;;  %v2298_v32 = vld [vmem:[%s18208_s22 + $0x3ff0] sm:$0xff] }
 0x633   : > { %14670 = vmatprep.subr.bf16.mxu0 %v17557_v17  ;;  %v17797_v39 = vcombine.high %v2294_v18, %v2298_v32  ;;  %v2158_v16 = vld [vmem:[%s18208_s22 + $0x3b90] sm:$0xff]  ;;  %v17796_v63 = vcombine.low %v2294_v18, %v2298_v32 }
 0x634   : > { %14710 = vmatpush1.bf16.msra.mxu1 %v17692_v30  ;;  %v2162_v28 = vld [vmem:[%s18208_s22 + $0x3bb0] sm:$0xff] }
 0x635   : > { %14711 = vmatprep.subr.bf16.mxu1 %v17685_v13  ;;  %v2286_v21 = vld [vmem:[%s18208_s22 + $0x3f90] sm:$0xff]  ;;  %v17661_v9 = vcombine.high %v2158_v16, %v2162_v28  ;;  %v17660_v13 = vcombine.low %v2158_v16, %v2162_v28 }
 0x636   : > { %14671 = vmatpush1.bf16.msra.mxu0 %v17556_v58  ;;  %v2290_v37 = vld [vmem:[%s18208_s22 + $0x3fb0] sm:$0xff] }
 0x637   : > { %14672 = vmatprep.subr.bf16.mxu0 %v17549_v47  ;;  %v17789_v2 = vcombine.high %v2286_v21, %v2290_v37  ;;  %v2150_v38 = vld [vmem:[%s18208_s22 + $0x3b50] sm:$0xff]  ;;  %v17788_v25 = vcombine.low %v2286_v21, %v2290_v37 }
 0x638   : > { %14712 = vmatpush1.bf16.msra.mxu1 %v17684_v4  ;;  %v2154_v50 = vld [vmem:[%s18208_s22 + $0x3b70] sm:$0xff] }
 0x639   : > { %14713 = vmatprep.subr.bf16.mxu1 %v17677_v52  ;;  %v2278_v30 = vld [vmem:[%s18208_s22 + $0x3f50] sm:$0xff]  ;;  %v17653_v53 = vcombine.high %v2150_v38, %v2154_v50  ;;  %v17652_v52 = vcombine.low %v2150_v38, %v2154_v50 }
 0x63a   : > { %14673 = vmatpush1.bf16.msra.mxu0 %v17548_v54  ;;  %v2282_v17 = vld [vmem:[%s18208_s22 + $0x3f70] sm:$0xff] }
 0x63b   : > { %14674 = vmatprep.subr.bf16.mxu0 %v17669_v3  ;;  %v17781_v59 = vcombine.high %v2278_v30, %v2282_v17  ;;  %v2142_v7 = vld [vmem:[%s18208_s22 + $0x3b10] sm:$0xff]  ;;  %v17780_v19 = vcombine.low %v2278_v30, %v2282_v17 }
 0x63c   : > { %14714 = vmatpush1.bf16.msra.mxu1 %v17676_v49  ;;  %v2146_v58 = vld [vmem:[%s18208_s22 + $0x3b30] sm:$0xff] }
 0x63d   : > { %14715 = vmatprep.subr.bf16.mxu1 %v17797_v39  ;;  %v2270_v4 = vld [vmem:[%s18208_s22 + $0x3f10] sm:$0xff]  ;;  %v17645_v46 = vcombine.high %v2142_v7, %v2146_v58  ;;  %v17644_v39 = vcombine.low %v2142_v7, %v2146_v58 }
 0x63e   : > { %14675 = vmatpush2.bf16.msra.mxu0 %v17668_v15  ;;  %v2274_v47 = vld [vmem:[%s18208_s22 + $0x3f30] sm:$0xff] }
 0x63f   : > { %14676 = vmatprep.subr.bf16.mxu0 %v17661_v9  ;;  %v17773_v18 = vcombine.high %v2270_v4, %v2274_v47  ;;  %v2134_v32 = vld [vmem:[%s18208_s22 + $0x3ad0] sm:$0xff]  ;;  %v17772_v16 = vcombine.low %v2270_v4, %v2274_v47 }
 0x640   : > { %14716 = vmatpush2.bf16.msra.mxu1 %v17796_v63  ;;  %v2138_v54 = vld [vmem:[%s18208_s22 + $0x3af0] sm:$0xff] }
 0x641   : > { %14717 = vmatprep.subr.bf16.mxu1 %v17789_v2  ;;  %v2262_v49 = vld [vmem:[%s18208_s22 + $0x3ed0] sm:$0xff]  ;;  %v17637_v28 = vcombine.high %v2134_v32, %v2138_v54  ;;  %v17636_v2 = vcombine.low %v2134_v32, %v2138_v54 }
 0x642   : > { %14677 = vmatpush2.bf16.msra.mxu0 %v17660_v13  ;;  %v2266_v3 = vld [vmem:[%s18208_s22 + $0x3ef0] sm:$0xff] }
 0x643   : > { %14678 = vmatprep.subr.bf16.mxu0 %v17653_v53  ;;  %v17765_v21 = vcombine.high %v2262_v49, %v2266_v3  ;;  %v2126_v37 = vld [vmem:[%s18208_s22 + $0x3a90] sm:$0xff]  ;;  %v17764_v38 = vcombine.low %v2262_v49, %v2266_v3  ;;  %v311_v3 = vld [vmem:[%s18208_s22 + $0x1d8] sm:$0xff] }
 0x644   : > { %14718 = vmatpush2.bf16.msra.mxu1 %v17788_v25  ;;  %v2130_v15 = vld [vmem:[%s18208_s22 + $0x3ab0] sm:$0xff] }
 0x645   : > { %14719 = vmatprep.subr.bf16.mxu1 %v17781_v59  ;;  %v2254_v63 = vld [vmem:[%s18208_s22 + $0x3e90] sm:$0xff]  ;;  %v17629_v50 = vcombine.high %v2126_v37, %v2130_v15  ;;  %v17628_v59 = vcombine.low %v2126_v37, %v2130_v15 }
 0x646   : > { %14679 = vmatpush2.bf16.msra.mxu0 %v17652_v52  ;;  %v2258_v9 = vld [vmem:[%s18208_s22 + $0x3eb0] sm:$0xff] }
 0x647   : > { %14680 = vmatprep.subr.bf16.mxu0 %v17645_v46  ;;  %v17757_v30 = vcombine.high %v2254_v63, %v2258_v9  ;;  %v2118_v17 = vld [vmem:[%s18208_s22 + $0x3a50] sm:$0xff]  ;;  %v17756_v7 = vcombine.low %v2254_v63, %v2258_v9  ;;  %v303_v9 = vld [vmem:[%s18208_s22 + $0x198] sm:$0xff] }
 0x648   : > { %14720 = vmatpush2.bf16.msra.mxu1 %v17780_v19  ;;  %v2122_v13 = vld [vmem:[%s18208_s22 + $0x3a70] sm:$0xff] }
 0x649   : > { %14721 = vmatprep.subr.bf16.mxu1 %v17773_v18  ;;  %v2246_v25 = vld [vmem:[%s18208_s22 + $0x3e50] sm:$0xff]  ;;  %v17621_v58 = vcombine.high %v2118_v17, %v2122_v13  ;;  %v17620_v18 = vcombine.low %v2118_v17, %v2122_v13 }
 0x64a   : > { %14681 = vmatpush2.bf16.msra.mxu0 %v17644_v39  ;;  %v2250_v53 = vld [vmem:[%s18208_s22 + $0x3e70] sm:$0xff]  ;;  %v315_v39 = vld [vmem:[%s18208_s22 + $0x1f8] sm:$0xff] }
 0x64b   : > { %14682 = vmatprep.subr.bf16.mxu0 %v17637_v28  ;;  %v17749_v4 = vcombine.high %v2246_v25, %v2250_v53  ;;  %v2110_v47 = vld [vmem:[%s18208_s22 + $0x3a10] sm:$0xff]  ;;  %v17748_v32 = vcombine.low %v2246_v25, %v2250_v53  ;;  %v443_v28 = vld [vmem:[%s18208_s22 + $0x5f8] sm:$0xff]  ;;  %v15815_v15 = vcombine.high %v311_v3, %v315_v39 }
 0x64c   : > { %14722 = vmatpush2.bf16.msra.mxu1 %v17772_v16  ;;  %v2114_v52 = vld [vmem:[%s18208_s22 + $0x3a30] sm:$0xff]  ;;  %v439_v16 = vld [vmem:[%s18208_s22 + $0x5d8] sm:$0xff] }
 0x64d   : > { %14723 = vmatprep.subr.bf16.mxu1 %v17765_v21  ;;  %v2238_v19 = vld [vmem:[%s18208_s22 + $0x3e10] sm:$0xff]  ;;  %v17613_v54 = vcombine.high %v2110_v47, %v2114_v52  ;;  %v17612_v21 = vcombine.low %v2110_v47, %v2114_v52  ;;  %v15943_v63 = vcombine.high %v439_v16, %v443_v28  ;;  %v15942_v17 = vcombine.low %v439_v16, %v443_v28  ;;  %v295_v53 = vld [vmem:[%s18208_s22 + $0x158] sm:$0xff] }
 0x64e   : > { %14683 = vmatpush2.bf16.msra.mxu0 %v17636_v2  ;;  %v2242_v46 = vld [vmem:[%s18208_s22 + $0x3e30] sm:$0xff]  ;;  %v307_v2 = vld [vmem:[%s18208_s22 + $0x1b8] sm:$0xff] }
 0x64f   : > { %14684 = vmatprep.subr.bf16.mxu0 %v17629_v50  ;;  %v17741_v49 = vcombine.high %v2238_v19, %v2242_v46  ;;  %v17740_v37 = vcombine.low %v2238_v19, %v2242_v46  ;;  %v435_v50 = vld [vmem:[%s18208_s22 + $0x5b8] sm:$0xff]  ;;  %v15807_v13 = vcombine.high %v303_v9, %v307_v2  ;;  %v15806_v19 = vcombine.low %v303_v9, %v307_v2 }
 0x650   : > { %14724 = vmatpush2.bf16.msra.mxu1 %v17764_v38  ;;  %v431_v38 = vld [vmem:[%s18208_s22 + $0x598] sm:$0xff] }
 0x651   : > { %14725 = vmatprep.subr.bf16.mxu1 %v17757_v30  ;;  %v15814_v30 = vcombine.low %v311_v3, %v315_v39  ;;  %v15935_v25 = vcombine.high %v431_v38, %v435_v50  ;;  %v287_v39 = vld [vmem:[%s18208_s22 + $0x118] sm:$0xff] }
 0x652   : > { %14685 = vmatpush2.bf16.msra.mxu0 %v17628_v59  ;;  %v299_v59 = vld [vmem:[%s18208_s22 + $0x178] sm:$0xff] }
 0x653   : > { %14686 = vmatprep.subr.bf16.mxu0 %v17621_v58  ;;  %v423_v58 = vld [vmem:[%s18208_s22 + $0x558] sm:$0xff] }
 0x654   : > { %14726 = vmatpush2.bf16.msra.mxu1 %v17756_v7  ;;  %v291_v16 = vld [vmem:[%s18208_s22 + $0x138] sm:$0xff] }
 0x655   : > { %14727 = vmatprep.subr.bf16.mxu1 %v17749_v4  ;;  %v427_v4 = vld [vmem:[%s18208_s22 + $0x578] sm:$0xff] }
 0x656   : > { %14687 = vmatpush2.bf16.msra.mxu0 %v17620_v18  ;;  %v15934_v18 = vcombine.low %v431_v38, %v435_v50  ;;  %v15926_v2 = vcombine.low %v423_v58, %v427_v4  ;;  %v15791_v38 = vcombine.high %v287_v39, %v291_v16 }
 0x657   : > { %14688 = vmatprep.subr.bf16.mxu0 %v17613_v54 }
 0x658   : > { %14728 = vmatpush2.bf16.msra.mxu1 %v17748_v32  ;;  %v15799_v32 = vcombine.high %v295_v53, %v299_v59 }
 0x659   : > { %14729 = vmatprep.subr.bf16.mxu1 %v17741_v49 }
 0x65a   : > { %14689 = vmatpush2.bf16.msra.mxu0 %v17612_v21  ;;  %v415_v21 = vld [vmem:[%s18208_s22 + $0x518] sm:$0xff] }
 0x65b   : > { %14740 = vmatprep.subr.bf16.mxu0 %v15815_v15 }
 0x65c   : > { %14730 = vmatpush2.bf16.msra.mxu1 %v17740_v37  ;;  %v419_v37 = vld [vmem:[%s18208_s22 + $0x538] sm:$0xff] }
 0x65d   : > { %14781 = vmatprep.subr.bf16.mxu1 %v15943_v63  ;;  %v14446_v7 = vpop.f32.mrf.mxu0  ;;  %14691 = vmatmul.mubr.bf16.vlgmr.msra.gmra.mxu0 %v18973_v42  ;;  %v15919_v50 = vcombine.high %v415_v21, %v419_v37 }
 0x65e   : > { %v14447_v47 = vadd.f32 %v14446_v7, %v20108_v5  ;;  %14741 = vmatpush1.bf16.msra.mxu0 %v15814_v30  ;;  %v15927_v5 = vcombine.high %v423_v58, %v427_v4  ;;  %14772 = vmatprep.mubr.bf16.mxu0 %v18271_v10  ;;  %v279_v30 = vld [vmem:[%s18208_s22 + $0xd8] sm:$0xff] }
 0x65f   : > { %v14487_v52 = vpop.f32.mrf.mxu1  ;;  %14732 = vmatmul.mubr.bf16.vlgmr.msra.gmra.mxu1 %v18981_v62  ;;  %v14448_v46 = vpop.f32.mrf.mxu0  ;;  %14742 = vmatprep.subr.bf16.mxu0 %v15807_v13  ;;  %v411_v13 = vld [vmem:[%s18208_s22 + $0x4f8] sm:$0xff] }
 0x660   : > { %14782 = vmatpush1.bf16.msra.mxu1 %v15942_v17  ;;  %v20182_v54 = vadd.f32 %v14487_v52, %v14447_v47  ;;  %v14449_v49 = vadd.f32 %v14448_v46, %v20117_v34  ;;  %14813 = vmatprep.mubr.bf16.mxu1 %v18278_v14  ;;  %v15798_v34 = vcombine.low %v295_v53, %v299_v59  ;;  %v283_v14 = vld [vmem:[%s18208_s22 + $0xf8] sm:$0xff] }
 0x661   : > { %v14489_v3 = vpop.f32.mrf.mxu1  ;;  %14783 = vmatprep.subr.bf16.mxu1 %v15935_v25  ;;  %v14450_v28 = vpop.f32.mrf.mxu0  ;;  %v407_v17 = vld [vmem:[%s18208_s22 + $0x4d8] sm:$0xff]  ;;  %v15790_v25 = vcombine.low %v287_v39, %v291_v16  ;;  %v15918_v53 = vcombine.low %v415_v21, %v419_v37  ;;  %v15783_v59 = vcombine.high %v279_v30, %v283_v14 }
 0x662   : > { %v20191_v15 = vadd.f32 %v14489_v3, %v14449_v49  ;;  %14743 = vmatpush1.bf16.msra.mxu0 %v15806_v19  ;;  %v15911_v7 = vcombine.high %v407_v17, %v411_v13  ;;  %v271_v58 = vld [vmem:[%s18208_s22 + $0x98] sm:$0xff]  ;;  %v15782_v19 = vcombine.low %v279_v30, %v283_v14  ;;  %v15910_v46 = vcombine.low %v407_v17, %v411_v13 }
 0x663   : > { %v14491_v63 = vpop.f32.mrf.mxu1  ;;  %v14451_v9 = vpop.f32.mrf.mxu0  ;;  %14744 = vmatprep.subr.bf16.mxu0 %v15799_v32  ;;  %v275_v4 = vld [vmem:[%s18208_s22 + $0xb8] sm:$0xff] }
 0x664   : > { %14784 = vmatpush1.bf16.msra.mxu1 %v15934_v18  ;;  %v399_v47 = vld [vmem:[%s18208_s22 + $0x498] sm:$0xff]  ;;  %v15775_v18 = vcombine.high %v271_v58, %v275_v4  ;;  %v15774_v16 = vcombine.low %v271_v58, %v275_v4 }
 0x665   : > { %v14492_v10 = vpop.f32.mrf.mxu1  ;;  %14785 = vmatprep.subr.bf16.mxu1 %v15927_v5  ;;  %v403_v52 = vld [vmem:[%s18208_s22 + $0x4b8] sm:$0xff] }
 0x666   : > { %14745 = vmatpush1.bf16.msra.mxu0 %v15798_v34  ;;  %v15903_v32 = vcombine.high %v399_v47, %v403_v52  ;;  %v263_v49 = vld [vmem:[%s18208_s22 + $0x58] sm:$0xff]  ;;  %v15902_v28 = vcombine.low %v399_v47, %v403_v52 }
 0x667   : > { %14746 = vmatprep.subr.bf16.mxu0 %v15791_v38  ;;  %v267_v3 = vld [vmem:[%s18208_s22 + $0x78] sm:$0xff] }
 0x668   : > { %14786 = vmatpush1.bf16.msra.mxu1 %v15926_v2  ;;  %v391_v5 = vld [vmem:[%s18208_s22 + $0x458] sm:$0xff]  ;;  %v15767_v21 = vcombine.high %v263_v49, %v267_v3  ;;  %v15766_v38 = vcombine.low %v263_v49, %v267_v3 }
 0x669   : > { %14787 = vmatprep.subr.bf16.mxu1 %v15919_v50  ;;  %v395_v39 = vld [vmem:[%s18208_s22 + $0x478] sm:$0xff] }
 0x66a   : > { %14747 = vmatpush1.bf16.msra.mxu0 %v15790_v25  ;;  %v15895_v37 = vcombine.high %v391_v5, %v395_v39  ;;  %v255_v63 = vld [vmem:[%s18208_s22 + $0x18] sm:$0xff]  ;;  %v15894_v10 = vcombine.low %v391_v5, %v395_v39 }
 0x66b   : > { %14748 = vmatprep.subr.bf16.mxu0 %v15783_v59  ;;  %v259_v34 = vld [vmem:[%s18208_s22 + $0x38] sm:$0xff] }
 0x66c   : > { %14788 = vmatpush1.bf16.msra.mxu1 %v15918_v53  ;;  %v383_v9 = vld [vmem:[%s18208_s22 + $0x418] sm:$0xff]  ;;  %v15759_v50 = vcombine.high %v255_v63, %v259_v34  ;;  %v15758_v53 = vcombine.low %v255_v63, %v259_v34 }
 0x66d   : > { %14789 = vmatprep.subr.bf16.mxu1 %v15911_v7  ;;  %v387_v2 = vld [vmem:[%s18208_s22 + $0x438] sm:$0xff] }
 0x66e   : > { %14749 = vmatpush1.bf16.msra.mxu0 %v15782_v19  ;;  %v15887_v30 = vcombine.high %v383_v9, %v387_v2  ;;  %v375_v14 = vld [vmem:[%s18208_s22 + $0x3d8] sm:$0xff]  ;;  %v15886_v59 = vcombine.low %v383_v9, %v387_v2 }
 0x66f   : > { %14750 = vmatprep.subr.bf16.mxu0 %v15775_v18  ;;  %v379_v17 = vld [vmem:[%s18208_s22 + $0x3f8] sm:$0xff] }
 0x670   : > { %14790 = vmatpush1.bf16.msra.mxu1 %v15910_v46  ;;  %v503_v13 = vld [vmem:[%s18208_s22 + $0x7d8] sm:$0xff]  ;;  %v15879_v7 = vcombine.high %v375_v14, %v379_v17  ;;  %v15878_v46 = vcombine.low %v375_v14, %v379_v17 }
 0x671   : > { %14791 = vmatprep.subr.bf16.mxu1 %v15903_v32  ;;  %v507_v25 = vld [vmem:[%s18208_s22 + $0x7f8] sm:$0xff] }
 0x672   : > { %14751 = vmatpush1.bf16.msra.mxu0 %v15774_v16  ;;  %v16007_v58 = vcombine.high %v503_v13, %v507_v25  ;;  %v367_v4 = vld [vmem:[%s18208_s22 + $0x398] sm:$0xff]  ;;  %v16006_v18 = vcombine.low %v503_v13, %v507_v25 }
 0x673   : > { %14752 = vmatprep.subr.bf16.mxu0 %v15767_v21  ;;  %v371_v47 = vld [vmem:[%s18208_s22 + $0x3b8] sm:$0xff] }
 0x674   : > { %14792 = vmatpush1.bf16.msra.mxu1 %v15902_v28  ;;  %v495_v52 = vld [vmem:[%s18208_s22 + $0x798] sm:$0xff]  ;;  %v15871_v32 = vcombine.high %v367_v4, %v371_v47  ;;  %v15870_v28 = vcombine.low %v367_v4, %v371_v47 }
 0x675   : > { %14793 = vmatprep.subr.bf16.mxu1 %v15895_v37  ;;  %v499_v19 = vld [vmem:[%s18208_s22 + $0x7b8] sm:$0xff] }
 0x676   : > { %14753 = vmatpush1.bf16.msra.mxu0 %v15766_v38  ;;  %v15999_v49 = vcombine.high %v495_v52, %v499_v19  ;;  %v359_v3 = vld [vmem:[%s18208_s22 + $0x358] sm:$0xff]  ;;  %v15998_v21 = vcombine.low %v495_v52, %v499_v19 }
 0x677   : > { %14754 = vmatprep.subr.bf16.mxu0 %v15759_v50  ;;  %v363_v5 = vld [vmem:[%s18208_s22 + $0x378] sm:$0xff] }
 0x678   : > { %14794 = vmatpush1.bf16.msra.mxu1 %v15894_v10  ;;  %v487_v39 = vld [vmem:[%s18208_s22 + $0x758] sm:$0xff]  ;;  %v15863_v37 = vcombine.high %v359_v3, %v363_v5  ;;  %v15862_v10 = vcombine.low %v359_v3, %v363_v5 }
 0x679   : > { %14795 = vmatprep.subr.bf16.mxu1 %v15887_v30  ;;  %v491_v16 = vld [vmem:[%s18208_s22 + $0x778] sm:$0xff] }
 0x67a   : > { %14755 = vmatpush1.bf16.msra.mxu0 %v15758_v53  ;;  %v15991_v63 = vcombine.high %v487_v39, %v491_v16  ;;  %v351_v34 = vld [vmem:[%s18208_s22 + $0x318] sm:$0xff]  ;;  %v15990_v50 = vcombine.low %v487_v39, %v491_v16 }
 0x67b   : > { %14756 = vmatprep.subr.bf16.mxu0 %v15879_v7  ;;  %v355_v9 = vld [vmem:[%s18208_s22 + $0x338] sm:$0xff] }
 0x67c   : > { %14796 = vmatpush1.bf16.msra.mxu1 %v15886_v59  ;;  %v479_v2 = vld [vmem:[%s18208_s22 + $0x718] sm:$0xff]  ;;  %v15855_v30 = vcombine.high %v351_v34, %v355_v9  ;;  %v15854_v59 = vcombine.low %v351_v34, %v355_v9 }
 0x67d   : > { %14797 = vmatprep.subr.bf16.mxu1 %v16007_v58  ;;  %v483_v38 = vld [vmem:[%s18208_s22 + $0x738] sm:$0xff] }
 0x67e   : > { %14757 = vmatpush2.bf16.msra.mxu0 %v15878_v46  ;;  %v15983_v14 = vcombine.high %v479_v2, %v483_v38  ;;  %v343_v17 = vld [vmem:[%s18208_s22 + $0x2d8] sm:$0xff]  ;;  %v15982_v7 = vcombine.low %v479_v2, %v483_v38 }
 0x67f   : > { %14758 = vmatprep.subr.bf16.mxu0 %v15871_v32  ;;  %v347_v13 = vld [vmem:[%s18208_s22 + $0x2f8] sm:$0xff] }
 0x680   : > { %14798 = vmatpush2.bf16.msra.mxu1 %v16006_v18  ;;  %v471_v25 = vld [vmem:[%s18208_s22 + $0x6d8] sm:$0xff]  ;;  %v15847_v58 = vcombine.high %v343_v17, %v347_v13  ;;  %v15846_v18 = vcombine.low %v343_v17, %v347_v13 }
 0x681   : > { %14799 = vmatprep.subr.bf16.mxu1 %v15999_v49  ;;  %v475_v53 = vld [vmem:[%s18208_s22 + $0x6f8] sm:$0xff] }
 0x682   : > { %14759 = vmatpush2.bf16.msra.mxu0 %v15870_v28  ;;  %v15975_v4 = vcombine.high %v471_v25, %v475_v53  ;;  %v335_v47 = vld [vmem:[%s18208_s22 + $0x298] sm:$0xff]  ;;  %v15974_v32 = vcombine.low %v471_v25, %v475_v53 }
 0x683   : > { %14760 = vmatprep.subr.bf16.mxu0 %v15863_v37  ;;  %v339_v52 = vld [vmem:[%s18208_s22 + $0x2b8] sm:$0xff] }
 0x684   : > { %14800 = vmatpush2.bf16.msra.mxu1 %v15998_v21  ;;  %v463_v19 = vld [vmem:[%s18208_s22 + $0x698] sm:$0xff]  ;;  %v15839_v49 = vcombine.high %v335_v47, %v339_v52  ;;  %v15838_v21 = vcombine.low %v335_v47, %v339_v52 }
 0x685   : > { %14801 = vmatprep.subr.bf16.mxu1 %v15991_v63  ;;  %v467_v46 = vld [vmem:[%s18208_s22 + $0x6b8] sm:$0xff] }
 0x686   : > { %14761 = vmatpush2.bf16.msra.mxu0 %v15862_v10  ;;  %v15967_v3 = vcombine.high %v463_v19, %v467_v46  ;;  %v327_v5 = vld [vmem:[%s18208_s22 + $0x258] sm:$0xff]  ;;  %v15966_v37 = vcombine.low %v463_v19, %v467_v46 }
 0x687   : > { %14762 = vmatprep.subr.bf16.mxu0 %v15855_v30  ;;  %v331_v39 = vld [vmem:[%s18208_s22 + $0x278] sm:$0xff] }
 0x688   : > { %14802 = vmatpush2.bf16.msra.mxu1 %v15990_v50  ;;  %v455_v16 = vld [vmem:[%s18208_s22 + $0x658] sm:$0xff]  ;;  %v15831_v63 = vcombine.high %v327_v5, %v331_v39  ;;  %v15830_v50 = vcombine.low %v327_v5, %v331_v39 }
 0x689   : > { %14803 = vmatprep.subr.bf16.mxu1 %v15983_v14  ;;  %v459_v28 = vld [vmem:[%s18208_s22 + $0x678] sm:$0xff] }
 0x68a   : > { %14763 = vmatpush2.bf16.msra.mxu0 %v15854_v59  ;;  %v15959_v34 = vcombine.high %v455_v16, %v459_v28  ;;  %v319_v9 = vld [vmem:[%s18208_s22 + $0x218] sm:$0xff]  ;;  %v15958_v30 = vcombine.low %v455_v16, %v459_v28 }
 0x68b   : > { %14764 = vmatprep.subr.bf16.mxu0 %v15847_v58  ;;  %v323_v2 = vld [vmem:[%s18208_s22 + $0x238] sm:$0xff] }
 0x68c   : > { %14804 = vmatpush2.bf16.msra.mxu1 %v15982_v7  ;;  %v447_v38 = vld [vmem:[%s18208_s22 + $0x618] sm:$0xff]  ;;  %v15823_v14 = vcombine.high %v319_v9, %v323_v2  ;;  %v15822_v7 = vcombine.low %v319_v9, %v323_v2 }
 0x68d   : > { %14805 = vmatprep.subr.bf16.mxu1 %v15975_v4  ;;  %v451_v10 = vld [vmem:[%s18208_s22 + $0x638] sm:$0xff] }
 0x68e   : > { %14765 = vmatpush2.bf16.msra.mxu0 %v15846_v18  ;;  %v15951_v17 = vcombine.high %v447_v38, %v451_v10  ;;  %v567_v13 = vld [vmem:[%s18208_s22 + $0x9d8] sm:$0xff]  ;;  %v15950_v58 = vcombine.low %v447_v38, %v451_v10 }
 0x68f   : > { %14766 = vmatprep.subr.bf16.mxu0 %v15839_v49  ;;  %v571_v25 = vld [vmem:[%s18208_s22 + $0x9f8] sm:$0xff] }
 0x690   : > { %14806 = vmatpush2.bf16.msra.mxu1 %v15974_v32  ;;  %v695_v53 = vld [vmem:[%s18208_s22 + $0xdd8] sm:$0xff]  ;;  %v16071_v4 = vcombine.high %v567_v13, %v571_v25  ;;  %v16070_v32 = vcombine.low %v567_v13, %v571_v25 }
 0x691   : > { %14807 = vmatprep.subr.bf16.mxu1 %v15967_v3  ;;  %v699_v59 = vld [vmem:[%s18208_s22 + $0xdf8] sm:$0xff] }
 0x692   : > { %14767 = vmatpush2.bf16.msra.mxu0 %v15838_v21  ;;  %v16199_v47 = vcombine.high %v695_v53, %v699_v59  ;;  %v559_v52 = vld [vmem:[%s18208_s22 + $0x998] sm:$0xff]  ;;  %v16198_v49 = vcombine.low %v695_v53, %v699_v59 }
 0x693   : > { %14768 = vmatprep.subr.bf16.mxu0 %v15831_v63  ;;  %v563_v19 = vld [vmem:[%s18208_s22 + $0x9b8] sm:$0xff] }
 0x694   : > { %14808 = vmatpush2.bf16.msra.mxu1 %v15966_v37  ;;  %v687_v46 = vld [vmem:[%s18208_s22 + $0xd98] sm:$0xff]  ;;  %v16063_v3 = vcombine.high %v559_v52, %v563_v19  ;;  %v16062_v9 = vcombine.low %v559_v52, %v563_v19 }
 0x695   : > { %14809 = vmatprep.subr.bf16.mxu1 %v15959_v34  ;;  %v691_v18 = vld [vmem:[%s18208_s22 + $0xdb8] sm:$0xff] }
 0x696   : > { %14769 = vmatpush2.bf16.msra.mxu0 %v15830_v50  ;;  %v16191_v5 = vcombine.high %v687_v46, %v691_v18  ;;  %v551_v39 = vld [vmem:[%s18208_s22 + $0x958] sm:$0xff]  ;;  %v16190_v38 = vcombine.low %v687_v46, %v691_v18 }
 0x697   : > { %14770 = vmatprep.subr.bf16.mxu0 %v15823_v14  ;;  %v555_v16 = vld [vmem:[%s18208_s22 + $0x978] sm:$0xff] }
 0x698   : > { %14810 = vmatpush2.bf16.msra.mxu1 %v15958_v30  ;;  %v679_v21 = vld [vmem:[%s18208_s22 + $0xd58] sm:$0xff]  ;;  %v16055_v10 = vcombine.high %v551_v39, %v555_v16 }
 0x699   : > { %14811 = vmatprep.subr.bf16.mxu1 %v15951_v17  ;;  %v683_v37 = vld [vmem:[%s18208_s22 + $0xd78] sm:$0xff] }
 0x69a   : > { %14771 = vmatpush2.bf16.msra.mxu0 %v15822_v7  ;;  %v543_v14 = vld [vmem:[%s18208_s22 + $0x918] sm:$0xff] }
 0x69b   : > { %14822 = vmatprep.subr.bf16.mxu0 %v16071_v4  ;;  %v547_v17 = vld [vmem:[%s18208_s22 + $0x938] sm:$0xff] }
 0x69c   : > { %14812 = vmatpush2.bf16.msra.mxu1 %v15950_v58  ;;  %v671_v13 = vld [vmem:[%s18208_s22 + $0xd18] sm:$0xff]  ;;  %v16182_v58 = vcombine.low %v679_v21, %v683_v37  ;;  %v16047_v4 = vcombine.high %v543_v14, %v547_v17  ;;  %v16046_v18 = vcombine.low %v543_v14, %v547_v17 }
 0x69d   : > { %14863 = vmatprep.subr.bf16.mxu1 %v16199_v47  ;;  %v14528_v28 = vpop.f32.mrf.mxu0  ;;  %14773 = vmatmul.mubr.bf16.vlgmr.msra.gmra.mxu0 %v18322_v23  ;;  %v675_v25 = vld [vmem:[%s18208_s22 + $0xd38] sm:$0xff] }
 0x69e   : > { %v14529_v63 = vadd.f32 %v14528_v28, %v20182_v54  ;;  %14823 = vmatpush1.bf16.msra.mxu0 %v16070_v32  ;;  %v16183_v54 = vcombine.high %v679_v21, %v683_v37  ;;  %14854 = vmatprep.mubr.bf16.mxu0 %v18329_v31  ;;  %v16175_v47 = vcombine.high %v671_v13, %v675_v25  ;;  %v535_v52 = vld [vmem:[%s18208_s22 + $0x8d8] sm:$0xff] }
 0x69f   : > { %v14569_v34 = vpop.f32.mrf.mxu1  ;;  %14814 = vmatmul.mubr.bf16.vlgmr.msra.gmra.mxu1 %v18333_v0  ;;  %v14530_v2 = vpop.f32.mrf.mxu0  ;;  %14824 = vmatprep.subr.bf16.mxu0 %v16063_v3  ;;  %v663_v19 = vld [vmem:[%s18208_s22 + $0xcd8] sm:$0xff]  ;;  %v16174_v32 = vcombine.low %v671_v13, %v675_v25 }
 0x6a0   : > { %14864 = vmatpush1.bf16.msra.mxu1 %v16198_v49  ;;  %v20256_v50 = vadd.f32 %v14569_v34, %v14529_v63  ;;  %v14531_v23 = vadd.f32 %v14530_v2, %v20191_v15  ;;  %14895 = vmatprep.mubr.bf16.mxu1 %v18342_v40  ;;  %v16054_v15 = vcombine.low %v551_v39, %v555_v16  ;;  %v539_v40 = vld [vmem:[%s18208_s22 + $0x8f8] sm:$0xff] }
 0x6a1   : > { %v14571_v30 = vpop.f32.mrf.mxu1  ;;  %14865 = vmatprep.subr.bf16.mxu1 %v16191_v5  ;;  %v14532_v0 = vpop.f32.mrf.mxu0  ;;  %v667_v46 = vld [vmem:[%s18208_s22 + $0xcf8] sm:$0xff]  ;;  %v16039_v49 = vcombine.high %v535_v52, %v539_v40  ;;  %v16038_v21 = vcombine.low %v535_v52, %v539_v40 }
 0x6a2   : > { %v20265_v53 = vadd.f32 %v14571_v30, %v14531_v23  ;;  %14825 = vmatpush1.bf16.msra.mxu0 %v16062_v9  ;;  %v16167_v3 = vcombine.high %v663_v19, %v667_v46  ;;  %v527_v5 = vld [vmem:[%s18208_s22 + $0x898] sm:$0xff]  ;;  %v16166_v37 = vcombine.low %v663_v19, %v667_v46 }
 0x6a3   : > { %v14573_v59 = vpop.f32.mrf.mxu1  ;;  %v14533_v7 = vpop.f32.mrf.mxu0  ;;  %14826 = vmatprep.subr.bf16.mxu0 %v16055_v10  ;;  %v531_v39 = vld [vmem:[%s18208_s22 + $0x8b8] sm:$0xff] }
 0x6a4   : > { %14866 = vmatpush1.bf16.msra.mxu1 %v16190_v38  ;;  %v655_v16 = vld [vmem:[%s18208_s22 + $0xc98] sm:$0xff]  ;;  %v16031_v63 = vcombine.high %v527_v5, %v531_v39  ;;  %v16030_v23 = vcombine.low %v527_v5, %v531_v39 }
 0x6a5   : > { %v14574_v31 = vpop.f32.mrf.mxu1  ;;  %14867 = vmatprep.subr.bf16.mxu1 %v16183_v54  ;;  %v659_v28 = vld [vmem:[%s18208_s22 + $0xcb8] sm:$0xff] }
 0x6a6   : > { %14827 = vmatpush1.bf16.msra.mxu0 %v16054_v15  ;;  %v16159_v34 = vcombine.high %v655_v16, %v659_v28  ;;  %v519_v9 = vld [vmem:[%s18208_s22 + $0x858] sm:$0xff]  ;;  %v16158_v30 = vcombine.low %v655_v16, %v659_v28 }
 0x6a7   : > { %14828 = vmatprep.subr.bf16.mxu0 %v16047_v4  ;;  %v523_v2 = vld [vmem:[%s18208_s22 + $0x878] sm:$0xff] }
 0x6a8   : > { %14868 = vmatpush1.bf16.msra.mxu1 %v16182_v58  ;;  %v647_v38 = vld [vmem:[%s18208_s22 + $0xc58] sm:$0xff]  ;;  %v16023_v54 = vcombine.high %v519_v9, %v523_v2  ;;  %v16022_v59 = vcombine.low %v519_v9, %v523_v2 }
 0x6a9   : > { %14869 = vmatprep.subr.bf16.mxu1 %v16175_v47  ;;  %v651_v10 = vld [vmem:[%s18208_s22 + $0xc78] sm:$0xff] }
 0x6aa   : > { %14829 = vmatpush1.bf16.msra.mxu0 %v16046_v18  ;;  %v16151_v14 = vcombine.high %v647_v38, %v651_v10  ;;  %v511_v17 = vld [vmem:[%s18208_s22 + $0x818] sm:$0xff]  ;;  %v16150_v15 = vcombine.low %v647_v38, %v651_v10 }
 0x6ab   : > { %14830 = vmatprep.subr.bf16.mxu0 %v16039_v49  ;;  %v515_v0 = vld [vmem:[%s18208_s22 + $0x838] sm:$0xff] }
 0x6ac   : > { %14870 = vmatpush1.bf16.msra.mxu1 %v16174_v32  ;;  %v639_v13 = vld [vmem:[%s18208_s22 + $0xc18] sm:$0xff]  ;;  %v16015_v7 = vcombine.high %v511_v17, %v515_v0  ;;  %v16014_v40 = vcombine.low %v511_v17, %v515_v0 }
 0x6ad   : > { %14871 = vmatprep.subr.bf16.mxu1 %v16167_v3  ;;  %v643_v25 = vld [vmem:[%s18208_s22 + $0xc38] sm:$0xff] }
 0x6ae   : > { %14831 = vmatpush1.bf16.msra.mxu0 %v16038_v21  ;;  %v16143_v58 = vcombine.high %v639_v13, %v643_v25  ;;  %v631_v4 = vld [vmem:[%s18208_s22 + $0xbd8] sm:$0xff]  ;;  %v16142_v19 = vcombine.low %v639_v13, %v643_v25 }
 0x6af   : > { %14832 = vmatprep.subr.bf16.mxu0 %v16031_v63  ;;  %v635_v31 = vld [vmem:[%s18208_s22 + $0xbf8] sm:$0xff] }
 0x6b0   : > { %14872 = vmatpush1.bf16.msra.mxu1 %v16166_v37  ;;  %v759_v47 = vld [vmem:[%s18208_s22 + $0xfd8] sm:$0xff]  ;;  %v16135_v46 = vcombine.high %v631_v4, %v635_v31  ;;  %v16134_v39 = vcombine.low %v631_v4, %v635_v31 }
 0x6b1   : > { %14873 = vmatprep.subr.bf16.mxu1 %v16159_v34  ;;  %v763_v52 = vld [vmem:[%s18208_s22 + $0xff8] sm:$0xff] }
 0x6b2   : > { %14833 = vmatpush1.bf16.msra.mxu0 %v16030_v23  ;;  %v16263_v18 = vcombine.high %v759_v47, %v763_v52  ;;  %v623_v32 = vld [vmem:[%s18208_s22 + $0xb98] sm:$0xff]  ;;  %v16262_v16 = vcombine.low %v759_v47, %v763_v52 }
 0x6b3   : > { %14834 = vmatprep.subr.bf16.mxu0 %v16023_v54  ;;  %v627_v49 = vld [vmem:[%s18208_s22 + $0xbb8] sm:$0xff] }
 0x6b4   : > { %14874 = vmatpush1.bf16.msra.mxu1 %v16158_v30  ;;  %v751_v3 = vld [vmem:[%s18208_s22 + $0xf98] sm:$0xff]  ;;  %v16127_v28 = vcombine.high %v623_v32, %v627_v49  ;;  %v16126_v2 = vcombine.low %v623_v32, %v627_v49 }
 0x6b5   : > { %14875 = vmatprep.subr.bf16.mxu1 %v16151_v14  ;;  %v755_v5 = vld [vmem:[%s18208_s22 + $0xfb8] sm:$0xff] }
 0x6b6   : > { %14835 = vmatpush1.bf16.msra.mxu0 %v16022_v59  ;;  %v16255_v21 = vcombine.high %v751_v3, %v755_v5  ;;  %v615_v37 = vld [vmem:[%s18208_s22 + $0xb58] sm:$0xff]  ;;  %v16254_v38 = vcombine.low %v751_v3, %v755_v5 }
 0x6b7   : > { %14836 = vmatprep.subr.bf16.mxu0 %v16015_v7  ;;  %v619_v63 = vld [vmem:[%s18208_s22 + $0xb78] sm:$0xff] }
 0x6b8   : > { %14876 = vmatpush1.bf16.msra.mxu1 %v16150_v15  ;;  %v743_v34 = vld [vmem:[%s18208_s22 + $0xf58] sm:$0xff]  ;;  %v16119_v10 = vcombine.high %v615_v37, %v619_v63  ;;  %v16118_v0 = vcombine.low %v615_v37, %v619_v63 }
 0x6b9   : > { %14877 = vmatprep.subr.bf16.mxu1 %v16143_v58  ;;  %v747_v9 = vld [vmem:[%s18208_s22 + $0xf78] sm:$0xff] }
 0x6ba   : > { %14837 = vmatpush1.bf16.msra.mxu0 %v16014_v40  ;;  %v16247_v23 = vcombine.high %v743_v34, %v747_v9  ;;  %v607_v30 = vld [vmem:[%s18208_s22 + $0xb18] sm:$0xff]  ;;  %v16246_v13 = vcombine.low %v743_v34, %v747_v9 }
 0x6bb   : > { %14838 = vmatprep.subr.bf16.mxu0 %v16135_v46  ;;  %v611_v54 = vld [vmem:[%s18208_s22 + $0xb38] sm:$0xff] }
 0x6bc   : > { %14878 = vmatpush1.bf16.msra.mxu1 %v16142_v19  ;;  %v735_v14 = vld [vmem:[%s18208_s22 + $0xf18] sm:$0xff]  ;;  %v16111_v25 = vcombine.high %v607_v30, %v611_v54  ;;  %v16110_v31 = vcombine.low %v607_v30, %v611_v54 }
 0x6bd   : > { %14879 = vmatprep.subr.bf16.mxu1 %v16263_v18  ;;  %v739_v17 = vld [vmem:[%s18208_s22 + $0xf38] sm:$0xff] }
 0x6be   : > { %14839 = vmatpush2.bf16.msra.mxu0 %v16134_v39  ;;  %v16239_v59 = vcombine.high %v735_v14, %v739_v17  ;;  %v599_v15 = vld [vmem:[%s18208_s22 + $0xad8] sm:$0xff]  ;;  %v16238_v47 = vcombine.low %v735_v14, %v739_v17 }
 0x6bf   : > { %14840 = vmatprep.subr.bf16.mxu0 %v16127_v28  ;;  %v603_v7 = vld [vmem:[%s18208_s22 + $0xaf8] sm:$0xff] }
 0x6c0   : > { %14880 = vmatpush2.bf16.msra.mxu1 %v16262_v16  ;;  %v727_v58 = vld [vmem:[%s18208_s22 + $0xed8] sm:$0xff]  ;;  %v16103_v52 = vcombine.high %v599_v15, %v603_v7  ;;  %v16102_v49 = vcombine.low %v599_v15, %v603_v7 }
 0x6c1   : > { %14881 = vmatprep.subr.bf16.mxu1 %v16255_v21  ;;  %v731_v4 = vld [vmem:[%s18208_s22 + $0xef8] sm:$0xff] }
 0x6c2   : > { %14841 = vmatpush2.bf16.msra.mxu0 %v16126_v2  ;;  %v16231_v40 = vcombine.high %v727_v58, %v731_v4  ;;  %v591_v19 = vld [vmem:[%s18208_s22 + $0xa98] sm:$0xff]  ;;  %v16230_v3 = vcombine.low %v727_v58, %v731_v4 }
 0x6c3   : > { %14842 = vmatprep.subr.bf16.mxu0 %v16119_v10  ;;  %v595_v46 = vld [vmem:[%s18208_s22 + $0xab8] sm:$0xff] }
 0x6c4   : > { %14882 = vmatpush2.bf16.msra.mxu1 %v16254_v38  ;;  %v719_v18 = vld [vmem:[%s18208_s22 + $0xe98] sm:$0xff]  ;;  %v16095_v5 = vcombine.high %v591_v19, %v595_v46  ;;  %v16094_v63 = vcombine.low %v591_v19, %v595_v46 }
 0x6c5   : > { %14883 = vmatprep.subr.bf16.mxu1 %v16247_v23  ;;  %v723_v32 = vld [vmem:[%s18208_s22 + $0xeb8] sm:$0xff] }
 0x6c6   : > { %14843 = vmatpush2.bf16.msra.mxu0 %v16118_v0  ;;  %v16223_v39 = vcombine.high %v719_v18, %v723_v32  ;;  %v583_v16 = vld [vmem:[%s18208_s22 + $0xa58] sm:$0xff]  ;;  %v16222_v34 = vcombine.low %v719_v18, %v723_v32 }
 0x6c7   : > { %14844 = vmatprep.subr.bf16.mxu0 %v16111_v25  ;;  %v587_v28 = vld [vmem:[%s18208_s22 + $0xa78] sm:$0xff] }
 0x6c8   : > { %14884 = vmatpush2.bf16.msra.mxu1 %v16246_v13  ;;  %v711_v21 = vld [vmem:[%s18208_s22 + $0xe58] sm:$0xff]  ;;  %v16087_v9 = vcombine.high %v583_v16, %v587_v28  ;;  %v16086_v54 = vcombine.low %v583_v16, %v587_v28 }
 0x6c9   : > { %14885 = vmatprep.subr.bf16.mxu1 %v16239_v59  ;;  %v715_v37 = vld [vmem:[%s18208_s22 + $0xe78] sm:$0xff] }
 0x6ca   : > { %14845 = vmatpush2.bf16.msra.mxu0 %v16110_v31  ;;  %v16215_v2 = vcombine.high %v711_v21, %v715_v37  ;;  %v575_v38 = vld [vmem:[%s18208_s22 + $0xa18] sm:$0xff]  ;;  %v16214_v14 = vcombine.low %v711_v21, %v715_v37 }
 0x6cb   : > { %14846 = vmatprep.subr.bf16.mxu0 %v16103_v52  ;;  %v579_v10 = vld [vmem:[%s18208_s22 + $0xa38] sm:$0xff] }
 0x6cc   : > { %14886 = vmatpush2.bf16.msra.mxu1 %v16238_v47  ;;  %v703_v23 = vld [vmem:[%s18208_s22 + $0xe18] sm:$0xff]  ;;  %v16079_v17 = vcombine.high %v575_v38, %v579_v10  ;;  %v16078_v7 = vcombine.low %v575_v38, %v579_v10 }
 0x6cd   : > { %14887 = vmatprep.subr.bf16.mxu1 %v16231_v40  ;;  %v707_v30 = vld [vmem:[%s18208_s22 + $0xe38] sm:$0xff] }
 0x6ce   : > { %14847 = vmatpush2.bf16.msra.mxu0 %v16102_v49  ;;  %v16207_v0 = vcombine.high %v703_v23, %v707_v30  ;;  %v823_v13 = vld [vmem:[%s18208_s22 + $0x11d8] sm:$0xff]  ;;  %v16206_v58 = vcombine.low %v703_v23, %v707_v30 }
 0x6cf   : > { %14848 = vmatprep.subr.bf16.mxu0 %v16095_v5  ;;  %v827_v25 = vld [vmem:[%s18208_s22 + $0x11f8] sm:$0xff] }
 0x6d0   : > { %14888 = vmatpush2.bf16.msra.mxu1 %v16230_v3  ;;  %v951_v59 = vld [vmem:[%s18208_s22 + $0x15d8] sm:$0xff]  ;;  %v16327_v4 = vcombine.high %v823_v13, %v827_v25  ;;  %v16326_v46 = vcombine.low %v823_v13, %v827_v25 }
 0x6d1   : > { %14889 = vmatprep.subr.bf16.mxu1 %v16223_v39  ;;  %v955_v15 = vld [vmem:[%s18208_s22 + $0x15f8] sm:$0xff] }
 0x6d2   : > { %14849 = vmatpush2.bf16.msra.mxu0 %v16094_v63  ;;  %v16455_v31 = vcombine.high %v951_v59, %v955_v15  ;;  %v815_v47 = vld [vmem:[%s18208_s22 + $0x1198] sm:$0xff]  ;;  %v16454_v18 = vcombine.low %v951_v59, %v955_v15 }
 0x6d3   : > { %14850 = vmatprep.subr.bf16.mxu0 %v16087_v9  ;;  %v819_v52 = vld [vmem:[%s18208_s22 + $0x11b8] sm:$0xff] }
 0x6d4   : > { %14890 = vmatpush2.bf16.msra.mxu1 %v16222_v34  ;;  %v943_v40 = vld [vmem:[%s18208_s22 + $0x1598] sm:$0xff]  ;;  %v16319_v32 = vcombine.high %v815_v47, %v819_v52  ;;  %v16318_v63 = vcombine.low %v815_v47, %v819_v52 }
 0x6d5   : > { %14891 = vmatprep.subr.bf16.mxu1 %v16215_v2  ;;  %v947_v19 = vld [vmem:[%s18208_s22 + $0x15b8] sm:$0xff] }
 0x6d6   : > { %14851 = vmatpush2.bf16.msra.mxu0 %v16086_v54  ;;  %v16447_v49 = vcombine.high %v943_v40, %v947_v19  ;;  %v807_v3 = vld [vmem:[%s18208_s22 + $0x1158] sm:$0xff]  ;;  %v16446_v9 = vcombine.low %v943_v40, %v947_v19 }
 0x6d7   : > { %14852 = vmatprep.subr.bf16.mxu0 %v16079_v17  ;;  %v811_v5 = vld [vmem:[%s18208_s22 + $0x1178] sm:$0xff] }
 0x6d8   : > { %14892 = vmatpush2.bf16.msra.mxu1 %v16214_v14  ;;  %v935_v16 = vld [vmem:[%s18208_s22 + $0x1558] sm:$0xff]  ;;  %v16311_v2 = vcombine.high %v807_v3, %v811_v5 }
 0x6d9   : > { %14893 = vmatprep.subr.bf16.mxu1 %v16207_v0  ;;  %v939_v28 = vld [vmem:[%s18208_s22 + $0x1578] sm:$0xff] }
 0x6da   : > { %14853 = vmatpush2.bf16.msra.mxu0 %v16078_v7  ;;  %v799_v23 = vld [vmem:[%s18208_s22 + $0x1118] sm:$0xff]  ;;  %v16438_v59 = vcombine.low %v935_v16, %v939_v28 }
 0x6db   : > { %14904 = vmatprep.subr.bf16.mxu0 %v16327_v4  ;;  %v803_v30 = vld [vmem:[%s18208_s22 + $0x1138] sm:$0xff] }
 0x6dc   : > { %14894 = vmatpush2.bf16.msra.mxu1 %v16206_v58  ;;  %v927_v54 = vld [vmem:[%s18208_s22 + $0x1518] sm:$0xff]  ;;  %v16303_v15 = vcombine.high %v799_v23, %v803_v30  ;;  %v16302_v52 = vcombine.low %v799_v23, %v803_v30 }
 0x6dd   : > { %14945 = vmatprep.subr.bf16.mxu1 %v16455_v31  ;;  %v14610_v39 = vpop.f32.mrf.mxu0  ;;  %14855 = vmatmul.mubr.bf16.vlgmr.msra.gmra.mxu0 %v18414_v48  ;;  %v931_v14 = vld [vmem:[%s18208_s22 + $0x1538] sm:$0xff] }
 0x6de   : > { %v14611_v21 = vadd.f32 %v14610_v39, %v20256_v50  ;;  %14905 = vmatpush1.bf16.msra.mxu0 %v16326_v46  ;;  %v16439_v50 = vcombine.high %v935_v16, %v939_v28  ;;  %14936 = vmatprep.mubr.bf16.mxu0 %v18421_v57  ;;  %v20844_v17 = vld [vmem:[#allocation15_spill] sm:$0xff]  ;;  %v16431_v7 = vcombine.high %v927_v54, %v931_v14 }
 0x6df   : > { %v14651_v37 = vpop.f32.mrf.mxu1  ;;  %14896 = vmatmul.mubr.bf16.vlgmr.msra.gmra.mxu1 %v18425_v12  ;;  %v14612_v34 = vpop.f32.mrf.mxu0  ;;  %14906 = vmatprep.subr.bf16.mxu0 %v16319_v32  ;;  %v791_v58 = vld [vmem:[%s18208_s22 + $0x10d8] sm:$0xff]  ;;  %v16430_v40 = vcombine.low %v927_v54, %v931_v14 }
 0x6e0   : > { %14946 = vmatpush1.bf16.msra.mxu1 %v16454_v18  ;;  %v20330_v38 = vadd.f32 %v14651_v37, %v14611_v21  ;;  %v14613_v48 = vadd.f32 %v14612_v34, %v20265_v53  ;;  %14977 = vmatprep.mubr.bf16.mxu1 %v20844_v17  ;;  %v16310_v53 = vcombine.low %v807_v3, %v811_v5  ;;  %v795_v4 = vld [vmem:[%s18208_s22 + $0x10f8] sm:$0xff] }
 0x6e1   : > { %v14653_v10 = vpop.f32.mrf.mxu1  ;;  %14947 = vmatprep.subr.bf16.mxu1 %v16447_v49  ;;  %v14614_v12 = vpop.f32.mrf.mxu0  ;;  %v919_v31 = vld [vmem:[%s18208_s22 + $0x14d8] sm:$0xff]  ;;  %v16295_v19 = vcombine.high %v791_v58, %v795_v4  ;;  %v16294_v5 = vcombine.low %v791_v58, %v795_v4 }
 0x6e2   : > { %v20339_v0 = vadd.f32 %v14653_v10, %v14613_v48  ;;  %14907 = vmatpush1.bf16.msra.mxu0 %v16318_v63  ;;  %v923_v47 = vld [vmem:[%s18208_s22 + $0x14f8] sm:$0xff] }
 0x6e3   : > { %v14655_v13 = vpop.f32.mrf.mxu1  ;;  %v14615_v25 = vpop.f32.mrf.mxu0  ;;  %14908 = vmatprep.subr.bf16.mxu0 %v16311_v2  ;;  %v16423_v46 = vcombine.high %v919_v31, %v923_v47  ;;  %v783_v18 = vld [vmem:[%s18208_s22 + $0x1098] sm:$0xff]  ;;  %v16422_v39 = vcombine.low %v919_v31, %v923_v47 }
 0x6e4   : > { %14948 = vmatpush1.bf16.msra.mxu1 %v16446_v9  ;;  %v787_v32 = vld [vmem:[%s18208_s22 + $0x10b8] sm:$0xff] }
 0x6e5   : > { %v14656_v57 = vpop.f32.mrf.mxu1  ;;  %14949 = vmatprep.subr.bf16.mxu1 %v16439_v50  ;;  %v911_v49 = vld [vmem:[%s18208_s22 + $0x1498] sm:$0xff]  ;;  %v16287_v16 = vcombine.high %v783_v18, %v787_v32  ;;  %v16286_v9 = vcombine.low %v783_v18, %v787_v32 }
 0x6e6   : > { %14909 = vmatpush1.bf16.msra.mxu0 %v16310_v53  ;;  %v915_v3 = vld [vmem:[%s18208_s22 + $0x14b8] sm:$0xff] }
 0x6e7   : > { %14910 = vmatprep.subr.bf16.mxu0 %v16303_v15  ;;  %v16415_v28 = vcombine.high %v911_v49, %v915_v3  ;;  %v775_v21 = vld [vmem:[%s18208_s22 + $0x1058] sm:$0xff]  ;;  %v16414_v2 = vcombine.low %v911_v49, %v915_v3 }
 0x6e8   : > { %14950 = vmatpush1.bf16.msra.mxu1 %v16438_v59  ;;  %v779_v37 = vld [vmem:[%s18208_s22 + $0x1078] sm:$0xff] }
 0x6e9   : > { %14951 = vmatprep.subr.bf16.mxu1 %v16431_v7  ;;  %v903_v63 = vld [vmem:[%s18208_s22 + $0x1458] sm:$0xff]  ;;  %v16279_v48 = vcombine.high %v775_v21, %v779_v37  ;;  %v16278_v54 = vcombine.low %v775_v21, %v779_v37 }
 0x6ea   : > { %14911 = vmatpush1.bf16.msra.mxu0 %v16302_v52  ;;  %v907_v34 = vld [vmem:[%s18208_s22 + $0x1478] sm:$0xff] }
 0x6eb   : > { %14912 = vmatprep.subr.bf16.mxu0 %v16295_v19  ;;  %v16407_v10 = vcombine.high %v903_v63, %v907_v34  ;;  %v767_v50 = vld [vmem:[%s18208_s22 + $0x1018] sm:$0xff]  ;;  %v16406_v14 = vcombine.low %v903_v63, %v907_v34 }
 0x6ec   : > { %14952 = vmatpush1.bf16.msra.mxu1 %v16430_v40  ;;  %v771_v23 = vld [vmem:[%s18208_s22 + $0x1038] sm:$0xff] }
 0x6ed   : > { %14953 = vmatprep.subr.bf16.mxu1 %v16423_v46  ;;  %v895_v30 = vld [vmem:[%s18208_s22 + $0x1418] sm:$0xff]  ;;  %v16271_v17 = vcombine.high %v767_v50, %v771_v23  ;;  %v16270_v57 = vcombine.low %v767_v50, %v771_v23 }
 0x6ee   : > { %14913 = vmatpush1.bf16.msra.mxu0 %v16294_v5  ;;  %v899_v12 = vld [vmem:[%s18208_s22 + $0x1438] sm:$0xff] }
 0x6ef   : > { %14914 = vmatprep.subr.bf16.mxu0 %v16287_v16  ;;  %v16399_v13 = vcombine.high %v895_v30, %v899_v12  ;;  %v887_v53 = vld [vmem:[%s18208_s22 + $0x13d8] sm:$0xff]  ;;  %v16398_v7 = vcombine.low %v895_v30, %v899_v12 }
 0x6f0   : > { %14954 = vmatpush1.bf16.msra.mxu1 %v16422_v39  ;;  %v891_v25 = vld [vmem:[%s18208_s22 + $0x13f8] sm:$0xff] }
 0x6f1   : > { %14955 = vmatprep.subr.bf16.mxu1 %v16415_v28  ;;  %v1015_v59 = vld [vmem:[%s18208_s22 + $0x17d8] sm:$0xff]  ;;  %v16391_v58 = vcombine.high %v887_v53, %v891_v25  ;;  %v16390_v19 = vcombine.low %v887_v53, %v891_v25 }
 0x6f2   : > { %14915 = vmatpush1.bf16.msra.mxu0 %v16286_v9  ;;  %v1019_v15 = vld [vmem:[%s18208_s22 + $0x17f8] sm:$0xff] }
 0x6f3   : > { %14916 = vmatprep.subr.bf16.mxu0 %v16279_v48  ;;  %v16519_v4 = vcombine.high %v1015_v59, %v1019_v15  ;;  %v879_v31 = vld [vmem:[%s18208_s22 + $0x1398] sm:$0xff]  ;;  %v16518_v46 = vcombine.low %v1015_v59, %v1019_v15 }
 0x6f4   : > { %14956 = vmatpush1.bf16.msra.mxu1 %v16414_v2  ;;  %v883_v47 = vld [vmem:[%s18208_s22 + $0x13b8] sm:$0xff] }
 0x6f5   : > { %14957 = vmatprep.subr.bf16.mxu1 %v16407_v10  ;;  %v1007_v52 = vld [vmem:[%s18208_s22 + $0x1798] sm:$0xff]  ;;  %v16383_v18 = vcombine.high %v879_v31, %v883_v47  ;;  %v16382_v16 = vcombine.low %v879_v31, %v883_v47 }
 0x6f6   : > { %14917 = vmatpush1.bf16.msra.mxu0 %v16278_v54  ;;  %v1011_v40 = vld [vmem:[%s18208_s22 + $0x17b8] sm:$0xff] }
 0x6f7   : > { %14918 = vmatprep.subr.bf16.mxu0 %v16271_v17  ;;  %v16511_v32 = vcombine.high %v1007_v52, %v1011_v40  ;;  %v871_v49 = vld [vmem:[%s18208_s22 + $0x1358] sm:$0xff]  ;;  %v16510_v28 = vcombine.low %v1007_v52, %v1011_v40 }
 0x6f8   : > { %14958 = vmatpush1.bf16.msra.mxu1 %v16406_v14  ;;  %v875_v3 = vld [vmem:[%s18208_s22 + $0x1378] sm:$0xff] }
 0x6f9   : > { %14959 = vmatprep.subr.bf16.mxu1 %v16399_v13  ;;  %v999_v5 = vld [vmem:[%s18208_s22 + $0x1758] sm:$0xff]  ;;  %v16375_v21 = vcombine.high %v871_v49, %v875_v3  ;;  %v16374_v48 = vcombine.low %v871_v49, %v875_v3 }
 0x6fa   : > { %14919 = vmatpush1.bf16.msra.mxu0 %v16270_v57  ;;  %v1003_v39 = vld [vmem:[%s18208_s22 + $0x1778] sm:$0xff] }
 0x6fb   : > { %14920 = vmatprep.subr.bf16.mxu0 %v16391_v58  ;;  %v16503_v37 = vcombine.high %v999_v5, %v1003_v39  ;;  %v863_v63 = vld [vmem:[%s18208_s22 + $0x1318] sm:$0xff]  ;;  %v16502_v10 = vcombine.low %v999_v5, %v1003_v39 }
 0x6fc   : > { %14960 = vmatpush1.bf16.msra.mxu1 %v16398_v7  ;;  %v867_v34 = vld [vmem:[%s18208_s22 + $0x1338] sm:$0xff] }
 0x6fd   : > { %14961 = vmatprep.subr.bf16.mxu1 %v16519_v4  ;;  %v991_v9 = vld [vmem:[%s18208_s22 + $0x1718] sm:$0xff]  ;;  %v16367_v50 = vcombine.high %v863_v63, %v867_v34  ;;  %v16366_v17 = vcombine.low %v863_v63, %v867_v34 }
 0x6fe   : > { %14921 = vmatpush2.bf16.msra.mxu0 %v16390_v19  ;;  %v995_v2 = vld [vmem:[%s18208_s22 + $0x1738] sm:$0xff] }
 0x6ff   : > { %14922 = vmatprep.subr.bf16.mxu0 %v16383_v18  ;;  %v16495_v23 = vcombine.high %v991_v9, %v995_v2  ;;  %v855_v30 = vld [vmem:[%s18208_s22 + $0x12d8] sm:$0xff]  ;;  %v16494_v13 = vcombine.low %v991_v9, %v995_v2 }
 0x700   : > { %14962 = vmatpush2.bf16.msra.mxu1 %v16518_v46  ;;  %v859_v12 = vld [vmem:[%s18208_s22 + $0x12f8] sm:$0xff] }
 0x701   : > { %14963 = vmatprep.subr.bf16.mxu1 %v16511_v32  ;;  %v983_v54 = vld [vmem:[%s18208_s22 + $0x16d8] sm:$0xff]  ;;  %v16359_v53 = vcombine.high %v855_v30, %v859_v12  ;;  %v16358_v58 = vcombine.low %v855_v30, %v859_v12 }
 0x702   : > { %14923 = vmatpush2.bf16.msra.mxu0 %v16382_v16  ;;  %v987_v14 = vld [vmem:[%s18208_s22 + $0x16f8] sm:$0xff] }
 0x703   : > { %14924 = vmatprep.subr.bf16.mxu0 %v16375_v21  ;;  %v16487_v25 = vcombine.high %v983_v54, %v987_v14  ;;  %v847_v59 = vld [vmem:[%s18208_s22 + $0x1298] sm:$0xff]  ;;  %v16486_v4 = vcombine.low %v983_v54, %v987_v14 }
 0x704   : > { %14964 = vmatpush2.bf16.msra.mxu1 %v16510_v28  ;;  %v851_v15 = vld [vmem:[%s18208_s22 + $0x12b8] sm:$0xff] }
 0x705   : > { %14965 = vmatprep.subr.bf16.mxu1 %v16503_v37  ;;  %v975_v57 = vld [vmem:[%s18208_s22 + $0x1698] sm:$0xff]  ;;  %v16351_v31 = vcombine.high %v847_v59, %v851_v15  ;;  %v16350_v18 = vcombine.low %v847_v59, %v851_v15 }
 0x706   : > { %14925 = vmatpush2.bf16.msra.mxu0 %v16374_v48  ;;  %v979_v7 = vld [vmem:[%s18208_s22 + $0x16b8] sm:$0xff] }
 0x707   : > { %14926 = vmatprep.subr.bf16.mxu0 %v16367_v50  ;;  %v16479_v47 = vcombine.high %v975_v57, %v979_v7  ;;  %v839_v52 = vld [vmem:[%s18208_s22 + $0x1258] sm:$0xff]  ;;  %v16478_v32 = vcombine.low %v975_v57, %v979_v7 }
 0x708   : > { %14966 = vmatpush2.bf16.msra.mxu1 %v16502_v10  ;;  %v843_v40 = vld [vmem:[%s18208_s22 + $0x1278] sm:$0xff] }
 0x709   : > { %14967 = vmatprep.subr.bf16.mxu1 %v16495_v23  ;;  %v967_v19 = vld [vmem:[%s18208_s22 + $0x1658] sm:$0xff]  ;;  %v16343_v49 = vcombine.high %v839_v52, %v843_v40  ;;  %v16342_v21 = vcombine.low %v839_v52, %v843_v40 }
 0x70a   : > { %14927 = vmatpush2.bf16.msra.mxu0 %v16366_v17  ;;  %v971_v46 = vld [vmem:[%s18208_s22 + $0x1678] sm:$0xff] }
 0x70b   : > { %14928 = vmatprep.subr.bf16.mxu0 %v16359_v53  ;;  %v16471_v3 = vcombine.high %v967_v19, %v971_v46  ;;  %v831_v5 = vld [vmem:[%s18208_s22 + $0x1218] sm:$0xff]  ;;  %v16470_v37 = vcombine.low %v967_v19, %v971_v46 }
 0x70c   : > { %14968 = vmatpush2.bf16.msra.mxu1 %v16494_v13  ;;  %v835_v39 = vld [vmem:[%s18208_s22 + $0x1238] sm:$0xff] }
 0x70d   : > { %14969 = vmatprep.subr.bf16.mxu1 %v16487_v25  ;;  %v959_v16 = vld [vmem:[%s18208_s22 + $0x1618] sm:$0xff]  ;;  %v16335_v63 = vcombine.high %v831_v5, %v835_v39  ;;  %v16334_v50 = vcombine.low %v831_v5, %v835_v39 }
 0x70e   : > { %14929 = vmatpush2.bf16.msra.mxu0 %v16358_v58  ;;  %v963_v28 = vld [vmem:[%s18208_s22 + $0x1638] sm:$0xff] }
 0x70f   : > { %14930 = vmatprep.subr.bf16.mxu0 %v16351_v31  ;;  %v16463_v34 = vcombine.high %v959_v16, %v963_v28  ;;  %v1079_v9 = vld [vmem:[%s18208_s22 + $0x19d8] sm:$0xff]  ;;  %v16462_v23 = vcombine.low %v959_v16, %v963_v28 }
 0x710   : > { %14970 = vmatpush2.bf16.msra.mxu1 %v16486_v4  ;;  %v1083_v2 = vld [vmem:[%s18208_s22 + $0x19f8] sm:$0xff] }
 0x711   : > { %14971 = vmatprep.subr.bf16.mxu1 %v16479_v47  ;;  %v1207_v48 = vld [vmem:[%s18208_s22 + $0x1dd8] sm:$0xff]  ;;  %v16583_v30 = vcombine.high %v1079_v9, %v1083_v2  ;;  %v16582_v53 = vcombine.low %v1079_v9, %v1083_v2 }
 0x712   : > { %14931 = vmatpush2.bf16.msra.mxu0 %v16350_v18  ;;  %v1211_v10 = vld [vmem:[%s18208_s22 + $0x1df8] sm:$0xff] }
 0x713   : > { %14932 = vmatprep.subr.bf16.mxu0 %v16343_v49  ;;  %v16711_v12 = vcombine.high %v1207_v48, %v1211_v10  ;;  %v1071_v54 = vld [vmem:[%s18208_s22 + $0x1998] sm:$0xff]  ;;  %v16710_v25 = vcombine.low %v1207_v48, %v1211_v10 }
 0x714   : > { %14972 = vmatpush2.bf16.msra.mxu1 %v16478_v32  ;;  %v1075_v14 = vld [vmem:[%s18208_s22 + $0x19b8] sm:$0xff] }
 0x715   : > { %14973 = vmatprep.subr.bf16.mxu1 %v16471_v3  ;;  %v1199_v17 = vld [vmem:[%s18208_s22 + $0x1d98] sm:$0xff]  ;;  %v16575_v59 = vcombine.high %v1071_v54, %v1075_v14  ;;  %v16574_v40 = vcombine.low %v1071_v54, %v1075_v14 }
 0x716   : > { %14933 = vmatpush2.bf16.msra.mxu0 %v16342_v21  ;;  %v1203_v13 = vld [vmem:[%s18208_s22 + $0x1db8] sm:$0xff] }
 0x717   : > { %14934 = vmatprep.subr.bf16.mxu0 %v16335_v63  ;;  %v16703_v15 = vcombine.high %v1199_v17, %v1203_v13  ;;  %v1063_v57 = vld [vmem:[%s18208_s22 + $0x1958] sm:$0xff]  ;;  %v16702_v46 = vcombine.low %v1199_v17, %v1203_v13 }
 0x718   : > { %14974 = vmatpush2.bf16.msra.mxu1 %v16470_v37  ;;  %v1067_v7 = vld [vmem:[%s18208_s22 + $0x1978] sm:$0xff] }
 0x719   : > { %14975 = vmatprep.subr.bf16.mxu1 %v16463_v34  ;;  %v1191_v4 = vld [vmem:[%s18208_s22 + $0x1d58] sm:$0xff]  ;;  %v16567_v18 = vcombine.high %v1063_v57, %v1067_v7 }
 0x71a   : > { %14935 = vmatpush2.bf16.msra.mxu0 %v16334_v50  ;;  %v1195_v31 = vld [vmem:[%s18208_s22 + $0x1d78] sm:$0xff] }
 0x71b   : > { %14986 = vmatprep.subr.bf16.mxu0 %v16583_v30  ;;  %v1055_v3 = vld [vmem:[%s18208_s22 + $0x1918] sm:$0xff]  ;;  %v16694_v63 = vcombine.low %v1191_v4, %v1195_v31 }
 0x71c   : > { %14976 = vmatpush2.bf16.msra.mxu1 %v16462_v23  ;;  %v1059_v5 = vld [vmem:[%s18208_s22 + $0x1938] sm:$0xff] }
 0x71d   : > { %15027 = vmatprep.subr.bf16.mxu1 %v16711_v12  ;;  %v14692_v58 = vpop.f32.mrf.mxu0  ;;  %14937 = vmatmul.mubr.bf16.vlgmr.msra.gmra.mxu0 %v18504_v22  ;;  %v1183_v39 = vld [vmem:[%s18208_s22 + $0x1d18] sm:$0xff]  ;;  %v16559_v34 = vcombine.high %v1055_v3, %v1059_v5  ;;  %v16558_v23 = vcombine.low %v1055_v3, %v1059_v5 }
 0x71e   : > { %v14693_v47 = vadd.f32 %v14692_v58, %v20330_v38  ;;  %14987 = vmatpush1.bf16.msra.mxu0 %v16582_v53  ;;  %v16695_v38 = vcombine.high %v1191_v4, %v1195_v31  ;;  %15018 = vmatprep.mubr.bf16.mxu0 %v18511_v33  ;;  %v1187_v16 = vld [vmem:[%s18208_s22 + $0x1d38] sm:$0xff] }
 0x71f   : > { %v14733_v52 = vpop.f32.mrf.mxu1  ;;  %14978 = vmatmul.mubr.bf16.vlgmr.msra.gmra.mxu1 %v18515_v35  ;;  %v14694_v19 = vpop.f32.mrf.mxu0  ;;  %14988 = vmatprep.subr.bf16.mxu0 %v16575_v59  ;;  %v1047_v2 = vld [vmem:[%s18208_s22 + $0x18d8] sm:$0xff]  ;;  %v16686_v30 = vcombine.low %v1183_v39, %v1187_v16 }
 0x720   : > { %15028 = vmatpush1.bf16.msra.mxu1 %v16710_v25  ;;  %v20404_v32 = vadd.f32 %v14733_v52, %v14693_v47  ;;  %v14695_v22 = vadd.f32 %v14694_v19, %v20339_v0  ;;  %15059 = vmatprep.mubr.bf16.mxu1 %v18524_v44  ;;  %v16566_v0 = vcombine.low %v1063_v57, %v1067_v7  ;;  %v1051_v48 = vld [vmem:[%s18208_s22 + $0x18f8] sm:$0xff] }
 0x721   : > { %v14735_v49 = vpop.f32.mrf.mxu1  ;;  %15029 = vmatprep.subr.bf16.mxu1 %v16703_v15  ;;  %v14696_v35 = vpop.f32.mrf.mxu0  ;;  %v16687_v44 = vcombine.high %v1183_v39, %v1187_v16  ;;  %v1175_v10 = vld [vmem:[%s18208_s22 + $0x1cd8] sm:$0xff]  ;;  %v16551_v12 = vcombine.high %v1047_v2, %v1051_v48  ;;  %v16550_v25 = vcombine.low %v1047_v2, %v1051_v48 }
 0x722   : > { %v20413_v28 = vadd.f32 %v14735_v49, %v14695_v22  ;;  %14989 = vmatpush1.bf16.msra.mxu0 %v16574_v40  ;;  %v1179_v50 = vld [vmem:[%s18208_s22 + $0x1cf8] sm:$0xff] }
 0x723   : > { %v14737_v21 = vpop.f32.mrf.mxu1  ;;  %v14697_v37 = vpop.f32.mrf.mxu0  ;;  %14990 = vmatprep.subr.bf16.mxu0 %v16567_v18  ;;  %v16679_v54 = vcombine.high %v1175_v10, %v1179_v50  ;;  %v1039_v14 = vld [vmem:[%s18208_s22 + $0x1898] sm:$0xff]  ;;  %v16678_v59 = vcombine.low %v1175_v10, %v1179_v50 }
 0x724   : > { %15030 = vmatpush1.bf16.msra.mxu1 %v16702_v46  ;;  %v15421_v33 = vcombine.low %v20404_v32, %v20413_v28  ;;  %v1043_v17 = vld [vmem:[%s18208_s22 + $0x18b8] sm:$0xff] }
 0x725   : > { %v14738_v9 = vpop.f32.mrf.mxu1  ;;  %15031 = vmatprep.subr.bf16.mxu1 %v16695_v38  ;;  %v1167_v13 = vld [vmem:[%s18208_s22 + $0x1c98] sm:$0xff]  ;;  %v16543_v15 = vcombine.high %v1039_v14, %v1043_v17  ;;  %v16542_v47 = vcombine.low %v1039_v14, %v1043_v17 }
 0x726   : > { %14991 = vmatpush1.bf16.msra.mxu0 %v16566_v0  ;;  %v1171_v53 = vld [vmem:[%s18208_s22 + $0x1cb8] sm:$0xff] }
 0x727   : > { %14992 = vmatprep.subr.bf16.mxu0 %v16559_v34  ;;  %v16671_v57 = vcombine.high %v1167_v13, %v1171_v53  ;;  %v1031_v7 = vld [vmem:[%s18208_s22 + $0x1858] sm:$0xff]  ;;  %v16670_v52 = vcombine.low %v1167_v13, %v1171_v53 }
 0x728   : > { %15032 = vmatpush1.bf16.msra.mxu1 %v16694_v63  ;;  %v1035_v58 = vld [vmem:[%s18208_s22 + $0x1878] sm:$0xff] }
 0x729   : > { %15033 = vmatprep.subr.bf16.mxu1 %v16687_v44  ;;  %v1159_v4 = vld [vmem:[%s18208_s22 + $0x1c58] sm:$0xff]  ;;  %v16535_v40 = vcombine.high %v1031_v7, %v1035_v58  ;;  %v16534_v38 = vcombine.low %v1031_v7, %v1035_v58 }
 0x72a   : > { %14993 = vmatpush1.bf16.msra.mxu0 %v16558_v23  ;;  %v1163_v31 = vld [vmem:[%s18208_s22 + $0x1c78] sm:$0xff] }
 0x72b   : > { %14994 = vmatprep.subr.bf16.mxu0 %v16551_v12  ;;  %v16663_v19 = vcombine.high %v1159_v4, %v1163_v31  ;;  %v1023_v46 = vld [vmem:[%s18208_s22 + $0x1818] sm:$0xff]  ;;  %v16662_v3 = vcombine.low %v1159_v4, %v1163_v31 }
 0x72c   : > { %15034 = vmatpush1.bf16.msra.mxu1 %v16686_v30  ;;  %v1027_v18 = vld [vmem:[%s18208_s22 + $0x1838] sm:$0xff] }
 0x72d   : > { %15035 = vmatprep.subr.bf16.mxu1 %v16679_v54  ;;  %v1151_v22 = vld [vmem:[%s18208_s22 + $0x1c18] sm:$0xff]  ;;  %v16527_v5 = vcombine.high %v1023_v46, %v1027_v18  ;;  %v16526_v37 = vcombine.low %v1023_v46, %v1027_v18 }
 0x72e   : > { %14995 = vmatpush1.bf16.msra.mxu0 %v16550_v25  ;;  %v1155_v49 = vld [vmem:[%s18208_s22 + $0x1c38] sm:$0xff] }
 0x72f   : > { %14996 = vmatprep.subr.bf16.mxu0 %v16543_v15  ;;  %v16655_v35 = vcombine.high %v1151_v22, %v1155_v49  ;;  %v1143_v39 = vld [vmem:[%s18208_s22 + $0x1bd8] sm:$0xff]  ;;  %v16654_v63 = vcombine.low %v1151_v22, %v1155_v49 }
 0x730   : > { %15036 = vmatpush1.bf16.msra.mxu1 %v16678_v59  ;;  %v1147_v16 = vld [vmem:[%s18208_s22 + $0x1bf8] sm:$0xff] }
 0x731   : > { %15037 = vmatprep.subr.bf16.mxu1 %v16671_v57  ;;  %v1271_v21 = vld [vmem:[%s18208_s22 + $0x1fd8] sm:$0xff]  ;;  %v16647_v34 = vcombine.high %v1143_v39, %v1147_v16  ;;  %v16646_v50 = vcombine.low %v1143_v39, %v1147_v16 }
 0x732   : > { %14997 = vmatpush1.bf16.msra.mxu0 %v16542_v47  ;;  %v1275_v0 = vld [vmem:[%s18208_s22 + $0x1ff8] sm:$0xff] }
 0x733   : > { %14998 = vmatprep.subr.bf16.mxu0 %v16535_v40  ;;  %v16775_v9 = vcombine.high %v1271_v21, %v1275_v0  ;;  %v1135_v44 = vld [vmem:[%s18208_s22 + $0x1b98] sm:$0xff]  ;;  %v16774_v23 = vcombine.low %v1271_v21, %v1275_v0 }
 0x734   : > { %15038 = vmatpush1.bf16.msra.mxu1 %v16670_v52  ;;  %v1139_v2 = vld [vmem:[%s18208_s22 + $0x1bb8] sm:$0xff] }
 0x735   : > { %15039 = vmatprep.subr.bf16.mxu1 %v16663_v19  ;;  %v1263_v48 = vld [vmem:[%s18208_s22 + $0x1f98] sm:$0xff]  ;;  %v16639_v30 = vcombine.high %v1135_v44, %v1139_v2  ;;  %v16638_v53 = vcombine.low %v1135_v44, %v1139_v2 }
 0x736   : > { %14999 = vmatpush1.bf16.msra.mxu0 %v16534_v38  ;;  %v1267_v10 = vld [vmem:[%s18208_s22 + $0x1fb8] sm:$0xff] }
 0x737   : > { %15000 = vmatprep.subr.bf16.mxu0 %v16527_v5  ;;  %v16767_v12 = vcombine.high %v1263_v48, %v1267_v10  ;;  %v1127_v54 = vld [vmem:[%s18208_s22 + $0x1b58] sm:$0xff]  ;;  %v16766_v25 = vcombine.low %v1263_v48, %v1267_v10 }
 0x738   : > { %15040 = vmatpush1.bf16.msra.mxu1 %v16662_v3  ;;  %v1131_v14 = vld [vmem:[%s18208_s22 + $0x1b78] sm:$0xff] }
 0x739   : > { %15041 = vmatprep.subr.bf16.mxu1 %v16655_v35  ;;  %v1255_v17 = vld [vmem:[%s18208_s22 + $0x1f58] sm:$0xff]  ;;  %v16631_v59 = vcombine.high %v1127_v54, %v1131_v14  ;;  %v16630_v31 = vcombine.low %v1127_v54, %v1131_v14 }
 0x73a   : > { %15001 = vmatpush1.bf16.msra.mxu0 %v16526_v37  ;;  %v1259_v13 = vld [vmem:[%s18208_s22 + $0x1f78] sm:$0xff] }
 0x73b   : > { %15002 = vmatprep.subr.bf16.mxu0 %v16647_v34  ;;  %v16759_v15 = vcombine.high %v1255_v17, %v1259_v13  ;;  %v1119_v57 = vld [vmem:[%s18208_s22 + $0x1b18] sm:$0xff]  ;;  %v16758_v47 = vcombine.low %v1255_v17, %v1259_v13 }
 0x73c   : > { %15042 = vmatpush1.bf16.msra.mxu1 %v16654_v63  ;;  %v1123_v7 = vld [vmem:[%s18208_s22 + $0x1b38] sm:$0xff] }
 0x73d   : > { %15043 = vmatprep.subr.bf16.mxu1 %v16775_v9  ;;  %v1247_v58 = vld [vmem:[%s18208_s22 + $0x1f18] sm:$0xff]  ;;  %v16623_v52 = vcombine.high %v1119_v57, %v1123_v7  ;;  %v16622_v49 = vcombine.low %v1119_v57, %v1123_v7 }
 0x73e   : > { %15003 = vmatpush2.bf16.msra.mxu0 %v16646_v50  ;;  %v1251_v4 = vld [vmem:[%s18208_s22 + $0x1f38] sm:$0xff] }
 0x73f   : > { %15004 = vmatprep.subr.bf16.mxu0 %v16639_v30  ;;  %v16751_v40 = vcombine.high %v1247_v58, %v1251_v4  ;;  %v1111_v19 = vld [vmem:[%s18208_s22 + $0x1ad8] sm:$0xff]  ;;  %v16750_v38 = vcombine.low %v1247_v58, %v1251_v4 }
 0x740   : > { %15044 = vmatpush2.bf16.msra.mxu1 %v16774_v23  ;;  %v1115_v46 = vld [vmem:[%s18208_s22 + $0x1af8] sm:$0xff] }
 0x741   : > { %15045 = vmatprep.subr.bf16.mxu1 %v16767_v12  ;;  %v1239_v18 = vld [vmem:[%s18208_s22 + $0x1ed8] sm:$0xff]  ;;  %v16615_v3 = vcombine.high %v1111_v19, %v1115_v46  ;;  %v16614_v0 = vcombine.low %v1111_v19, %v1115_v46 }
 0x742   : > { %15005 = vmatpush2.bf16.msra.mxu0 %v16638_v53  ;;  %v1243_v22 = vld [vmem:[%s18208_s22 + $0x1ef8] sm:$0xff] }
 0x743   : > { %15006 = vmatprep.subr.bf16.mxu0 %v16631_v59  ;;  %v16743_v5 = vcombine.high %v1239_v18, %v1243_v22  ;;  %v1103_v35 = vld [vmem:[%s18208_s22 + $0x1a98] sm:$0xff]  ;;  %v16742_v37 = vcombine.low %v1239_v18, %v1243_v22 }
 0x744   : > { %15046 = vmatpush2.bf16.msra.mxu1 %v16766_v25  ;;  %v1107_v39 = vld [vmem:[%s18208_s22 + $0x1ab8] sm:$0xff] }
 0x745   : > { %15047 = vmatprep.subr.bf16.mxu1 %v16759_v15  ;;  %v1231_v16 = vld [vmem:[%s18208_s22 + $0x1e98] sm:$0xff]  ;;  %v16607_v63 = vcombine.high %v1103_v35, %v1107_v39  ;;  %v16606_v10 = vcombine.low %v1103_v35, %v1107_v39 }
 0x746   : > { %15007 = vmatpush2.bf16.msra.mxu0 %v16630_v31  ;;  %v1235_v21 = vld [vmem:[%s18208_s22 + $0x1eb8] sm:$0xff] }
 0x747   : > { %15008 = vmatprep.subr.bf16.mxu0 %v16623_v52  ;;  %v16735_v34 = vcombine.high %v1231_v16, %v1235_v21  ;;  %v1095_v9 = vld [vmem:[%s18208_s22 + $0x1a58] sm:$0xff]  ;;  %v16734_v50 = vcombine.low %v1231_v16, %v1235_v21 }
 0x748   : > { %15048 = vmatpush2.bf16.msra.mxu1 %v16758_v47  ;;  %v1099_v44 = vld [vmem:[%s18208_s22 + $0x1a78] sm:$0xff] }
 0x749   : > { %15049 = vmatprep.subr.bf16.mxu1 %v16751_v40  ;;  %v1223_v2 = vld [vmem:[%s18208_s22 + $0x1e58] sm:$0xff]  ;;  %v16599_v23 = vcombine.high %v1095_v9, %v1099_v44  ;;  %v16598_v13 = vcombine.low %v1095_v9, %v1099_v44 }
 0x74a   : > { %15009 = vmatpush2.bf16.msra.mxu0 %v16622_v49  ;;  %v1227_v48 = vld [vmem:[%s18208_s22 + $0x1e78] sm:$0xff] }
 0x74b   : > { %15010 = vmatprep.subr.bf16.mxu0 %v16615_v3  ;;  %v16727_v30 = vcombine.high %v1223_v2, %v1227_v48  ;;  %v1087_v12 = vld [vmem:[%s18208_s22 + $0x1a18] sm:$0xff]  ;;  %v16726_v53 = vcombine.low %v1223_v2, %v1227_v48 }
 0x74c   : > { %15050 = vmatpush2.bf16.msra.mxu1 %v16750_v38  ;;  %v1091_v54 = vld [vmem:[%s18208_s22 + $0x1a38] sm:$0xff] }
 0x74d   : > { %15051 = vmatprep.subr.bf16.mxu1 %v16743_v5  ;;  %v1215_v14 = vld [vmem:[%s18208_s22 + $0x1e18] sm:$0xff]  ;;  %v16591_v25 = vcombine.high %v1087_v12, %v1091_v54  ;;  %v16590_v4 = vcombine.low %v1087_v12, %v1091_v54 }
 0x74e   : > { %15011 = vmatpush2.bf16.msra.mxu0 %v16614_v0  ;;  %v1219_v17 = vld [vmem:[%s18208_s22 + $0x1e38] sm:$0xff] }
 0x74f   : > { %15012 = vmatprep.subr.bf16.mxu0 %v16607_v63  ;;  %v16719_v59 = vcombine.high %v1215_v14, %v1219_v17  ;;  %v1335_v15 = vld [vmem:[%s18208_s22 + $0x21d8] sm:$0xff]  ;;  %v16718_v31 = vcombine.low %v1215_v14, %v1219_v17 }
 0x750   : > { %15052 = vmatpush2.bf16.msra.mxu1 %v16742_v37  ;;  %v1339_v57 = vld [vmem:[%s18208_s22 + $0x21f8] sm:$0xff] }
 0x751   : > { %15053 = vmatprep.subr.bf16.mxu1 %v16735_v34  ;;  %v1463_v7 = vld [vmem:[%s18208_s22 + $0x25d8] sm:$0xff]  ;;  %v16839_v47 = vcombine.high %v1335_v15, %v1339_v57  ;;  %v16838_v22 = vcombine.low %v1335_v15, %v1339_v57 }
 0x752   : > { %15013 = vmatpush2.bf16.msra.mxu0 %v16606_v10  ;;  %v1467_v58 = vld [vmem:[%s18208_s22 + $0x25f8] sm:$0xff] }
 0x753   : > { %15014 = vmatprep.subr.bf16.mxu0 %v16599_v23  ;;  %v16967_v52 = vcombine.high %v1463_v7, %v1467_v58  ;;  %v1327_v40 = vld [vmem:[%s18208_s22 + $0x2198] sm:$0xff]  ;;  %v16966_v49 = vcombine.low %v1463_v7, %v1467_v58 }
 0x754   : > { %15054 = vmatpush2.bf16.msra.mxu1 %v16734_v50  ;;  %v1331_v19 = vld [vmem:[%s18208_s22 + $0x21b8] sm:$0xff] }
 0x755   : > { %15055 = vmatprep.subr.bf16.mxu1 %v16727_v30  ;;  %v1455_v46 = vld [vmem:[%s18208_s22 + $0x2598] sm:$0xff]  ;;  %v16831_v38 = vcombine.high %v1327_v40, %v1331_v19  ;;  %v16830_v37 = vcombine.low %v1327_v40, %v1331_v19 }
 0x756   : > { %15015 = vmatpush2.bf16.msra.mxu0 %v16598_v13  ;;  %v1459_v18 = vld [vmem:[%s18208_s22 + $0x25b8] sm:$0xff] }
 0x757   : > { %15016 = vmatprep.subr.bf16.mxu0 %v16591_v25  ;;  %v16959_v3 = vcombine.high %v1455_v46, %v1459_v18  ;;  %v1319_v5 = vld [vmem:[%s18208_s22 + $0x2158] sm:$0xff]  ;;  %v16958_v9 = vcombine.low %v1455_v46, %v1459_v18 }
 0x758   : > { %15056 = vmatpush2.bf16.msra.mxu1 %v16726_v53  ;;  %v1323_v35 = vld [vmem:[%s18208_s22 + $0x2178] sm:$0xff] }
 0x759   : > { %15057 = vmatprep.subr.bf16.mxu1 %v16719_v59  ;;  %v1447_v16 = vld [vmem:[%s18208_s22 + $0x2558] sm:$0xff]  ;;  %v16823_v44 = vcombine.high %v1319_v5, %v1323_v35  ;;  %v16822_v54 = vcombine.low %v1319_v5, %v1323_v35 }
 0x75a   : > { %15017 = vmatpush2.bf16.msra.mxu0 %v16590_v4  ;;  %v1451_v21 = vld [vmem:[%s18208_s22 + $0x2578] sm:$0xff] }
 0x75b   : > { %15068 = vmatprep.subr.bf16.mxu0 %v16839_v47  ;;  %v1311_v48 = vld [vmem:[%s18208_s22 + $0x2118] sm:$0xff]  ;;  %v16950_v17 = vcombine.low %v1447_v16, %v1451_v21 }
 0x75c   : > { %15058 = vmatpush2.bf16.msra.mxu1 %v16718_v31  ;;  %v1315_v10 = vld [vmem:[%s18208_s22 + $0x2138] sm:$0xff] }
 0x75d   : > { %15109 = vmatprep.subr.bf16.mxu1 %v16967_v52  ;;  %v14774_v39 = vpop.f32.mrf.mxu0  ;;  %15019 = vmatmul.mubr.bf16.vlgmr.msra.gmra.mxu0 %v18596_v26  ;;  %v16951_v26 = vcombine.high %v1447_v16, %v1451_v21  ;;  %v1439_v23 = vld [vmem:[%s18208_s22 + $0x2518] sm:$0xff]  ;;  %v16815_v13 = vcombine.high %v1311_v48, %v1315_v10 }
 0x75e   : > { %15069 = vmatpush1.bf16.msra.mxu0 %v16838_v22  ;;  %15100 = vmatprep.mubr.bf16.mxu0 %v18603_v20  ;;  %v1443_v30 = vld [vmem:[%s18208_s22 + $0x2538] sm:$0xff] }
 0x75f   : > { %v14815_v0 = vpop.f32.mrf.mxu1  ;;  %15060 = vmatmul.mubr.bf16.vlgmr.msra.gmra.mxu1 %v18607_v11  ;;  %v14776_v34 = vpop.f32.mrf.mxu0  ;;  %15070 = vmatprep.subr.bf16.mxu0 %v16831_v38  ;;  %v16943_v53 = vcombine.high %v1439_v23, %v1443_v30  ;;  %v1303_v25 = vld [vmem:[%s18208_s22 + $0x20d8] sm:$0xff]  ;;  %v16942_v7 = vcombine.low %v1439_v23, %v1443_v30 }
 0x760   : > { %v20479_v63 = vadd.f32 %v14815_v0, %v14774_v39  ;;  %15110 = vmatpush1.bf16.msra.mxu1 %v16966_v49  ;;  %15141 = vmatprep.mubr.bf16.mxu1 %v18616_v36  ;;  %v1307_v59 = vld [vmem:[%s18208_s22 + $0x20f8] sm:$0xff]  ;;  %v16814_v36 = vcombine.low %v1311_v48, %v1315_v10 }
 0x761   : > { %v14817_v2 = vpop.f32.mrf.mxu1  ;;  %15111 = vmatprep.subr.bf16.mxu1 %v16959_v3  ;;  %v14778_v11 = vpop.f32.mrf.mxu0  ;;  %v1431_v15 = vld [vmem:[%s18208_s22 + $0x24d8] sm:$0xff]  ;;  %v16807_v58 = vcombine.high %v1303_v25, %v1307_v59  ;;  %v16806_v19 = vcombine.low %v1303_v25, %v1307_v59 }
 0x762   : > { %v20484_v50 = vadd.f32 %v14817_v2, %v14776_v34  ;;  %15071 = vmatpush1.bf16.msra.mxu0 %v16830_v37  ;;  %v1435_v57 = vld [vmem:[%s18208_s22 + $0x24f8] sm:$0xff] }
 0x763   : > { %v14819_v12 = vpop.f32.mrf.mxu1  ;;  %v14779_v14 = vpop.f32.mrf.mxu0  ;;  %15072 = vmatprep.subr.bf16.mxu0 %v16823_v44  ;;  %v16935_v4 = vcombine.high %v1431_v15, %v1435_v57  ;;  %v1295_v31 = vld [vmem:[%s18208_s22 + $0x2098] sm:$0xff]  ;;  %v16934_v46 = vcombine.low %v1431_v15, %v1435_v57 }
 0x764   : > { %15112 = vmatpush1.bf16.msra.mxu1 %v16958_v9  ;;  %v1299_v47 = vld [vmem:[%s18208_s22 + $0x20b8] sm:$0xff] }
 0x765   : > { %v14820_v20 = vpop.f32.mrf.mxu1  ;;  %15113 = vmatprep.subr.bf16.mxu1 %v16951_v26  ;;  %v1423_v52 = vld [vmem:[%s18208_s22 + $0x2498] sm:$0xff]  ;;  %v16799_v18 = vcombine.high %v1295_v31, %v1299_v47  ;;  %v16798_v35 = vcombine.low %v1295_v31, %v1299_v47 }
 0x766   : > { %15073 = vmatpush1.bf16.msra.mxu0 %v16822_v54  ;;  %v1427_v40 = vld [vmem:[%s18208_s22 + $0x24b8] sm:$0xff] }
 0x767   : > { %15074 = vmatprep.subr.bf16.mxu0 %v16815_v13  ;;  %v16927_v22 = vcombine.high %v1423_v52, %v1427_v40  ;;  %v1287_v49 = vld [vmem:[%s18208_s22 + $0x2058] sm:$0xff]  ;;  %v16926_v39 = vcombine.low %v1423_v52, %v1427_v40 }
 0x768   : > { %15114 = vmatpush1.bf16.msra.mxu1 %v16950_v17  ;;  %v1291_v38 = vld [vmem:[%s18208_s22 + $0x2078] sm:$0xff] }
 0x769   : > { %15115 = vmatprep.subr.bf16.mxu1 %v16943_v53  ;;  %v1415_v3 = vld [vmem:[%s18208_s22 + $0x2458] sm:$0xff]  ;;  %v16791_v16 = vcombine.high %v1287_v49, %v1291_v38  ;;  %v16790_v44 = vcombine.low %v1287_v49, %v1291_v38 }
 0x76a   : > { %15075 = vmatpush1.bf16.msra.mxu0 %v16814_v36  ;;  %v1419_v5 = vld [vmem:[%s18208_s22 + $0x2478] sm:$0xff] }
 0x76b   : > { %15076 = vmatprep.subr.bf16.mxu0 %v16807_v58  ;;  %v16919_v21 = vcombine.high %v1415_v3, %v1419_v5  ;;  %v1279_v0 = vld [vmem:[%s18208_s22 + $0x2018] sm:$0xff]  ;;  %v16918_v2 = vcombine.low %v1415_v3, %v1419_v5 }
 0x76c   : > { %15116 = vmatpush1.bf16.msra.mxu1 %v16942_v7  ;;  %v1283_v37 = vld [vmem:[%s18208_s22 + $0x2038] sm:$0xff] }
 0x76d   : > { %15117 = vmatprep.subr.bf16.mxu1 %v16935_v4  ;;  %v1407_v34 = vld [vmem:[%s18208_s22 + $0x2418] sm:$0xff]  ;;  %v16783_v26 = vcombine.high %v1279_v0, %v1283_v37  ;;  %v16782_v12 = vcombine.low %v1279_v0, %v1283_v37 }
 0x76e   : > { %15077 = vmatpush1.bf16.msra.mxu0 %v16806_v19  ;;  %v1411_v9 = vld [vmem:[%s18208_s22 + $0x2438] sm:$0xff] }
 0x76f   : > { %15078 = vmatprep.subr.bf16.mxu0 %v16799_v18  ;;  %v16911_v48 = vcombine.high %v1407_v34, %v1411_v9  ;;  %v1399_v10 = vld [vmem:[%s18208_s22 + $0x23d8] sm:$0xff]  ;;  %v16910_v54 = vcombine.low %v1407_v34, %v1411_v9 }
 0x770   : > { %15118 = vmatpush1.bf16.msra.mxu1 %v16934_v46  ;;  %v1403_v11 = vld [vmem:[%s18208_s22 + $0x23f8] sm:$0xff] }
 0x771   : > { %15119 = vmatprep.subr.bf16.mxu1 %v16927_v22  ;;  %v1527_v23 = vld [vmem:[%s18208_s22 + $0x27d8] sm:$0xff]  ;;  %v16903_v14 = vcombine.high %v1399_v10, %v1403_v11  ;;  %v16902_v59 = vcombine.low %v1399_v10, %v1403_v11 }
 0x772   : > { %15079 = vmatpush1.bf16.msra.mxu0 %v16798_v35  ;;  %v1531_v30 = vld [vmem:[%s18208_s22 + $0x27f8] sm:$0xff] }
 0x773   : > { %15080 = vmatprep.subr.bf16.mxu0 %v16791_v16  ;;  %v17031_v17 = vcombine.high %v1527_v23, %v1531_v30  ;;  %v1391_v13 = vld [vmem:[%s18208_s22 + $0x2398] sm:$0xff]  ;;  %v17030_v15 = vcombine.low %v1527_v23, %v1531_v30 }
 0x774   : > { %15120 = vmatpush1.bf16.msra.mxu1 %v16926_v39  ;;  %v1395_v20 = vld [vmem:[%s18208_s22 + $0x23b8] sm:$0xff] }
 0x775   : > { %15121 = vmatprep.subr.bf16.mxu1 %v16919_v21  ;;  %v1519_v53 = vld [vmem:[%s18208_s22 + $0x2798] sm:$0xff]  ;;  %v16895_v57 = vcombine.high %v1391_v13, %v1395_v20  ;;  %v16894_v47 = vcombine.low %v1391_v13, %v1395_v20 }
 0x776   : > { %15081 = vmatpush1.bf16.msra.mxu0 %v16790_v44  ;;  %v1523_v25 = vld [vmem:[%s18208_s22 + $0x27b8] sm:$0xff] }
 0x777   : > { %15082 = vmatprep.subr.bf16.mxu0 %v16783_v26  ;;  %v17023_v36 = vcombine.high %v1519_v53, %v1523_v25  ;;  %v1383_v7 = vld [vmem:[%s18208_s22 + $0x2358] sm:$0xff]  ;;  %v17022_v52 = vcombine.low %v1519_v53, %v1523_v25 }
 0x778   : > { %15122 = vmatpush1.bf16.msra.mxu1 %v16918_v2  ;;  %v1387_v58 = vld [vmem:[%s18208_s22 + $0x2378] sm:$0xff] }
 0x779   : > { %15123 = vmatprep.subr.bf16.mxu1 %v16911_v48  ;;  %v1511_v4 = vld [vmem:[%s18208_s22 + $0x2758] sm:$0xff]  ;;  %v16887_v40 = vcombine.high %v1383_v7, %v1387_v58  ;;  %v16886_v38 = vcombine.low %v1383_v7, %v1387_v58 }
 0x77a   : > { %15083 = vmatpush1.bf16.msra.mxu0 %v16782_v12  ;;  %v1515_v31 = vld [vmem:[%s18208_s22 + $0x2778] sm:$0xff] }
 0x77b   : > { %15084 = vmatprep.subr.bf16.mxu0 %v16903_v14  ;;  %v17015_v19 = vcombine.high %v1511_v4, %v1515_v31  ;;  %v1375_v46 = vld [vmem:[%s18208_s22 + $0x2318] sm:$0xff]  ;;  %v17014_v3 = vcombine.low %v1511_v4, %v1515_v31 }
 0x77c   : > { %15124 = vmatpush1.bf16.msra.mxu1 %v16910_v54  ;;  %v1379_v18 = vld [vmem:[%s18208_s22 + $0x2338] sm:$0xff] }
 0x77d   : > { %15125 = vmatprep.subr.bf16.mxu1 %v17031_v17  ;;  %v1503_v22 = vld [vmem:[%s18208_s22 + $0x2718] sm:$0xff]  ;;  %v16879_v5 = vcombine.high %v1375_v46, %v1379_v18  ;;  %v16878_v37 = vcombine.low %v1375_v46, %v1379_v18 }
 0x77e   : > { %15085 = vmatpush2.bf16.msra.mxu0 %v16902_v59  ;;  %v1507_v49 = vld [vmem:[%s18208_s22 + $0x2738] sm:$0xff] }
 0x77f   : > { %15086 = vmatprep.subr.bf16.mxu0 %v16895_v57  ;;  %v17007_v35 = vcombine.high %v1503_v22, %v1507_v49  ;;  %v1367_v39 = vld [vmem:[%s18208_s22 + $0x22d8] sm:$0xff]  ;;  %v17006_v34 = vcombine.low %v1503_v22, %v1507_v49 }
 0x780   : > { %15126 = vmatpush2.bf16.msra.mxu1 %v17030_v15  ;;  %v1371_v16 = vld [vmem:[%s18208_s22 + $0x22f8] sm:$0xff] }
 0x781   : > { %15127 = vmatprep.subr.bf16.mxu1 %v17023_v36  ;;  %v1495_v21 = vld [vmem:[%s18208_s22 + $0x26d8] sm:$0xff]  ;;  %v16871_v9 = vcombine.high %v1367_v39, %v1371_v16  ;;  %v16870_v11 = vcombine.low %v1367_v39, %v1371_v16 }
 0x782   : > { %15087 = vmatpush2.bf16.msra.mxu0 %v16894_v47  ;;  %v1499_v0 = vld [vmem:[%s18208_s22 + $0x26f8] sm:$0xff] }
 0x783   : > { %15088 = vmatprep.subr.bf16.mxu0 %v16887_v40  ;;  %v16999_v44 = vcombine.high %v1495_v21, %v1499_v0  ;;  %v1359_v2 = vld [vmem:[%s18208_s22 + $0x2298] sm:$0xff]  ;;  %v16998_v23 = vcombine.low %v1495_v21, %v1499_v0 }
 0x784   : > { %15128 = vmatpush2.bf16.msra.mxu1 %v17022_v52  ;;  %v1363_v26 = vld [vmem:[%s18208_s22 + $0x22b8] sm:$0xff] }
 0x785   : > { %15129 = vmatprep.subr.bf16.mxu1 %v17015_v19  ;;  %v1487_v48 = vld [vmem:[%s18208_s22 + $0x2698] sm:$0xff]  ;;  %v16863_v30 = vcombine.high %v1359_v2, %v1363_v26  ;;  %v16862_v20 = vcombine.low %v1359_v2, %v1363_v26 }
 0x786   : > { %15089 = vmatpush2.bf16.msra.mxu0 %v16886_v38  ;;  %v1491_v10 = vld [vmem:[%s18208_s22 + $0x26b8] sm:$0xff] }
 0x787   : > { %15090 = vmatprep.subr.bf16.mxu0 %v16879_v5  ;;  %v16991_v12 = vcombine.high %v1487_v48, %v1491_v10  ;;  %v1351_v54 = vld [vmem:[%s18208_s22 + $0x2258] sm:$0xff]  ;;  %v16990_v53 = vcombine.low %v1487_v48, %v1491_v10 }
 0x788   : > { %15130 = vmatpush2.bf16.msra.mxu1 %v17014_v3  ;;  %v1355_v14 = vld [vmem:[%s18208_s22 + $0x2278] sm:$0xff] }
 0x789   : > { %15131 = vmatprep.subr.bf16.mxu1 %v17007_v35  ;;  %v1479_v17 = vld [vmem:[%s18208_s22 + $0x2658] sm:$0xff]  ;;  %v16855_v25 = vcombine.high %v1351_v54, %v1355_v14  ;;  %v16854_v58 = vcombine.low %v1351_v54, %v1355_v14 }
 0x78a   : > { %15091 = vmatpush2.bf16.msra.mxu0 %v16878_v37  ;;  %v1483_v13 = vld [vmem:[%s18208_s22 + $0x2678] sm:$0xff] }
 0x78b   : > { %15092 = vmatprep.subr.bf16.mxu0 %v16871_v9  ;;  %v16983_v59 = vcombine.high %v1479_v17, %v1483_v13  ;;  %v1343_v15 = vld [vmem:[%s18208_s22 + $0x2218] sm:$0xff]  ;;  %v16982_v4 = vcombine.low %v1479_v17, %v1483_v13 }
 0x78c   : > { %15132 = vmatpush2.bf16.msra.mxu1 %v17006_v34  ;;  %v1347_v57 = vld [vmem:[%s18208_s22 + $0x2238] sm:$0xff] }
 0x78d   : > { %15133 = vmatprep.subr.bf16.mxu1 %v16999_v44  ;;  %v1471_v36 = vld [vmem:[%s18208_s22 + $0x2618] sm:$0xff]  ;;  %v16847_v31 = vcombine.high %v1343_v15, %v1347_v57  ;;  %v16846_v18 = vcombine.low %v1343_v15, %v1347_v57 }
 0x78e   : > { %15093 = vmatpush2.bf16.msra.mxu0 %v16870_v11  ;;  %v1475_v7 = vld [vmem:[%s18208_s22 + $0x2638] sm:$0xff] }
 0x78f   : > { %15094 = vmatprep.subr.bf16.mxu0 %v16863_v30  ;;  %v16975_v47 = vcombine.high %v1471_v36, %v1475_v7  ;;  %v1591_v52 = vld [vmem:[%s18208_s22 + $0x29d8] sm:$0xff]  ;;  %v16974_v22 = vcombine.low %v1471_v36, %v1475_v7 }
 0x790   : > { %15134 = vmatpush2.bf16.msra.mxu1 %v16998_v23  ;;  %v1595_v40 = vld [vmem:[%s18208_s22 + $0x29f8] sm:$0xff] }
 0x791   : > { %15135 = vmatprep.subr.bf16.mxu1 %v16991_v12  ;;  %v1719_v19 = vld [vmem:[%s18208_s22 + $0x2dd8] sm:$0xff]  ;;  %v17095_v49 = vcombine.high %v1591_v52, %v1595_v40  ;;  %v17094_v16 = vcombine.low %v1591_v52, %v1595_v40 }
 0x792   : > { %15095 = vmatpush2.bf16.msra.mxu0 %v16862_v20  ;;  %v1723_v46 = vld [vmem:[%s18208_s22 + $0x2df8] sm:$0xff] }
 0x793   : > { %15096 = vmatprep.subr.bf16.mxu0 %v16855_v25  ;;  %v17223_v38 = vcombine.high %v1719_v19, %v1723_v46  ;;  %v1583_v3 = vld [vmem:[%s18208_s22 + $0x2998] sm:$0xff]  ;;  %v17222_v21 = vcombine.low %v1719_v19, %v1723_v46 }
 0x794   : > { %15136 = vmatpush2.bf16.msra.mxu1 %v16990_v53  ;;  %v1587_v5 = vld [vmem:[%s18208_s22 + $0x29b8] sm:$0xff] }
 0x795   : > { %15137 = vmatprep.subr.bf16.mxu1 %v16983_v59  ;;  %v1711_v35 = vld [vmem:[%s18208_s22 + $0x2d98] sm:$0xff]  ;;  %v17087_v0 = vcombine.high %v1583_v3, %v1587_v5  ;;  %v17086_v11 = vcombine.low %v1583_v3, %v1587_v5 }
 0x796   : > { %15097 = vmatpush2.bf16.msra.mxu0 %v16854_v58  ;;  %v1715_v39 = vld [vmem:[%s18208_s22 + $0x2db8] sm:$0xff] }
 0x797   : > { %15098 = vmatprep.subr.bf16.mxu0 %v16847_v31  ;;  %v17215_v37 = vcombine.high %v1711_v35, %v1715_v39  ;;  %v1575_v34 = vld [vmem:[%s18208_s22 + $0x2958] sm:$0xff]  ;;  %v17214_v30 = vcombine.low %v1711_v35, %v1715_v39 }
 0x798   : > { %15138 = vmatpush2.bf16.msra.mxu1 %v16982_v4  ;;  %v1579_v9 = vld [vmem:[%s18208_s22 + $0x2978] sm:$0xff] }
 0x799   : > { %15139 = vmatprep.subr.bf16.mxu1 %v16975_v47  ;;  %v1703_v2 = vld [vmem:[%s18208_s22 + $0x2d58] sm:$0xff]  ;;  %v17079_v12 = vcombine.high %v1575_v34, %v1579_v9 }
 0x79a   : > { %15099 = vmatpush2.bf16.msra.mxu0 %v16846_v18  ;;  %v1707_v26 = vld [vmem:[%s18208_s22 + $0x2d78] sm:$0xff] }
 0x79b   : > { %15150 = vmatprep.subr.bf16.mxu0 %v17095_v49  ;;  %v1567_v17 = vld [vmem:[%s18208_s22 + $0x2918] sm:$0xff]  ;;  %v17206_v57 = vcombine.low %v1703_v2, %v1707_v26 }
 0x79c   : > { %15140 = vmatpush2.bf16.msra.mxu1 %v16974_v22  ;;  %v1571_v13 = vld [vmem:[%s18208_s22 + $0x2938] sm:$0xff] }
 0x79d   : > { %15191 = vmatprep.subr.bf16.mxu1 %v17223_v38  ;;  %v14856_v44 = vpop.f32.mrf.mxu0  ;;  %15101 = vmatmul.mubr.bf16.vlgmr.msra.gmra.mxu0 %v18690_v41  ;;  %v1695_v20 = vld [vmem:[%s18208_s22 + $0x2d18] sm:$0xff]  ;;  %v17071_v36 = vcombine.high %v1567_v17, %v1571_v13  ;;  %v17070_v47 = vcombine.low %v1567_v17, %v1571_v13 }
 0x79e   : > { %v14857_v48 = vadd.f32 %v14856_v44, %v20479_v63  ;;  %15151 = vmatpush1.bf16.msra.mxu0 %v17094_v16  ;;  %v17207_v63 = vcombine.high %v1703_v2, %v1707_v26  ;;  %15182 = vmatprep.mubr.bf16.mxu0 %v18697_v55  ;;  %v1699_v53 = vld [vmem:[%s18208_s22 + $0x2d38] sm:$0xff] }
 0x79f   : > { %v14897_v10 = vpop.f32.mrf.mxu1  ;;  %15142 = vmatmul.mubr.bf16.vlgmr.msra.gmra.mxu1 %v18701_v61  ;;  %v14858_v23 = vpop.f32.mrf.mxu0  ;;  %15152 = vmatprep.subr.bf16.mxu0 %v17087_v0  ;;  %v17199_v7 = vcombine.high %v1695_v20, %v1699_v53  ;;  %v1559_v58 = vld [vmem:[%s18208_s22 + $0x28d8] sm:$0xff]  ;;  %v17198_v52 = vcombine.low %v1695_v20, %v1699_v53 }
 0x7a0   : > { %15192 = vmatpush1.bf16.msra.mxu1 %v17222_v21  ;;  %v20552_v54 = vadd.f32 %v14897_v10, %v14857_v48  ;;  %v14859_v41 = vadd.f32 %v14858_v23, %v20484_v50  ;;  %15223 = vmatprep.mubr.bf16.mxu1 %v18710_v6  ;;  %v17078_v50 = vcombine.low %v1575_v34, %v1579_v9  ;;  %v1563_v6 = vld [vmem:[%s18208_s22 + $0x28f8] sm:$0xff] }
 0x7a1   : > { %v14899_v14 = vpop.f32.mrf.mxu1  ;;  %15193 = vmatprep.subr.bf16.mxu1 %v17215_v37  ;;  %v14860_v61 = vpop.f32.mrf.mxu0  ;;  %v1687_v4 = vld [vmem:[%s18208_s22 + $0x2cd8] sm:$0xff]  ;;  %v17063_v40 = vcombine.high %v1559_v58, %v1563_v6  ;;  %v17062_v38 = vcombine.low %v1559_v58, %v1563_v6 }
 0x7a2   : > { %v20561_v25 = vadd.f32 %v14899_v14, %v14859_v41  ;;  %15153 = vmatpush1.bf16.msra.mxu0 %v17086_v11  ;;  %v1691_v31 = vld [vmem:[%s18208_s22 + $0x2cf8] sm:$0xff] }
 0x7a3   : > { %v14901_v59 = vpop.f32.mrf.mxu1  ;;  %v14861_v15 = vpop.f32.mrf.mxu0  ;;  %15154 = vmatprep.subr.bf16.mxu0 %v17079_v12  ;;  %v17191_v19 = vcombine.high %v1687_v4, %v1691_v31  ;;  %v1551_v46 = vld [vmem:[%s18208_s22 + $0x2898] sm:$0xff]  ;;  %v17190_v3 = vcombine.low %v1687_v4, %v1691_v31 }
 0x7a4   : > { %15194 = vmatpush1.bf16.msra.mxu1 %v17214_v30  ;;  %v1555_v18 = vld [vmem:[%s18208_s22 + $0x28b8] sm:$0xff] }
 0x7a5   : > { %v14902_v55 = vpop.f32.mrf.mxu1  ;;  %15195 = vmatprep.subr.bf16.mxu1 %v17207_v63  ;;  %v1679_v22 = vld [vmem:[%s18208_s22 + $0x2c98] sm:$0xff]  ;;  %v17055_v5 = vcombine.high %v1551_v46, %v1555_v18  ;;  %v17054_v37 = vcombine.low %v1551_v46, %v1555_v18 }
 0x7a6   : > { %15155 = vmatpush1.bf16.msra.mxu0 %v17078_v50  ;;  %v1683_v49 = vld [vmem:[%s18208_s22 + $0x2cb8] sm:$0xff] }
 0x7a7   : > { %15156 = vmatprep.subr.bf16.mxu0 %v17071_v36  ;;  %v17183_v35 = vcombine.high %v1679_v22, %v1683_v49  ;;  %v1543_v39 = vld [vmem:[%s18208_s22 + $0x2858] sm:$0xff]  ;;  %v17182_v34 = vcombine.low %v1679_v22, %v1683_v49 }
 0x7a8   : > { %15196 = vmatpush1.bf16.msra.mxu1 %v17206_v57  ;;  %v1547_v16 = vld [vmem:[%s18208_s22 + $0x2878] sm:$0xff] }
 0x7a9   : > { %15197 = vmatprep.subr.bf16.mxu1 %v17199_v7  ;;  %v1671_v21 = vld [vmem:[%s18208_s22 + $0x2c58] sm:$0xff]  ;;  %v17047_v9 = vcombine.high %v1543_v39, %v1547_v16  ;;  %v17046_v11 = vcombine.low %v1543_v39, %v1547_v16 }
 0x7aa   : > { %15157 = vmatpush1.bf16.msra.mxu0 %v17070_v47  ;;  %v1675_v0 = vld [vmem:[%s18208_s22 + $0x2c78] sm:$0xff] }
 0x7ab   : > { %15158 = vmatprep.subr.bf16.mxu0 %v17063_v40  ;;  %v17175_v44 = vcombine.high %v1671_v21, %v1675_v0  ;;  %v1535_v2 = vld [vmem:[%s18208_s22 + $0x2818] sm:$0xff]  ;;  %v17174_v23 = vcombine.low %v1671_v21, %v1675_v0 }
 0x7ac   : > { %15198 = vmatpush1.bf16.msra.mxu1 %v17198_v52  ;;  %v1539_v26 = vld [vmem:[%s18208_s22 + $0x2838] sm:$0xff] }
 0x7ad   : > { %15199 = vmatprep.subr.bf16.mxu1 %v17191_v19  ;;  %v1663_v48 = vld [vmem:[%s18208_s22 + $0x2c18] sm:$0xff]  ;;  %v17039_v30 = vcombine.high %v1535_v2, %v1539_v26  ;;  %v17038_v13 = vcombine.low %v1535_v2, %v1539_v26 }
 0x7ae   : > { %15159 = vmatpush1.bf16.msra.mxu0 %v17062_v38  ;;  %v1667_v10 = vld [vmem:[%s18208_s22 + $0x2c38] sm:$0xff] }
 0x7af   : > { %15160 = vmatprep.subr.bf16.mxu0 %v17055_v5  ;;  %v17167_v12 = vcombine.high %v1663_v48, %v1667_v10  ;;  %v1655_v41 = vld [vmem:[%s18208_s22 + $0x2bd8] sm:$0xff]  ;;  %v17166_v61 = vcombine.low %v1663_v48, %v1667_v10 }
 0x7b0   : > { %15200 = vmatpush1.bf16.msra.mxu1 %v17190_v3  ;;  %v1659_v14 = vld [vmem:[%s18208_s22 + $0x2bf8] sm:$0xff] }
 0x7b1   : > { %15201 = vmatprep.subr.bf16.mxu1 %v17183_v35  ;;  %v1783_v63 = vld [vmem:[%s18208_s22 + $0x2fd8] sm:$0xff]  ;;  %v17159_v20 = vcombine.high %v1655_v41, %v1659_v14  ;;  %v17158_v36 = vcombine.low %v1655_v41, %v1659_v14 }
 0x7b2   : > { %15161 = vmatpush1.bf16.msra.mxu0 %v17054_v37  ;;  %v1787_v17 = vld [vmem:[%s18208_s22 + $0x2ff8] sm:$0xff] }
 0x7b3   : > { %15162 = vmatprep.subr.bf16.mxu0 %v17047_v9  ;;  %v17287_v53 = vcombine.high %v1783_v63, %v1787_v17  ;;  %v1647_v59 = vld [vmem:[%s18208_s22 + $0x2b98] sm:$0xff]  ;;  %v17286_v55 = vcombine.low %v1783_v63, %v1787_v17 }
 0x7b4   : > { %15202 = vmatpush1.bf16.msra.mxu1 %v17182_v34  ;;  %v1651_v50 = vld [vmem:[%s18208_s22 + $0x2bb8] sm:$0xff] }
 0x7b5   : > { %15203 = vmatprep.subr.bf16.mxu1 %v17175_v44  ;;  %v1775_v15 = vld [vmem:[%s18208_s22 + $0x2f98] sm:$0xff]  ;;  %v17151_v7 = vcombine.high %v1647_v59, %v1651_v50  ;;  %v17150_v52 = vcombine.low %v1647_v59, %v1651_v50 }
 0x7b6   : > { %15163 = vmatpush1.bf16.msra.mxu0 %v17046_v11  ;;  %v1779_v57 = vld [vmem:[%s18208_s22 + $0x2fb8] sm:$0xff] }
 0x7b7   : > { %15164 = vmatprep.subr.bf16.mxu0 %v17039_v30  ;;  %v17279_v58 = vcombine.high %v1775_v15, %v1779_v57  ;;  %v1639_v6 = vld [vmem:[%s18208_s22 + $0x2b58] sm:$0xff]  ;;  %v17278_v40 = vcombine.low %v1775_v15, %v1779_v57 }
 0x7b8   : > { %15204 = vmatpush1.bf16.msra.mxu1 %v17174_v23  ;;  %v1643_v4 = vld [vmem:[%s18208_s22 + $0x2b78] sm:$0xff] }
 0x7b9   : > { %15205 = vmatprep.subr.bf16.mxu1 %v17167_v12  ;;  %v1767_v31 = vld [vmem:[%s18208_s22 + $0x2f58] sm:$0xff]  ;;  %v17143_v19 = vcombine.high %v1639_v6, %v1643_v4  ;;  %v17142_v3 = vcombine.low %v1639_v6, %v1643_v4 }
 0x7ba   : > { %15165 = vmatpush1.bf16.msra.mxu0 %v17038_v13  ;;  %v1771_v47 = vld [vmem:[%s18208_s22 + $0x2f78] sm:$0xff] }
 0x7bb   : > { %15166 = vmatprep.subr.bf16.mxu0 %v17159_v20  ;;  %v17271_v46 = vcombine.high %v1767_v31, %v1771_v47  ;;  %v1631_v18 = vld [vmem:[%s18208_s22 + $0x2b18] sm:$0xff]  ;;  %v17270_v5 = vcombine.low %v1767_v31, %v1771_v47 }
 0x7bc   : > { %15206 = vmatpush1.bf16.msra.mxu1 %v17166_v61  ;;  %v1635_v22 = vld [vmem:[%s18208_s22 + $0x2b38] sm:$0xff] }
 0x7bd   : > { %15207 = vmatprep.subr.bf16.mxu1 %v17287_v53  ;;  %v1759_v49 = vld [vmem:[%s18208_s22 + $0x2f18] sm:$0xff]  ;;  %v17135_v35 = vcombine.high %v1631_v18, %v1635_v22  ;;  %v17134_v34 = vcombine.low %v1631_v18, %v1635_v22 }
 0x7be   : > { %15167 = vmatpush2.bf16.msra.mxu0 %v17158_v36  ;;  %v1763_v38 = vld [vmem:[%s18208_s22 + $0x2f38] sm:$0xff] }
 0x7bf   : > { %15168 = vmatprep.subr.bf16.mxu0 %v17151_v7  ;;  %v17263_v39 = vcombine.high %v1759_v49, %v1763_v38  ;;  %v1623_v16 = vld [vmem:[%s18208_s22 + $0x2ad8] sm:$0xff]  ;;  %v17262_v9 = vcombine.low %v1759_v49, %v1763_v38 }
 0x7c0   : > { %15208 = vmatpush2.bf16.msra.mxu1 %v17286_v55  ;;  %v1627_v21 = vld [vmem:[%s18208_s22 + $0x2af8] sm:$0xff] }
 0x7c1   : > { %15209 = vmatprep.subr.bf16.mxu1 %v17279_v58  ;;  %v1751_v0 = vld [vmem:[%s18208_s22 + $0x2ed8] sm:$0xff]  ;;  %v17127_v44 = vcombine.high %v1623_v16, %v1627_v21  ;;  %v17126_v23 = vcombine.low %v1623_v16, %v1627_v21 }
 0x7c2   : > { %15169 = vmatpush2.bf16.msra.mxu0 %v17150_v52  ;;  %v1755_v37 = vld [vmem:[%s18208_s22 + $0x2ef8] sm:$0xff] }
 0x7c3   : > { %15170 = vmatprep.subr.bf16.mxu0 %v17143_v19  ;;  %v17255_v2 = vcombine.high %v1751_v0, %v1755_v37  ;;  %v1615_v26 = vld [vmem:[%s18208_s22 + $0x2a98] sm:$0xff]  ;;  %v17254_v30 = vcombine.low %v1751_v0, %v1755_v37 }
 0x7c4   : > { %15210 = vmatpush2.bf16.msra.mxu1 %v17278_v40  ;;  %v1619_v48 = vld [vmem:[%s18208_s22 + $0x2ab8] sm:$0xff] }
 0x7c5   : > { %15211 = vmatprep.subr.bf16.mxu1 %v17271_v46  ;;  %v1743_v10 = vld [vmem:[%s18208_s22 + $0x2e98] sm:$0xff]  ;;  %v17119_v12 = vcombine.high %v1615_v26, %v1619_v48  ;;  %v17118_v61 = vcombine.low %v1615_v26, %v1619_v48 }
 0x7c6   : > { %15171 = vmatpush2.bf16.msra.mxu0 %v17142_v3  ;;  %v1747_v11 = vld [vmem:[%s18208_s22 + $0x2eb8] sm:$0xff] }
 0x7c7   : > { %15172 = vmatprep.subr.bf16.mxu0 %v17135_v35  ;;  %v17247_v41 = vcombine.high %v1743_v10, %v1747_v11  ;;  %v1607_v14 = vld [vmem:[%s18208_s22 + $0x2a58] sm:$0xff]  ;;  %v17246_v20 = vcombine.low %v1743_v10, %v1747_v11 }
 0x7c8   : > { %15212 = vmatpush2.bf16.msra.mxu1 %v17270_v5  ;;  %v1611_v63 = vld [vmem:[%s18208_s22 + $0x2a78] sm:$0xff] }
 0x7c9   : > { %15213 = vmatprep.subr.bf16.mxu1 %v17263_v39  ;;  %v1735_v17 = vld [vmem:[%s18208_s22 + $0x2e58] sm:$0xff]  ;;  %v17111_v53 = vcombine.high %v1607_v14, %v1611_v63  ;;  %v17110_v55 = vcombine.low %v1607_v14, %v1611_v63 }
 0x7ca   : > { %15173 = vmatpush2.bf16.msra.mxu0 %v17134_v34  ;;  %v1739_v13 = vld [vmem:[%s18208_s22 + $0x2e78] sm:$0xff] }
 0x7cb   : > { %15174 = vmatprep.subr.bf16.mxu0 %v17127_v44  ;;  %v17239_v59 = vcombine.high %v1735_v17, %v1739_v13  ;;  %v1599_v50 = vld [vmem:[%s18208_s22 + $0x2a18] sm:$0xff]  ;;  %v17238_v7 = vcombine.low %v1735_v17, %v1739_v13 }
 0x7cc   : > { %15214 = vmatpush2.bf16.msra.mxu1 %v17262_v9  ;;  %v1603_v15 = vld [vmem:[%s18208_s22 + $0x2a38] sm:$0xff] }
 0x7cd   : > { %15215 = vmatprep.subr.bf16.mxu1 %v17255_v2  ;;  %v1727_v57 = vld [vmem:[%s18208_s22 + $0x2e18] sm:$0xff]  ;;  %v17103_v58 = vcombine.high %v1599_v50, %v1603_v15  ;;  %v17102_v40 = vcombine.low %v1599_v50, %v1603_v15 }
 0x7ce   : > { %15175 = vmatpush2.bf16.msra.mxu0 %v17126_v23  ;;  %v1731_v36 = vld [vmem:[%s18208_s22 + $0x2e38] sm:$0xff] }
 0x7cf   : > { %15176 = vmatprep.subr.bf16.mxu0 %v17119_v12  ;;  %v17231_v6 = vcombine.high %v1727_v57, %v1731_v36  ;;  %v1847_v4 = vld [vmem:[%s18208_s22 + $0x31d8] sm:$0xff]  ;;  %v17230_v19 = vcombine.low %v1727_v57, %v1731_v36 }
 0x7d0   : > { %15216 = vmatpush2.bf16.msra.mxu1 %v17254_v30  ;;  %v1851_v31 = vld [vmem:[%s18208_s22 + $0x31f8] sm:$0xff] }
 0x7d1   : > { %15217 = vmatprep.subr.bf16.mxu1 %v17247_v41  ;;  %v1975_v47 = vld [vmem:[%s18208_s22 + $0x35d8] sm:$0xff]  ;;  %v17351_v46 = vcombine.high %v1847_v4, %v1851_v31  ;;  %v17350_v5 = vcombine.low %v1847_v4, %v1851_v31 }
 0x7d2   : > { %15177 = vmatpush2.bf16.msra.mxu0 %v17118_v61  ;;  %v1979_v52 = vld [vmem:[%s18208_s22 + $0x35f8] sm:$0xff] }
 0x7d3   : > { %15178 = vmatprep.subr.bf16.mxu0 %v17111_v53  ;;  %v17479_v18 = vcombine.high %v1975_v47, %v1979_v52  ;;  %v1839_v22 = vld [vmem:[%s18208_s22 + $0x3198] sm:$0xff]  ;;  %v17478_v35 = vcombine.low %v1975_v47, %v1979_v52 }
 0x7d4   : > { %15218 = vmatpush2.bf16.msra.mxu1 %v17246_v20  ;;  %v1843_v49 = vld [vmem:[%s18208_s22 + $0x31b8] sm:$0xff] }
 0x7d5   : > { %15219 = vmatprep.subr.bf16.mxu1 %v17239_v59  ;;  %v1967_v38 = vld [vmem:[%s18208_s22 + $0x3598] sm:$0xff]  ;;  %v17343_v39 = vcombine.high %v1839_v22, %v1843_v49  ;;  %v17342_v26 = vcombine.low %v1839_v22, %v1843_v49 }
 0x7d6   : > { %15179 = vmatpush2.bf16.msra.mxu0 %v17110_v55  ;;  %v1971_v3 = vld [vmem:[%s18208_s22 + $0x35b8] sm:$0xff] }
 0x7d7   : > { %15180 = vmatprep.subr.bf16.mxu0 %v17103_v58  ;;  %v17471_v16 = vcombine.high %v1967_v38, %v1971_v3  ;;  %v1831_v21 = vld [vmem:[%s18208_s22 + $0x3158] sm:$0xff]  ;;  %v17470_v10 = vcombine.low %v1967_v38, %v1971_v3 }
 0x7d8   : > { %15220 = vmatpush2.bf16.msra.mxu1 %v17238_v7  ;;  %v1835_v0 = vld [vmem:[%s18208_s22 + $0x3178] sm:$0xff] }
 0x7d9   : > { %15221 = vmatprep.subr.bf16.mxu1 %v17231_v6  ;;  %v1959_v34 = vld [vmem:[%s18208_s22 + $0x3558] sm:$0xff]  ;;  %v17335_v11 = vcombine.high %v1831_v21, %v1835_v0 }
 0x7da   : > { %15181 = vmatpush2.bf16.msra.mxu0 %v17102_v40  ;;  %v1963_v9 = vld [vmem:[%s18208_s22 + $0x3578] sm:$0xff] }
 0x7db   : > { %15232 = vmatprep.subr.bf16.mxu0 %v17351_v46  ;;  %v1823_v12 = vld [vmem:[%s18208_s22 + $0x3118] sm:$0xff]  ;;  %v17462_v20 = vcombine.low %v1959_v34, %v1963_v9 }
 0x7dc   : > { %15222 = vmatpush2.bf16.msra.mxu1 %v17230_v19  ;;  %v1827_v41 = vld [vmem:[%s18208_s22 + $0x3138] sm:$0xff] }
 0x7dd   : > { %15273 = vmatprep.subr.bf16.mxu1 %v17479_v18  ;;  %v14938_v37 = vpop.f32.mrf.mxu0  ;;  %15183 = vmatmul.mubr.bf16.vlgmr.msra.gmra.mxu0 %v18788_v29  ;;  %v1951_v14 = vld [vmem:[%s18208_s22 + $0x3518] sm:$0xff]  ;;  %v17327_v53 = vcombine.high %v1823_v12, %v1827_v41  ;;  %v17326_v36 = vcombine.low %v1823_v12, %v1827_v41 }
 0x7de   : > { %v14939_v44 = vadd.f32 %v14938_v37, %v20552_v54  ;;  %15233 = vmatpush1.bf16.msra.mxu0 %v17350_v5  ;;  %v17463_v54 = vcombine.high %v1959_v34, %v1963_v9  ;;  %15264 = vmatprep.mubr.bf16.mxu0 %v18795_v43  ;;  %v1955_v63 = vld [vmem:[%s18208_s22 + $0x3538] sm:$0xff] }
 0x7df   : > { %v14979_v2 = vpop.f32.mrf.mxu1  ;;  %15224 = vmatmul.mubr.bf16.vlgmr.msra.gmra.mxu1 %v18799_v24  ;;  %v14940_v48 = vpop.f32.mrf.mxu0  ;;  %15234 = vmatprep.subr.bf16.mxu0 %v17343_v39  ;;  %v17455_v59 = vcombine.high %v1951_v14, %v1955_v63  ;;  %v1815_v50 = vld [vmem:[%s18208_s22 + $0x30d8] sm:$0xff]  ;;  %v17454_v55 = vcombine.low %v1951_v14, %v1955_v63 }
 0x7e0   : > { %15274 = vmatpush1.bf16.msra.mxu1 %v17478_v35  ;;  %v20626_v23 = vadd.f32 %v14979_v2, %v14939_v44  ;;  %v14941_v29 = vadd.f32 %v14940_v48, %v20561_v25  ;;  %15305 = vmatprep.mubr.bf16.mxu1 %v18808_v1  ;;  %v17334_v25 = vcombine.low %v1831_v21, %v1835_v0  ;;  %v1819_v1 = vld [vmem:[%s18208_s22 + $0x30f8] sm:$0xff] }
 0x7e1   : > { %v14981_v30 = vpop.f32.mrf.mxu1  ;;  %15275 = vmatprep.subr.bf16.mxu1 %v17471_v16  ;;  %v14942_v24 = vpop.f32.mrf.mxu0  ;;  %v1943_v15 = vld [vmem:[%s18208_s22 + $0x34d8] sm:$0xff]  ;;  %v17319_v7 = vcombine.high %v1815_v50, %v1819_v1  ;;  %v17318_v52 = vcombine.low %v1815_v50, %v1819_v1 }
 0x7e2   : > { %v20635_v17 = vadd.f32 %v14981_v30, %v14941_v29  ;;  %15235 = vmatpush1.bf16.msra.mxu0 %v17342_v26  ;;  %v1947_v57 = vld [vmem:[%s18208_s22 + $0x34f8] sm:$0xff] }
 0x7e3   : > { %v14983_v13 = vpop.f32.mrf.mxu1  ;;  %v14943_v61 = vpop.f32.mrf.mxu0  ;;  %15236 = vmatprep.subr.bf16.mxu0 %v17335_v11  ;;  %v17447_v58 = vcombine.high %v1943_v15, %v1947_v57  ;;  %v1807_v6 = vld [vmem:[%s18208_s22 + $0x3098] sm:$0xff]  ;;  %v17446_v40 = vcombine.low %v1943_v15, %v1947_v57 }
 0x7e4   : > { %15276 = vmatpush1.bf16.msra.mxu1 %v17470_v10  ;;  %v1811_v4 = vld [vmem:[%s18208_s22 + $0x30b8] sm:$0xff] }
 0x7e5   : > { %v14984_v43 = vpop.f32.mrf.mxu1  ;;  %15277 = vmatprep.subr.bf16.mxu1 %v17463_v54  ;;  %v1935_v31 = vld [vmem:[%s18208_s22 + $0x3498] sm:$0xff]  ;;  %v17311_v19 = vcombine.high %v1807_v6, %v1811_v4  ;;  %v17310_v3 = vcombine.low %v1807_v6, %v1811_v4 }
 0x7e6   : > { %15237 = vmatpush1.bf16.msra.mxu0 %v17334_v25  ;;  %v1939_v47 = vld [vmem:[%s18208_s22 + $0x34b8] sm:$0xff] }
 0x7e7   : > { %15238 = vmatprep.subr.bf16.mxu0 %v17327_v53  ;;  %v17439_v46 = vcombine.high %v1935_v31, %v1939_v47  ;;  %v1799_v18 = vld [vmem:[%s18208_s22 + $0x3058] sm:$0xff]  ;;  %v17438_v5 = vcombine.low %v1935_v31, %v1939_v47 }
 0x7e8   : > { %15278 = vmatpush1.bf16.msra.mxu1 %v17462_v20  ;;  %v1803_v22 = vld [vmem:[%s18208_s22 + $0x3078] sm:$0xff] }
 0x7e9   : > { %15279 = vmatprep.subr.bf16.mxu1 %v17455_v59  ;;  %v1927_v49 = vld [vmem:[%s18208_s22 + $0x3458] sm:$0xff]  ;;  %v17303_v35 = vcombine.high %v1799_v18, %v1803_v22  ;;  %v17302_v34 = vcombine.low %v1799_v18, %v1803_v22 }
 0x7ea   : > { %15239 = vmatpush1.bf16.msra.mxu0 %v17326_v36  ;;  %v1931_v38 = vld [vmem:[%s18208_s22 + $0x3478] sm:$0xff] }
 0x7eb   : > { %15240 = vmatprep.subr.bf16.mxu0 %v17319_v7  ;;  %v17431_v39 = vcombine.high %v1927_v49, %v1931_v38  ;;  %v1791_v16 = vld [vmem:[%s18208_s22 + $0x3018] sm:$0xff]  ;;  %v17430_v9 = vcombine.low %v1927_v49, %v1931_v38 }
 0x7ec   : > { %15280 = vmatpush1.bf16.msra.mxu1 %v17454_v55  ;;  %v1795_v21 = vld [vmem:[%s18208_s22 + $0x3038] sm:$0xff] }
 0x7ed   : > { %15281 = vmatprep.subr.bf16.mxu1 %v17447_v58  ;;  %v1919_v0 = vld [vmem:[%s18208_s22 + $0x3418] sm:$0xff]  ;;  %v17295_v44 = vcombine.high %v1791_v16, %v1795_v21  ;;  %v17294_v29 = vcombine.low %v1791_v16, %v1795_v21 }
 0x7ee   : > { %15241 = vmatpush1.bf16.msra.mxu0 %v17318_v52  ;;  %v1923_v37 = vld [vmem:[%s18208_s22 + $0x3438] sm:$0xff] }
 0x7ef   : > { %15242 = vmatprep.subr.bf16.mxu0 %v17311_v19  ;;  %v17423_v2 = vcombine.high %v1919_v0, %v1923_v37  ;;  %v1911_v26 = vld [vmem:[%s18208_s22 + $0x33d8] sm:$0xff]  ;;  %v17422_v30 = vcombine.low %v1919_v0, %v1923_v37 }
 0x7f0   : > { %15282 = vmatpush1.bf16.msra.mxu1 %v17446_v40  ;;  %v1915_v48 = vld [vmem:[%s18208_s22 + $0x33f8] sm:$0xff] }
 0x7f1   : > { %15283 = vmatprep.subr.bf16.mxu1 %v17439_v46  ;;  %v2039_v10 = vld [vmem:[%s18208_s22 + $0x37d8] sm:$0xff]  ;;  %v17415_v54 = vcombine.high %v1911_v26, %v1915_v48  ;;  %v17414_v13 = vcombine.low %v1911_v26, %v1915_v48 }
 0x7f2   : > { %15243 = vmatpush1.bf16.msra.mxu0 %v17310_v3  ;;  %v2043_v11 = vld [vmem:[%s18208_s22 + $0x37f8] sm:$0xff] }
 0x7f3   : > { %15244 = vmatprep.subr.bf16.mxu0 %v17303_v35  ;;  %v17543_v12 = vcombine.high %v2039_v10, %v2043_v11  ;;  %v1903_v41 = vld [vmem:[%s18208_s22 + $0x3398] sm:$0xff]  ;;  %v17542_v25 = vcombine.low %v2039_v10, %v2043_v11 }
 0x7f4   : > { %15284 = vmatpush1.bf16.msra.mxu1 %v17438_v5  ;;  %v1907_v24 = vld [vmem:[%s18208_s22 + $0x33b8] sm:$0xff] }
 0x7f5   : > { %15285 = vmatprep.subr.bf16.mxu1 %v17431_v39  ;;  %v2031_v14 = vld [vmem:[%s18208_s22 + $0x3798] sm:$0xff]  ;;  %v17407_v61 = vcombine.high %v1903_v41, %v1907_v24  ;;  %v17406_v1 = vcombine.low %v1903_v41, %v1907_v24 }
 0x7f6   : > { %15245 = vmatpush1.bf16.msra.mxu0 %v17302_v34  ;;  %v2035_v63 = vld [vmem:[%s18208_s22 + $0x37b8] sm:$0xff] }
 0x7f7   : > { %15246 = vmatprep.subr.bf16.mxu0 %v17295_v44  ;;  %v17535_v20 = vcombine.high %v2031_v14, %v2035_v63  ;;  %v1895_v53 = vld [vmem:[%s18208_s22 + $0x3358] sm:$0xff]  ;;  %v17534_v15 = vcombine.low %v2031_v14, %v2035_v63 }
 0x7f8   : > { %15286 = vmatpush1.bf16.msra.mxu1 %v17430_v9  ;;  %v1899_v43 = vld [vmem:[%s18208_s22 + $0x3378] sm:$0xff] }
 0x7f9   : > { %15287 = vmatprep.subr.bf16.mxu1 %v17423_v2  ;;  %v2023_v59 = vld [vmem:[%s18208_s22 + $0x3758] sm:$0xff]  ;;  %v17399_v57 = vcombine.high %v1895_v53, %v1899_v43  ;;  %v17398_v4 = vcombine.low %v1895_v53, %v1899_v43 }
 0x7fa   : > { %15247 = vmatpush1.bf16.msra.mxu0 %v17294_v29  ;;  %v2027_v50 = vld [vmem:[%s18208_s22 + $0x3778] sm:$0xff] }
 0x7fb   : > { %15248 = vmatprep.subr.bf16.mxu0 %v17415_v54  ;;  %v17527_v36 = vcombine.high %v2023_v59, %v2027_v50  ;;  %v1887_v55 = vld [vmem:[%s18208_s22 + $0x3318] sm:$0xff]  ;;  %v17526_v31 = vcombine.low %v2023_v59, %v2027_v50 }
 0x7fc   : > { %15288 = vmatpush1.bf16.msra.mxu1 %v17422_v30  ;;  %v1891_v7 = vld [vmem:[%s18208_s22 + $0x3338] sm:$0xff] }
 0x7fd   : > { %15289 = vmatprep.subr.bf16.mxu1 %v17543_v12  ;;  %v2015_v58 = vld [vmem:[%s18208_s22 + $0x3718] sm:$0xff]  ;;  %v17391_v47 = vcombine.high %v1887_v55, %v1891_v7  ;;  %v17390_v22 = vcombine.low %v1887_v55, %v1891_v7 }
 0x7fe   : > { %15249 = vmatpush2.bf16.msra.mxu0 %v17414_v13  ;;  %v2019_v6 = vld [vmem:[%s18208_s22 + $0x3738] sm:$0xff] }
 0x7ff   : > { %15250 = vmatprep.subr.bf16.mxu0 %v17407_v61  ;;  %v17519_v52 = vcombine.high %v2015_v58, %v2019_v6  ;;  %v1879_v40 = vld [vmem:[%s18208_s22 + $0x32d8] sm:$0xff]  ;;  %v17518_v49 = vcombine.low %v2015_v58, %v2019_v6 }
 0x800   : > { %15290 = vmatpush2.bf16.msra.mxu1 %v17542_v25  ;;  %v1883_v19 = vld [vmem:[%s18208_s22 + $0x32f8] sm:$0xff] }
 0x801   : > { %15291 = vmatprep.subr.bf16.mxu1 %v17535_v20  ;;  %v2007_v46 = vld [vmem:[%s18208_s22 + $0x36d8] sm:$0xff]  ;;  %v17383_v38 = vcombine.high %v1879_v40, %v1883_v19  ;;  %v17382_v21 = vcombine.low %v1879_v40, %v1883_v19 }
 0x802   : > { %15251 = vmatpush2.bf16.msra.mxu0 %v17406_v1  ;;  %v2011_v18 = vld [vmem:[%s18208_s22 + $0x36f8] sm:$0xff] }
 0x803   : > { %15252 = vmatprep.subr.bf16.mxu0 %v17399_v57  ;;  %v17511_v3 = vcombine.high %v2007_v46, %v2011_v18  ;;  %v1871_v5 = vld [vmem:[%s18208_s22 + $0x3298] sm:$0xff]  ;;  %v17510_v0 = vcombine.low %v2007_v46, %v2011_v18 }
 0x804   : > { %15292 = vmatpush2.bf16.msra.mxu1 %v17534_v15  ;;  %v1875_v35 = vld [vmem:[%s18208_s22 + $0x32b8] sm:$0xff] }
 0x805   : > { %15293 = vmatprep.subr.bf16.mxu1 %v17527_v36  ;;  %v1999_v39 = vld [vmem:[%s18208_s22 + $0x3698] sm:$0xff]  ;;  %v17375_v37 = vcombine.high %v1871_v5, %v1875_v35  ;;  %v17374_v48 = vcombine.low %v1871_v5, %v1875_v35 }
 0x806   : > { %15253 = vmatpush2.bf16.msra.mxu0 %v17398_v4  ;;  %v2003_v16 = vld [vmem:[%s18208_s22 + $0x36b8] sm:$0xff] }
 0x807   : > { %15254 = vmatprep.subr.bf16.mxu0 %v17391_v47  ;;  %v17503_v34 = vcombine.high %v1999_v39, %v2003_v16  ;;  %v1863_v9 = vld [vmem:[%s18208_s22 + $0x3258] sm:$0xff]  ;;  %v17502_v10 = vcombine.low %v1999_v39, %v2003_v16 }
 0x808   : > { %15294 = vmatpush2.bf16.msra.mxu1 %v17526_v31  ;;  %v1867_v44 = vld [vmem:[%s18208_s22 + $0x3278] sm:$0xff] }
 0x809   : > { %15295 = vmatprep.subr.bf16.mxu1 %v17519_v52  ;;  %v1991_v2 = vld [vmem:[%s18208_s22 + $0x3658] sm:$0xff]  ;;  %v17367_v11 = vcombine.high %v1863_v9, %v1867_v44  ;;  %v17366_v24 = vcombine.low %v1863_v9, %v1867_v44 }
 0x80a   : > { %15255 = vmatpush2.bf16.msra.mxu0 %v17390_v22  ;;  %v1995_v26 = vld [vmem:[%s18208_s22 + $0x3678] sm:$0xff] }
 0x80b   : > { %15256 = vmatprep.subr.bf16.mxu0 %v17383_v38  ;;  %v17495_v29 = vcombine.high %v1991_v2, %v1995_v26  ;;  %v1855_v30 = vld [vmem:[%s18208_s22 + $0x3218] sm:$0xff]  ;;  %v17494_v14 = vcombine.low %v1991_v2, %v1995_v26 }
 0x80c   : > { %15296 = vmatpush2.bf16.msra.mxu1 %v17518_v49  ;;  %v1859_v54 = vld [vmem:[%s18208_s22 + $0x3238] sm:$0xff] }
 0x80d   : > { %15297 = vmatprep.subr.bf16.mxu1 %v17511_v3  ;;  %v1983_v12 = vld [vmem:[%s18208_s22 + $0x3618] sm:$0xff]  ;;  %v17359_v63 = vcombine.high %v1855_v30, %v1859_v54  ;;  %v17358_v43 = vcombine.low %v1855_v30, %v1859_v54 }
 0x80e   : > { %15257 = vmatpush2.bf16.msra.mxu0 %v17382_v21  ;;  %v1987_v41 = vld [vmem:[%s18208_s22 + $0x3638] sm:$0xff] }
 0x80f   : > { %15258 = vmatprep.subr.bf16.mxu0 %v17375_v37  ;;  %v17487_v13 = vcombine.high %v1983_v12, %v1987_v41  ;;  %v2103_v25 = vld [vmem:[%s18208_s22 + $0x39d8] sm:$0xff]  ;;  %v17486_v59 = vcombine.low %v1983_v12, %v1987_v41 }
 0x810   : > { %15298 = vmatpush2.bf16.msra.mxu1 %v17510_v0  ;;  %v2107_v61 = vld [vmem:[%s18208_s22 + $0x39f8] sm:$0xff] }
 0x811   : > { %15299 = vmatprep.subr.bf16.mxu1 %v17503_v34  ;;  %v2231_v20 = vld [vmem:[%s18208_s22 + $0x3dd8] sm:$0xff]  ;;  %v17607_v50 = vcombine.high %v2103_v25, %v2107_v61  ;;  %v17606_v7 = vcombine.low %v2103_v25, %v2107_v61 }
 0x812   : > { %15259 = vmatpush2.bf16.msra.mxu0 %v17374_v48  ;;  %v2235_v53 = vld [vmem:[%s18208_s22 + $0x3df8] sm:$0xff] }
 0x813   : > { %15260 = vmatprep.subr.bf16.mxu0 %v17367_v11  ;;  %v17735_v1 = vcombine.high %v2231_v20, %v2235_v53  ;;  %v2095_v15 = vld [vmem:[%s18208_s22 + $0x3998] sm:$0xff]  ;;  %v17734_v58 = vcombine.low %v2231_v20, %v2235_v53 }
 0x814   : > { %15300 = vmatpush2.bf16.msra.mxu1 %v17502_v10  ;;  %v2099_v57 = vld [vmem:[%s18208_s22 + $0x39b8] sm:$0xff] }
 0x815   : > { %15301 = vmatprep.subr.bf16.mxu1 %v17495_v29  ;;  %v2223_v36 = vld [vmem:[%s18208_s22 + $0x3d98] sm:$0xff]  ;;  %v17599_v6 = vcombine.high %v2095_v15, %v2099_v57  ;;  %v17598_v22 = vcombine.low %v2095_v15, %v2099_v57 }
 0x816   : > { %15261 = vmatpush2.bf16.msra.mxu0 %v17366_v24  ;;  %v2227_v55 = vld [vmem:[%s18208_s22 + $0x3db8] sm:$0xff] }
 0x817   : > { %15262 = vmatprep.subr.bf16.mxu0 %v17359_v63  ;;  %v17727_v4 = vcombine.high %v2223_v36, %v2227_v55  ;;  %v2087_v31 = vld [vmem:[%s18208_s22 + $0x3958] sm:$0xff]  ;;  %v17726_v38 = vcombine.low %v2223_v36, %v2227_v55 }
 0x818   : > { %15302 = vmatpush2.bf16.msra.mxu1 %v17494_v14  ;;  %v2091_v47 = vld [vmem:[%s18208_s22 + $0x3978] sm:$0xff] }
 0x819   : > { %15303 = vmatprep.subr.bf16.mxu1 %v17487_v13  ;;  %v2215_v40 = vld [vmem:[%s18208_s22 + $0x3d58] sm:$0xff]  ;;  %v17591_v3 = vcombine.high %v2087_v31, %v2091_v47 }
 0x81a   : > { %15263 = vmatpush2.bf16.msra.mxu0 %v17358_v43  ;;  %v2219_v19 = vld [vmem:[%s18208_s22 + $0x3d78] sm:$0xff] }
 0x81b   : > { %15314 = vmatprep.subr.bf16.mxu0 %v17607_v50  ;;  %v2079_v39 = vld [vmem:[%s18208_s22 + $0x3918] sm:$0xff]  ;;  %v17718_v44 = vcombine.low %v2215_v40, %v2219_v19 }
 0x81c   : > { %15304 = vmatpush2.bf16.msra.mxu1 %v17486_v59  ;;  %v2083_v16 = vld [vmem:[%s18208_s22 + $0x3938] sm:$0xff] }
 0x81d   : > { %15355 = vmatprep.subr.bf16.mxu1 %v17735_v1  ;;  %v15020_v52 = vpop.f32.mrf.mxu0  ;;  %15265 = vmatmul.mubr.bf16.vlgmr.msra.gmra.mxu0 %v18884_v56  ;;  %v2207_v21 = vld [vmem:[%s18208_s22 + $0x3d18] sm:$0xff]  ;;  %v17583_v2 = vcombine.high %v2079_v39, %v2083_v16  ;;  %v17582_v29 = vcombine.low %v2079_v39, %v2083_v16 }
 0x81e   : > { %v15021_v46 = vadd.f32 %v15020_v52, %v20626_v23  ;;  %15315 = vmatpush1.bf16.msra.mxu0 %v17606_v7  ;;  %v17719_v23 = vcombine.high %v2215_v40, %v2219_v19  ;;  %15346 = vmatprep.mubr.bf16.mxu0 %v18891_v8  ;;  %v2211_v0 = vld [vmem:[%s18208_s22 + $0x3d38] sm:$0xff] }
 0x81f   : > { %v15061_v18 = vpop.f32.mrf.mxu1  ;;  %15306 = vmatmul.mubr.bf16.vlgmr.msra.gmra.mxu1 %v18895_v60  ;;  %v15022_v49 = vpop.f32.mrf.mxu0  ;;  %15316 = vmatprep.subr.bf16.mxu0 %v17599_v6  ;;  %v17711_v26 = vcombine.high %v2207_v21, %v2211_v0  ;;  %v2071_v48 = vld [vmem:[%s18208_s22 + $0x38d8] sm:$0xff]  ;;  %v17710_v30 = vcombine.low %v2207_v21, %v2211_v0 }
 0x820   : > { %15356 = vmatpush1.bf16.msra.mxu1 %v17734_v58  ;;  %v20700_v5 = vadd.f32 %v15061_v18, %v15021_v46  ;;  %v15023_v56 = vadd.f32 %v15022_v49, %v20635_v17  ;;  %15387 = vmatprep.mubr.bf16.mxu1 %v18904_v27  ;;  %v17590_v17 = vcombine.low %v2087_v31, %v2091_v47  ;;  %v2075_v27 = vld [vmem:[%s18208_s22 + $0x38f8] sm:$0xff] }
 0x821   : > { %v15063_v35 = vpop.f32.mrf.mxu1  ;;  %15357 = vmatprep.subr.bf16.mxu1 %v17727_v4  ;;  %v15024_v60 = vpop.f32.mrf.mxu0  ;;  %v2199_v10 = vld [vmem:[%s18208_s22 + $0x3cd8] sm:$0xff]  ;;  %v17575_v54 = vcombine.high %v2071_v48, %v2075_v27  ;;  %v17574_v13 = vcombine.low %v2071_v48, %v2075_v27 }
 0x822   : > { %v20709_v37 = vadd.f32 %v15063_v35, %v15023_v56  ;;  %15317 = vmatpush1.bf16.msra.mxu0 %v17598_v22  ;;  %v2203_v11 = vld [vmem:[%s18208_s22 + $0x3cf8] sm:$0xff] }
 0x823   : > { %v15065_v34 = vpop.f32.mrf.mxu1  ;;  %v15025_v9 = vpop.f32.mrf.mxu0  ;;  %15318 = vmatprep.subr.bf16.mxu0 %v17591_v3  ;;  %v17703_v12 = vcombine.high %v2199_v10, %v2203_v11  ;;  %v2063_v41 = vld [vmem:[%s18208_s22 + $0x3898] sm:$0xff]  ;;  %v17702_v25 = vcombine.low %v2199_v10, %v2203_v11 }
 0x824   : > { %15358 = vmatpush1.bf16.msra.mxu1 %v17726_v38  ;;  %v2067_v24 = vld [vmem:[%s18208_s22 + $0x38b8] sm:$0xff] }
 0x825   : > { %v15066_v8 = vpop.f32.mrf.mxu1  ;;  %15359 = vmatprep.subr.bf16.mxu1 %v17719_v23  ;;  %v2191_v14 = vld [vmem:[%s18208_s22 + $0x3c98] sm:$0xff]  ;;  %v17567_v61 = vcombine.high %v2063_v41, %v2067_v24  ;;  %v17566_v1 = vcombine.low %v2063_v41, %v2067_v24 }
 0x826   : > { %15319 = vmatpush1.bf16.msra.mxu0 %v17590_v17  ;;  %v2195_v63 = vld [vmem:[%s18208_s22 + $0x3cb8] sm:$0xff] }
 0x827   : > { %15320 = vmatprep.subr.bf16.mxu0 %v17583_v2  ;;  %v17695_v20 = vcombine.high %v2191_v14, %v2195_v63  ;;  %v2055_v53 = vld [vmem:[%s18208_s22 + $0x3858] sm:$0xff]  ;;  %v17694_v15 = vcombine.low %v2191_v14, %v2195_v63 }
 0x828   : > { %15360 = vmatpush1.bf16.msra.mxu1 %v17718_v44  ;;  %v2059_v43 = vld [vmem:[%s18208_s22 + $0x3878] sm:$0xff] }
 0x829   : > { %15361 = vmatprep.subr.bf16.mxu1 %v17711_v26  ;;  %v2183_v59 = vld [vmem:[%s18208_s22 + $0x3c58] sm:$0xff]  ;;  %v17559_v57 = vcombine.high %v2055_v53, %v2059_v43  ;;  %v17558_v4 = vcombine.low %v2055_v53, %v2059_v43 }
 0x82a   : > { %15321 = vmatpush1.bf16.msra.mxu0 %v17582_v29  ;;  %v2187_v50 = vld [vmem:[%s18208_s22 + $0x3c78] sm:$0xff] }
 0x82b   : > { %15322 = vmatprep.subr.bf16.mxu0 %v17575_v54  ;;  %v17687_v36 = vcombine.high %v2183_v59, %v2187_v50  ;;  %v2047_v55 = vld [vmem:[%s18208_s22 + $0x3818] sm:$0xff]  ;;  %v17686_v31 = vcombine.low %v2183_v59, %v2187_v50 }
 0x82c   : > { %15362 = vmatpush1.bf16.msra.mxu1 %v17710_v30  ;;  %v2051_v7 = vld [vmem:[%s18208_s22 + $0x3838] sm:$0xff] }
 0x82d   : > { %15363 = vmatprep.subr.bf16.mxu1 %v17703_v12  ;;  %v2175_v58 = vld [vmem:[%s18208_s22 + $0x3c18] sm:$0xff]  ;;  %v17551_v47 = vcombine.high %v2047_v55, %v2051_v7  ;;  %v17550_v22 = vcombine.low %v2047_v55, %v2051_v7 }
 0x82e   : > { %15323 = vmatpush1.bf16.msra.mxu0 %v17574_v13  ;;  %v2179_v6 = vld [vmem:[%s18208_s22 + $0x3c38] sm:$0xff] }
 0x82f   : > { %15324 = vmatprep.subr.bf16.mxu0 %v17567_v61  ;;  %v17679_v52 = vcombine.high %v2175_v58, %v2179_v6  ;;  %v2167_v40 = vld [vmem:[%s18208_s22 + $0x3bd8] sm:$0xff]  ;;  %v17678_v49 = vcombine.low %v2175_v58, %v2179_v6 }
 0x830   : > { %15364 = vmatpush1.bf16.msra.mxu1 %v17702_v25  ;;  %v2171_v19 = vld [vmem:[%s18208_s22 + $0x3bf8] sm:$0xff] }
 0x831   : > { %15365 = vmatprep.subr.bf16.mxu1 %v17695_v20  ;;  %v2295_v46 = vld [vmem:[%s18208_s22 + $0x3fd8] sm:$0xff]  ;;  %v17671_v38 = vcombine.high %v2167_v40, %v2171_v19  ;;  %v17670_v16 = vcombine.low %v2167_v40, %v2171_v19 }
 0x832   : > { %15325 = vmatpush1.bf16.msra.mxu0 %v17566_v1  ;;  %v2299_v18 = vld [vmem:[%s18208_s22 + $0x3ff8] sm:$0xff] }
 0x833   : > { %15326 = vmatprep.subr.bf16.mxu0 %v17559_v57  ;;  %v17799_v3 = vcombine.high %v2295_v46, %v2299_v18  ;;  %v2159_v56 = vld [vmem:[%s18208_s22 + $0x3b98] sm:$0xff]  ;;  %v17798_v60 = vcombine.low %v2295_v46, %v2299_v18 }
 0x834   : > { %15366 = vmatpush1.bf16.msra.mxu1 %v17694_v15  ;;  %v2163_v35 = vld [vmem:[%s18208_s22 + $0x3bb8] sm:$0xff] }
 0x835   : > { %15367 = vmatprep.subr.bf16.mxu1 %v17687_v36  ;;  %v2287_v23 = vld [vmem:[%s18208_s22 + $0x3f98] sm:$0xff]  ;;  %v17663_v21 = vcombine.high %v2159_v56, %v2163_v35  ;;  %v17662_v2 = vcombine.low %v2159_v56, %v2163_v35 }
 0x836   : > { %15327 = vmatpush1.bf16.msra.mxu0 %v17558_v4  ;;  %v2291_v39 = vld [vmem:[%s18208_s22 + $0x3fb8] sm:$0xff] }
 0x837   : > { %15328 = vmatprep.subr.bf16.mxu0 %v17551_v47  ;;  %v17791_v0 = vcombine.high %v2287_v23, %v2291_v39  ;;  %v2151_v34 = vld [vmem:[%s18208_s22 + $0x3b58] sm:$0xff]  ;;  %v17790_v8 = vcombine.low %v2287_v23, %v2291_v39 }
 0x838   : > { %15368 = vmatpush1.bf16.msra.mxu1 %v17686_v31  ;;  %v2155_v17 = vld [vmem:[%s18208_s22 + $0x3b78] sm:$0xff] }
 0x839   : > { %15369 = vmatprep.subr.bf16.mxu1 %v17679_v52  ;;  %v2279_v9 = vld [vmem:[%s18208_s22 + $0x3f58] sm:$0xff]  ;;  %v17655_v26 = vcombine.high %v2151_v34, %v2155_v17  ;;  %v17654_v30 = vcombine.low %v2151_v34, %v2155_v17 }
 0x83a   : > { %15329 = vmatpush1.bf16.msra.mxu0 %v17550_v22  ;;  %v2283_v44 = vld [vmem:[%s18208_s22 + $0x3f78] sm:$0xff] }
 0x83b   : > { %15330 = vmatprep.subr.bf16.mxu0 %v17671_v38  ;;  %v17783_v48 = vcombine.high %v2279_v9, %v2283_v44  ;;  %v2143_v27 = vld [vmem:[%s18208_s22 + $0x3b18] sm:$0xff]  ;;  %v17782_v54 = vcombine.low %v2279_v9, %v2283_v44 }
 0x83c   : > { %15370 = vmatpush1.bf16.msra.mxu1 %v17678_v49  ;;  %v2147_v10 = vld [vmem:[%s18208_s22 + $0x3b38] sm:$0xff] }
 0x83d   : > { %15371 = vmatprep.subr.bf16.mxu1 %v17799_v3  ;;  %v2271_v11 = vld [vmem:[%s18208_s22 + $0x3f18] sm:$0xff]  ;;  %v17647_v12 = vcombine.high %v2143_v27, %v2147_v10  ;;  %v17646_v25 = vcombine.low %v2143_v27, %v2147_v10 }
 0x83e   : > { %15331 = vmatpush2.bf16.msra.mxu0 %v17670_v16  ;;  %v2275_v29 = vld [vmem:[%s18208_s22 + $0x3f38] sm:$0xff] }
 0x83f   : > { %15332 = vmatprep.subr.bf16.mxu0 %v17663_v21  ;;  %v17775_v41 = vcombine.high %v2271_v11, %v2275_v29  ;;  %v2135_v24 = vld [vmem:[%s18208_s22 + $0x3ad8] sm:$0xff]  ;;  %v17774_v61 = vcombine.low %v2271_v11, %v2275_v29 }
 0x840   : > { %15372 = vmatpush2.bf16.msra.mxu1 %v17798_v60  ;;  %v2139_v14 = vld [vmem:[%s18208_s22 + $0x3af8] sm:$0xff] }
 0x841   : > { %15373 = vmatprep.subr.bf16.mxu1 %v17791_v0  ;;  %v2263_v63 = vld [vmem:[%s18208_s22 + $0x3ed8] sm:$0xff]  ;;  %v17639_v20 = vcombine.high %v2135_v24, %v2139_v14  ;;  %v17638_v15 = vcombine.low %v2135_v24, %v2139_v14 }
 0x842   : > { %15333 = vmatpush2.bf16.msra.mxu0 %v17662_v2  ;;  %v2267_v13 = vld [vmem:[%s18208_s22 + $0x3ef8] sm:$0xff] }
 0x843   : > { %15334 = vmatprep.subr.bf16.mxu0 %v17655_v26  ;;  %v17767_v53 = vcombine.high %v2263_v63, %v2267_v13  ;;  %v2127_v43 = vld [vmem:[%s18208_s22 + $0x3a98] sm:$0xff]  ;;  %v17766_v57 = vcombine.low %v2263_v63, %v2267_v13 }
 0x844   : > { %15374 = vmatpush2.bf16.msra.mxu1 %v17790_v8  ;;  %v2131_v59 = vld [vmem:[%s18208_s22 + $0x3ab8] sm:$0xff] }
 0x845   : > { %15375 = vmatprep.subr.bf16.mxu1 %v17783_v48  ;;  %v2255_v50 = vld [vmem:[%s18208_s22 + $0x3e98] sm:$0xff]  ;;  %v17631_v36 = vcombine.high %v2127_v43, %v2131_v59  ;;  %v17630_v31 = vcombine.low %v2127_v43, %v2131_v59 }
 0x846   : > { %15335 = vmatpush2.bf16.msra.mxu0 %v17654_v30  ;;  %v2259_v1 = vld [vmem:[%s18208_s22 + $0x3eb8] sm:$0xff] }
 0x847   : > { %15336 = vmatprep.subr.bf16.mxu0 %v17647_v12  ;;  %v17759_v55 = vcombine.high %v2255_v50, %v2259_v1  ;;  %v2119_v7 = vld [vmem:[%s18208_s22 + $0x3a58] sm:$0xff]  ;;  %v17758_v47 = vcombine.low %v2255_v50, %v2259_v1 }
 0x848   : > { %15376 = vmatpush2.bf16.msra.mxu1 %v17782_v54  ;;  %v2123_v58 = vld [vmem:[%s18208_s22 + $0x3a78] sm:$0xff] }
 0x849   : > { %15377 = vmatprep.subr.bf16.mxu1 %v17775_v41  ;;  %v2247_v6 = vld [vmem:[%s18208_s22 + $0x3e58] sm:$0xff]  ;;  %v17623_v52 = vcombine.high %v2119_v7, %v2123_v58  ;;  %v17622_v49 = vcombine.low %v2119_v7, %v2123_v58 }
 0x84a   : > { %15337 = vmatpush2.bf16.msra.mxu0 %v17646_v25  ;;  %v2251_v4 = vld [vmem:[%s18208_s22 + $0x3e78] sm:$0xff] }
 0x84b   : > { %15338 = vmatprep.subr.bf16.mxu0 %v17639_v20  ;;  %v17751_v40 = vcombine.high %v2247_v6, %v2251_v4  ;;  %v2111_v19 = vld [vmem:[%s18208_s22 + $0x3a18] sm:$0xff]  ;;  %v17750_v38 = vcombine.low %v2247_v6, %v2251_v4 }
 0x84c   : > { %15378 = vmatpush2.bf16.msra.mxu1 %v17774_v61  ;;  %v2115_v46 = vld [vmem:[%s18208_s22 + $0x3a38] sm:$0xff] }
 0x84d   : > { %15379 = vmatprep.subr.bf16.mxu1 %v17767_v53  ;;  %v2239_v18 = vld [vmem:[%s18208_s22 + $0x3e18] sm:$0xff]  ;;  %v17615_v3 = vcombine.high %v2111_v19, %v2115_v46  ;;  %v17614_v35 = vcombine.low %v2111_v19, %v2115_v46  ;;  %v15429_v19 = vrot.slane %v15421_v33, %v19818_v51 }
 0x84e   : > { %15339 = vmatpush2.bf16.msra.mxu0 %v17638_v15  ;;  %v2243_v22 = vld [vmem:[%s18208_s22 + $0x3e38] sm:$0xff] }
 0x84f   : > { %15340 = vmatprep.subr.bf16.mxu0 %v17631_v36  ;;  %v17743_v56 = vcombine.high %v2239_v18, %v2243_v22  ;;  %v17742_v23 = vcombine.low %v2239_v18, %v2243_v22  ;;  %v244_v18 = vld [vmem:[#allocation2 + $0x8] sm:$0xff] }
 0x850   : > { %15380 = vmatpush2.bf16.msra.mxu1 %v17766_v57 }
 0x851   : > { %15381 = vmatprep.subr.bf16.mxu1 %v17759_v55 }
 0x852   : > { %15341 = vmatpush2.bf16.msra.mxu0 %v17630_v31 }
 0x853   : > { %15342 = vmatprep.subr.bf16.mxu0 %v17623_v52 }
 0x854   : > { %15382 = vmatpush2.bf16.msra.mxu1 %v17758_v47 }
 0x855   : > { %15383 = vmatprep.subr.bf16.mxu1 %v17751_v40 }
 0x856   : > { %15343 = vmatpush2.bf16.msra.mxu0 %v17622_v49 }
 0x857   : > { %15344 = vmatprep.subr.bf16.mxu0 %v17615_v3 }
 0x858   : > { %15384 = vmatpush2.bf16.msra.mxu1 %v17750_v38 }
 0x859   : > { %15385 = vmatprep.subr.bf16.mxu1 %v17743_v56 }
 0x85a   : > { %15345 = vmatpush2.bf16.msra.mxu0 %v17614_v35 }
 0x85c   : > { %15386 = vmatpush2.bf16.msra.mxu1 %v17742_v23 }
 0x85d   : > { %v15102_v39 = vpop.f32.mrf.mxu0  ;;  %15347 = vmatmul.mubr.bf16.vlgmr.msra.gmra.mxu0 %v18973_v42 }
 0x85e   : > { %v15103_v16 = vadd.f32 %v15102_v39, %v20700_v5 }
 0x85f   : > { %v15143_v60 = vpop.f32.mrf.mxu1  ;;  %15388 = vmatmul.mubr.bf16.vlgmr.msra.gmra.mxu1 %v18981_v62  ;;  %v15104_v21 = vpop.f32.mrf.mxu0 }
 0x860   : > { %v15144_v0 = vadd.f32 %v15143_v60, %v15103_v16  ;;  %v15105_v34 = vadd.f32 %v15104_v21, %v20709_v37 }
 0x861   : > { %v15145_v17 = vpop.f32.mrf.mxu1  ;;  %v15106_v9 = vpop.f32.mrf.mxu0 }
 0x862   : > { %v15146_v44 = vadd.f32 %v15145_v17, %v15105_v34 }
 0x863   : > { %v15147_v2 = vpop.f32.mrf.mxu1  ;;  %v15107_v8 = vpop.f32.mrf.mxu0 }
 0x865   : > { %v15148_v26 = vpop.f32.mrf.mxu1 }
 0x89d   : > { %v15184_v48 = vpop.f32.mrf.mxu0 }
 0x89e   : > { %v15185_v27 = vadd.f32 %v15184_v48, %v15144_v0 }
 0x89f   : > { %v15225_v10 = vpop.f32.mrf.mxu1  ;;  %v15186_v11 = vpop.f32.mrf.mxu0 }
 0x8a0   : > { %v15226_v42 = vadd.f32 %v15225_v10, %v15185_v27  ;;  %v15187_v29 = vadd.f32 %v15186_v11, %v15146_v44 }
 0x8a1   : > { %v15227_v5 = vpop.f32.mrf.mxu1  ;;  %v15188_v30 = vpop.f32.mrf.mxu0 }
 0x8a2   : > { %v15228_v54 = vadd.f32 %v15227_v5, %v15187_v29 }
 0x8a3   : > { %v15229_v62 = vpop.f32.mrf.mxu1  ;;  %v15189_v12 = vpop.f32.mrf.mxu0 }
 0x8a5   : > { %v15230_v41 = vpop.f32.mrf.mxu1 }
 0x8dd   : > { %v15266_v24 = vpop.f32.mrf.mxu0 }
 0x8de   : > { %v15267_v53 = vadd.f32 %v15266_v24, %v15226_v42 }
 0x8df   : > { %v15307_v37 = vpop.f32.mrf.mxu1  ;;  %v15268_v14 = vpop.f32.mrf.mxu0 }
 0x8e0   : > { %v15269_v43 = vadd.f32 %v15268_v14, %v15228_v54  ;;  %v15308_v59 = vadd.f32 %v15307_v37, %v15267_v53 }
 0x8e1   : > { %v15309_v63 = vpop.f32.mrf.mxu1  ;;  %v15270_v13 = vpop.f32.mrf.mxu0 }
 0x8e2   : > { %v15310_v1 = vadd.f32 %v15309_v63, %v15269_v43 }
 0x8e3   : > { %v15311_v25 = vpop.f32.mrf.mxu1  ;;  %v15271_v61 = vpop.f32.mrf.mxu0 }
 0x8e5   : > { %v15312_v20 = vpop.f32.mrf.mxu1 }
 0x91d   : > { %v15348_v50 = vpop.f32.mrf.mxu0 }
 0x91e   : > { %v15349_v15 = vadd.f32 %v15348_v50, %v15308_v59 }
 0x91f   : > { %v15389_v57 = vpop.f32.mrf.mxu1  ;;  %v15350_v36 = vpop.f32.mrf.mxu0 }
 0x920   : > { %v15351_v55 = vadd.f32 %v15350_v36, %v15310_v1  ;;  %v15390_v6 = vadd.f32 %v15389_v57, %v15349_v15 }
 0x921   : > { %v15391_v7 = vpop.f32.mrf.mxu1  ;;  %v15352_v58 = vpop.f32.mrf.mxu0 }
 0x922   : > { %v15392_v4 = vadd.f32 %v15391_v7, %v15351_v55 }
 0x923   : > { %v15393_v31 = vpop.f32.mrf.mxu1  ;;  %v15353_v47 = vpop.f32.mrf.mxu0 }
 0x924   : > { %v15422_v52 = vcombine.low %v15390_v6, %v15392_v4 }
 0x925   : > { %v15394_v40 = vpop.f32.mrf.mxu1 }
 0x926   : > { %v15436_v46 = vrot.slane %v15422_v52, %v19818_v51 }
 0x928   : > { %v15437_v22 = vcombine.low %v15429_v19, %v15436_v46  ;;  %15447 = sbr.rel (%p17800_p11) target bundleno = 2382 (0x94e), region = 52 }
 0x92a   : > { %v15441_v49 = vadd.f32 %v15437_v22, %v244_v18 }
 0x92c   : > { %15443 = vst [vmem:[#allocation2 + $0x8] sm:$0xff] %v15441_v49 }
 0x92d   : > { %v15450_v38 = vld [vmem:[#allocation8] sm:$0xff]  ;;  %v15454_v3 = vsub.s32 0, %v18242_v45  ;;  %v15458_v56 = vsub.s32 1, %v18242_v45  ;;  %v15462_v35 = vsub.s32 2, %v18242_v45  ;;  %v15466_v23 = vsub.s32 3, %v18242_v45  ;;  %v15448_v42 = vld [vmem:[#allocation2] sm:$0xff] }
 0x92e   : > { %v15470_v32 = vsub.s32 4, %v18242_v45  ;;  %v15474_v28 = vsub.s32 5, %v18242_v45  ;;  %v15478_v33 = vsub.s32 6, %v18242_v45  ;;  %v15482_v21 = vsub.s32 7, %v18242_v45  ;;  %v20845_v36 = vld [vmem:[#allocation14_spill] sm:$0xff] }
 0x92f   : > { %v15455_v39 = vrot.slane %v15450_v38, %v15454_v3  ;;  %v15459_v16 = vrot.slane %v15450_v38, %v15458_v56  ;;  %v15463_v60 = vrot.slane %v15450_v38, %v15462_v35  ;;  %v15467_v0 = vrot.slane %v15450_v38, %v15466_v23 }
 0x930   : > { %v15471_v34 = vrot.slane %v15450_v38, %v15470_v32  ;;  %v15475_v17 = vrot.slane %v15450_v38, %v15474_v28  ;;  %v15479_v9 = vrot.slane %v15450_v38, %v15478_v33  ;;  %v15483_v44 = vrot.slane %v15450_v38, %v15482_v21 }
 0x931   : > { %v15484_v2 = vcombine.low %v15455_v39, %v15459_v16  ;;  %v15485_v8 = vcombine.low %v15463_v60, %v15467_v0 }
 0x932   : > { %v15501_v26 = vcombine.low %v15471_v34, %v15475_v17  ;;  %v15502_v27 = vcombine.low %v15479_v9, %v15483_v44 }
 0x933   : > { %v15492_v48 = vrot.slane %v15484_v2, %v19818_v51  ;;  %v15499_v10 = vrot.slane %v15485_v8, %v19818_v51  ;;  %v15449_v5 = vld [vmem:[#allocation2 + $0x8] sm:$0xff] }
 0x934   : > { %v15509_v11 = vrot.slane %v15501_v26, %v19818_v51  ;;  %v15516_v29 = vrot.slane %v15502_v27, %v19818_v51 }
 0x935   : > { %v15500_v45 = vcombine.low %v15492_v48, %v15499_v10 }
 0x936   : > { %v15517_v30 = vcombine.low %v15509_v11, %v15516_v29 }
 0x937   : > { %v15520_v54 = vadd.f32 %v15500_v45, %v15448_v42 }
 0x938   : > { %v15521_v62 = vadd.f32 %v15517_v30, %v15449_v5 }
 0x939   : > { %vm15522_vm0 = vcmp.gt.f32.partialorder %v15520_v54, 0.0  ;;  %v15524_v12 = vmul.f32 0.2, %v15520_v54 }
 0x93a   : > { %vm15523_vm1 = vcmp.gt.f32.partialorder %v15521_v62, 0.0  ;;  %v15525_v41 = vmul.f32 0.2, %v15521_v62 }
 0x93b   : > { %v15526_v24 = vsel %vm15522_vm0, %v15520_v54, %v15524_v12 }
 0x93c   : > { %v15527_v37 = vsel %vm15523_vm1, %v15521_v62, %v15525_v41  ;;  %v15530_v14 = vcombine.high %v15526_v24, %v15526_v24  ;;  %v15537_v63 = vrot.slane %v15526_v24, %v19818_v51 }
 0x93d   : > { %v15547_v13 = vcombine.high %v15527_v37, %v15527_v37  ;;  %v15554_v25 = vrot.slane %v15527_v37, %v19818_v51 }
 0x93e   : > { %v15544_v61 = vrot.slane %v15530_v14, %v19818_v51  ;;  %v15545_v20 = vcombine.high %v15537_v63, %v15537_v63 }
 0x93f   : > { %v15561_v53 = vrot.slane %v15547_v13, %v19818_v51  ;;  %v15562_v43 = vcombine.high %v15554_v25, %v15554_v25 }
 0x940   : > { %v15546_v59 = vcombine.high %v15544_v61, %v15544_v61  ;;  %v17801_v50 = vpack.c.bf16 %v15545_v20, %v15537_v63 }
 0x941   : > { %v15563_v1 = vcombine.high %v15561_v53, %v15561_v53  ;;  %v17803_v15 = vpack.c.bf16 %v15562_v43, %v15554_v25 }
 0x942   : > { %v17802_v57 = vpack.c.bf16 %v15546_v59, %v15544_v61  ;;  %v15598_v55 = vrot.slane %v17801_v50, %v20845_v36 }
 0x943   : > { %v17804_v7 = vpack.c.bf16 %v15563_v1, %v15561_v53  ;;  %v15612_v58 = vrot.slane %v17803_v15, %v20845_v36 }
 0x944   : > { %v15605_v6 = vrot.slane %v17802_v57, %v20845_v36 }
 0x945   : > { %v15619_v4 = vrot.slane %v17804_v7, %v20845_v36 }
 0x946   : > { %v15620_v31 = vcombine.low %v15598_v55, %v15605_v6 }
 0x947   : > { %v15621_v47 = vcombine.low %v15612_v58, %v15619_v4 }
 0x948   : > { %v15628_v52 = vrot.slane %v15620_v31, %v20845_v36 }
 0x949   : > { %v15635_v51 = vrot.slane %v15621_v47, %v20845_v36 }
 0x94b   : > { %v15636_v40 = vcombine.low %v15628_v52, %v15635_v51 }
 0x94d   : > { %15638 = vst [vmem:[#allocation9] sm:$0xff] %v15636_v40 }
 0x94e PF: > { %p17841_p13 = scmp.eq.s32.totalorder %s18129_s18, 2  ;;  %s18079_s15 = smov [#allocation9]  }
 0x94f   : > { %s15649_s23 = sshll.u32 %s18079_s15, 4  ;;  %s15650_s23 = int_to_ptr.vmem [resolvable:$true] %s15649_s23 }
 0x950   : > { %s17983_s24 = scalar_lea.vmem %s15650_s23, 128  ;;  %p17990_p4 = scmp.lt.s32.totalorder %s15650_s23, %s15650_s23 }
 0x951   : > { %p17984_p2 = scmp.ne.s32.totalorder %s15650_s23, %s17983_s24  ;;  %p17991_p10 = scmp.lt.s32.totalorder %s17983_s24, %s17983_s24 }
 0x953   : > { %p17985_p7 = pnand %p17984_p2, %p17841_p13  ;;  %p17992_p0 = por %p17991_p10, %p17990_p4 }
 0x955   : > { %p17986_p9 = pneg %p17985_p7 }
 0x957   : > { %p17993_p1 = pnand %p17992_p0, %p17986_p9 }
 0x959   : > { %17996 = shalt.err (!%p17993_p1)
}
 0x95a   : > { %17822 = dma.vmem_to_hbm [thread:$0]  (%p17841_p13), %s15650_s23, 128, %s20824_s3, [#allocation5]  }
 0x95b   : > { %18044 = dma.done.wait (%p17841_p13), [#allocation5], 128  }
 0x95c   : > { %18046 = vsyncadd (%p17841_p13), [#allocation5], 4294967168 }
 0x95d PF: > { %s18_s17 = sadd.s32 1, %s18069_s17   ;;  %s20846_s12 = smov %s18053_s13 }
 0x95e   : > { %p15_p5 = scmp.ge.s32.totalorder %s18_s17, 5   ;;  %s20847_s13 = smov %s18057_s14 }
 0x95f   : > { %s20848_s14 = smov %s18194_s27  ;;  %s20849_s15 = smov %s18065_s16 }
 0x960   : > { %s20850_s16 = smov %s20852_s8  ;;  %17 = sbr.rel (!%p15_p5) target bundleno = 6 (0x6), region = 89 }
 0x965   :  { %15662 = vsyncpa [#allocation4], 1 }
 0x966   :  { %15664 = vsyncpa [#allocation4 + $0x1], 1 }
 0x967   :  { %15665 = vsyncpa [#allocation7], 1 }
 0x968   :  { %15667 = vsyncpa [#allocation7 + $0x1], 1 }
 0x969   :  { %15668 = vsyncpa [#allocation5], 1 }
 0x96a   :  { %15670 = vsyncpa [#allocation5 + $0x1], 1 }

</bundles_post_ra>
